<compile_context>
chip_gen: v5e
topology: v5e:2x2
jax: 0.10.0
libtpu: 0.0.40
codegen_flags: <defaults>
</compile_context>

<pallas_src>
import math
import jax
import jax.numpy as jnp
from jax import lax
from jax.experimental import pallas as pl
from jax.experimental.pallas import tpu as pltpu

# Keep plain-JAX matmuls (reference) at full precision; in-kernel dots set precision explicitly.
jax.config.update("jax_default_matmul_precision", "highest")

# ----------------------- module configuration (mirrors __init__) ----------------
HIDDEN = 32                     # config.bert_config['hidden_size']
NUM_IPA_HEADS = 4               # config.num_ipa_heads
HEAD_SIZE = HIDDEN // NUM_IPA_HEADS
ALL_HEAD = NUM_IPA_HEADS * HEAD_SIZE
NUM_QUERY_POINTS = 4            # config.num_points
NUM_VALUE_POINTS = 4            # other_config.num_points
PAIR_CH = 4 + 4                 # num_attention_heads + other num_attention_heads (cross-attn)
OUT_IN = NUM_IPA_HEADS * (PAIR_CH + HEAD_SIZE + NUM_VALUE_POINTS * (3 + 1))   # 128

B, N, M = 2, 8, 16              # batch, query length, key/encoder length

_HIGH = jax.lax.Precision.HIGHEST


# ------------------------------ fused IPCA kernel --------------------------------
def _ipca_kernel(hs_ref, ehs_ref, pair_ref, rot_ref, trans_ref, erot_ref, etrans_ref,
                 w_hs_ref, w_ehs_ref, w_out_ref, b_out_ref,
                 w_pair_ref, c1_ref,
                 out_ref):
    H, D, Pq, Pv = NUM_IPA_HEADS, HEAD_SIZE, NUM_QUERY_POINTS, NUM_VALUE_POINTS
    Bb, C, Nq, Mk = pair_ref.shape
    f32 = jnp.float32
    qscale = 1.0 / (math.sqrt(D) * math.sqrt(3.0))
    HPq, HPv = H * Pq, H * Pv

    # ---- fused projections: one MXU matmul per input stream --------------------
    # hs projection layout:  [ q (H*D) | qp_x (H*Pq) | qp_y | qp_z ]
    hp = jnp.dot(hs_ref[...], w_hs_ref[...], precision=_HIGH,
                 preferred_element_type=f32)                                  # (B*N, 80)
    # ehs projection layout: [ k | v | kp_x | kp_y | kp_z | vp_x | vp_y | vp_z ]
    ep = jnp.dot(ehs_ref[...], w_ehs_ref[...], precision=_HIGH,
                 preferred_element_type=f32)                                  # (B*M, 160)

    q_all = hp[:, :H * D]
    qpx = hp[:, H * D:H * D + HPq]
    qpy = hp[:, H * D + HPq:H * D + 2 * HPq]
    qpz = hp[:, H * D + 2 * HPq:H * D + 3 * HPq]

    k_all = ep[:, :H * D]
    v_all = ep[:, H * D:2 * H * D]
    o = 2 * H * D
    kpx = ep[:, o:o + HPq]
    kpy = ep[:, o + HPq:o + 2 * HPq]
    kpz = ep[:, o + 2 * HPq:o + 3 * HPq]
    o2 = o + 3 * HPq
    vpx = ep[:, o2:o2 + HPv]
    vpy = ep[:, o2 + HPv:o2 + 2 * HPv]
    vpz = ep[:, o2 + 2 * HPv:o2 + 3 * HPv]

    # ---- rigid frames applied to the points (global frame), all rows at once ---
    rot = rot_ref[...]        # (B*N, 9)  row-major [R00 R01 R02 R10 ... R22]
    trs = trans_ref[...]      # (B*N, 3)
    erot = erot_ref[...]      # (B*M, 9)
    etrs = etrans_ref[...]    # (B*M, 3)

    def fwd_rot(Rm, t, px, py, pz):
        ax = Rm[:, 0:1] * px + Rm[:, 1:2] * py + Rm[:, 2:3] * pz + t[:, 0:1]
        ay = Rm[:, 3:4] * px + Rm[:, 4:5] * py + Rm[:, 5:6] * pz + t[:, 1:2]
        az = Rm[:, 6:7] * px + Rm[:, 7:8] * py + Rm[:, 8:9] * pz + t[:, 2:3]
        return ax, ay, az

    ax, ay, az = fwd_rot(rot, trs, qpx, qpy, qpz)      # (B*N, H*Pq)  query points
    bx, by, bz = fwd_rot(erot, etrs, kpx, kpy, kpz)    # (B*M, H*Pq)  key points
    cx, cy, cz = fwd_rot(erot, etrs, vpx, vpy, vpz)    # (B*M, H*Pv)  value points

    ones_m = jnp.ones((Mk, 1), f32)
    neg1_n = jnp.full((Nq, 1), -1.0, f32)

    # TODO(synk): attention-mask path (get_extended_attention_mask) not implemented; masks are None here.

    feat_rows = []
    for b in range(Bb):
        rq = slice(b * Nq, (b + 1) * Nq)
        rk = slice(b * Mk, (b + 1) * Mk)
        rot_b = rot[rq]                                  # (N, 9)
        trs_b = trs[rq]                                  # (N, 3)
        pair_bc = [pair_ref[b, c] for c in range(C)]     # C x (N, M)

        head_pieces = []
        for h in range(H):
            c1 = c1_ref[h]                               # sqrt(2 * coef_h / sqrt(3))  (SMEM scalar)

            qh = q_all[rq, h * D:(h + 1) * D] * qscale   # (N, D)
            kh = k_all[rk, h * D:(h + 1) * D]            # (M, D)
            axh = ax[rq, h * Pq:(h + 1) * Pq] * c1
            ayh = ay[rq, h * Pq:(h + 1) * Pq] * c1
            azh = az[rq, h * Pq:(h + 1) * Pq] * c1
            bxh = bx[rk, h * Pq:(h + 1) * Pq] * c1
            byh = by[rk, h * Pq:(h + 1) * Pq] * c1
            bzh = bz[rk, h * Pq:(h + 1) * Pq] * c1

            # 0.5*|c1*a|^2 = coef/sqrt(3) * |a|^2   (same for b)
            asq = 0.5 * jnp.sum(axh * axh + ayh * ayh + azh * azh, axis=1, keepdims=True)  # (N,1)
            bsq = 0.5 * jnp.sum(bxh * bxh + byh * byh + bzh * bzh, axis=1, keepdims=True)  # (M,1)

            # single MXU contraction: qk/sqrt(3D) + 2*coef/sqrt(3)*(a.b) - asq[n] - bsq[m]
            qaug = jnp.concatenate([qh, axh, ayh, azh, -asq, neg1_n], axis=1)   # (N, D+3Pq+2)
            kaug = jnp.concatenate([kh, bxh, byh, bzh, ones_m, bsq], axis=1)    # (M, D+3Pq+2)
            scores = lax.dot_general(qaug, kaug, (((1,), (1,)), ((), ())),
                                     precision=_HIGH, preferred_element_type=f32)  # (N, M)

            # pair bias (W_pair already scaled by 1/sqrt(3)); SMEM scalar x VMEM tile sums
            bias = w_pair_ref[h, 0] * pair_bc[0]
            for c in range(1, C):
                bias = bias + w_pair_ref[h, c] * pair_bc[c]
            scores = scores + bias

            # softmax over keys
            mx = jnp.max(scores, axis=1, keepdims=True)
            e = jnp.exp(scores - mx)
            probs = e / jnp.sum(e, axis=1, keepdims=True)                        # (N, M)

            # fused weighted sums: probs @ [ v | c_x | c_y | c_z ]
            vh = v_all[rk, h * D:(h + 1) * D]
            cxh = cx[rk, h * Pv:(h + 1) * Pv]
            cyh = cy[rk, h * Pv:(h + 1) * Pv]
            czh = cz[rk, h * Pv:(h + 1) * Pv]
            vc = jnp.concatenate([vh, cxh, cyh, czh], axis=1)                    # (M, D+3Pv)
            ovc = jnp.dot(probs, vc, precision=_HIGH, preferred_element_type=f32)  # (N, D+3Pv)
            ctx = ovc[:, :D]
            gx = ovc[:, D:D + Pv]
            gy = ovc[:, D + Pv:D + 2 * Pv]
            gz = ovc[:, D + 2 * Pv:D + 3 * Pv]

            # pair output, one column per pair channel
            po_cols = [jnp.sum(probs * pair_bc[c], axis=1, keepdims=True) for c in range(C)]
            po = jnp.concatenate(po_cols, axis=1)                                # (N, C)

            # back-rotation into the local frame (R^T (g - t)) + point norms
            dx = gx - trs_b[:, 0:1]
            dy = gy - trs_b[:, 1:2]
            dz = gz - trs_b[:, 2:3]
            lx = rot_b[:, 0:1] * dx + rot_b[:, 3:4] * dy + rot_b[:, 6:7] * dz
            ly = rot_b[:, 1:2] * dx + rot_b[:, 4:5] * dy + rot_b[:, 7:8] * dz
            lz = rot_b[:, 2:3] * dx + rot_b[:, 5:6] * dy + rot_b[:, 8:9] * dz
            pnorm = jnp.sqrt(lx * lx + ly * ly + lz * lz)                        # (N, Pv)

            # per-head feature block: [pair(C) | ctx(D) | x(Pv) | y(Pv) | z(Pv) | norm(Pv)] = 32 lanes
            head_pieces.append(jnp.concatenate([po, ctx, lx, ly, lz, pnorm], axis=1))

        feat_rows.append(jnp.concatenate(head_pieces, axis=1))                   # (N, 128)

    feats = jnp.concatenate(feat_rows, axis=0)                                   # (B*N, 128) lane-dense
    out_ref[...] = (jnp.dot(feats, w_out_ref[...], precision=_HIGH,
                            preferred_element_type=f32) + b_out_ref[...])


# ----------------------------- host-side weight prep -----------------------------
def _prepare_weights(params):
    H, D, Pq, Pv, C = NUM_IPA_HEADS, HEAD_SIZE, NUM_QUERY_POINTS, NUM_VALUE_POINTS, PAIR_CH
    inv_sqrt3 = 1.0 / math.sqrt(3.0)

    def comp_major(Wp, P):
        # (H*P*3, HIDDEN) rows ordered (h, p, xyz)  ->  rows ordered (xyz, h, p)
        return Wp.reshape(H, P, 3, HIDDEN).transpose(2, 0, 1, 3).reshape(3 * H * P, HIDDEN)

    w_hs = jnp.concatenate([params['W_q'], comp_major(params['W_qp'], Pq)], axis=0).T       # (32, 80)
    w_ehs = jnp.concatenate([params['W_k'], params['W_v'],
                             comp_major(params['W_kp'], Pq),
                             comp_major(params['W_vp'], Pv)], axis=0).T                     # (32, 160)

    # permute W_out input-feature columns to the kernel's per-head feature layout
    perm = []
    for h in range(H):
        perm += [h * C + c for c in range(C)]                                    # pair block
        perm += [H * C + h * D + d for d in range(D)]                            # context block
        perm += [H * (C + D) + h * Pv * 3 + p * 3 + comp                          # point block (comp-major in-kernel)
                 for comp in range(3) for p in range(Pv)]
        perm += [H * (C + D + 3 * Pv) + h * Pv + p for p in range(Pv)]           # norm block
    perm = jnp.array(perm, dtype=jnp.int32)
    w_out_k = jnp.take(params['W_out'], perm, axis=1).T                          # (128, 32)

    w_pair_s = (params['W_pair'] * inv_sqrt3).astype(jnp.float32)                # (H, C) incl. 1/sqrt(3)

    weight_points = math.sqrt(2.0 / (9.0 * Pq))
    coef = 0.5 * weight_points * jax.nn.softplus(params['head_weight'])          # (H,)
    c1 = jnp.sqrt(2.0 * coef * inv_sqrt3).astype(jnp.float32)                    # (H,)

    b_out = params['b_out'].reshape(1, HIDDEN).astype(jnp.float32)
    return w_hs, w_ehs, w_out_k, b_out, w_pair_s, c1


# ----------------------------------- forward -------------------------------------
def ipca_forward(params, hidden_states, encoder_hidden_states, pair_representation,
                 rigid_rotations, rigid_translations,
                 encoder_rigid_rotations, encoder_rigid_translations):
    Bb, Nq, _ = hidden_states.shape
    Mk = encoder_hidden_states.shape[1]

    w_hs, w_ehs, w_out_k, b_out, w_pair_s, c1 = _prepare_weights(params)

    hs_flat = hidden_states.reshape(Bb * Nq, HIDDEN)
    ehs_flat = encoder_hidden_states.reshape(Bb * Mk, HIDDEN)
    rot_flat = rigid_rotations.reshape(Bb * Nq, 9)
    trans_flat = rigid_translations.reshape(Bb * Nq, 3)
    erot_flat = encoder_rigid_rotations.reshape(Bb * Mk, 9)
    etrans_flat = encoder_rigid_translations.reshape(Bb * Mk, 3)

    vmem = pl.BlockSpec(memory_space=pltpu.MemorySpace.VMEM)
    smem = pl.BlockSpec(memory_space=pltpu.MemorySpace.SMEM)

    out_flat = pl.pallas_call(
        _ipca_kernel,
        out_shape=jax.ShapeDtypeStruct((Bb * Nq, HIDDEN), jnp.float32),
        in_specs=[vmem] * 11 + [smem, smem],
        out_specs=vmem,
    )(hs_flat, ehs_flat, pair_representation, rot_flat, trans_flat,
      erot_flat, etrans_flat, w_hs, w_ehs, w_out_k, b_out, w_pair_s, c1)

    return out_flat.reshape(Bb, Nq, HIDDEN)


# ------------------------- pure-JAX reference (PyTorch semantics) -----------------
def ipca_reference(params, hs, ehs, pair, rot, trans, erot, etrans):
    H, D, Pq, Pv = NUM_IPA_HEADS, HEAD_SIZE, NUM_QUERY_POINTS, NUM_VALUE_POINTS
    Bb, Nq, _ = hs.shape
    Mk = ehs.shape[1]
    lin = lambda x, W: x @ W.T
    q = lin(hs, params['W_q']).reshape(Bb, Nq, H, D).transpose(0, 2, 1, 3)
    k = lin(ehs, params['W_k']).reshape(Bb, Mk, H, D).transpose(0, 2, 1, 3)
    v = lin(ehs, params['W_v']).reshape(Bb, Mk, H, D).transpose(0, 2, 1, 3)
    scores = jnp.einsum('bhnd,bhmd->bhnm', q, k) / math.sqrt(D)
    scores = scores + lin(pair.transpose(0, 2, 3, 1), params['W_pair']).transpose(0, 3, 1, 2)
    qp = lin(hs, params['W_qp']).reshape(Bb, Nq, H, Pq, 3).transpose(0, 2, 1, 3, 4)
    kp = lin(ehs, params['W_kp']).reshape(Bb, Mk, H, Pq, 3).transpose(0, 2, 1, 3, 4)
    vp = lin(ehs, params['W_vp']).reshape(Bb, Mk, H, Pv, 3).transpose(0, 2, 1, 3, 4)
    a = jnp.einsum('bnij,bhnpj->bhnpi', rot, qp) + trans[:, None, :, None]
    b = jnp.einsum('bnij,bhnpj->bhnpi', erot, kp) + etrans[:, None, :, None]
    wp = math.sqrt(2.0 / (9.0 * Pq))
    gamma = jax.nn.softplus(params['head_weight'])
    a_sq = jnp.sum(a ** 2, axis=(-2, -1))
    b_sq = jnp.sum(b ** 2, axis=(-2, -1))
    inv = a_sq[:, :, :, None] + b_sq[:, :, None, :] - 2 * jnp.einsum('bhnpi,bhmpi->bhnm', a, b)
    scores = scores - (0.5 * wp) * gamma[None, :, None, None] * inv
    scores = scores / math.sqrt(3.0)
    probs = jax.nn.softmax(scores, axis=-1)
    pair_out = jnp.einsum('bhnm,bcnm->bnhc', probs, pair)
    c = jnp.einsum('bnij,bhnpj->bhnpi', erot, vp) + etrans[:, None, :, None]
    po = jnp.einsum('bhij,bhjpk->bhipk', probs, c)
    po = po - trans[:, None, :, None]
    po = jnp.einsum('bnji,bhnpj->bhnpi', rot, po)
    ctx = jnp.einsum('bhnm,bhmd->bhnd', probs, v)
    pair_out = pair_out.reshape(Bb, Nq, H * PAIR_CH)
    ctx = ctx.transpose(0, 2, 1, 3).reshape(Bb, Nq, H * D)
    po = po.transpose(0, 2, 1, 3, 4)
    po_sq = jnp.sqrt(jnp.sum(po * po, axis=-1))
    feats = jnp.concatenate([pair_out, ctx,
                             po.reshape(Bb, Nq, 3 * Pv * H),
                             po_sq.reshape(Bb, Nq, Pv * H)], axis=-1)
    return lin(feats, params['W_out']) + params['b_out']


# ------------------------------- deterministic params -----------------------------
def init_params(key):
    keys = jax.random.split(key, 10)
    w = lambda kk, shape: (0.02 * jax.random.normal(kk, shape)).astype(jnp.float32)
    return {
        'W_q':  w(keys[0], (ALL_HEAD, HIDDEN)),
        'W_k':  w(keys[1], (ALL_HEAD, HIDDEN)),
        'W_v':  w(keys[2], (ALL_HEAD, HIDDEN)),
        'W_qp': w(keys[3], (NUM_IPA_HEADS * NUM_QUERY_POINTS * 3, HIDDEN)),
        'W_kp': w(keys[4], (NUM_IPA_HEADS * NUM_QUERY_POINTS * 3, HIDDEN)),
        'W_vp': w(keys[5], (NUM_IPA_HEADS * NUM_VALUE_POINTS * 3, HIDDEN)),
        'W_pair': w(keys[6], (NUM_IPA_HEADS, PAIR_CH)),
        'head_weight': jax.random.normal(keys[7], (NUM_IPA_HEADS,)).astype(jnp.float32),
        'W_out': w(keys[8], (HIDDEN, OUT_IN)),
        'b_out': w(keys[9], (HIDDEN,)),
    }


if __name__ == "__main__":
    key = jax.random.PRNGKey(0)
    kparams, kdata = jax.random.split(key)
    params = init_params(kparams)
    ks = jax.random.split(kdata, 7)

    hidden_states = jax.random.normal(ks[0], (B, N, HIDDEN), jnp.float32)
    encoder_hidden_states = jax.random.normal(ks[1], (B, M, HIDDEN), jnp.float32)
    pair_representation = jax.random.normal(ks[2], (B, PAIR_CH, N, M), jnp.float32)
    rigid_rotations = jax.random.normal(ks[3], (B, N, 3, 3), jnp.float32)
    rigid_translations = jax.random.normal(ks[4], (B, N, 3), jnp.float32)
    encoder_rigid_rotations = jax.random.normal(ks[5], (B, M, 3, 3), jnp.float32)
    encoder_rigid_translations = jax.random.normal(ks[6], (B, M, 3), jnp.float32)

    out = ipca_forward(params, hidden_states, encoder_hidden_states, pair_representation,
                       rigid_rotations, rigid_translations,
                       encoder_rigid_rotations, encoder_rigid_translations)
    out = jax.block_until_ready(out)

    ref = ipca_reference(params, hidden_states, encoder_hidden_states, pair_representation,
                         rigid_rotations, rigid_translations,
                         encoder_rigid_rotations, encoder_rigid_translations)
    ref = jax.block_until_ready(ref)

    assert out.shape == (B, N, HIDDEN), out.shape
    max_err = float(jnp.max(jnp.abs(out - ref)))
    assert max_err < 5e-3, f"mismatch vs reference, max abs err = {max_err}"
    print("KERNEL_OK")
</pallas_src>

<mosaic_0001>
module attributes {stable_mosaic.version = 11 : i64} {
  func.func @_ipca_kernel(%arg0: memref<16x32xf32, #tpu.memory_space<vmem>>, %arg1: memref<32x32xf32, #tpu.memory_space<vmem>>, %arg2: memref<2x8x8x16xf32, #tpu.memory_space<vmem>>, %arg3: memref<16x9xf32, #tpu.memory_space<vmem>>, %arg4: memref<16x3xf32, #tpu.memory_space<vmem>>, %arg5: memref<32x9xf32, #tpu.memory_space<vmem>>, %arg6: memref<32x3xf32, #tpu.memory_space<vmem>>, %arg7: memref<32x80xf32, #tpu.memory_space<vmem>>, %arg8: memref<32x160xf32, #tpu.memory_space<vmem>>, %arg9: memref<128x32xf32, #tpu.memory_space<vmem>>, %arg10: memref<1x32xf32, #tpu.memory_space<vmem>>, %arg11: memref<4x8xf32, #tpu.memory_space<smem>>, %arg12: memref<4xf32, #tpu.memory_space<smem>>, %arg13: memref<16x32xf32, #tpu.memory_space<vmem>>) attributes {dimension_semantics = [], scalar_prefetch = 0 : i64, scratch_operands = 0 : i64, tpu.core_type = #tpu.core_type<tc>} {
    %c0 = arith.constant 0 : index
    %c0_0 = arith.constant 0 : index
    %0 = vector.load %arg0[%c0, %c0_0] : memref<16x32xf32, #tpu.memory_space<vmem>>, vector<16x32xf32>
    %c0_1 = arith.constant 0 : index
    %c0_2 = arith.constant 0 : index
    %1 = vector.load %arg7[%c0_1, %c0_2] : memref<32x80xf32, #tpu.memory_space<vmem>>, vector<32x80xf32>
    %cst = arith.constant dense<0.000000e+00> : vector<16x80xf32>
    %2 = tpu.matmul %0, %1, %cst {dimension_numbers = #tpu.dot_dimension_numbers<[1], [0], [0], [1], [0, 0, 1, 1], [], []>, precision = #tpu.contract_precision<fp32>} : vector<16x32xf32>, vector<32x80xf32>, vector<16x80xf32> -> vector<16x80xf32>
    %c0_3 = arith.constant 0 : index
    %c0_4 = arith.constant 0 : index
    %3 = vector.load %arg1[%c0_3, %c0_4] : memref<32x32xf32, #tpu.memory_space<vmem>>, vector<32x32xf32>
    %c0_5 = arith.constant 0 : index
    %c0_6 = arith.constant 0 : index
    %4 = vector.load %arg8[%c0_5, %c0_6] : memref<32x160xf32, #tpu.memory_space<vmem>>, vector<32x160xf32>
    %cst_7 = arith.constant dense<0.000000e+00> : vector<32x160xf32>
    %5 = tpu.matmul %3, %4, %cst_7 {dimension_numbers = #tpu.dot_dimension_numbers<[1], [0], [0], [1], [0, 0, 1, 1], [], []>, precision = #tpu.contract_precision<fp32>} : vector<32x32xf32>, vector<32x160xf32>, vector<32x160xf32> -> vector<32x160xf32>
    %6 = vector.extract_strided_slice %2 {offsets = [0, 0], sizes = [16, 32], strides = [1, 1]} : vector<16x80xf32> to vector<16x32xf32>
    %7 = vector.extract_strided_slice %2 {offsets = [0, 32], sizes = [16, 16], strides = [1, 1]} : vector<16x80xf32> to vector<16x16xf32>
    %8 = vector.extract_strided_slice %2 {offsets = [0, 48], sizes = [16, 16], strides = [1, 1]} : vector<16x80xf32> to vector<16x16xf32>
    %9 = vector.extract_strided_slice %2 {offsets = [0, 64], sizes = [16, 16], strides = [1, 1]} : vector<16x80xf32> to vector<16x16xf32>
    %10 = vector.extract_strided_slice %5 {offsets = [0, 0], sizes = [32, 32], strides = [1, 1]} : vector<32x160xf32> to vector<32x32xf32>
    %11 = vector.extract_strided_slice %5 {offsets = [0, 32], sizes = [32, 32], strides = [1, 1]} : vector<32x160xf32> to vector<32x32xf32>
    %12 = vector.extract_strided_slice %5 {offsets = [0, 64], sizes = [32, 16], strides = [1, 1]} : vector<32x160xf32> to vector<32x16xf32>
    %13 = vector.extract_strided_slice %5 {offsets = [0, 80], sizes = [32, 16], strides = [1, 1]} : vector<32x160xf32> to vector<32x16xf32>
    %14 = vector.extract_strided_slice %5 {offsets = [0, 96], sizes = [32, 16], strides = [1, 1]} : vector<32x160xf32> to vector<32x16xf32>
    %15 = vector.extract_strided_slice %5 {offsets = [0, 112], sizes = [32, 16], strides = [1, 1]} : vector<32x160xf32> to vector<32x16xf32>
    %16 = vector.extract_strided_slice %5 {offsets = [0, 128], sizes = [32, 16], strides = [1, 1]} : vector<32x160xf32> to vector<32x16xf32>
    %17 = vector.extract_strided_slice %5 {offsets = [0, 144], sizes = [32, 16], strides = [1, 1]} : vector<32x160xf32> to vector<32x16xf32>
    %c0_8 = arith.constant 0 : index
    %c0_9 = arith.constant 0 : index
    %18 = vector.load %arg3[%c0_8, %c0_9] : memref<16x9xf32, #tpu.memory_space<vmem>>, vector<16x9xf32>
    %c0_10 = arith.constant 0 : index
    %c0_11 = arith.constant 0 : index
    %19 = vector.load %arg4[%c0_10, %c0_11] : memref<16x3xf32, #tpu.memory_space<vmem>>, vector<16x3xf32>
    %c0_12 = arith.constant 0 : index
    %c0_13 = arith.constant 0 : index
    %20 = vector.load %arg5[%c0_12, %c0_13] : memref<32x9xf32, #tpu.memory_space<vmem>>, vector<32x9xf32>
    %c0_14 = arith.constant 0 : index
    %c0_15 = arith.constant 0 : index
    %21 = vector.load %arg6[%c0_14, %c0_15] : memref<32x3xf32, #tpu.memory_space<vmem>>, vector<32x3xf32>
    %22 = vector.extract_strided_slice %18 {offsets = [0, 0], sizes = [16, 1], strides = [1, 1]} : vector<16x9xf32> to vector<16x1xf32>
    %23 = vector.broadcast %22 : vector<16x1xf32> to vector<16x16xf32>
    %24 = arith.mulf %23, %7 : vector<16x16xf32>
    %25 = vector.extract_strided_slice %18 {offsets = [0, 1], sizes = [16, 1], strides = [1, 1]} : vector<16x9xf32> to vector<16x1xf32>
    %26 = vector.broadcast %25 : vector<16x1xf32> to vector<16x16xf32>
    %27 = arith.mulf %26, %8 : vector<16x16xf32>
    %28 = arith.addf %24, %27 : vector<16x16xf32>
    %29 = vector.extract_strided_slice %18 {offsets = [0, 2], sizes = [16, 1], strides = [1, 1]} : vector<16x9xf32> to vector<16x1xf32>
    %30 = vector.broadcast %29 : vector<16x1xf32> to vector<16x16xf32>
    %31 = arith.mulf %30, %9 : vector<16x16xf32>
    %32 = arith.addf %28, %31 : vector<16x16xf32>
    %33 = vector.extract_strided_slice %19 {offsets = [0, 0], sizes = [16, 1], strides = [1, 1]} : vector<16x3xf32> to vector<16x1xf32>
    %34 = vector.broadcast %33 : vector<16x1xf32> to vector<16x16xf32>
    %35 = arith.addf %32, %34 : vector<16x16xf32>
    %36 = vector.extract_strided_slice %18 {offsets = [0, 3], sizes = [16, 1], strides = [1, 1]} : vector<16x9xf32> to vector<16x1xf32>
    %37 = vector.broadcast %36 : vector<16x1xf32> to vector<16x16xf32>
    %38 = arith.mulf %37, %7 : vector<16x16xf32>
    %39 = vector.extract_strided_slice %18 {offsets = [0, 4], sizes = [16, 1], strides = [1, 1]} : vector<16x9xf32> to vector<16x1xf32>
    %40 = vector.broadcast %39 : vector<16x1xf32> to vector<16x16xf32>
    %41 = arith.mulf %40, %8 : vector<16x16xf32>
    %42 = arith.addf %38, %41 : vector<16x16xf32>
    %43 = vector.extract_strided_slice %18 {offsets = [0, 5], sizes = [16, 1], strides = [1, 1]} : vector<16x9xf32> to vector<16x1xf32>
    %44 = vector.broadcast %43 : vector<16x1xf32> to vector<16x16xf32>
    %45 = arith.mulf %44, %9 : vector<16x16xf32>
    %46 = arith.addf %42, %45 : vector<16x16xf32>
    %47 = vector.extract_strided_slice %19 {offsets = [0, 1], sizes = [16, 1], strides = [1, 1]} : vector<16x3xf32> to vector<16x1xf32>
    %48 = vector.broadcast %47 : vector<16x1xf32> to vector<16x16xf32>
    %49 = arith.addf %46, %48 : vector<16x16xf32>
    %50 = vector.extract_strided_slice %18 {offsets = [0, 6], sizes = [16, 1], strides = [1, 1]} : vector<16x9xf32> to vector<16x1xf32>
    %51 = vector.broadcast %50 : vector<16x1xf32> to vector<16x16xf32>
    %52 = arith.mulf %51, %7 : vector<16x16xf32>
    %53 = vector.extract_strided_slice %18 {offsets = [0, 7], sizes = [16, 1], strides = [1, 1]} : vector<16x9xf32> to vector<16x1xf32>
    %54 = vector.broadcast %53 : vector<16x1xf32> to vector<16x16xf32>
    %55 = arith.mulf %54, %8 : vector<16x16xf32>
    %56 = arith.addf %52, %55 : vector<16x16xf32>
    %57 = vector.extract_strided_slice %18 {offsets = [0, 8], sizes = [16, 1], strides = [1, 1]} : vector<16x9xf32> to vector<16x1xf32>
    %58 = vector.broadcast %57 : vector<16x1xf32> to vector<16x16xf32>
    %59 = arith.mulf %58, %9 : vector<16x16xf32>
    %60 = arith.addf %56, %59 : vector<16x16xf32>
    %61 = vector.extract_strided_slice %19 {offsets = [0, 2], sizes = [16, 1], strides = [1, 1]} : vector<16x3xf32> to vector<16x1xf32>
    %62 = vector.broadcast %61 : vector<16x1xf32> to vector<16x16xf32>
    %63 = arith.addf %60, %62 : vector<16x16xf32>
    %64 = vector.extract_strided_slice %20 {offsets = [0, 0], sizes = [32, 1], strides = [1, 1]} : vector<32x9xf32> to vector<32x1xf32>
    %65 = vector.broadcast %64 : vector<32x1xf32> to vector<32x16xf32>
    %66 = arith.mulf %65, %12 : vector<32x16xf32>
    %67 = vector.extract_strided_slice %20 {offsets = [0, 1], sizes = [32, 1], strides = [1, 1]} : vector<32x9xf32> to vector<32x1xf32>
    %68 = vector.broadcast %67 : vector<32x1xf32> to vector<32x16xf32>
    %69 = arith.mulf %68, %13 : vector<32x16xf32>
    %70 = arith.addf %66, %69 : vector<32x16xf32>
    %71 = vector.extract_strided_slice %20 {offsets = [0, 2], sizes = [32, 1], strides = [1, 1]} : vector<32x9xf32> to vector<32x1xf32>
    %72 = vector.broadcast %71 : vector<32x1xf32> to vector<32x16xf32>
    %73 = arith.mulf %72, %14 : vector<32x16xf32>
    %74 = arith.addf %70, %73 : vector<32x16xf32>
    %75 = vector.extract_strided_slice %21 {offsets = [0, 0], sizes = [32, 1], strides = [1, 1]} : vector<32x3xf32> to vector<32x1xf32>
    %76 = vector.broadcast %75 : vector<32x1xf32> to vector<32x16xf32>
    %77 = arith.addf %74, %76 : vector<32x16xf32>
    %78 = vector.extract_strided_slice %20 {offsets = [0, 3], sizes = [32, 1], strides = [1, 1]} : vector<32x9xf32> to vector<32x1xf32>
    %79 = vector.broadcast %78 : vector<32x1xf32> to vector<32x16xf32>
    %80 = arith.mulf %79, %12 : vector<32x16xf32>
    %81 = vector.extract_strided_slice %20 {offsets = [0, 4], sizes = [32, 1], strides = [1, 1]} : vector<32x9xf32> to vector<32x1xf32>
    %82 = vector.broadcast %81 : vector<32x1xf32> to vector<32x16xf32>
    %83 = arith.mulf %82, %13 : vector<32x16xf32>
    %84 = arith.addf %80, %83 : vector<32x16xf32>
    %85 = vector.extract_strided_slice %20 {offsets = [0, 5], sizes = [32, 1], strides = [1, 1]} : vector<32x9xf32> to vector<32x1xf32>
    %86 = vector.broadcast %85 : vector<32x1xf32> to vector<32x16xf32>
    %87 = arith.mulf %86, %14 : vector<32x16xf32>
    %88 = arith.addf %84, %87 : vector<32x16xf32>
    %89 = vector.extract_strided_slice %21 {offsets = [0, 1], sizes = [32, 1], strides = [1, 1]} : vector<32x3xf32> to vector<32x1xf32>
    %90 = vector.broadcast %89 : vector<32x1xf32> to vector<32x16xf32>
    %91 = arith.addf %88, %90 : vector<32x16xf32>
    %92 = vector.extract_strided_slice %20 {offsets = [0, 6], sizes = [32, 1], strides = [1, 1]} : vector<32x9xf32> to vector<32x1xf32>
    %93 = vector.broadcast %92 : vector<32x1xf32> to vector<32x16xf32>
    %94 = arith.mulf %93, %12 : vector<32x16xf32>
    %95 = vector.extract_strided_slice %20 {offsets = [0, 7], sizes = [32, 1], strides = [1, 1]} : vector<32x9xf32> to vector<32x1xf32>
    %96 = vector.broadcast %95 : vector<32x1xf32> to vector<32x16xf32>
    %97 = arith.mulf %96, %13 : vector<32x16xf32>
    %98 = arith.addf %94, %97 : vector<32x16xf32>
    %99 = vector.extract_strided_slice %20 {offsets = [0, 8], sizes = [32, 1], strides = [1, 1]} : vector<32x9xf32> to vector<32x1xf32>
    %100 = vector.broadcast %99 : vector<32x1xf32> to vector<32x16xf32>
    %101 = arith.mulf %100, %14 : vector<32x16xf32>
    %102 = arith.addf %98, %101 : vector<32x16xf32>
    %103 = vector.extract_strided_slice %21 {offsets = [0, 2], sizes = [32, 1], strides = [1, 1]} : vector<32x3xf32> to vector<32x1xf32>
    %104 = vector.broadcast %103 : vector<32x1xf32> to vector<32x16xf32>
    %105 = arith.addf %102, %104 : vector<32x16xf32>
    %106 = vector.extract_strided_slice %20 {offsets = [0, 0], sizes = [32, 1], strides = [1, 1]} : vector<32x9xf32> to vector<32x1xf32>
    %107 = vector.broadcast %106 : vector<32x1xf32> to vector<32x16xf32>
    %108 = arith.mulf %107, %15 : vector<32x16xf32>
    %109 = vector.extract_strided_slice %20 {offsets = [0, 1], sizes = [32, 1], strides = [1, 1]} : vector<32x9xf32> to vector<32x1xf32>
    %110 = vector.broadcast %109 : vector<32x1xf32> to vector<32x16xf32>
    %111 = arith.mulf %110, %16 : vector<32x16xf32>
    %112 = arith.addf %108, %111 : vector<32x16xf32>
    %113 = vector.extract_strided_slice %20 {offsets = [0, 2], sizes = [32, 1], strides = [1, 1]} : vector<32x9xf32> to vector<32x1xf32>
    %114 = vector.broadcast %113 : vector<32x1xf32> to vector<32x16xf32>
    %115 = arith.mulf %114, %17 : vector<32x16xf32>
    %116 = arith.addf %112, %115 : vector<32x16xf32>
    %117 = vector.extract_strided_slice %21 {offsets = [0, 0], sizes = [32, 1], strides = [1, 1]} : vector<32x3xf32> to vector<32x1xf32>
    %118 = vector.broadcast %117 : vector<32x1xf32> to vector<32x16xf32>
    %119 = arith.addf %116, %118 : vector<32x16xf32>
    %120 = vector.extract_strided_slice %20 {offsets = [0, 3], sizes = [32, 1], strides = [1, 1]} : vector<32x9xf32> to vector<32x1xf32>
    %121 = vector.broadcast %120 : vector<32x1xf32> to vector<32x16xf32>
    %122 = arith.mulf %121, %15 : vector<32x16xf32>
    %123 = vector.extract_strided_slice %20 {offsets = [0, 4], sizes = [32, 1], strides = [1, 1]} : vector<32x9xf32> to vector<32x1xf32>
    %124 = vector.broadcast %123 : vector<32x1xf32> to vector<32x16xf32>
    %125 = arith.mulf %124, %16 : vector<32x16xf32>
    %126 = arith.addf %122, %125 : vector<32x16xf32>
    %127 = vector.extract_strided_slice %20 {offsets = [0, 5], sizes = [32, 1], strides = [1, 1]} : vector<32x9xf32> to vector<32x1xf32>
    %128 = vector.broadcast %127 : vector<32x1xf32> to vector<32x16xf32>
    %129 = arith.mulf %128, %17 : vector<32x16xf32>
    %130 = arith.addf %126, %129 : vector<32x16xf32>
    %131 = vector.extract_strided_slice %21 {offsets = [0, 1], sizes = [32, 1], strides = [1, 1]} : vector<32x3xf32> to vector<32x1xf32>
    %132 = vector.broadcast %131 : vector<32x1xf32> to vector<32x16xf32>
    %133 = arith.addf %130, %132 : vector<32x16xf32>
    %134 = vector.extract_strided_slice %20 {offsets = [0, 6], sizes = [32, 1], strides = [1, 1]} : vector<32x9xf32> to vector<32x1xf32>
    %135 = vector.broadcast %134 : vector<32x1xf32> to vector<32x16xf32>
    %136 = arith.mulf %135, %15 : vector<32x16xf32>
    %137 = vector.extract_strided_slice %20 {offsets = [0, 7], sizes = [32, 1], strides = [1, 1]} : vector<32x9xf32> to vector<32x1xf32>
    %138 = vector.broadcast %137 : vector<32x1xf32> to vector<32x16xf32>
    %139 = arith.mulf %138, %16 : vector<32x16xf32>
    %140 = arith.addf %136, %139 : vector<32x16xf32>
    %141 = vector.extract_strided_slice %20 {offsets = [0, 8], sizes = [32, 1], strides = [1, 1]} : vector<32x9xf32> to vector<32x1xf32>
    %142 = vector.broadcast %141 : vector<32x1xf32> to vector<32x16xf32>
    %143 = arith.mulf %142, %17 : vector<32x16xf32>
    %144 = arith.addf %140, %143 : vector<32x16xf32>
    %145 = vector.extract_strided_slice %21 {offsets = [0, 2], sizes = [32, 1], strides = [1, 1]} : vector<32x3xf32> to vector<32x1xf32>
    %146 = vector.broadcast %145 : vector<32x1xf32> to vector<32x16xf32>
    %147 = arith.addf %144, %146 : vector<32x16xf32>
    %cst_16 = arith.constant 1.000000e+00 : f32
    %148 = vector.broadcast %cst_16 : f32 to vector<16x1xf32>
    %cst_17 = arith.constant -1.000000e+00 : f32
    %149 = vector.broadcast %cst_17 : f32 to vector<8x1xf32>
    %150 = vector.extract_strided_slice %18 {offsets = [0, 0], sizes = [8, 9], strides = [1, 1]} : vector<16x9xf32> to vector<8x9xf32>
    %151 = vector.extract_strided_slice %19 {offsets = [0, 0], sizes = [8, 3], strides = [1, 1]} : vector<16x3xf32> to vector<8x3xf32>
    %c0_18 = arith.constant 0 : index
    %c0_19 = arith.constant 0 : index
    %c0_20 = arith.constant 0 : index
    %c0_21 = arith.constant 0 : index
    %152 = vector.load %arg2[%c0_18, %c0_19, %c0_20, %c0_21] : memref<2x8x8x16xf32, #tpu.memory_space<vmem>>, vector<1x1x8x16xf32>
    %153 = vector.shape_cast %152 : vector<1x1x8x16xf32> to vector<8x16xf32>
    %c0_22 = arith.constant 0 : index
    %c1 = arith.constant 1 : index
    %c0_23 = arith.constant 0 : index
    %c0_24 = arith.constant 0 : index
    %154 = vector.load %arg2[%c0_22, %c1, %c0_23, %c0_24] : memref<2x8x8x16xf32, #tpu.memory_space<vmem>>, vector<1x1x8x16xf32>
    %155 = vector.shape_cast %154 : vector<1x1x8x16xf32> to vector<8x16xf32>
    %c0_25 = arith.constant 0 : index
    %c2 = arith.constant 2 : index
    %c0_26 = arith.constant 0 : index
    %c0_27 = arith.constant 0 : index
    %156 = vector.load %arg2[%c0_25, %c2, %c0_26, %c0_27] : memref<2x8x8x16xf32, #tpu.memory_space<vmem>>, vector<1x1x8x16xf32>
    %157 = vector.shape_cast %156 : vector<1x1x8x16xf32> to vector<8x16xf32>
    %c0_28 = arith.constant 0 : index
    %c3 = arith.constant 3 : index
    %c0_29 = arith.constant 0 : index
    %c0_30 = arith.constant 0 : index
    %158 = vector.load %arg2[%c0_28, %c3, %c0_29, %c0_30] : memref<2x8x8x16xf32, #tpu.memory_space<vmem>>, vector<1x1x8x16xf32>
    %159 = vector.shape_cast %158 : vector<1x1x8x16xf32> to vector<8x16xf32>
    %c0_31 = arith.constant 0 : index
    %c4 = arith.constant 4 : index
    %c0_32 = arith.constant 0 : index
    %c0_33 = arith.constant 0 : index
    %160 = vector.load %arg2[%c0_31, %c4, %c0_32, %c0_33] : memref<2x8x8x16xf32, #tpu.memory_space<vmem>>, vector<1x1x8x16xf32>
    %161 = vector.shape_cast %160 : vector<1x1x8x16xf32> to vector<8x16xf32>
    %c0_34 = arith.constant 0 : index
    %c5 = arith.constant 5 : index
    %c0_35 = arith.constant 0 : index
    %c0_36 = arith.constant 0 : index
    %162 = vector.load %arg2[%c0_34, %c5, %c0_35, %c0_36] : memref<2x8x8x16xf32, #tpu.memory_space<vmem>>, vector<1x1x8x16xf32>
    %163 = vector.shape_cast %162 : vector<1x1x8x16xf32> to vector<8x16xf32>
    %c0_37 = arith.constant 0 : index
    %c6 = arith.constant 6 : index
    %c0_38 = arith.constant 0 : index
    %c0_39 = arith.constant 0 : index
    %164 = vector.load %arg2[%c0_37, %c6, %c0_38, %c0_39] : memref<2x8x8x16xf32, #tpu.memory_space<vmem>>, vector<1x1x8x16xf32>
    %165 = vector.shape_cast %164 : vector<1x1x8x16xf32> to vector<8x16xf32>
    %c0_40 = arith.constant 0 : index
    %c7 = arith.constant 7 : index
    %c0_41 = arith.constant 0 : index
    %c0_42 = arith.constant 0 : index
    %166 = vector.load %arg2[%c0_40, %c7, %c0_41, %c0_42] : memref<2x8x8x16xf32, #tpu.memory_space<vmem>>, vector<1x1x8x16xf32>
    %167 = vector.shape_cast %166 : vector<1x1x8x16xf32> to vector<8x16xf32>
    %c0_43 = arith.constant 0 : index
    %168 = memref.load %arg12[%c0_43] : memref<4xf32, #tpu.memory_space<smem>>
    %169 = vector.extract_strided_slice %6 {offsets = [0, 0], sizes = [8, 8], strides = [1, 1]} : vector<16x32xf32> to vector<8x8xf32>
    %cst_44 = arith.constant 0.204124153 : f32
    %170 = vector.broadcast %cst_44 : f32 to vector<8x8xf32>
    %171 = arith.mulf %169, %170 : vector<8x8xf32>
    %172 = vector.extract_strided_slice %10 {offsets = [0, 0], sizes = [16, 8], strides = [1, 1]} : vector<32x32xf32> to vector<16x8xf32>
    %173 = vector.extract_strided_slice %35 {offsets = [0, 0], sizes = [8, 4], strides = [1, 1]} : vector<16x16xf32> to vector<8x4xf32>
    %174 = vector.broadcast %168 : f32 to vector<8x4xf32>
    %175 = arith.mulf %173, %174 : vector<8x4xf32>
    %176 = vector.extract_strided_slice %49 {offsets = [0, 0], sizes = [8, 4], strides = [1, 1]} : vector<16x16xf32> to vector<8x4xf32>
    %177 = vector.broadcast %168 : f32 to vector<8x4xf32>
    %178 = arith.mulf %176, %177 : vector<8x4xf32>
    %179 = vector.extract_strided_slice %63 {offsets = [0, 0], sizes = [8, 4], strides = [1, 1]} : vector<16x16xf32> to vector<8x4xf32>
    %180 = vector.broadcast %168 : f32 to vector<8x4xf32>
    %181 = arith.mulf %179, %180 : vector<8x4xf32>
    %182 = vector.extract_strided_slice %77 {offsets = [0, 0], sizes = [16, 4], strides = [1, 1]} : vector<32x16xf32> to vector<16x4xf32>
    %183 = vector.broadcast %168 : f32 to vector<16x4xf32>
    %184 = arith.mulf %182, %183 : vector<16x4xf32>
    %185 = vector.extract_strided_slice %91 {offsets = [0, 0], sizes = [16, 4], strides = [1, 1]} : vector<32x16xf32> to vector<16x4xf32>
    %186 = vector.broadcast %168 : f32 to vector<16x4xf32>
    %187 = arith.mulf %185, %186 : vector<16x4xf32>
    %188 = vector.extract_strided_slice %105 {offsets = [0, 0], sizes = [16, 4], strides = [1, 1]} : vector<32x16xf32> to vector<16x4xf32>
    %189 = vector.broadcast %168 : f32 to vector<16x4xf32>
    %190 = arith.mulf %188, %189 : vector<16x4xf32>
    %191 = arith.mulf %175, %175 : vector<8x4xf32>
    %192 = arith.mulf %178, %178 : vector<8x4xf32>
    %193 = arith.addf %191, %192 : vector<8x4xf32>
    %194 = arith.mulf %181, %181 : vector<8x4xf32>
    %195 = arith.addf %193, %194 : vector<8x4xf32>
    %cst_45 = arith.constant dense<0.000000e+00> : vector<8xf32>
    %196 = vector.multi_reduction <add>, %195, %cst_45 [1] : vector<8x4xf32> to vector<8xf32>
    %197 = vector.shape_cast %196 : vector<8xf32> to vector<8x1xf32>
    %cst_46 = arith.constant 5.000000e-01 : f32
    %198 = vector.broadcast %cst_46 : f32 to vector<8x1xf32>
    %199 = arith.mulf %198, %197 : vector<8x1xf32>
    %200 = arith.mulf %184, %184 : vector<16x4xf32>
    %201 = arith.mulf %187, %187 : vector<16x4xf32>
    %202 = arith.addf %200, %201 : vector<16x4xf32>
    %203 = arith.mulf %190, %190 : vector<16x4xf32>
    %204 = arith.addf %202, %203 : vector<16x4xf32>
    %cst_47 = arith.constant dense<0.000000e+00> : vector<16xf32>
    %205 = vector.multi_reduction <add>, %204, %cst_47 [1] : vector<16x4xf32> to vector<16xf32>
    %206 = vector.shape_cast %205 : vector<16xf32> to vector<16x1xf32>
    %cst_48 = arith.constant 5.000000e-01 : f32
    %207 = vector.broadcast %cst_48 : f32 to vector<16x1xf32>
    %208 = arith.mulf %207, %206 : vector<16x1xf32>
    %cst_49 = arith.constant 0.000000e+00 : f32
    %209 = vector.broadcast %cst_49 : f32 to vector<8x1xf32>
    %210 = arith.subf %209, %199 : vector<8x1xf32>
    %211 = tpu.concatenate %171, %175, %178, %181, %210, %149 in 1 : vector<8x8xf32>, vector<8x4xf32>, vector<8x4xf32>, vector<8x4xf32>, vector<8x1xf32>, vector<8x1xf32> -> vector<8x22xf32>
    %212 = tpu.concatenate %172, %184, %187, %190, %148, %208 in 1 : vector<16x8xf32>, vector<16x4xf32>, vector<16x4xf32>, vector<16x4xf32>, vector<16x1xf32>, vector<16x1xf32> -> vector<16x22xf32>
    %cst_50 = arith.constant dense<0.000000e+00> : vector<8x16xf32>
    %213 = tpu.matmul %211, %212, %cst_50 {dimension_numbers = #tpu.dot_dimension_numbers<[1], [1], [0], [0], [0, 0, 1, 0], [], []>, precision = #tpu.contract_precision<fp32>} : vector<8x22xf32>, vector<16x22xf32>, vector<8x16xf32> -> vector<8x16xf32>
    %c0_51 = arith.constant 0 : index
    %c0_52 = arith.constant 0 : index
    %214 = memref.load %arg11[%c0_51, %c0_52] : memref<4x8xf32, #tpu.memory_space<smem>>
    %215 = vector.broadcast %214 : f32 to vector<8x16xf32>
    %216 = arith.mulf %215, %153 : vector<8x16xf32>
    %c0_53 = arith.constant 0 : index
    %c1_54 = arith.constant 1 : index
    %217 = memref.load %arg11[%c0_53, %c1_54] : memref<4x8xf32, #tpu.memory_space<smem>>
    %218 = vector.broadcast %217 : f32 to vector<8x16xf32>
    %219 = arith.mulf %218, %155 : vector<8x16xf32>
    %220 = arith.addf %216, %219 : vector<8x16xf32>
    %c0_55 = arith.constant 0 : index
    %c2_56 = arith.constant 2 : index
    %221 = memref.load %arg11[%c0_55, %c2_56] : memref<4x8xf32, #tpu.memory_space<smem>>
    %222 = vector.broadcast %221 : f32 to vector<8x16xf32>
    %223 = arith.mulf %222, %157 : vector<8x16xf32>
    %224 = arith.addf %220, %223 : vector<8x16xf32>
    %c0_57 = arith.constant 0 : index
    %c3_58 = arith.constant 3 : index
    %225 = memref.load %arg11[%c0_57, %c3_58] : memref<4x8xf32, #tpu.memory_space<smem>>
    %226 = vector.broadcast %225 : f32 to vector<8x16xf32>
    %227 = arith.mulf %226, %159 : vector<8x16xf32>
    %228 = arith.addf %224, %227 : vector<8x16xf32>
    %c0_59 = arith.constant 0 : index
    %c4_60 = arith.constant 4 : index
    %229 = memref.load %arg11[%c0_59, %c4_60] : memref<4x8xf32, #tpu.memory_space<smem>>
    %230 = vector.broadcast %229 : f32 to vector<8x16xf32>
    %231 = arith.mulf %230, %161 : vector<8x16xf32>
    %232 = arith.addf %228, %231 : vector<8x16xf32>
    %c0_61 = arith.constant 0 : index
    %c5_62 = arith.constant 5 : index
    %233 = memref.load %arg11[%c0_61, %c5_62] : memref<4x8xf32, #tpu.memory_space<smem>>
    %234 = vector.broadcast %233 : f32 to vector<8x16xf32>
    %235 = arith.mulf %234, %163 : vector<8x16xf32>
    %236 = arith.addf %232, %235 : vector<8x16xf32>
    %c0_63 = arith.constant 0 : index
    %c6_64 = arith.constant 6 : index
    %237 = memref.load %arg11[%c0_63, %c6_64] : memref<4x8xf32, #tpu.memory_space<smem>>
    %238 = vector.broadcast %237 : f32 to vector<8x16xf32>
    %239 = arith.mulf %238, %165 : vector<8x16xf32>
    %240 = arith.addf %236, %239 : vector<8x16xf32>
    %c0_65 = arith.constant 0 : index
    %c7_66 = arith.constant 7 : index
    %241 = memref.load %arg11[%c0_65, %c7_66] : memref<4x8xf32, #tpu.memory_space<smem>>
    %242 = vector.broadcast %241 : f32 to vector<8x16xf32>
    %243 = arith.mulf %242, %167 : vector<8x16xf32>
    %244 = arith.addf %240, %243 : vector<8x16xf32>
    %245 = arith.addf %213, %244 : vector<8x16xf32>
    %cst_67 = arith.constant dense<0xFF800000> : vector<8xf32>
    %246 = vector.multi_reduction <maximumf>, %245, %cst_67 [1] : vector<8x16xf32> to vector<8xf32>
    %247 = vector.shape_cast %246 : vector<8xf32> to vector<8x1xf32>
    %248 = vector.broadcast %247 : vector<8x1xf32> to vector<8x16xf32>
    %249 = arith.subf %245, %248 : vector<8x16xf32>
    %250 = math.exp %249 : vector<8x16xf32>
    %cst_68 = arith.constant dense<0.000000e+00> : vector<8xf32>
    %251 = vector.multi_reduction <add>, %250, %cst_68 [1] : vector<8x16xf32> to vector<8xf32>
    %252 = vector.shape_cast %251 : vector<8xf32> to vector<8x1xf32>
    %253 = vector.broadcast %252 : vector<8x1xf32> to vector<8x16xf32>
    %254 = arith.divf %250, %253 : vector<8x16xf32>
    %255 = vector.extract_strided_slice %11 {offsets = [0, 0], sizes = [16, 8], strides = [1, 1]} : vector<32x32xf32> to vector<16x8xf32>
    %256 = vector.extract_strided_slice %119 {offsets = [0, 0], sizes = [16, 4], strides = [1, 1]} : vector<32x16xf32> to vector<16x4xf32>
    %257 = vector.extract_strided_slice %133 {offsets = [0, 0], sizes = [16, 4], strides = [1, 1]} : vector<32x16xf32> to vector<16x4xf32>
    %258 = vector.extract_strided_slice %147 {offsets = [0, 0], sizes = [16, 4], strides = [1, 1]} : vector<32x16xf32> to vector<16x4xf32>
    %259 = tpu.concatenate %255, %256, %257, %258 in 1 : vector<16x8xf32>, vector<16x4xf32>, vector<16x4xf32>, vector<16x4xf32> -> vector<16x20xf32>
    %cst_69 = arith.constant dense<0.000000e+00> : vector<8x20xf32>
    %260 = tpu.matmul %254, %259, %cst_69 {dimension_numbers = #tpu.dot_dimension_numbers<[1], [0], [0], [1], [0, 0, 1, 1], [], []>, precision = #tpu.contract_precision<fp32>} : vector<8x16xf32>, vector<16x20xf32>, vector<8x20xf32> -> vector<8x20xf32>
    %261 = vector.extract_strided_slice %260 {offsets = [0, 0], sizes = [8, 8], strides = [1, 1]} : vector<8x20xf32> to vector<8x8xf32>
    %262 = vector.extract_strided_slice %260 {offsets = [0, 8], sizes = [8, 4], strides = [1, 1]} : vector<8x20xf32> to vector<8x4xf32>
    %263 = vector.extract_strided_slice %260 {offsets = [0, 12], sizes = [8, 4], strides = [1, 1]} : vector<8x20xf32> to vector<8x4xf32>
    %264 = vector.extract_strided_slice %260 {offsets = [0, 16], sizes = [8, 4], strides = [1, 1]} : vector<8x20xf32> to vector<8x4xf32>
    %265 = arith.mulf %254, %153 : vector<8x16xf32>
    %cst_70 = arith.constant dense<0.000000e+00> : vector<8xf32>
    %266 = vector.multi_reduction <add>, %265, %cst_70 [1] : vector<8x16xf32> to vector<8xf32>
    %267 = vector.shape_cast %266 : vector<8xf32> to vector<8x1xf32>
    %268 = arith.mulf %254, %155 : vector<8x16xf32>
    %cst_71 = arith.constant dense<0.000000e+00> : vector<8xf32>
    %269 = vector.multi_reduction <add>, %268, %cst_71 [1] : vector<8x16xf32> to vector<8xf32>
    %270 = vector.shape_cast %269 : vector<8xf32> to vector<8x1xf32>
    %271 = arith.mulf %254, %157 : vector<8x16xf32>
    %cst_72 = arith.constant dense<0.000000e+00> : vector<8xf32>
    %272 = vector.multi_reduction <add>, %271, %cst_72 [1] : vector<8x16xf32> to vector<8xf32>
    %273 = vector.shape_cast %272 : vector<8xf32> to vector<8x1xf32>
    %274 = arith.mulf %254, %159 : vector<8x16xf32>
    %cst_73 = arith.constant dense<0.000000e+00> : vector<8xf32>
    %275 = vector.multi_reduction <add>, %274, %cst_73 [1] : vector<8x16xf32> to vector<8xf32>
    %276 = vector.shape_cast %275 : vector<8xf32> to vector<8x1xf32>
    %277 = arith.mulf %254, %161 : vector<8x16xf32>
    %cst_74 = arith.constant dense<0.000000e+00> : vector<8xf32>
    %278 = vector.multi_reduction <add>, %277, %cst_74 [1] : vector<8x16xf32> to vector<8xf32>
    %279 = vector.shape_cast %278 : vector<8xf32> to vector<8x1xf32>
    %280 = arith.mulf %254, %163 : vector<8x16xf32>
    %cst_75 = arith.constant dense<0.000000e+00> : vector<8xf32>
    %281 = vector.multi_reduction <add>, %280, %cst_75 [1] : vector<8x16xf32> to vector<8xf32>
    %282 = vector.shape_cast %281 : vector<8xf32> to vector<8x1xf32>
    %283 = arith.mulf %254, %165 : vector<8x16xf32>
    %cst_76 = arith.constant dense<0.000000e+00> : vector<8xf32>
    %284 = vector.multi_reduction <add>, %283, %cst_76 [1] : vector<8x16xf32> to vector<8xf32>
    %285 = vector.shape_cast %284 : vector<8xf32> to vector<8x1xf32>
    %286 = arith.mulf %254, %167 : vector<8x16xf32>
    %cst_77 = arith.constant dense<0.000000e+00> : vector<8xf32>
    %287 = vector.multi_reduction <add>, %286, %cst_77 [1] : vector<8x16xf32> to vector<8xf32>
    %288 = vector.shape_cast %287 : vector<8xf32> to vector<8x1xf32>
    %289 = tpu.concatenate %267, %270, %273, %276, %279, %282, %285, %288 in 1 : vector<8x1xf32>, vector<8x1xf32>, vector<8x1xf32>, vector<8x1xf32>, vector<8x1xf32>, vector<8x1xf32>, vector<8x1xf32>, vector<8x1xf32> -> vector<8x8xf32>
    %290 = vector.extract_strided_slice %151 {offsets = [0, 0], sizes = [8, 1], strides = [1, 1]} : vector<8x3xf32> to vector<8x1xf32>
    %291 = vector.broadcast %290 : vector<8x1xf32> to vector<8x4xf32>
    %292 = arith.subf %262, %291 : vector<8x4xf32>
    %293 = vector.extract_strided_slice %151 {offsets = [0, 1], sizes = [8, 1], strides = [1, 1]} : vector<8x3xf32> to vector<8x1xf32>
    %294 = vector.broadcast %293 : vector<8x1xf32> to vector<8x4xf32>
    %295 = arith.subf %263, %294 : vector<8x4xf32>
    %296 = vector.extract_strided_slice %151 {offsets = [0, 2], sizes = [8, 1], strides = [1, 1]} : vector<8x3xf32> to vector<8x1xf32>
    %297 = vector.broadcast %296 : vector<8x1xf32> to vector<8x4xf32>
    %298 = arith.subf %264, %297 : vector<8x4xf32>
    %299 = vector.extract_strided_slice %150 {offsets = [0, 0], sizes = [8, 1], strides = [1, 1]} : vector<8x9xf32> to vector<8x1xf32>
    %300 = vector.broadcast %299 : vector<8x1xf32> to vector<8x4xf32>
    %301 = arith.mulf %300, %292 : vector<8x4xf32>
    %302 = vector.extract_strided_slice %150 {offsets = [0, 3], sizes = [8, 1], strides = [1, 1]} : vector<8x9xf32> to vector<8x1xf32>
    %303 = vector.broadcast %302 : vector<8x1xf32> to vector<8x4xf32>
    %304 = arith.mulf %303, %295 : vector<8x4xf32>
    %305 = arith.addf %301, %304 : vector<8x4xf32>
    %306 = vector.extract_strided_slice %150 {offsets = [0, 6], sizes = [8, 1], strides = [1, 1]} : vector<8x9xf32> to vector<8x1xf32>
    %307 = vector.broadcast %306 : vector<8x1xf32> to vector<8x4xf32>
    %308 = arith.mulf %307, %298 : vector<8x4xf32>
    %309 = arith.addf %305, %308 : vector<8x4xf32>
    %310 = vector.extract_strided_slice %150 {offsets = [0, 1], sizes = [8, 1], strides = [1, 1]} : vector<8x9xf32> to vector<8x1xf32>
    %311 = vector.broadcast %310 : vector<8x1xf32> to vector<8x4xf32>
    %312 = arith.mulf %311, %292 : vector<8x4xf32>
    %313 = vector.extract_strided_slice %150 {offsets = [0, 4], sizes = [8, 1], strides = [1, 1]} : vector<8x9xf32> to vector<8x1xf32>
    %314 = vector.broadcast %313 : vector<8x1xf32> to vector<8x4xf32>
    %315 = arith.mulf %314, %295 : vector<8x4xf32>
    %316 = arith.addf %312, %315 : vector<8x4xf32>
    %317 = vector.extract_strided_slice %150 {offsets = [0, 7], sizes = [8, 1], strides = [1, 1]} : vector<8x9xf32> to vector<8x1xf32>
    %318 = vector.broadcast %317 : vector<8x1xf32> to vector<8x4xf32>
    %319 = arith.mulf %318, %298 : vector<8x4xf32>
    %320 = arith.addf %316, %319 : vector<8x4xf32>
    %321 = vector.extract_strided_slice %150 {offsets = [0, 2], sizes = [8, 1], strides = [1, 1]} : vector<8x9xf32> to vector<8x1xf32>
    %322 = vector.broadcast %321 : vector<8x1xf32> to vector<8x4xf32>
    %323 = arith.mulf %322, %292 : vector<8x4xf32>
    %324 = vector.extract_strided_slice %150 {offsets = [0, 5], sizes = [8, 1], strides = [1, 1]} : vector<8x9xf32> to vector<8x1xf32>
    %325 = vector.broadcast %324 : vector<8x1xf32> to vector<8x4xf32>
    %326 = arith.mulf %325, %295 : vector<8x4xf32>
    %327 = arith.addf %323, %326 : vector<8x4xf32>
    %328 = vector.extract_strided_slice %150 {offsets = [0, 8], sizes = [8, 1], strides = [1, 1]} : vector<8x9xf32> to vector<8x1xf32>
    %329 = vector.broadcast %328 : vector<8x1xf32> to vector<8x4xf32>
    %330 = arith.mulf %329, %298 : vector<8x4xf32>
    %331 = arith.addf %327, %330 : vector<8x4xf32>
    %332 = arith.mulf %309, %309 : vector<8x4xf32>
    %333 = arith.mulf %320, %320 : vector<8x4xf32>
    %334 = arith.addf %332, %333 : vector<8x4xf32>
    %335 = arith.mulf %331, %331 : vector<8x4xf32>
    %336 = arith.addf %334, %335 : vector<8x4xf32>
    %337 = math.sqrt %336 : vector<8x4xf32>
    %338 = tpu.concatenate %289, %261, %309, %320, %331, %337 in 1 : vector<8x8xf32>, vector<8x8xf32>, vector<8x4xf32>, vector<8x4xf32>, vector<8x4xf32>, vector<8x4xf32> -> vector<8x32xf32>
    %c1_78 = arith.constant 1 : index
    %339 = memref.load %arg12[%c1_78] : memref<4xf32, #tpu.memory_space<smem>>
    %340 = vector.extract_strided_slice %6 {offsets = [0, 8], sizes = [8, 8], strides = [1, 1]} : vector<16x32xf32> to vector<8x8xf32>
    %cst_79 = arith.constant 0.204124153 : f32
    %341 = vector.broadcast %cst_79 : f32 to vector<8x8xf32>
    %342 = arith.mulf %340, %341 : vector<8x8xf32>
    %343 = vector.extract_strided_slice %10 {offsets = [0, 8], sizes = [16, 8], strides = [1, 1]} : vector<32x32xf32> to vector<16x8xf32>
    %344 = vector.extract_strided_slice %35 {offsets = [0, 4], sizes = [8, 4], strides = [1, 1]} : vector<16x16xf32> to vector<8x4xf32>
    %345 = vector.broadcast %339 : f32 to vector<8x4xf32>
    %346 = arith.mulf %344, %345 : vector<8x4xf32>
    %347 = vector.extract_strided_slice %49 {offsets = [0, 4], sizes = [8, 4], strides = [1, 1]} : vector<16x16xf32> to vector<8x4xf32>
    %348 = vector.broadcast %339 : f32 to vector<8x4xf32>
    %349 = arith.mulf %347, %348 : vector<8x4xf32>
    %350 = vector.extract_strided_slice %63 {offsets = [0, 4], sizes = [8, 4], strides = [1, 1]} : vector<16x16xf32> to vector<8x4xf32>
    %351 = vector.broadcast %339 : f32 to vector<8x4xf32>
    %352 = arith.mulf %350, %351 : vector<8x4xf32>
    %353 = vector.extract_strided_slice %77 {offsets = [0, 4], sizes = [16, 4], strides = [1, 1]} : vector<32x16xf32> to vector<16x4xf32>
    %354 = vector.broadcast %339 : f32 to vector<16x4xf32>
    %355 = arith.mulf %353, %354 : vector<16x4xf32>
    %356 = vector.extract_strided_slice %91 {offsets = [0, 4], sizes = [16, 4], strides = [1, 1]} : vector<32x16xf32> to vector<16x4xf32>
    %357 = vector.broadcast %339 : f32 to vector<16x4xf32>
    %358 = arith.mulf %356, %357 : vector<16x4xf32>
    %359 = vector.extract_strided_slice %105 {offsets = [0, 4], sizes = [16, 4], strides = [1, 1]} : vector<32x16xf32> to vector<16x4xf32>
    %360 = vector.broadcast %339 : f32 to vector<16x4xf32>
    %361 = arith.mulf %359, %360 : vector<16x4xf32>
    %362 = arith.mulf %346, %346 : vector<8x4xf32>
    %363 = arith.mulf %349, %349 : vector<8x4xf32>
    %364 = arith.addf %362, %363 : vector<8x4xf32>
    %365 = arith.mulf %352, %352 : vector<8x4xf32>
    %366 = arith.addf %364, %365 : vector<8x4xf32>
    %cst_80 = arith.constant dense<0.000000e+00> : vector<8xf32>
    %367 = vector.multi_reduction <add>, %366, %cst_80 [1] : vector<8x4xf32> to vector<8xf32>
    %368 = vector.shape_cast %367 : vector<8xf32> to vector<8x1xf32>
    %cst_81 = arith.constant 5.000000e-01 : f32
    %369 = vector.broadcast %cst_81 : f32 to vector<8x1xf32>
    %370 = arith.mulf %369, %368 : vector<8x1xf32>
    %371 = arith.mulf %355, %355 : vector<16x4xf32>
    %372 = arith.mulf %358, %358 : vector<16x4xf32>
    %373 = arith.addf %371, %372 : vector<16x4xf32>
    %374 = arith.mulf %361, %361 : vector<16x4xf32>
    %375 = arith.addf %373, %374 : vector<16x4xf32>
    %cst_82 = arith.constant dense<0.000000e+00> : vector<16xf32>
    %376 = vector.multi_reduction <add>, %375, %cst_82 [1] : vector<16x4xf32> to vector<16xf32>
    %377 = vector.shape_cast %376 : vector<16xf32> to vector<16x1xf32>
    %cst_83 = arith.constant 5.000000e-01 : f32
    %378 = vector.broadcast %cst_83 : f32 to vector<16x1xf32>
    %379 = arith.mulf %378, %377 : vector<16x1xf32>
    %cst_84 = arith.constant 0.000000e+00 : f32
    %380 = vector.broadcast %cst_84 : f32 to vector<8x1xf32>
    %381 = arith.subf %380, %370 : vector<8x1xf32>
    %382 = tpu.concatenate %342, %346, %349, %352, %381, %149 in 1 : vector<8x8xf32>, vector<8x4xf32>, vector<8x4xf32>, vector<8x4xf32>, vector<8x1xf32>, vector<8x1xf32> -> vector<8x22xf32>
    %383 = tpu.concatenate %343, %355, %358, %361, %148, %379 in 1 : vector<16x8xf32>, vector<16x4xf32>, vector<16x4xf32>, vector<16x4xf32>, vector<16x1xf32>, vector<16x1xf32> -> vector<16x22xf32>
    %cst_85 = arith.constant dense<0.000000e+00> : vector<8x16xf32>
    %384 = tpu.matmul %382, %383, %cst_85 {dimension_numbers = #tpu.dot_dimension_numbers<[1], [1], [0], [0], [0, 0, 1, 0], [], []>, precision = #tpu.contract_precision<fp32>} : vector<8x22xf32>, vector<16x22xf32>, vector<8x16xf32> -> vector<8x16xf32>
    %c1_86 = arith.constant 1 : index
    %c0_87 = arith.constant 0 : index
    %385 = memref.load %arg11[%c1_86, %c0_87] : memref<4x8xf32, #tpu.memory_space<smem>>
    %386 = vector.broadcast %385 : f32 to vector<8x16xf32>
    %387 = arith.mulf %386, %153 : vector<8x16xf32>
    %c1_88 = arith.constant 1 : index
    %c1_89 = arith.constant 1 : index
    %388 = memref.load %arg11[%c1_88, %c1_89] : memref<4x8xf32, #tpu.memory_space<smem>>
    %389 = vector.broadcast %388 : f32 to vector<8x16xf32>
    %390 = arith.mulf %389, %155 : vector<8x16xf32>
    %391 = arith.addf %387, %390 : vector<8x16xf32>
    %c1_90 = arith.constant 1 : index
    %c2_91 = arith.constant 2 : index
    %392 = memref.load %arg11[%c1_90, %c2_91] : memref<4x8xf32, #tpu.memory_space<smem>>
    %393 = vector.broadcast %392 : f32 to vector<8x16xf32>
    %394 = arith.mulf %393, %157 : vector<8x16xf32>
    %395 = arith.addf %391, %394 : vector<8x16xf32>
    %c1_92 = arith.constant 1 : index
    %c3_93 = arith.constant 3 : index
    %396 = memref.load %arg11[%c1_92, %c3_93] : memref<4x8xf32, #tpu.memory_space<smem>>
    %397 = vector.broadcast %396 : f32 to vector<8x16xf32>
    %398 = arith.mulf %397, %159 : vector<8x16xf32>
    %399 = arith.addf %395, %398 : vector<8x16xf32>
    %c1_94 = arith.constant 1 : index
    %c4_95 = arith.constant 4 : index
    %400 = memref.load %arg11[%c1_94, %c4_95] : memref<4x8xf32, #tpu.memory_space<smem>>
    %401 = vector.broadcast %400 : f32 to vector<8x16xf32>
    %402 = arith.mulf %401, %161 : vector<8x16xf32>
    %403 = arith.addf %399, %402 : vector<8x16xf32>
    %c1_96 = arith.constant 1 : index
    %c5_97 = arith.constant 5 : index
    %404 = memref.load %arg11[%c1_96, %c5_97] : memref<4x8xf32, #tpu.memory_space<smem>>
    %405 = vector.broadcast %404 : f32 to vector<8x16xf32>
    %406 = arith.mulf %405, %163 : vector<8x16xf32>
    %407 = arith.addf %403, %406 : vector<8x16xf32>
    %c1_98 = arith.constant 1 : index
    %c6_99 = arith.constant 6 : index
    %408 = memref.load %arg11[%c1_98, %c6_99] : memref<4x8xf32, #tpu.memory_space<smem>>
    %409 = vector.broadcast %408 : f32 to vector<8x16xf32>
    %410 = arith.mulf %409, %165 : vector<8x16xf32>
    %411 = arith.addf %407, %410 : vector<8x16xf32>
    %c1_100 = arith.constant 1 : index
    %c7_101 = arith.constant 7 : index
    %412 = memref.load %arg11[%c1_100, %c7_101] : memref<4x8xf32, #tpu.memory_space<smem>>
    %413 = vector.broadcast %412 : f32 to vector<8x16xf32>
    %414 = arith.mulf %413, %167 : vector<8x16xf32>
    %415 = arith.addf %411, %414 : vector<8x16xf32>
    %416 = arith.addf %384, %415 : vector<8x16xf32>
    %cst_102 = arith.constant dense<0xFF800000> : vector<8xf32>
    %417 = vector.multi_reduction <maximumf>, %416, %cst_102 [1] : vector<8x16xf32> to vector<8xf32>
    %418 = vector.shape_cast %417 : vector<8xf32> to vector<8x1xf32>
    %419 = vector.broadcast %418 : vector<8x1xf32> to vector<8x16xf32>
    %420 = arith.subf %416, %419 : vector<8x16xf32>
    %421 = math.exp %420 : vector<8x16xf32>
    %cst_103 = arith.constant dense<0.000000e+00> : vector<8xf32>
    %422 = vector.multi_reduction <add>, %421, %cst_103 [1] : vector<8x16xf32> to vector<8xf32>
    %423 = vector.shape_cast %422 : vector<8xf32> to vector<8x1xf32>
    %424 = vector.broadcast %423 : vector<8x1xf32> to vector<8x16xf32>
    %425 = arith.divf %421, %424 : vector<8x16xf32>
    %426 = vector.extract_strided_slice %11 {offsets = [0, 8], sizes = [16, 8], strides = [1, 1]} : vector<32x32xf32> to vector<16x8xf32>
    %427 = vector.extract_strided_slice %119 {offsets = [0, 4], sizes = [16, 4], strides = [1, 1]} : vector<32x16xf32> to vector<16x4xf32>
    %428 = vector.extract_strided_slice %133 {offsets = [0, 4], sizes = [16, 4], strides = [1, 1]} : vector<32x16xf32> to vector<16x4xf32>
    %429 = vector.extract_strided_slice %147 {offsets = [0, 4], sizes = [16, 4], strides = [1, 1]} : vector<32x16xf32> to vector<16x4xf32>
    %430 = tpu.concatenate %426, %427, %428, %429 in 1 : vector<16x8xf32>, vector<16x4xf32>, vector<16x4xf32>, vector<16x4xf32> -> vector<16x20xf32>
    %cst_104 = arith.constant dense<0.000000e+00> : vector<8x20xf32>
    %431 = tpu.matmul %425, %430, %cst_104 {dimension_numbers = #tpu.dot_dimension_numbers<[1], [0], [0], [1], [0, 0, 1, 1], [], []>, precision = #tpu.contract_precision<fp32>} : vector<8x16xf32>, vector<16x20xf32>, vector<8x20xf32> -> vector<8x20xf32>
    %432 = vector.extract_strided_slice %431 {offsets = [0, 0], sizes = [8, 8], strides = [1, 1]} : vector<8x20xf32> to vector<8x8xf32>
    %433 = vector.extract_strided_slice %431 {offsets = [0, 8], sizes = [8, 4], strides = [1, 1]} : vector<8x20xf32> to vector<8x4xf32>
    %434 = vector.extract_strided_slice %431 {offsets = [0, 12], sizes = [8, 4], strides = [1, 1]} : vector<8x20xf32> to vector<8x4xf32>
    %435 = vector.extract_strided_slice %431 {offsets = [0, 16], sizes = [8, 4], strides = [1, 1]} : vector<8x20xf32> to vector<8x4xf32>
    %436 = arith.mulf %425, %153 : vector<8x16xf32>
    %cst_105 = arith.constant dense<0.000000e+00> : vector<8xf32>
    %437 = vector.multi_reduction <add>, %436, %cst_105 [1] : vector<8x16xf32> to vector<8xf32>
    %438 = vector.shape_cast %437 : vector<8xf32> to vector<8x1xf32>
    %439 = arith.mulf %425, %155 : vector<8x16xf32>
    %cst_106 = arith.constant dense<0.000000e+00> : vector<8xf32>
    %440 = vector.multi_reduction <add>, %439, %cst_106 [1] : vector<8x16xf32> to vector<8xf32>
    %441 = vector.shape_cast %440 : vector<8xf32> to vector<8x1xf32>
    %442 = arith.mulf %425, %157 : vector<8x16xf32>
    %cst_107 = arith.constant dense<0.000000e+00> : vector<8xf32>
    %443 = vector.multi_reduction <add>, %442, %cst_107 [1] : vector<8x16xf32> to vector<8xf32>
    %444 = vector.shape_cast %443 : vector<8xf32> to vector<8x1xf32>
    %445 = arith.mulf %425, %159 : vector<8x16xf32>
    %cst_108 = arith.constant dense<0.000000e+00> : vector<8xf32>
    %446 = vector.multi_reduction <add>, %445, %cst_108 [1] : vector<8x16xf32> to vector<8xf32>
    %447 = vector.shape_cast %446 : vector<8xf32> to vector<8x1xf32>
    %448 = arith.mulf %425, %161 : vector<8x16xf32>
    %cst_109 = arith.constant dense<0.000000e+00> : vector<8xf32>
    %449 = vector.multi_reduction <add>, %448, %cst_109 [1] : vector<8x16xf32> to vector<8xf32>
    %450 = vector.shape_cast %449 : vector<8xf32> to vector<8x1xf32>
    %451 = arith.mulf %425, %163 : vector<8x16xf32>
    %cst_110 = arith.constant dense<0.000000e+00> : vector<8xf32>
    %452 = vector.multi_reduction <add>, %451, %cst_110 [1] : vector<8x16xf32> to vector<8xf32>
    %453 = vector.shape_cast %452 : vector<8xf32> to vector<8x1xf32>
    %454 = arith.mulf %425, %165 : vector<8x16xf32>
    %cst_111 = arith.constant dense<0.000000e+00> : vector<8xf32>
    %455 = vector.multi_reduction <add>, %454, %cst_111 [1] : vector<8x16xf32> to vector<8xf32>
    %456 = vector.shape_cast %455 : vector<8xf32> to vector<8x1xf32>
    %457 = arith.mulf %425, %167 : vector<8x16xf32>
    %cst_112 = arith.constant dense<0.000000e+00> : vector<8xf32>
    %458 = vector.multi_reduction <add>, %457, %cst_112 [1] : vector<8x16xf32> to vector<8xf32>
    %459 = vector.shape_cast %458 : vector<8xf32> to vector<8x1xf32>
    %460 = tpu.concatenate %438, %441, %444, %447, %450, %453, %456, %459 in 1 : vector<8x1xf32>, vector<8x1xf32>, vector<8x1xf32>, vector<8x1xf32>, vector<8x1xf32>, vector<8x1xf32>, vector<8x1xf32>, vector<8x1xf32> -> vector<8x8xf32>
    %461 = vector.extract_strided_slice %151 {offsets = [0, 0], sizes = [8, 1], strides = [1, 1]} : vector<8x3xf32> to vector<8x1xf32>
    %462 = vector.broadcast %461 : vector<8x1xf32> to vector<8x4xf32>
    %463 = arith.subf %433, %462 : vector<8x4xf32>
    %464 = vector.extract_strided_slice %151 {offsets = [0, 1], sizes = [8, 1], strides = [1, 1]} : vector<8x3xf32> to vector<8x1xf32>
    %465 = vector.broadcast %464 : vector<8x1xf32> to vector<8x4xf32>
    %466 = arith.subf %434, %465 : vector<8x4xf32>
    %467 = vector.extract_strided_slice %151 {offsets = [0, 2], sizes = [8, 1], strides = [1, 1]} : vector<8x3xf32> to vector<8x1xf32>
    %468 = vector.broadcast %467 : vector<8x1xf32> to vector<8x4xf32>
    %469 = arith.subf %435, %468 : vector<8x4xf32>
    %470 = vector.extract_strided_slice %150 {offsets = [0, 0], sizes = [8, 1], strides = [1, 1]} : vector<8x9xf32> to vector<8x1xf32>
    %471 = vector.broadcast %470 : vector<8x1xf32> to vector<8x4xf32>
    %472 = arith.mulf %471, %463 : vector<8x4xf32>
    %473 = vector.extract_strided_slice %150 {offsets = [0, 3], sizes = [8, 1], strides = [1, 1]} : vector<8x9xf32> to vector<8x1xf32>
    %474 = vector.broadcast %473 : vector<8x1xf32> to vector<8x4xf32>
    %475 = arith.mulf %474, %466 : vector<8x4xf32>
    %476 = arith.addf %472, %475 : vector<8x4xf32>
    %477 = vector.extract_strided_slice %150 {offsets = [0, 6], sizes = [8, 1], strides = [1, 1]} : vector<8x9xf32> to vector<8x1xf32>
    %478 = vector.broadcast %477 : vector<8x1xf32> to vector<8x4xf32>
    %479 = arith.mulf %478, %469 : vector<8x4xf32>
    %480 = arith.addf %476, %479 : vector<8x4xf32>
    %481 = vector.extract_strided_slice %150 {offsets = [0, 1], sizes = [8, 1], strides = [1, 1]} : vector<8x9xf32> to vector<8x1xf32>
    %482 = vector.broadcast %481 : vector<8x1xf32> to vector<8x4xf32>
    %483 = arith.mulf %482, %463 : vector<8x4xf32>
    %484 = vector.extract_strided_slice %150 {offsets = [0, 4], sizes = [8, 1], strides = [1, 1]} : vector<8x9xf32> to vector<8x1xf32>
    %485 = vector.broadcast %484 : vector<8x1xf32> to vector<8x4xf32>
    %486 = arith.mulf %485, %466 : vector<8x4xf32>
    %487 = arith.addf %483, %486 : vector<8x4xf32>
    %488 = vector.extract_strided_slice %150 {offsets = [0, 7], sizes = [8, 1], strides = [1, 1]} : vector<8x9xf32> to vector<8x1xf32>
    %489 = vector.broadcast %488 : vector<8x1xf32> to vector<8x4xf32>
    %490 = arith.mulf %489, %469 : vector<8x4xf32>
    %491 = arith.addf %487, %490 : vector<8x4xf32>
    %492 = vector.extract_strided_slice %150 {offsets = [0, 2], sizes = [8, 1], strides = [1, 1]} : vector<8x9xf32> to vector<8x1xf32>
    %493 = vector.broadcast %492 : vector<8x1xf32> to vector<8x4xf32>
    %494 = arith.mulf %493, %463 : vector<8x4xf32>
    %495 = vector.extract_strided_slice %150 {offsets = [0, 5], sizes = [8, 1], strides = [1, 1]} : vector<8x9xf32> to vector<8x1xf32>
    %496 = vector.broadcast %495 : vector<8x1xf32> to vector<8x4xf32>
    %497 = arith.mulf %496, %466 : vector<8x4xf32>
    %498 = arith.addf %494, %497 : vector<8x4xf32>
    %499 = vector.extract_strided_slice %150 {offsets = [0, 8], sizes = [8, 1], strides = [1, 1]} : vector<8x9xf32> to vector<8x1xf32>
    %500 = vector.broadcast %499 : vector<8x1xf32> to vector<8x4xf32>
    %501 = arith.mulf %500, %469 : vector<8x4xf32>
    %502 = arith.addf %498, %501 : vector<8x4xf32>
    %503 = arith.mulf %480, %480 : vector<8x4xf32>
    %504 = arith.mulf %491, %491 : vector<8x4xf32>
    %505 = arith.addf %503, %504 : vector<8x4xf32>
    %506 = arith.mulf %502, %502 : vector<8x4xf32>
    %507 = arith.addf %505, %506 : vector<8x4xf32>
    %508 = math.sqrt %507 : vector<8x4xf32>
    %509 = tpu.concatenate %460, %432, %480, %491, %502, %508 in 1 : vector<8x8xf32>, vector<8x8xf32>, vector<8x4xf32>, vector<8x4xf32>, vector<8x4xf32>, vector<8x4xf32> -> vector<8x32xf32>
    %c2_113 = arith.constant 2 : index
    %510 = memref.load %arg12[%c2_113] : memref<4xf32, #tpu.memory_space<smem>>
    %511 = vector.extract_strided_slice %6 {offsets = [0, 16], sizes = [8, 8], strides = [1, 1]} : vector<16x32xf32> to vector<8x8xf32>
    %cst_114 = arith.constant 0.204124153 : f32
    %512 = vector.broadcast %cst_114 : f32 to vector<8x8xf32>
    %513 = arith.mulf %511, %512 : vector<8x8xf32>
    %514 = vector.extract_strided_slice %10 {offsets = [0, 16], sizes = [16, 8], strides = [1, 1]} : vector<32x32xf32> to vector<16x8xf32>
    %515 = vector.extract_strided_slice %35 {offsets = [0, 8], sizes = [8, 4], strides = [1, 1]} : vector<16x16xf32> to vector<8x4xf32>
    %516 = vector.broadcast %510 : f32 to vector<8x4xf32>
    %517 = arith.mulf %515, %516 : vector<8x4xf32>
    %518 = vector.extract_strided_slice %49 {offsets = [0, 8], sizes = [8, 4], strides = [1, 1]} : vector<16x16xf32> to vector<8x4xf32>
    %519 = vector.broadcast %510 : f32 to vector<8x4xf32>
    %520 = arith.mulf %518, %519 : vector<8x4xf32>
    %521 = vector.extract_strided_slice %63 {offsets = [0, 8], sizes = [8, 4], strides = [1, 1]} : vector<16x16xf32> to vector<8x4xf32>
    %522 = vector.broadcast %510 : f32 to vector<8x4xf32>
    %523 = arith.mulf %521, %522 : vector<8x4xf32>
    %524 = vector.extract_strided_slice %77 {offsets = [0, 8], sizes = [16, 4], strides = [1, 1]} : vector<32x16xf32> to vector<16x4xf32>
    %525 = vector.broadcast %510 : f32 to vector<16x4xf32>
    %526 = arith.mulf %524, %525 : vector<16x4xf32>
    %527 = vector.extract_strided_slice %91 {offsets = [0, 8], sizes = [16, 4], strides = [1, 1]} : vector<32x16xf32> to vector<16x4xf32>
    %528 = vector.broadcast %510 : f32 to vector<16x4xf32>
    %529 = arith.mulf %527, %528 : vector<16x4xf32>
    %530 = vector.extract_strided_slice %105 {offsets = [0, 8], sizes = [16, 4], strides = [1, 1]} : vector<32x16xf32> to vector<16x4xf32>
    %531 = vector.broadcast %510 : f32 to vector<16x4xf32>
    %532 = arith.mulf %530, %531 : vector<16x4xf32>
    %533 = arith.mulf %517, %517 : vector<8x4xf32>
    %534 = arith.mulf %520, %520 : vector<8x4xf32>
    %535 = arith.addf %533, %534 : vector<8x4xf32>
    %536 = arith.mulf %523, %523 : vector<8x4xf32>
    %537 = arith.addf %535, %536 : vector<8x4xf32>
    %cst_115 = arith.constant dense<0.000000e+00> : vector<8xf32>
    %538 = vector.multi_reduction <add>, %537, %cst_115 [1] : vector<8x4xf32> to vector<8xf32>
    %539 = vector.shape_cast %538 : vector<8xf32> to vector<8x1xf32>
    %cst_116 = arith.constant 5.000000e-01 : f32
    %540 = vector.broadcast %cst_116 : f32 to vector<8x1xf32>
    %541 = arith.mulf %540, %539 : vector<8x1xf32>
    %542 = arith.mulf %526, %526 : vector<16x4xf32>
    %543 = arith.mulf %529, %529 : vector<16x4xf32>
    %544 = arith.addf %542, %543 : vector<16x4xf32>
    %545 = arith.mulf %532, %532 : vector<16x4xf32>
    %546 = arith.addf %544, %545 : vector<16x4xf32>
    %cst_117 = arith.constant dense<0.000000e+00> : vector<16xf32>
    %547 = vector.multi_reduction <add>, %546, %cst_117 [1] : vector<16x4xf32> to vector<16xf32>
    %548 = vector.shape_cast %547 : vector<16xf32> to vector<16x1xf32>
    %cst_118 = arith.constant 5.000000e-01 : f32
    %549 = vector.broadcast %cst_118 : f32 to vector<16x1xf32>
    %550 = arith.mulf %549, %548 : vector<16x1xf32>
    %cst_119 = arith.constant 0.000000e+00 : f32
    %551 = vector.broadcast %cst_119 : f32 to vector<8x1xf32>
    %552 = arith.subf %551, %541 : vector<8x1xf32>
    %553 = tpu.concatenate %513, %517, %520, %523, %552, %149 in 1 : vector<8x8xf32>, vector<8x4xf32>, vector<8x4xf32>, vector<8x4xf32>, vector<8x1xf32>, vector<8x1xf32> -> vector<8x22xf32>
    %554 = tpu.concatenate %514, %526, %529, %532, %148, %550 in 1 : vector<16x8xf32>, vector<16x4xf32>, vector<16x4xf32>, vector<16x4xf32>, vector<16x1xf32>, vector<16x1xf32> -> vector<16x22xf32>
    %cst_120 = arith.constant dense<0.000000e+00> : vector<8x16xf32>
    %555 = tpu.matmul %553, %554, %cst_120 {dimension_numbers = #tpu.dot_dimension_numbers<[1], [1], [0], [0], [0, 0, 1, 0], [], []>, precision = #tpu.contract_precision<fp32>} : vector<8x22xf32>, vector<16x22xf32>, vector<8x16xf32> -> vector<8x16xf32>
    %c2_121 = arith.constant 2 : index
    %c0_122 = arith.constant 0 : index
    %556 = memref.load %arg11[%c2_121, %c0_122] : memref<4x8xf32, #tpu.memory_space<smem>>
    %557 = vector.broadcast %556 : f32 to vector<8x16xf32>
    %558 = arith.mulf %557, %153 : vector<8x16xf32>
    %c2_123 = arith.constant 2 : index
    %c1_124 = arith.constant 1 : index
    %559 = memref.load %arg11[%c2_123, %c1_124] : memref<4x8xf32, #tpu.memory_space<smem>>
    %560 = vector.broadcast %559 : f32 to vector<8x16xf32>
    %561 = arith.mulf %560, %155 : vector<8x16xf32>
    %562 = arith.addf %558, %561 : vector<8x16xf32>
    %c2_125 = arith.constant 2 : index
    %c2_126 = arith.constant 2 : index
    %563 = memref.load %arg11[%c2_125, %c2_126] : memref<4x8xf32, #tpu.memory_space<smem>>
    %564 = vector.broadcast %563 : f32 to vector<8x16xf32>
    %565 = arith.mulf %564, %157 : vector<8x16xf32>
    %566 = arith.addf %562, %565 : vector<8x16xf32>
    %c2_127 = arith.constant 2 : index
    %c3_128 = arith.constant 3 : index
    %567 = memref.load %arg11[%c2_127, %c3_128] : memref<4x8xf32, #tpu.memory_space<smem>>
    %568 = vector.broadcast %567 : f32 to vector<8x16xf32>
    %569 = arith.mulf %568, %159 : vector<8x16xf32>
    %570 = arith.addf %566, %569 : vector<8x16xf32>
    %c2_129 = arith.constant 2 : index
    %c4_130 = arith.constant 4 : index
    %571 = memref.load %arg11[%c2_129, %c4_130] : memref<4x8xf32, #tpu.memory_space<smem>>
    %572 = vector.broadcast %571 : f32 to vector<8x16xf32>
    %573 = arith.mulf %572, %161 : vector<8x16xf32>
    %574 = arith.addf %570, %573 : vector<8x16xf32>
    %c2_131 = arith.constant 2 : index
    %c5_132 = arith.constant 5 : index
    %575 = memref.load %arg11[%c2_131, %c5_132] : memref<4x8xf32, #tpu.memory_space<smem>>
    %576 = vector.broadcast %575 : f32 to vector<8x16xf32>
    %577 = arith.mulf %576, %163 : vector<8x16xf32>
    %578 = arith.addf %574, %577 : vector<8x16xf32>
    %c2_133 = arith.constant 2 : index
    %c6_134 = arith.constant 6 : index
    %579 = memref.load %arg11[%c2_133, %c6_134] : memref<4x8xf32, #tpu.memory_space<smem>>
    %580 = vector.broadcast %579 : f32 to vector<8x16xf32>
    %581 = arith.mulf %580, %165 : vector<8x16xf32>
    %582 = arith.addf %578, %581 : vector<8x16xf32>
    %c2_135 = arith.constant 2 : index
    %c7_136 = arith.constant 7 : index
    %583 = memref.load %arg11[%c2_135, %c7_136] : memref<4x8xf32, #tpu.memory_space<smem>>
    %584 = vector.broadcast %583 : f32 to vector<8x16xf32>
    %585 = arith.mulf %584, %167 : vector<8x16xf32>
    %586 = arith.addf %582, %585 : vector<8x16xf32>
    %587 = arith.addf %555, %586 : vector<8x16xf32>
    %cst_137 = arith.constant dense<0xFF800000> : vector<8xf32>
    %588 = vector.multi_reduction <maximumf>, %587, %cst_137 [1] : vector<8x16xf32> to vector<8xf32>
    %589 = vector.shape_cast %588 : vector<8xf32> to vector<8x1xf32>
    %590 = vector.broadcast %589 : vector<8x1xf32> to vector<8x16xf32>
    %591 = arith.subf %587, %590 : vector<8x16xf32>
    %592 = math.exp %591 : vector<8x16xf32>
    %cst_138 = arith.constant dense<0.000000e+00> : vector<8xf32>
    %593 = vector.multi_reduction <add>, %592, %cst_138 [1] : vector<8x16xf32> to vector<8xf32>
    %594 = vector.shape_cast %593 : vector<8xf32> to vector<8x1xf32>
    %595 = vector.broadcast %594 : vector<8x1xf32> to vector<8x16xf32>
    %596 = arith.divf %592, %595 : vector<8x16xf32>
    %597 = vector.extract_strided_slice %11 {offsets = [0, 16], sizes = [16, 8], strides = [1, 1]} : vector<32x32xf32> to vector<16x8xf32>
    %598 = vector.extract_strided_slice %119 {offsets = [0, 8], sizes = [16, 4], strides = [1, 1]} : vector<32x16xf32> to vector<16x4xf32>
    %599 = vector.extract_strided_slice %133 {offsets = [0, 8], sizes = [16, 4], strides = [1, 1]} : vector<32x16xf32> to vector<16x4xf32>
    %600 = vector.extract_strided_slice %147 {offsets = [0, 8], sizes = [16, 4], strides = [1, 1]} : vector<32x16xf32> to vector<16x4xf32>
    %601 = tpu.concatenate %597, %598, %599, %600 in 1 : vector<16x8xf32>, vector<16x4xf32>, vector<16x4xf32>, vector<16x4xf32> -> vector<16x20xf32>
    %cst_139 = arith.constant dense<0.000000e+00> : vector<8x20xf32>
    %602 = tpu.matmul %596, %601, %cst_139 {dimension_numbers = #tpu.dot_dimension_numbers<[1], [0], [0], [1], [0, 0, 1, 1], [], []>, precision = #tpu.contract_precision<fp32>} : vector<8x16xf32>, vector<16x20xf32>, vector<8x20xf32> -> vector<8x20xf32>
    %603 = vector.extract_strided_slice %602 {offsets = [0, 0], sizes = [8, 8], strides = [1, 1]} : vector<8x20xf32> to vector<8x8xf32>
    %604 = vector.extract_strided_slice %602 {offsets = [0, 8], sizes = [8, 4], strides = [1, 1]} : vector<8x20xf32> to vector<8x4xf32>
    %605 = vector.extract_strided_slice %602 {offsets = [0, 12], sizes = [8, 4], strides = [1, 1]} : vector<8x20xf32> to vector<8x4xf32>
    %606 = vector.extract_strided_slice %602 {offsets = [0, 16], sizes = [8, 4], strides = [1, 1]} : vector<8x20xf32> to vector<8x4xf32>
    %607 = arith.mulf %596, %153 : vector<8x16xf32>
    %cst_140 = arith.constant dense<0.000000e+00> : vector<8xf32>
    %608 = vector.multi_reduction <add>, %607, %cst_140 [1] : vector<8x16xf32> to vector<8xf32>
    %609 = vector.shape_cast %608 : vector<8xf32> to vector<8x1xf32>
    %610 = arith.mulf %596, %155 : vector<8x16xf32>
    %cst_141 = arith.constant dense<0.000000e+00> : vector<8xf32>
    %611 = vector.multi_reduction <add>, %610, %cst_141 [1] : vector<8x16xf32> to vector<8xf32>
    %612 = vector.shape_cast %611 : vector<8xf32> to vector<8x1xf32>
    %613 = arith.mulf %596, %157 : vector<8x16xf32>
    %cst_142 = arith.constant dense<0.000000e+00> : vector<8xf32>
    %614 = vector.multi_reduction <add>, %613, %cst_142 [1] : vector<8x16xf32> to vector<8xf32>
    %615 = vector.shape_cast %614 : vector<8xf32> to vector<8x1xf32>
    %616 = arith.mulf %596, %159 : vector<8x16xf32>
    %cst_143 = arith.constant dense<0.000000e+00> : vector<8xf32>
    %617 = vector.multi_reduction <add>, %616, %cst_143 [1] : vector<8x16xf32> to vector<8xf32>
    %618 = vector.shape_cast %617 : vector<8xf32> to vector<8x1xf32>
    %619 = arith.mulf %596, %161 : vector<8x16xf32>
    %cst_144 = arith.constant dense<0.000000e+00> : vector<8xf32>
    %620 = vector.multi_reduction <add>, %619, %cst_144 [1] : vector<8x16xf32> to vector<8xf32>
    %621 = vector.shape_cast %620 : vector<8xf32> to vector<8x1xf32>
    %622 = arith.mulf %596, %163 : vector<8x16xf32>
    %cst_145 = arith.constant dense<0.000000e+00> : vector<8xf32>
    %623 = vector.multi_reduction <add>, %622, %cst_145 [1] : vector<8x16xf32> to vector<8xf32>
    %624 = vector.shape_cast %623 : vector<8xf32> to vector<8x1xf32>
    %625 = arith.mulf %596, %165 : vector<8x16xf32>
    %cst_146 = arith.constant dense<0.000000e+00> : vector<8xf32>
    %626 = vector.multi_reduction <add>, %625, %cst_146 [1] : vector<8x16xf32> to vector<8xf32>
    %627 = vector.shape_cast %626 : vector<8xf32> to vector<8x1xf32>
    %628 = arith.mulf %596, %167 : vector<8x16xf32>
    %cst_147 = arith.constant dense<0.000000e+00> : vector<8xf32>
    %629 = vector.multi_reduction <add>, %628, %cst_147 [1] : vector<8x16xf32> to vector<8xf32>
    %630 = vector.shape_cast %629 : vector<8xf32> to vector<8x1xf32>
    %631 = tpu.concatenate %609, %612, %615, %618, %621, %624, %627, %630 in 1 : vector<8x1xf32>, vector<8x1xf32>, vector<8x1xf32>, vector<8x1xf32>, vector<8x1xf32>, vector<8x1xf32>, vector<8x1xf32>, vector<8x1xf32> -> vector<8x8xf32>
    %632 = vector.extract_strided_slice %151 {offsets = [0, 0], sizes = [8, 1], strides = [1, 1]} : vector<8x3xf32> to vector<8x1xf32>
    %633 = vector.broadcast %632 : vector<8x1xf32> to vector<8x4xf32>
    %634 = arith.subf %604, %633 : vector<8x4xf32>
    %635 = vector.extract_strided_slice %151 {offsets = [0, 1], sizes = [8, 1], strides = [1, 1]} : vector<8x3xf32> to vector<8x1xf32>
    %636 = vector.broadcast %635 : vector<8x1xf32> to vector<8x4xf32>
    %637 = arith.subf %605, %636 : vector<8x4xf32>
    %638 = vector.extract_strided_slice %151 {offsets = [0, 2], sizes = [8, 1], strides = [1, 1]} : vector<8x3xf32> to vector<8x1xf32>
    %639 = vector.broadcast %638 : vector<8x1xf32> to vector<8x4xf32>
    %640 = arith.subf %606, %639 : vector<8x4xf32>
    %641 = vector.extract_strided_slice %150 {offsets = [0, 0], sizes = [8, 1], strides = [1, 1]} : vector<8x9xf32> to vector<8x1xf32>
    %642 = vector.broadcast %641 : vector<8x1xf32> to vector<8x4xf32>
    %643 = arith.mulf %642, %634 : vector<8x4xf32>
    %644 = vector.extract_strided_slice %150 {offsets = [0, 3], sizes = [8, 1], strides = [1, 1]} : vector<8x9xf32> to vector<8x1xf32>
    %645 = vector.broadcast %644 : vector<8x1xf32> to vector<8x4xf32>
    %646 = arith.mulf %645, %637 : vector<8x4xf32>
    %647 = arith.addf %643, %646 : vector<8x4xf32>
    %648 = vector.extract_strided_slice %150 {offsets = [0, 6], sizes = [8, 1], strides = [1, 1]} : vector<8x9xf32> to vector<8x1xf32>
    %649 = vector.broadcast %648 : vector<8x1xf32> to vector<8x4xf32>
    %650 = arith.mulf %649, %640 : vector<8x4xf32>
    %651 = arith.addf %647, %650 : vector<8x4xf32>
    %652 = vector.extract_strided_slice %150 {offsets = [0, 1], sizes = [8, 1], strides = [1, 1]} : vector<8x9xf32> to vector<8x1xf32>
    %653 = vector.broadcast %652 : vector<8x1xf32> to vector<8x4xf32>
    %654 = arith.mulf %653, %634 : vector<8x4xf32>
    %655 = vector.extract_strided_slice %150 {offsets = [0, 4], sizes = [8, 1], strides = [1, 1]} : vector<8x9xf32> to vector<8x1xf32>
    %656 = vector.broadcast %655 : vector<8x1xf32> to vector<8x4xf32>
    %657 = arith.mulf %656, %637 : vector<8x4xf32>
    %658 = arith.addf %654, %657 : vector<8x4xf32>
    %659 = vector.extract_strided_slice %150 {offsets = [0, 7], sizes = [8, 1], strides = [1, 1]} : vector<8x9xf32> to vector<8x1xf32>
    %660 = vector.broadcast %659 : vector<8x1xf32> to vector<8x4xf32>
    %661 = arith.mulf %660, %640 : vector<8x4xf32>
    %662 = arith.addf %658, %661 : vector<8x4xf32>
    %663 = vector.extract_strided_slice %150 {offsets = [0, 2], sizes = [8, 1], strides = [1, 1]} : vector<8x9xf32> to vector<8x1xf32>
    %664 = vector.broadcast %663 : vector<8x1xf32> to vector<8x4xf32>
    %665 = arith.mulf %664, %634 : vector<8x4xf32>
    %666 = vector.extract_strided_slice %150 {offsets = [0, 5], sizes = [8, 1], strides = [1, 1]} : vector<8x9xf32> to vector<8x1xf32>
    %667 = vector.broadcast %666 : vector<8x1xf32> to vector<8x4xf32>
    %668 = arith.mulf %667, %637 : vector<8x4xf32>
    %669 = arith.addf %665, %668 : vector<8x4xf32>
    %670 = vector.extract_strided_slice %150 {offsets = [0, 8], sizes = [8, 1], strides = [1, 1]} : vector<8x9xf32> to vector<8x1xf32>
    %671 = vector.broadcast %670 : vector<8x1xf32> to vector<8x4xf32>
    %672 = arith.mulf %671, %640 : vector<8x4xf32>
    %673 = arith.addf %669, %672 : vector<8x4xf32>
    %674 = arith.mulf %651, %651 : vector<8x4xf32>
    %675 = arith.mulf %662, %662 : vector<8x4xf32>
    %676 = arith.addf %674, %675 : vector<8x4xf32>
    %677 = arith.mulf %673, %673 : vector<8x4xf32>
    %678 = arith.addf %676, %677 : vector<8x4xf32>
    %679 = math.sqrt %678 : vector<8x4xf32>
    %680 = tpu.concatenate %631, %603, %651, %662, %673, %679 in 1 : vector<8x8xf32>, vector<8x8xf32>, vector<8x4xf32>, vector<8x4xf32>, vector<8x4xf32>, vector<8x4xf32> -> vector<8x32xf32>
    %c3_148 = arith.constant 3 : index
    %681 = memref.load %arg12[%c3_148] : memref<4xf32, #tpu.memory_space<smem>>
    %682 = vector.extract_strided_slice %6 {offsets = [0, 24], sizes = [8, 8], strides = [1, 1]} : vector<16x32xf32> to vector<8x8xf32>
    %cst_149 = arith.constant 0.204124153 : f32
    %683 = vector.broadcast %cst_149 : f32 to vector<8x8xf32>
    %684 = arith.mulf %682, %683 : vector<8x8xf32>
    %685 = vector.extract_strided_slice %10 {offsets = [0, 24], sizes = [16, 8], strides = [1, 1]} : vector<32x32xf32> to vector<16x8xf32>
    %686 = vector.extract_strided_slice %35 {offsets = [0, 12], sizes = [8, 4], strides = [1, 1]} : vector<16x16xf32> to vector<8x4xf32>
    %687 = vector.broadcast %681 : f32 to vector<8x4xf32>
    %688 = arith.mulf %686, %687 : vector<8x4xf32>
    %689 = vector.extract_strided_slice %49 {offsets = [0, 12], sizes = [8, 4], strides = [1, 1]} : vector<16x16xf32> to vector<8x4xf32>
    %690 = vector.broadcast %681 : f32 to vector<8x4xf32>
    %691 = arith.mulf %689, %690 : vector<8x4xf32>
    %692 = vector.extract_strided_slice %63 {offsets = [0, 12], sizes = [8, 4], strides = [1, 1]} : vector<16x16xf32> to vector<8x4xf32>
    %693 = vector.broadcast %681 : f32 to vector<8x4xf32>
    %694 = arith.mulf %692, %693 : vector<8x4xf32>
    %695 = vector.extract_strided_slice %77 {offsets = [0, 12], sizes = [16, 4], strides = [1, 1]} : vector<32x16xf32> to vector<16x4xf32>
    %696 = vector.broadcast %681 : f32 to vector<16x4xf32>
    %697 = arith.mulf %695, %696 : vector<16x4xf32>
    %698 = vector.extract_strided_slice %91 {offsets = [0, 12], sizes = [16, 4], strides = [1, 1]} : vector<32x16xf32> to vector<16x4xf32>
    %699 = vector.broadcast %681 : f32 to vector<16x4xf32>
    %700 = arith.mulf %698, %699 : vector<16x4xf32>
    %701 = vector.extract_strided_slice %105 {offsets = [0, 12], sizes = [16, 4], strides = [1, 1]} : vector<32x16xf32> to vector<16x4xf32>
    %702 = vector.broadcast %681 : f32 to vector<16x4xf32>
    %703 = arith.mulf %701, %702 : vector<16x4xf32>
    %704 = arith.mulf %688, %688 : vector<8x4xf32>
    %705 = arith.mulf %691, %691 : vector<8x4xf32>
    %706 = arith.addf %704, %705 : vector<8x4xf32>
    %707 = arith.mulf %694, %694 : vector<8x4xf32>
    %708 = arith.addf %706, %707 : vector<8x4xf32>
    %cst_150 = arith.constant dense<0.000000e+00> : vector<8xf32>
    %709 = vector.multi_reduction <add>, %708, %cst_150 [1] : vector<8x4xf32> to vector<8xf32>
    %710 = vector.shape_cast %709 : vector<8xf32> to vector<8x1xf32>
    %cst_151 = arith.constant 5.000000e-01 : f32
    %711 = vector.broadcast %cst_151 : f32 to vector<8x1xf32>
    %712 = arith.mulf %711, %710 : vector<8x1xf32>
    %713 = arith.mulf %697, %697 : vector<16x4xf32>
    %714 = arith.mulf %700, %700 : vector<16x4xf32>
    %715 = arith.addf %713, %714 : vector<16x4xf32>
    %716 = arith.mulf %703, %703 : vector<16x4xf32>
    %717 = arith.addf %715, %716 : vector<16x4xf32>
    %cst_152 = arith.constant dense<0.000000e+00> : vector<16xf32>
    %718 = vector.multi_reduction <add>, %717, %cst_152 [1] : vector<16x4xf32> to vector<16xf32>
    %719 = vector.shape_cast %718 : vector<16xf32> to vector<16x1xf32>
    %cst_153 = arith.constant 5.000000e-01 : f32
    %720 = vector.broadcast %cst_153 : f32 to vector<16x1xf32>
    %721 = arith.mulf %720, %719 : vector<16x1xf32>
    %cst_154 = arith.constant 0.000000e+00 : f32
    %722 = vector.broadcast %cst_154 : f32 to vector<8x1xf32>
    %723 = arith.subf %722, %712 : vector<8x1xf32>
    %724 = tpu.concatenate %684, %688, %691, %694, %723, %149 in 1 : vector<8x8xf32>, vector<8x4xf32>, vector<8x4xf32>, vector<8x4xf32>, vector<8x1xf32>, vector<8x1xf32> -> vector<8x22xf32>
    %725 = tpu.concatenate %685, %697, %700, %703, %148, %721 in 1 : vector<16x8xf32>, vector<16x4xf32>, vector<16x4xf32>, vector<16x4xf32>, vector<16x1xf32>, vector<16x1xf32> -> vector<16x22xf32>
    %cst_155 = arith.constant dense<0.000000e+00> : vector<8x16xf32>
    %726 = tpu.matmul %724, %725, %cst_155 {dimension_numbers = #tpu.dot_dimension_numbers<[1], [1], [0], [0], [0, 0, 1, 0], [], []>, precision = #tpu.contract_precision<fp32>} : vector<8x22xf32>, vector<16x22xf32>, vector<8x16xf32> -> vector<8x16xf32>
    %c3_156 = arith.constant 3 : index
    %c0_157 = arith.constant 0 : index
    %727 = memref.load %arg11[%c3_156, %c0_157] : memref<4x8xf32, #tpu.memory_space<smem>>
    %728 = vector.broadcast %727 : f32 to vector<8x16xf32>
    %729 = arith.mulf %728, %153 : vector<8x16xf32>
    %c3_158 = arith.constant 3 : index
    %c1_159 = arith.constant 1 : index
    %730 = memref.load %arg11[%c3_158, %c1_159] : memref<4x8xf32, #tpu.memory_space<smem>>
    %731 = vector.broadcast %730 : f32 to vector<8x16xf32>
    %732 = arith.mulf %731, %155 : vector<8x16xf32>
    %733 = arith.addf %729, %732 : vector<8x16xf32>
    %c3_160 = arith.constant 3 : index
    %c2_161 = arith.constant 2 : index
    %734 = memref.load %arg11[%c3_160, %c2_161] : memref<4x8xf32, #tpu.memory_space<smem>>
    %735 = vector.broadcast %734 : f32 to vector<8x16xf32>
    %736 = arith.mulf %735, %157 : vector<8x16xf32>
    %737 = arith.addf %733, %736 : vector<8x16xf32>
    %c3_162 = arith.constant 3 : index
    %c3_163 = arith.constant 3 : index
    %738 = memref.load %arg11[%c3_162, %c3_163] : memref<4x8xf32, #tpu.memory_space<smem>>
    %739 = vector.broadcast %738 : f32 to vector<8x16xf32>
    %740 = arith.mulf %739, %159 : vector<8x16xf32>
    %741 = arith.addf %737, %740 : vector<8x16xf32>
    %c3_164 = arith.constant 3 : index
    %c4_165 = arith.constant 4 : index
    %742 = memref.load %arg11[%c3_164, %c4_165] : memref<4x8xf32, #tpu.memory_space<smem>>
    %743 = vector.broadcast %742 : f32 to vector<8x16xf32>
    %744 = arith.mulf %743, %161 : vector<8x16xf32>
    %745 = arith.addf %741, %744 : vector<8x16xf32>
    %c3_166 = arith.constant 3 : index
    %c5_167 = arith.constant 5 : index
    %746 = memref.load %arg11[%c3_166, %c5_167] : memref<4x8xf32, #tpu.memory_space<smem>>
    %747 = vector.broadcast %746 : f32 to vector<8x16xf32>
    %748 = arith.mulf %747, %163 : vector<8x16xf32>
    %749 = arith.addf %745, %748 : vector<8x16xf32>
    %c3_168 = arith.constant 3 : index
    %c6_169 = arith.constant 6 : index
    %750 = memref.load %arg11[%c3_168, %c6_169] : memref<4x8xf32, #tpu.memory_space<smem>>
    %751 = vector.broadcast %750 : f32 to vector<8x16xf32>
    %752 = arith.mulf %751, %165 : vector<8x16xf32>
    %753 = arith.addf %749, %752 : vector<8x16xf32>
    %c3_170 = arith.constant 3 : index
    %c7_171 = arith.constant 7 : index
    %754 = memref.load %arg11[%c3_170, %c7_171] : memref<4x8xf32, #tpu.memory_space<smem>>
    %755 = vector.broadcast %754 : f32 to vector<8x16xf32>
    %756 = arith.mulf %755, %167 : vector<8x16xf32>
    %757 = arith.addf %753, %756 : vector<8x16xf32>
    %758 = arith.addf %726, %757 : vector<8x16xf32>
    %cst_172 = arith.constant dense<0xFF800000> : vector<8xf32>
    %759 = vector.multi_reduction <maximumf>, %758, %cst_172 [1] : vector<8x16xf32> to vector<8xf32>
    %760 = vector.shape_cast %759 : vector<8xf32> to vector<8x1xf32>
    %761 = vector.broadcast %760 : vector<8x1xf32> to vector<8x16xf32>
    %762 = arith.subf %758, %761 : vector<8x16xf32>
    %763 = math.exp %762 : vector<8x16xf32>
    %cst_173 = arith.constant dense<0.000000e+00> : vector<8xf32>
    %764 = vector.multi_reduction <add>, %763, %cst_173 [1] : vector<8x16xf32> to vector<8xf32>
    %765 = vector.shape_cast %764 : vector<8xf32> to vector<8x1xf32>
    %766 = vector.broadcast %765 : vector<8x1xf32> to vector<8x16xf32>
    %767 = arith.divf %763, %766 : vector<8x16xf32>
    %768 = vector.extract_strided_slice %11 {offsets = [0, 24], sizes = [16, 8], strides = [1, 1]} : vector<32x32xf32> to vector<16x8xf32>
    %769 = vector.extract_strided_slice %119 {offsets = [0, 12], sizes = [16, 4], strides = [1, 1]} : vector<32x16xf32> to vector<16x4xf32>
    %770 = vector.extract_strided_slice %133 {offsets = [0, 12], sizes = [16, 4], strides = [1, 1]} : vector<32x16xf32> to vector<16x4xf32>
    %771 = vector.extract_strided_slice %147 {offsets = [0, 12], sizes = [16, 4], strides = [1, 1]} : vector<32x16xf32> to vector<16x4xf32>
    %772 = tpu.concatenate %768, %769, %770, %771 in 1 : vector<16x8xf32>, vector<16x4xf32>, vector<16x4xf32>, vector<16x4xf32> -> vector<16x20xf32>
    %cst_174 = arith.constant dense<0.000000e+00> : vector<8x20xf32>
    %773 = tpu.matmul %767, %772, %cst_174 {dimension_numbers = #tpu.dot_dimension_numbers<[1], [0], [0], [1], [0, 0, 1, 1], [], []>, precision = #tpu.contract_precision<fp32>} : vector<8x16xf32>, vector<16x20xf32>, vector<8x20xf32> -> vector<8x20xf32>
    %774 = vector.extract_strided_slice %773 {offsets = [0, 0], sizes = [8, 8], strides = [1, 1]} : vector<8x20xf32> to vector<8x8xf32>
    %775 = vector.extract_strided_slice %773 {offsets = [0, 8], sizes = [8, 4], strides = [1, 1]} : vector<8x20xf32> to vector<8x4xf32>
    %776 = vector.extract_strided_slice %773 {offsets = [0, 12], sizes = [8, 4], strides = [1, 1]} : vector<8x20xf32> to vector<8x4xf32>
    %777 = vector.extract_strided_slice %773 {offsets = [0, 16], sizes = [8, 4], strides = [1, 1]} : vector<8x20xf32> to vector<8x4xf32>
    %778 = arith.mulf %767, %153 : vector<8x16xf32>
    %cst_175 = arith.constant dense<0.000000e+00> : vector<8xf32>
    %779 = vector.multi_reduction <add>, %778, %cst_175 [1] : vector<8x16xf32> to vector<8xf32>
    %780 = vector.shape_cast %779 : vector<8xf32> to vector<8x1xf32>
    %781 = arith.mulf %767, %155 : vector<8x16xf32>
    %cst_176 = arith.constant dense<0.000000e+00> : vector<8xf32>
    %782 = vector.multi_reduction <add>, %781, %cst_176 [1] : vector<8x16xf32> to vector<8xf32>
    %783 = vector.shape_cast %782 : vector<8xf32> to vector<8x1xf32>
    %784 = arith.mulf %767, %157 : vector<8x16xf32>
    %cst_177 = arith.constant dense<0.000000e+00> : vector<8xf32>
    %785 = vector.multi_reduction <add>, %784, %cst_177 [1] : vector<8x16xf32> to vector<8xf32>
    %786 = vector.shape_cast %785 : vector<8xf32> to vector<8x1xf32>
    %787 = arith.mulf %767, %159 : vector<8x16xf32>
    %cst_178 = arith.constant dense<0.000000e+00> : vector<8xf32>
    %788 = vector.multi_reduction <add>, %787, %cst_178 [1] : vector<8x16xf32> to vector<8xf32>
    %789 = vector.shape_cast %788 : vector<8xf32> to vector<8x1xf32>
    %790 = arith.mulf %767, %161 : vector<8x16xf32>
    %cst_179 = arith.constant dense<0.000000e+00> : vector<8xf32>
    %791 = vector.multi_reduction <add>, %790, %cst_179 [1] : vector<8x16xf32> to vector<8xf32>
    %792 = vector.shape_cast %791 : vector<8xf32> to vector<8x1xf32>
    %793 = arith.mulf %767, %163 : vector<8x16xf32>
    %cst_180 = arith.constant dense<0.000000e+00> : vector<8xf32>
    %794 = vector.multi_reduction <add>, %793, %cst_180 [1] : vector<8x16xf32> to vector<8xf32>
    %795 = vector.shape_cast %794 : vector<8xf32> to vector<8x1xf32>
    %796 = arith.mulf %767, %165 : vector<8x16xf32>
    %cst_181 = arith.constant dense<0.000000e+00> : vector<8xf32>
    %797 = vector.multi_reduction <add>, %796, %cst_181 [1] : vector<8x16xf32> to vector<8xf32>
    %798 = vector.shape_cast %797 : vector<8xf32> to vector<8x1xf32>
    %799 = arith.mulf %767, %167 : vector<8x16xf32>
    %cst_182 = arith.constant dense<0.000000e+00> : vector<8xf32>
    %800 = vector.multi_reduction <add>, %799, %cst_182 [1] : vector<8x16xf32> to vector<8xf32>
    %801 = vector.shape_cast %800 : vector<8xf32> to vector<8x1xf32>
    %802 = tpu.concatenate %780, %783, %786, %789, %792, %795, %798, %801 in 1 : vector<8x1xf32>, vector<8x1xf32>, vector<8x1xf32>, vector<8x1xf32>, vector<8x1xf32>, vector<8x1xf32>, vector<8x1xf32>, vector<8x1xf32> -> vector<8x8xf32>
    %803 = vector.extract_strided_slice %151 {offsets = [0, 0], sizes = [8, 1], strides = [1, 1]} : vector<8x3xf32> to vector<8x1xf32>
    %804 = vector.broadcast %803 : vector<8x1xf32> to vector<8x4xf32>
    %805 = arith.subf %775, %804 : vector<8x4xf32>
    %806 = vector.extract_strided_slice %151 {offsets = [0, 1], sizes = [8, 1], strides = [1, 1]} : vector<8x3xf32> to vector<8x1xf32>
    %807 = vector.broadcast %806 : vector<8x1xf32> to vector<8x4xf32>
    %808 = arith.subf %776, %807 : vector<8x4xf32>
    %809 = vector.extract_strided_slice %151 {offsets = [0, 2], sizes = [8, 1], strides = [1, 1]} : vector<8x3xf32> to vector<8x1xf32>
    %810 = vector.broadcast %809 : vector<8x1xf32> to vector<8x4xf32>
    %811 = arith.subf %777, %810 : vector<8x4xf32>
    %812 = vector.extract_strided_slice %150 {offsets = [0, 0], sizes = [8, 1], strides = [1, 1]} : vector<8x9xf32> to vector<8x1xf32>
    %813 = vector.broadcast %812 : vector<8x1xf32> to vector<8x4xf32>
    %814 = arith.mulf %813, %805 : vector<8x4xf32>
    %815 = vector.extract_strided_slice %150 {offsets = [0, 3], sizes = [8, 1], strides = [1, 1]} : vector<8x9xf32> to vector<8x1xf32>
    %816 = vector.broadcast %815 : vector<8x1xf32> to vector<8x4xf32>
    %817 = arith.mulf %816, %808 : vector<8x4xf32>
    %818 = arith.addf %814, %817 : vector<8x4xf32>
    %819 = vector.extract_strided_slice %150 {offsets = [0, 6], sizes = [8, 1], strides = [1, 1]} : vector<8x9xf32> to vector<8x1xf32>
    %820 = vector.broadcast %819 : vector<8x1xf32> to vector<8x4xf32>
    %821 = arith.mulf %820, %811 : vector<8x4xf32>
    %822 = arith.addf %818, %821 : vector<8x4xf32>
    %823 = vector.extract_strided_slice %150 {offsets = [0, 1], sizes = [8, 1], strides = [1, 1]} : vector<8x9xf32> to vector<8x1xf32>
    %824 = vector.broadcast %823 : vector<8x1xf32> to vector<8x4xf32>
    %825 = arith.mulf %824, %805 : vector<8x4xf32>
    %826 = vector.extract_strided_slice %150 {offsets = [0, 4], sizes = [8, 1], strides = [1, 1]} : vector<8x9xf32> to vector<8x1xf32>
    %827 = vector.broadcast %826 : vector<8x1xf32> to vector<8x4xf32>
    %828 = arith.mulf %827, %808 : vector<8x4xf32>
    %829 = arith.addf %825, %828 : vector<8x4xf32>
    %830 = vector.extract_strided_slice %150 {offsets = [0, 7], sizes = [8, 1], strides = [1, 1]} : vector<8x9xf32> to vector<8x1xf32>
    %831 = vector.broadcast %830 : vector<8x1xf32> to vector<8x4xf32>
    %832 = arith.mulf %831, %811 : vector<8x4xf32>
    %833 = arith.addf %829, %832 : vector<8x4xf32>
    %834 = vector.extract_strided_slice %150 {offsets = [0, 2], sizes = [8, 1], strides = [1, 1]} : vector<8x9xf32> to vector<8x1xf32>
    %835 = vector.broadcast %834 : vector<8x1xf32> to vector<8x4xf32>
    %836 = arith.mulf %835, %805 : vector<8x4xf32>
    %837 = vector.extract_strided_slice %150 {offsets = [0, 5], sizes = [8, 1], strides = [1, 1]} : vector<8x9xf32> to vector<8x1xf32>
    %838 = vector.broadcast %837 : vector<8x1xf32> to vector<8x4xf32>
    %839 = arith.mulf %838, %808 : vector<8x4xf32>
    %840 = arith.addf %836, %839 : vector<8x4xf32>
    %841 = vector.extract_strided_slice %150 {offsets = [0, 8], sizes = [8, 1], strides = [1, 1]} : vector<8x9xf32> to vector<8x1xf32>
    %842 = vector.broadcast %841 : vector<8x1xf32> to vector<8x4xf32>
    %843 = arith.mulf %842, %811 : vector<8x4xf32>
    %844 = arith.addf %840, %843 : vector<8x4xf32>
    %845 = arith.mulf %822, %822 : vector<8x4xf32>
    %846 = arith.mulf %833, %833 : vector<8x4xf32>
    %847 = arith.addf %845, %846 : vector<8x4xf32>
    %848 = arith.mulf %844, %844 : vector<8x4xf32>
    %849 = arith.addf %847, %848 : vector<8x4xf32>
    %850 = math.sqrt %849 : vector<8x4xf32>
    %851 = tpu.concatenate %802, %774, %822, %833, %844, %850 in 1 : vector<8x8xf32>, vector<8x8xf32>, vector<8x4xf32>, vector<8x4xf32>, vector<8x4xf32>, vector<8x4xf32> -> vector<8x32xf32>
    %852 = tpu.concatenate %338, %509, %680, %851 in 1 : vector<8x32xf32>, vector<8x32xf32>, vector<8x32xf32>, vector<8x32xf32> -> vector<8x128xf32>
    %853 = vector.extract_strided_slice %18 {offsets = [8, 0], sizes = [8, 9], strides = [1, 1]} : vector<16x9xf32> to vector<8x9xf32>
    %854 = vector.extract_strided_slice %19 {offsets = [8, 0], sizes = [8, 3], strides = [1, 1]} : vector<16x3xf32> to vector<8x3xf32>
    %c1_183 = arith.constant 1 : index
    %c0_184 = arith.constant 0 : index
    %c0_185 = arith.constant 0 : index
    %c0_186 = arith.constant 0 : index
    %855 = vector.load %arg2[%c1_183, %c0_184, %c0_185, %c0_186] : memref<2x8x8x16xf32, #tpu.memory_space<vmem>>, vector<1x1x8x16xf32>
    %856 = vector.shape_cast %855 : vector<1x1x8x16xf32> to vector<8x16xf32>
    %c1_187 = arith.constant 1 : index
    %c1_188 = arith.constant 1 : index
    %c0_189 = arith.constant 0 : index
    %c0_190 = arith.constant 0 : index
    %857 = vector.load %arg2[%c1_187, %c1_188, %c0_189, %c0_190] : memref<2x8x8x16xf32, #tpu.memory_space<vmem>>, vector<1x1x8x16xf32>
    %858 = vector.shape_cast %857 : vector<1x1x8x16xf32> to vector<8x16xf32>
    %c1_191 = arith.constant 1 : index
    %c2_192 = arith.constant 2 : index
    %c0_193 = arith.constant 0 : index
    %c0_194 = arith.constant 0 : index
    %859 = vector.load %arg2[%c1_191, %c2_192, %c0_193, %c0_194] : memref<2x8x8x16xf32, #tpu.memory_space<vmem>>, vector<1x1x8x16xf32>
    %860 = vector.shape_cast %859 : vector<1x1x8x16xf32> to vector<8x16xf32>
    %c1_195 = arith.constant 1 : index
    %c3_196 = arith.constant 3 : index
    %c0_197 = arith.constant 0 : index
    %c0_198 = arith.constant 0 : index
    %861 = vector.load %arg2[%c1_195, %c3_196, %c0_197, %c0_198] : memref<2x8x8x16xf32, #tpu.memory_space<vmem>>, vector<1x1x8x16xf32>
    %862 = vector.shape_cast %861 : vector<1x1x8x16xf32> to vector<8x16xf32>
    %c1_199 = arith.constant 1 : index
    %c4_200 = arith.constant 4 : index
    %c0_201 = arith.constant 0 : index
    %c0_202 = arith.constant 0 : index
    %863 = vector.load %arg2[%c1_199, %c4_200, %c0_201, %c0_202] : memref<2x8x8x16xf32, #tpu.memory_space<vmem>>, vector<1x1x8x16xf32>
    %864 = vector.shape_cast %863 : vector<1x1x8x16xf32> to vector<8x16xf32>
    %c1_203 = arith.constant 1 : index
    %c5_204 = arith.constant 5 : index
    %c0_205 = arith.constant 0 : index
    %c0_206 = arith.constant 0 : index
    %865 = vector.load %arg2[%c1_203, %c5_204, %c0_205, %c0_206] : memref<2x8x8x16xf32, #tpu.memory_space<vmem>>, vector<1x1x8x16xf32>
    %866 = vector.shape_cast %865 : vector<1x1x8x16xf32> to vector<8x16xf32>
    %c1_207 = arith.constant 1 : index
    %c6_208 = arith.constant 6 : index
    %c0_209 = arith.constant 0 : index
    %c0_210 = arith.constant 0 : index
    %867 = vector.load %arg2[%c1_207, %c6_208, %c0_209, %c0_210] : memref<2x8x8x16xf32, #tpu.memory_space<vmem>>, vector<1x1x8x16xf32>
    %868 = vector.shape_cast %867 : vector<1x1x8x16xf32> to vector<8x16xf32>
    %c1_211 = arith.constant 1 : index
    %c7_212 = arith.constant 7 : index
    %c0_213 = arith.constant 0 : index
    %c0_214 = arith.constant 0 : index
    %869 = vector.load %arg2[%c1_211, %c7_212, %c0_213, %c0_214] : memref<2x8x8x16xf32, #tpu.memory_space<vmem>>, vector<1x1x8x16xf32>
    %870 = vector.shape_cast %869 : vector<1x1x8x16xf32> to vector<8x16xf32>
    %c0_215 = arith.constant 0 : index
    %871 = memref.load %arg12[%c0_215] : memref<4xf32, #tpu.memory_space<smem>>
    %872 = vector.extract_strided_slice %6 {offsets = [8, 0], sizes = [8, 8], strides = [1, 1]} : vector<16x32xf32> to vector<8x8xf32>
    %cst_216 = arith.constant 0.204124153 : f32
    %873 = vector.broadcast %cst_216 : f32 to vector<8x8xf32>
    %874 = arith.mulf %872, %873 : vector<8x8xf32>
    %875 = vector.extract_strided_slice %10 {offsets = [16, 0], sizes = [16, 8], strides = [1, 1]} : vector<32x32xf32> to vector<16x8xf32>
    %876 = vector.extract_strided_slice %35 {offsets = [8, 0], sizes = [8, 4], strides = [1, 1]} : vector<16x16xf32> to vector<8x4xf32>
    %877 = vector.broadcast %871 : f32 to vector<8x4xf32>
    %878 = arith.mulf %876, %877 : vector<8x4xf32>
    %879 = vector.extract_strided_slice %49 {offsets = [8, 0], sizes = [8, 4], strides = [1, 1]} : vector<16x16xf32> to vector<8x4xf32>
    %880 = vector.broadcast %871 : f32 to vector<8x4xf32>
    %881 = arith.mulf %879, %880 : vector<8x4xf32>
    %882 = vector.extract_strided_slice %63 {offsets = [8, 0], sizes = [8, 4], strides = [1, 1]} : vector<16x16xf32> to vector<8x4xf32>
    %883 = vector.broadcast %871 : f32 to vector<8x4xf32>
    %884 = arith.mulf %882, %883 : vector<8x4xf32>
    %885 = vector.extract_strided_slice %77 {offsets = [16, 0], sizes = [16, 4], strides = [1, 1]} : vector<32x16xf32> to vector<16x4xf32>
    %886 = vector.broadcast %871 : f32 to vector<16x4xf32>
    %887 = arith.mulf %885, %886 : vector<16x4xf32>
    %888 = vector.extract_strided_slice %91 {offsets = [16, 0], sizes = [16, 4], strides = [1, 1]} : vector<32x16xf32> to vector<16x4xf32>
    %889 = vector.broadcast %871 : f32 to vector<16x4xf32>
    %890 = arith.mulf %888, %889 : vector<16x4xf32>
    %891 = vector.extract_strided_slice %105 {offsets = [16, 0], sizes = [16, 4], strides = [1, 1]} : vector<32x16xf32> to vector<16x4xf32>
    %892 = vector.broadcast %871 : f32 to vector<16x4xf32>
    %893 = arith.mulf %891, %892 : vector<16x4xf32>
    %894 = arith.mulf %878, %878 : vector<8x4xf32>
    %895 = arith.mulf %881, %881 : vector<8x4xf32>
    %896 = arith.addf %894, %895 : vector<8x4xf32>
    %897 = arith.mulf %884, %884 : vector<8x4xf32>
    %898 = arith.addf %896, %897 : vector<8x4xf32>
    %cst_217 = arith.constant dense<0.000000e+00> : vector<8xf32>
    %899 = vector.multi_reduction <add>, %898, %cst_217 [1] : vector<8x4xf32> to vector<8xf32>
    %900 = vector.shape_cast %899 : vector<8xf32> to vector<8x1xf32>
    %cst_218 = arith.constant 5.000000e-01 : f32
    %901 = vector.broadcast %cst_218 : f32 to vector<8x1xf32>
    %902 = arith.mulf %901, %900 : vector<8x1xf32>
    %903 = arith.mulf %887, %887 : vector<16x4xf32>
    %904 = arith.mulf %890, %890 : vector<16x4xf32>
    %905 = arith.addf %903, %904 : vector<16x4xf32>
    %906 = arith.mulf %893, %893 : vector<16x4xf32>
    %907 = arith.addf %905, %906 : vector<16x4xf32>
    %cst_219 = arith.constant dense<0.000000e+00> : vector<16xf32>
    %908 = vector.multi_reduction <add>, %907, %cst_219 [1] : vector<16x4xf32> to vector<16xf32>
    %909 = vector.shape_cast %908 : vector<16xf32> to vector<16x1xf32>
    %cst_220 = arith.constant 5.000000e-01 : f32
    %910 = vector.broadcast %cst_220 : f32 to vector<16x1xf32>
    %911 = arith.mulf %910, %909 : vector<16x1xf32>
    %cst_221 = arith.constant 0.000000e+00 : f32
    %912 = vector.broadcast %cst_221 : f32 to vector<8x1xf32>
    %913 = arith.subf %912, %902 : vector<8x1xf32>
    %914 = tpu.concatenate %874, %878, %881, %884, %913, %149 in 1 : vector<8x8xf32>, vector<8x4xf32>, vector<8x4xf32>, vector<8x4xf32>, vector<8x1xf32>, vector<8x1xf32> -> vector<8x22xf32>
    %915 = tpu.concatenate %875, %887, %890, %893, %148, %911 in 1 : vector<16x8xf32>, vector<16x4xf32>, vector<16x4xf32>, vector<16x4xf32>, vector<16x1xf32>, vector<16x1xf32> -> vector<16x22xf32>
    %cst_222 = arith.constant dense<0.000000e+00> : vector<8x16xf32>
    %916 = tpu.matmul %914, %915, %cst_222 {dimension_numbers = #tpu.dot_dimension_numbers<[1], [1], [0], [0], [0, 0, 1, 0], [], []>, precision = #tpu.contract_precision<fp32>} : vector<8x22xf32>, vector<16x22xf32>, vector<8x16xf32> -> vector<8x16xf32>
    %c0_223 = arith.constant 0 : index
    %c0_224 = arith.constant 0 : index
    %917 = memref.load %arg11[%c0_223, %c0_224] : memref<4x8xf32, #tpu.memory_space<smem>>
    %918 = vector.broadcast %917 : f32 to vector<8x16xf32>
    %919 = arith.mulf %918, %856 : vector<8x16xf32>
    %c0_225 = arith.constant 0 : index
    %c1_226 = arith.constant 1 : index
    %920 = memref.load %arg11[%c0_225, %c1_226] : memref<4x8xf32, #tpu.memory_space<smem>>
    %921 = vector.broadcast %920 : f32 to vector<8x16xf32>
    %922 = arith.mulf %921, %858 : vector<8x16xf32>
    %923 = arith.addf %919, %922 : vector<8x16xf32>
    %c0_227 = arith.constant 0 : index
    %c2_228 = arith.constant 2 : index
    %924 = memref.load %arg11[%c0_227, %c2_228] : memref<4x8xf32, #tpu.memory_space<smem>>
    %925 = vector.broadcast %924 : f32 to vector<8x16xf32>
    %926 = arith.mulf %925, %860 : vector<8x16xf32>
    %927 = arith.addf %923, %926 : vector<8x16xf32>
    %c0_229 = arith.constant 0 : index
    %c3_230 = arith.constant 3 : index
    %928 = memref.load %arg11[%c0_229, %c3_230] : memref<4x8xf32, #tpu.memory_space<smem>>
    %929 = vector.broadcast %928 : f32 to vector<8x16xf32>
    %930 = arith.mulf %929, %862 : vector<8x16xf32>
    %931 = arith.addf %927, %930 : vector<8x16xf32>
    %c0_231 = arith.constant 0 : index
    %c4_232 = arith.constant 4 : index
    %932 = memref.load %arg11[%c0_231, %c4_232] : memref<4x8xf32, #tpu.memory_space<smem>>
    %933 = vector.broadcast %932 : f32 to vector<8x16xf32>
    %934 = arith.mulf %933, %864 : vector<8x16xf32>
    %935 = arith.addf %931, %934 : vector<8x16xf32>
    %c0_233 = arith.constant 0 : index
    %c5_234 = arith.constant 5 : index
    %936 = memref.load %arg11[%c0_233, %c5_234] : memref<4x8xf32, #tpu.memory_space<smem>>
    %937 = vector.broadcast %936 : f32 to vector<8x16xf32>
    %938 = arith.mulf %937, %866 : vector<8x16xf32>
    %939 = arith.addf %935, %938 : vector<8x16xf32>
    %c0_235 = arith.constant 0 : index
    %c6_236 = arith.constant 6 : index
    %940 = memref.load %arg11[%c0_235, %c6_236] : memref<4x8xf32, #tpu.memory_space<smem>>
    %941 = vector.broadcast %940 : f32 to vector<8x16xf32>
    %942 = arith.mulf %941, %868 : vector<8x16xf32>
    %943 = arith.addf %939, %942 : vector<8x16xf32>
    %c0_237 = arith.constant 0 : index
    %c7_238 = arith.constant 7 : index
    %944 = memref.load %arg11[%c0_237, %c7_238] : memref<4x8xf32, #tpu.memory_space<smem>>
    %945 = vector.broadcast %944 : f32 to vector<8x16xf32>
    %946 = arith.mulf %945, %870 : vector<8x16xf32>
    %947 = arith.addf %943, %946 : vector<8x16xf32>
    %948 = arith.addf %916, %947 : vector<8x16xf32>
    %cst_239 = arith.constant dense<0xFF800000> : vector<8xf32>
    %949 = vector.multi_reduction <maximumf>, %948, %cst_239 [1] : vector<8x16xf32> to vector<8xf32>
    %950 = vector.shape_cast %949 : vector<8xf32> to vector<8x1xf32>
    %951 = vector.broadcast %950 : vector<8x1xf32> to vector<8x16xf32>
    %952 = arith.subf %948, %951 : vector<8x16xf32>
    %953 = math.exp %952 : vector<8x16xf32>
    %cst_240 = arith.constant dense<0.000000e+00> : vector<8xf32>
    %954 = vector.multi_reduction <add>, %953, %cst_240 [1] : vector<8x16xf32> to vector<8xf32>
    %955 = vector.shape_cast %954 : vector<8xf32> to vector<8x1xf32>
    %956 = vector.broadcast %955 : vector<8x1xf32> to vector<8x16xf32>
    %957 = arith.divf %953, %956 : vector<8x16xf32>
    %958 = vector.extract_strided_slice %11 {offsets = [16, 0], sizes = [16, 8], strides = [1, 1]} : vector<32x32xf32> to vector<16x8xf32>
    %959 = vector.extract_strided_slice %119 {offsets = [16, 0], sizes = [16, 4], strides = [1, 1]} : vector<32x16xf32> to vector<16x4xf32>
    %960 = vector.extract_strided_slice %133 {offsets = [16, 0], sizes = [16, 4], strides = [1, 1]} : vector<32x16xf32> to vector<16x4xf32>
    %961 = vector.extract_strided_slice %147 {offsets = [16, 0], sizes = [16, 4], strides = [1, 1]} : vector<32x16xf32> to vector<16x4xf32>
    %962 = tpu.concatenate %958, %959, %960, %961 in 1 : vector<16x8xf32>, vector<16x4xf32>, vector<16x4xf32>, vector<16x4xf32> -> vector<16x20xf32>
    %cst_241 = arith.constant dense<0.000000e+00> : vector<8x20xf32>
    %963 = tpu.matmul %957, %962, %cst_241 {dimension_numbers = #tpu.dot_dimension_numbers<[1], [0], [0], [1], [0, 0, 1, 1], [], []>, precision = #tpu.contract_precision<fp32>} : vector<8x16xf32>, vector<16x20xf32>, vector<8x20xf32> -> vector<8x20xf32>
    %964 = vector.extract_strided_slice %963 {offsets = [0, 0], sizes = [8, 8], strides = [1, 1]} : vector<8x20xf32> to vector<8x8xf32>
    %965 = vector.extract_strided_slice %963 {offsets = [0, 8], sizes = [8, 4], strides = [1, 1]} : vector<8x20xf32> to vector<8x4xf32>
    %966 = vector.extract_strided_slice %963 {offsets = [0, 12], sizes = [8, 4], strides = [1, 1]} : vector<8x20xf32> to vector<8x4xf32>
    %967 = vector.extract_strided_slice %963 {offsets = [0, 16], sizes = [8, 4], strides = [1, 1]} : vector<8x20xf32> to vector<8x4xf32>
    %968 = arith.mulf %957, %856 : vector<8x16xf32>
    %cst_242 = arith.constant dense<0.000000e+00> : vector<8xf32>
    %969 = vector.multi_reduction <add>, %968, %cst_242 [1] : vector<8x16xf32> to vector<8xf32>
    %970 = vector.shape_cast %969 : vector<8xf32> to vector<8x1xf32>
    %971 = arith.mulf %957, %858 : vector<8x16xf32>
    %cst_243 = arith.constant dense<0.000000e+00> : vector<8xf32>
    %972 = vector.multi_reduction <add>, %971, %cst_243 [1] : vector<8x16xf32> to vector<8xf32>
    %973 = vector.shape_cast %972 : vector<8xf32> to vector<8x1xf32>
    %974 = arith.mulf %957, %860 : vector<8x16xf32>
    %cst_244 = arith.constant dense<0.000000e+00> : vector<8xf32>
    %975 = vector.multi_reduction <add>, %974, %cst_244 [1] : vector<8x16xf32> to vector<8xf32>
    %976 = vector.shape_cast %975 : vector<8xf32> to vector<8x1xf32>
    %977 = arith.mulf %957, %862 : vector<8x16xf32>
    %cst_245 = arith.constant dense<0.000000e+00> : vector<8xf32>
    %978 = vector.multi_reduction <add>, %977, %cst_245 [1] : vector<8x16xf32> to vector<8xf32>
    %979 = vector.shape_cast %978 : vector<8xf32> to vector<8x1xf32>
    %980 = arith.mulf %957, %864 : vector<8x16xf32>
    %cst_246 = arith.constant dense<0.000000e+00> : vector<8xf32>
    %981 = vector.multi_reduction <add>, %980, %cst_246 [1] : vector<8x16xf32> to vector<8xf32>
    %982 = vector.shape_cast %981 : vector<8xf32> to vector<8x1xf32>
    %983 = arith.mulf %957, %866 : vector<8x16xf32>
    %cst_247 = arith.constant dense<0.000000e+00> : vector<8xf32>
    %984 = vector.multi_reduction <add>, %983, %cst_247 [1] : vector<8x16xf32> to vector<8xf32>
    %985 = vector.shape_cast %984 : vector<8xf32> to vector<8x1xf32>
    %986 = arith.mulf %957, %868 : vector<8x16xf32>
    %cst_248 = arith.constant dense<0.000000e+00> : vector<8xf32>
    %987 = vector.multi_reduction <add>, %986, %cst_248 [1] : vector<8x16xf32> to vector<8xf32>
    %988 = vector.shape_cast %987 : vector<8xf32> to vector<8x1xf32>
    %989 = arith.mulf %957, %870 : vector<8x16xf32>
    %cst_249 = arith.constant dense<0.000000e+00> : vector<8xf32>
    %990 = vector.multi_reduction <add>, %989, %cst_249 [1] : vector<8x16xf32> to vector<8xf32>
    %991 = vector.shape_cast %990 : vector<8xf32> to vector<8x1xf32>
    %992 = tpu.concatenate %970, %973, %976, %979, %982, %985, %988, %991 in 1 : vector<8x1xf32>, vector<8x1xf32>, vector<8x1xf32>, vector<8x1xf32>, vector<8x1xf32>, vector<8x1xf32>, vector<8x1xf32>, vector<8x1xf32> -> vector<8x8xf32>
    %993 = vector.extract_strided_slice %854 {offsets = [0, 0], sizes = [8, 1], strides = [1, 1]} : vector<8x3xf32> to vector<8x1xf32>
    %994 = vector.broadcast %993 : vector<8x1xf32> to vector<8x4xf32>
    %995 = arith.subf %965, %994 : vector<8x4xf32>
    %996 = vector.extract_strided_slice %854 {offsets = [0, 1], sizes = [8, 1], strides = [1, 1]} : vector<8x3xf32> to vector<8x1xf32>
    %997 = vector.broadcast %996 : vector<8x1xf32> to vector<8x4xf32>
    %998 = arith.subf %966, %997 : vector<8x4xf32>
    %999 = vector.extract_strided_slice %854 {offsets = [0, 2], sizes = [8, 1], strides = [1, 1]} : vector<8x3xf32> to vector<8x1xf32>
    %1000 = vector.broadcast %999 : vector<8x1xf32> to vector<8x4xf32>
    %1001 = arith.subf %967, %1000 : vector<8x4xf32>
    %1002 = vector.extract_strided_slice %853 {offsets = [0, 0], sizes = [8, 1], strides = [1, 1]} : vector<8x9xf32> to vector<8x1xf32>
    %1003 = vector.broadcast %1002 : vector<8x1xf32> to vector<8x4xf32>
    %1004 = arith.mulf %1003, %995 : vector<8x4xf32>
    %1005 = vector.extract_strided_slice %853 {offsets = [0, 3], sizes = [8, 1], strides = [1, 1]} : vector<8x9xf32> to vector<8x1xf32>
    %1006 = vector.broadcast %1005 : vector<8x1xf32> to vector<8x4xf32>
    %1007 = arith.mulf %1006, %998 : vector<8x4xf32>
    %1008 = arith.addf %1004, %1007 : vector<8x4xf32>
    %1009 = vector.extract_strided_slice %853 {offsets = [0, 6], sizes = [8, 1], strides = [1, 1]} : vector<8x9xf32> to vector<8x1xf32>
    %1010 = vector.broadcast %1009 : vector<8x1xf32> to vector<8x4xf32>
    %1011 = arith.mulf %1010, %1001 : vector<8x4xf32>
    %1012 = arith.addf %1008, %1011 : vector<8x4xf32>
    %1013 = vector.extract_strided_slice %853 {offsets = [0, 1], sizes = [8, 1], strides = [1, 1]} : vector<8x9xf32> to vector<8x1xf32>
    %1014 = vector.broadcast %1013 : vector<8x1xf32> to vector<8x4xf32>
    %1015 = arith.mulf %1014, %995 : vector<8x4xf32>
    %1016 = vector.extract_strided_slice %853 {offsets = [0, 4], sizes = [8, 1], strides = [1, 1]} : vector<8x9xf32> to vector<8x1xf32>
    %1017 = vector.broadcast %1016 : vector<8x1xf32> to vector<8x4xf32>
    %1018 = arith.mulf %1017, %998 : vector<8x4xf32>
    %1019 = arith.addf %1015, %1018 : vector<8x4xf32>
    %1020 = vector.extract_strided_slice %853 {offsets = [0, 7], sizes = [8, 1], strides = [1, 1]} : vector<8x9xf32> to vector<8x1xf32>
    %1021 = vector.broadcast %1020 : vector<8x1xf32> to vector<8x4xf32>
    %1022 = arith.mulf %1021, %1001 : vector<8x4xf32>
    %1023 = arith.addf %1019, %1022 : vector<8x4xf32>
    %1024 = vector.extract_strided_slice %853 {offsets = [0, 2], sizes = [8, 1], strides = [1, 1]} : vector<8x9xf32> to vector<8x1xf32>
    %1025 = vector.broadcast %1024 : vector<8x1xf32> to vector<8x4xf32>
    %1026 = arith.mulf %1025, %995 : vector<8x4xf32>
    %1027 = vector.extract_strided_slice %853 {offsets = [0, 5], sizes = [8, 1], strides = [1, 1]} : vector<8x9xf32> to vector<8x1xf32>
    %1028 = vector.broadcast %1027 : vector<8x1xf32> to vector<8x4xf32>
    %1029 = arith.mulf %1028, %998 : vector<8x4xf32>
    %1030 = arith.addf %1026, %1029 : vector<8x4xf32>
    %1031 = vector.extract_strided_slice %853 {offsets = [0, 8], sizes = [8, 1], strides = [1, 1]} : vector<8x9xf32> to vector<8x1xf32>
    %1032 = vector.broadcast %1031 : vector<8x1xf32> to vector<8x4xf32>
    %1033 = arith.mulf %1032, %1001 : vector<8x4xf32>
    %1034 = arith.addf %1030, %1033 : vector<8x4xf32>
    %1035 = arith.mulf %1012, %1012 : vector<8x4xf32>
    %1036 = arith.mulf %1023, %1023 : vector<8x4xf32>
    %1037 = arith.addf %1035, %1036 : vector<8x4xf32>
    %1038 = arith.mulf %1034, %1034 : vector<8x4xf32>
    %1039 = arith.addf %1037, %1038 : vector<8x4xf32>
    %1040 = math.sqrt %1039 : vector<8x4xf32>
    %1041 = tpu.concatenate %992, %964, %1012, %1023, %1034, %1040 in 1 : vector<8x8xf32>, vector<8x8xf32>, vector<8x4xf32>, vector<8x4xf32>, vector<8x4xf32>, vector<8x4xf32> -> vector<8x32xf32>
    %c1_250 = arith.constant 1 : index
    %1042 = memref.load %arg12[%c1_250] : memref<4xf32, #tpu.memory_space<smem>>
    %1043 = vector.extract_strided_slice %6 {offsets = [8, 8], sizes = [8, 8], strides = [1, 1]} : vector<16x32xf32> to vector<8x8xf32>
    %cst_251 = arith.constant 0.204124153 : f32
    %1044 = vector.broadcast %cst_251 : f32 to vector<8x8xf32>
    %1045 = arith.mulf %1043, %1044 : vector<8x8xf32>
    %1046 = vector.extract_strided_slice %10 {offsets = [16, 8], sizes = [16, 8], strides = [1, 1]} : vector<32x32xf32> to vector<16x8xf32>
    %1047 = vector.extract_strided_slice %35 {offsets = [8, 4], sizes = [8, 4], strides = [1, 1]} : vector<16x16xf32> to vector<8x4xf32>
    %1048 = vector.broadcast %1042 : f32 to vector<8x4xf32>
    %1049 = arith.mulf %1047, %1048 : vector<8x4xf32>
    %1050 = vector.extract_strided_slice %49 {offsets = [8, 4], sizes = [8, 4], strides = [1, 1]} : vector<16x16xf32> to vector<8x4xf32>
    %1051 = vector.broadcast %1042 : f32 to vector<8x4xf32>
    %1052 = arith.mulf %1050, %1051 : vector<8x4xf32>
    %1053 = vector.extract_strided_slice %63 {offsets = [8, 4], sizes = [8, 4], strides = [1, 1]} : vector<16x16xf32> to vector<8x4xf32>
    %1054 = vector.broadcast %1042 : f32 to vector<8x4xf32>
    %1055 = arith.mulf %1053, %1054 : vector<8x4xf32>
    %1056 = vector.extract_strided_slice %77 {offsets = [16, 4], sizes = [16, 4], strides = [1, 1]} : vector<32x16xf32> to vector<16x4xf32>
    %1057 = vector.broadcast %1042 : f32 to vector<16x4xf32>
    %1058 = arith.mulf %1056, %1057 : vector<16x4xf32>
    %1059 = vector.extract_strided_slice %91 {offsets = [16, 4], sizes = [16, 4], strides = [1, 1]} : vector<32x16xf32> to vector<16x4xf32>
    %1060 = vector.broadcast %1042 : f32 to vector<16x4xf32>
    %1061 = arith.mulf %1059, %1060 : vector<16x4xf32>
    %1062 = vector.extract_strided_slice %105 {offsets = [16, 4], sizes = [16, 4], strides = [1, 1]} : vector<32x16xf32> to vector<16x4xf32>
    %1063 = vector.broadcast %1042 : f32 to vector<16x4xf32>
    %1064 = arith.mulf %1062, %1063 : vector<16x4xf32>
    %1065 = arith.mulf %1049, %1049 : vector<8x4xf32>
    %1066 = arith.mulf %1052, %1052 : vector<8x4xf32>
    %1067 = arith.addf %1065, %1066 : vector<8x4xf32>
    %1068 = arith.mulf %1055, %1055 : vector<8x4xf32>
    %1069 = arith.addf %1067, %1068 : vector<8x4xf32>
    %cst_252 = arith.constant dense<0.000000e+00> : vector<8xf32>
    %1070 = vector.multi_reduction <add>, %1069, %cst_252 [1] : vector<8x4xf32> to vector<8xf32>
    %1071 = vector.shape_cast %1070 : vector<8xf32> to vector<8x1xf32>
    %cst_253 = arith.constant 5.000000e-01 : f32
    %1072 = vector.broadcast %cst_253 : f32 to vector<8x1xf32>
    %1073 = arith.mulf %1072, %1071 : vector<8x1xf32>
    %1074 = arith.mulf %1058, %1058 : vector<16x4xf32>
    %1075 = arith.mulf %1061, %1061 : vector<16x4xf32>
    %1076 = arith.addf %1074, %1075 : vector<16x4xf32>
    %1077 = arith.mulf %1064, %1064 : vector<16x4xf32>
    %1078 = arith.addf %1076, %1077 : vector<16x4xf32>
    %cst_254 = arith.constant dense<0.000000e+00> : vector<16xf32>
    %1079 = vector.multi_reduction <add>, %1078, %cst_254 [1] : vector<16x4xf32> to vector<16xf32>
    %1080 = vector.shape_cast %1079 : vector<16xf32> to vector<16x1xf32>
    %cst_255 = arith.constant 5.000000e-01 : f32
    %1081 = vector.broadcast %cst_255 : f32 to vector<16x1xf32>
    %1082 = arith.mulf %1081, %1080 : vector<16x1xf32>
    %cst_256 = arith.constant 0.000000e+00 : f32
    %1083 = vector.broadcast %cst_256 : f32 to vector<8x1xf32>
    %1084 = arith.subf %1083, %1073 : vector<8x1xf32>
    %1085 = tpu.concatenate %1045, %1049, %1052, %1055, %1084, %149 in 1 : vector<8x8xf32>, vector<8x4xf32>, vector<8x4xf32>, vector<8x4xf32>, vector<8x1xf32>, vector<8x1xf32> -> vector<8x22xf32>
    %1086 = tpu.concatenate %1046, %1058, %1061, %1064, %148, %1082 in 1 : vector<16x8xf32>, vector<16x4xf32>, vector<16x4xf32>, vector<16x4xf32>, vector<16x1xf32>, vector<16x1xf32> -> vector<16x22xf32>
    %cst_257 = arith.constant dense<0.000000e+00> : vector<8x16xf32>
    %1087 = tpu.matmul %1085, %1086, %cst_257 {dimension_numbers = #tpu.dot_dimension_numbers<[1], [1], [0], [0], [0, 0, 1, 0], [], []>, precision = #tpu.contract_precision<fp32>} : vector<8x22xf32>, vector<16x22xf32>, vector<8x16xf32> -> vector<8x16xf32>
    %c1_258 = arith.constant 1 : index
    %c0_259 = arith.constant 0 : index
    %1088 = memref.load %arg11[%c1_258, %c0_259] : memref<4x8xf32, #tpu.memory_space<smem>>
    %1089 = vector.broadcast %1088 : f32 to vector<8x16xf32>
    %1090 = arith.mulf %1089, %856 : vector<8x16xf32>
    %c1_260 = arith.constant 1 : index
    %c1_261 = arith.constant 1 : index
    %1091 = memref.load %arg11[%c1_260, %c1_261] : memref<4x8xf32, #tpu.memory_space<smem>>
    %1092 = vector.broadcast %1091 : f32 to vector<8x16xf32>
    %1093 = arith.mulf %1092, %858 : vector<8x16xf32>
    %1094 = arith.addf %1090, %1093 : vector<8x16xf32>
    %c1_262 = arith.constant 1 : index
    %c2_263 = arith.constant 2 : index
    %1095 = memref.load %arg11[%c1_262, %c2_263] : memref<4x8xf32, #tpu.memory_space<smem>>
    %1096 = vector.broadcast %1095 : f32 to vector<8x16xf32>
    %1097 = arith.mulf %1096, %860 : vector<8x16xf32>
    %1098 = arith.addf %1094, %1097 : vector<8x16xf32>
    %c1_264 = arith.constant 1 : index
    %c3_265 = arith.constant 3 : index
    %1099 = memref.load %arg11[%c1_264, %c3_265] : memref<4x8xf32, #tpu.memory_space<smem>>
    %1100 = vector.broadcast %1099 : f32 to vector<8x16xf32>
    %1101 = arith.mulf %1100, %862 : vector<8x16xf32>
    %1102 = arith.addf %1098, %1101 : vector<8x16xf32>
    %c1_266 = arith.constant 1 : index
    %c4_267 = arith.constant 4 : index
    %1103 = memref.load %arg11[%c1_266, %c4_267] : memref<4x8xf32, #tpu.memory_space<smem>>
    %1104 = vector.broadcast %1103 : f32 to vector<8x16xf32>
    %1105 = arith.mulf %1104, %864 : vector<8x16xf32>
    %1106 = arith.addf %1102, %1105 : vector<8x16xf32>
    %c1_268 = arith.constant 1 : index
    %c5_269 = arith.constant 5 : index
    %1107 = memref.load %arg11[%c1_268, %c5_269] : memref<4x8xf32, #tpu.memory_space<smem>>
    %1108 = vector.broadcast %1107 : f32 to vector<8x16xf32>
    %1109 = arith.mulf %1108, %866 : vector<8x16xf32>
    %1110 = arith.addf %1106, %1109 : vector<8x16xf32>
    %c1_270 = arith.constant 1 : index
    %c6_271 = arith.constant 6 : index
    %1111 = memref.load %arg11[%c1_270, %c6_271] : memref<4x8xf32, #tpu.memory_space<smem>>
    %1112 = vector.broadcast %1111 : f32 to vector<8x16xf32>
    %1113 = arith.mulf %1112, %868 : vector<8x16xf32>
    %1114 = arith.addf %1110, %1113 : vector<8x16xf32>
    %c1_272 = arith.constant 1 : index
    %c7_273 = arith.constant 7 : index
    %1115 = memref.load %arg11[%c1_272, %c7_273] : memref<4x8xf32, #tpu.memory_space<smem>>
    %1116 = vector.broadcast %1115 : f32 to vector<8x16xf32>
    %1117 = arith.mulf %1116, %870 : vector<8x16xf32>
    %1118 = arith.addf %1114, %1117 : vector<8x16xf32>
    %1119 = arith.addf %1087, %1118 : vector<8x16xf32>
    %cst_274 = arith.constant dense<0xFF800000> : vector<8xf32>
    %1120 = vector.multi_reduction <maximumf>, %1119, %cst_274 [1] : vector<8x16xf32> to vector<8xf32>
    %1121 = vector.shape_cast %1120 : vector<8xf32> to vector<8x1xf32>
    %1122 = vector.broadcast %1121 : vector<8x1xf32> to vector<8x16xf32>
    %1123 = arith.subf %1119, %1122 : vector<8x16xf32>
    %1124 = math.exp %1123 : vector<8x16xf32>
    %cst_275 = arith.constant dense<0.000000e+00> : vector<8xf32>
    %1125 = vector.multi_reduction <add>, %1124, %cst_275 [1] : vector<8x16xf32> to vector<8xf32>
    %1126 = vector.shape_cast %1125 : vector<8xf32> to vector<8x1xf32>
    %1127 = vector.broadcast %1126 : vector<8x1xf32> to vector<8x16xf32>
    %1128 = arith.divf %1124, %1127 : vector<8x16xf32>
    %1129 = vector.extract_strided_slice %11 {offsets = [16, 8], sizes = [16, 8], strides = [1, 1]} : vector<32x32xf32> to vector<16x8xf32>
    %1130 = vector.extract_strided_slice %119 {offsets = [16, 4], sizes = [16, 4], strides = [1, 1]} : vector<32x16xf32> to vector<16x4xf32>
    %1131 = vector.extract_strided_slice %133 {offsets = [16, 4], sizes = [16, 4], strides = [1, 1]} : vector<32x16xf32> to vector<16x4xf32>
    %1132 = vector.extract_strided_slice %147 {offsets = [16, 4], sizes = [16, 4], strides = [1, 1]} : vector<32x16xf32> to vector<16x4xf32>
    %1133 = tpu.concatenate %1129, %1130, %1131, %1132 in 1 : vector<16x8xf32>, vector<16x4xf32>, vector<16x4xf32>, vector<16x4xf32> -> vector<16x20xf32>
    %cst_276 = arith.constant dense<0.000000e+00> : vector<8x20xf32>
    %1134 = tpu.matmul %1128, %1133, %cst_276 {dimension_numbers = #tpu.dot_dimension_numbers<[1], [0], [0], [1], [0, 0, 1, 1], [], []>, precision = #tpu.contract_precision<fp32>} : vector<8x16xf32>, vector<16x20xf32>, vector<8x20xf32> -> vector<8x20xf32>
    %1135 = vector.extract_strided_slice %1134 {offsets = [0, 0], sizes = [8, 8], strides = [1, 1]} : vector<8x20xf32> to vector<8x8xf32>
    %1136 = vector.extract_strided_slice %1134 {offsets = [0, 8], sizes = [8, 4], strides = [1, 1]} : vector<8x20xf32> to vector<8x4xf32>
    %1137 = vector.extract_strided_slice %1134 {offsets = [0, 12], sizes = [8, 4], strides = [1, 1]} : vector<8x20xf32> to vector<8x4xf32>
    %1138 = vector.extract_strided_slice %1134 {offsets = [0, 16], sizes = [8, 4], strides = [1, 1]} : vector<8x20xf32> to vector<8x4xf32>
    %1139 = arith.mulf %1128, %856 : vector<8x16xf32>
    %cst_277 = arith.constant dense<0.000000e+00> : vector<8xf32>
    %1140 = vector.multi_reduction <add>, %1139, %cst_277 [1] : vector<8x16xf32> to vector<8xf32>
    %1141 = vector.shape_cast %1140 : vector<8xf32> to vector<8x1xf32>
    %1142 = arith.mulf %1128, %858 : vector<8x16xf32>
    %cst_278 = arith.constant dense<0.000000e+00> : vector<8xf32>
    %1143 = vector.multi_reduction <add>, %1142, %cst_278 [1] : vector<8x16xf32> to vector<8xf32>
    %1144 = vector.shape_cast %1143 : vector<8xf32> to vector<8x1xf32>
    %1145 = arith.mulf %1128, %860 : vector<8x16xf32>
    %cst_279 = arith.constant dense<0.000000e+00> : vector<8xf32>
    %1146 = vector.multi_reduction <add>, %1145, %cst_279 [1] : vector<8x16xf32> to vector<8xf32>
    %1147 = vector.shape_cast %1146 : vector<8xf32> to vector<8x1xf32>
    %1148 = arith.mulf %1128, %862 : vector<8x16xf32>
    %cst_280 = arith.constant dense<0.000000e+00> : vector<8xf32>
    %1149 = vector.multi_reduction <add>, %1148, %cst_280 [1] : vector<8x16xf32> to vector<8xf32>
    %1150 = vector.shape_cast %1149 : vector<8xf32> to vector<8x1xf32>
    %1151 = arith.mulf %1128, %864 : vector<8x16xf32>
    %cst_281 = arith.constant dense<0.000000e+00> : vector<8xf32>
    %1152 = vector.multi_reduction <add>, %1151, %cst_281 [1] : vector<8x16xf32> to vector<8xf32>
    %1153 = vector.shape_cast %1152 : vector<8xf32> to vector<8x1xf32>
    %1154 = arith.mulf %1128, %866 : vector<8x16xf32>
    %cst_282 = arith.constant dense<0.000000e+00> : vector<8xf32>
    %1155 = vector.multi_reduction <add>, %1154, %cst_282 [1] : vector<8x16xf32> to vector<8xf32>
    %1156 = vector.shape_cast %1155 : vector<8xf32> to vector<8x1xf32>
    %1157 = arith.mulf %1128, %868 : vector<8x16xf32>
    %cst_283 = arith.constant dense<0.000000e+00> : vector<8xf32>
    %1158 = vector.multi_reduction <add>, %1157, %cst_283 [1] : vector<8x16xf32> to vector<8xf32>
    %1159 = vector.shape_cast %1158 : vector<8xf32> to vector<8x1xf32>
    %1160 = arith.mulf %1128, %870 : vector<8x16xf32>
    %cst_284 = arith.constant dense<0.000000e+00> : vector<8xf32>
    %1161 = vector.multi_reduction <add>, %1160, %cst_284 [1] : vector<8x16xf32> to vector<8xf32>
    %1162 = vector.shape_cast %1161 : vector<8xf32> to vector<8x1xf32>
    %1163 = tpu.concatenate %1141, %1144, %1147, %1150, %1153, %1156, %1159, %1162 in 1 : vector<8x1xf32>, vector<8x1xf32>, vector<8x1xf32>, vector<8x1xf32>, vector<8x1xf32>, vector<8x1xf32>, vector<8x1xf32>, vector<8x1xf32> -> vector<8x8xf32>
    %1164 = vector.extract_strided_slice %854 {offsets = [0, 0], sizes = [8, 1], strides = [1, 1]} : vector<8x3xf32> to vector<8x1xf32>
    %1165 = vector.broadcast %1164 : vector<8x1xf32> to vector<8x4xf32>
    %1166 = arith.subf %1136, %1165 : vector<8x4xf32>
    %1167 = vector.extract_strided_slice %854 {offsets = [0, 1], sizes = [8, 1], strides = [1, 1]} : vector<8x3xf32> to vector<8x1xf32>
    %1168 = vector.broadcast %1167 : vector<8x1xf32> to vector<8x4xf32>
    %1169 = arith.subf %1137, %1168 : vector<8x4xf32>
    %1170 = vector.extract_strided_slice %854 {offsets = [0, 2], sizes = [8, 1], strides = [1, 1]} : vector<8x3xf32> to vector<8x1xf32>
    %1171 = vector.broadcast %1170 : vector<8x1xf32> to vector<8x4xf32>
    %1172 = arith.subf %1138, %1171 : vector<8x4xf32>
    %1173 = vector.extract_strided_slice %853 {offsets = [0, 0], sizes = [8, 1], strides = [1, 1]} : vector<8x9xf32> to vector<8x1xf32>
    %1174 = vector.broadcast %1173 : vector<8x1xf32> to vector<8x4xf32>
    %1175 = arith.mulf %1174, %1166 : vector<8x4xf32>
    %1176 = vector.extract_strided_slice %853 {offsets = [0, 3], sizes = [8, 1], strides = [1, 1]} : vector<8x9xf32> to vector<8x1xf32>
    %1177 = vector.broadcast %1176 : vector<8x1xf32> to vector<8x4xf32>
    %1178 = arith.mulf %1177, %1169 : vector<8x4xf32>
    %1179 = arith.addf %1175, %1178 : vector<8x4xf32>
    %1180 = vector.extract_strided_slice %853 {offsets = [0, 6], sizes = [8, 1], strides = [1, 1]} : vector<8x9xf32> to vector<8x1xf32>
    %1181 = vector.broadcast %1180 : vector<8x1xf32> to vector<8x4xf32>
    %1182 = arith.mulf %1181, %1172 : vector<8x4xf32>
    %1183 = arith.addf %1179, %1182 : vector<8x4xf32>
    %1184 = vector.extract_strided_slice %853 {offsets = [0, 1], sizes = [8, 1], strides = [1, 1]} : vector<8x9xf32> to vector<8x1xf32>
    %1185 = vector.broadcast %1184 : vector<8x1xf32> to vector<8x4xf32>
    %1186 = arith.mulf %1185, %1166 : vector<8x4xf32>
    %1187 = vector.extract_strided_slice %853 {offsets = [0, 4], sizes = [8, 1], strides = [1, 1]} : vector<8x9xf32> to vector<8x1xf32>
    %1188 = vector.broadcast %1187 : vector<8x1xf32> to vector<8x4xf32>
    %1189 = arith.mulf %1188, %1169 : vector<8x4xf32>
    %1190 = arith.addf %1186, %1189 : vector<8x4xf32>
    %1191 = vector.extract_strided_slice %853 {offsets = [0, 7], sizes = [8, 1], strides = [1, 1]} : vector<8x9xf32> to vector<8x1xf32>
    %1192 = vector.broadcast %1191 : vector<8x1xf32> to vector<8x4xf32>
    %1193 = arith.mulf %1192, %1172 : vector<8x4xf32>
    %1194 = arith.addf %1190, %1193 : vector<8x4xf32>
    %1195 = vector.extract_strided_slice %853 {offsets = [0, 2], sizes = [8, 1], strides = [1, 1]} : vector<8x9xf32> to vector<8x1xf32>
    %1196 = vector.broadcast %1195 : vector<8x1xf32> to vector<8x4xf32>
    %1197 = arith.mulf %1196, %1166 : vector<8x4xf32>
    %1198 = vector.extract_strided_slice %853 {offsets = [0, 5], sizes = [8, 1], strides = [1, 1]} : vector<8x9xf32> to vector<8x1xf32>
    %1199 = vector.broadcast %1198 : vector<8x1xf32> to vector<8x4xf32>
    %1200 = arith.mulf %1199, %1169 : vector<8x4xf32>
    %1201 = arith.addf %1197, %1200 : vector<8x4xf32>
    %1202 = vector.extract_strided_slice %853 {offsets = [0, 8], sizes = [8, 1], strides = [1, 1]} : vector<8x9xf32> to vector<8x1xf32>
    %1203 = vector.broadcast %1202 : vector<8x1xf32> to vector<8x4xf32>
    %1204 = arith.mulf %1203, %1172 : vector<8x4xf32>
    %1205 = arith.addf %1201, %1204 : vector<8x4xf32>
    %1206 = arith.mulf %1183, %1183 : vector<8x4xf32>
    %1207 = arith.mulf %1194, %1194 : vector<8x4xf32>
    %1208 = arith.addf %1206, %1207 : vector<8x4xf32>
    %1209 = arith.mulf %1205, %1205 : vector<8x4xf32>
    %1210 = arith.addf %1208, %1209 : vector<8x4xf32>
    %1211 = math.sqrt %1210 : vector<8x4xf32>
    %1212 = tpu.concatenate %1163, %1135, %1183, %1194, %1205, %1211 in 1 : vector<8x8xf32>, vector<8x8xf32>, vector<8x4xf32>, vector<8x4xf32>, vector<8x4xf32>, vector<8x4xf32> -> vector<8x32xf32>
    %c2_285 = arith.constant 2 : index
    %1213 = memref.load %arg12[%c2_285] : memref<4xf32, #tpu.memory_space<smem>>
    %1214 = vector.extract_strided_slice %6 {offsets = [8, 16], sizes = [8, 8], strides = [1, 1]} : vector<16x32xf32> to vector<8x8xf32>
    %cst_286 = arith.constant 0.204124153 : f32
    %1215 = vector.broadcast %cst_286 : f32 to vector<8x8xf32>
    %1216 = arith.mulf %1214, %1215 : vector<8x8xf32>
    %1217 = vector.extract_strided_slice %10 {offsets = [16, 16], sizes = [16, 8], strides = [1, 1]} : vector<32x32xf32> to vector<16x8xf32>
    %1218 = vector.extract_strided_slice %35 {offsets = [8, 8], sizes = [8, 4], strides = [1, 1]} : vector<16x16xf32> to vector<8x4xf32>
    %1219 = vector.broadcast %1213 : f32 to vector<8x4xf32>
    %1220 = arith.mulf %1218, %1219 : vector<8x4xf32>
    %1221 = vector.extract_strided_slice %49 {offsets = [8, 8], sizes = [8, 4], strides = [1, 1]} : vector<16x16xf32> to vector<8x4xf32>
    %1222 = vector.broadcast %1213 : f32 to vector<8x4xf32>
    %1223 = arith.mulf %1221, %1222 : vector<8x4xf32>
    %1224 = vector.extract_strided_slice %63 {offsets = [8, 8], sizes = [8, 4], strides = [1, 1]} : vector<16x16xf32> to vector<8x4xf32>
    %1225 = vector.broadcast %1213 : f32 to vector<8x4xf32>
    %1226 = arith.mulf %1224, %1225 : vector<8x4xf32>
    %1227 = vector.extract_strided_slice %77 {offsets = [16, 8], sizes = [16, 4], strides = [1, 1]} : vector<32x16xf32> to vector<16x4xf32>
    %1228 = vector.broadcast %1213 : f32 to vector<16x4xf32>
    %1229 = arith.mulf %1227, %1228 : vector<16x4xf32>
    %1230 = vector.extract_strided_slice %91 {offsets = [16, 8], sizes = [16, 4], strides = [1, 1]} : vector<32x16xf32> to vector<16x4xf32>
    %1231 = vector.broadcast %1213 : f32 to vector<16x4xf32>
    %1232 = arith.mulf %1230, %1231 : vector<16x4xf32>
    %1233 = vector.extract_strided_slice %105 {offsets = [16, 8], sizes = [16, 4], strides = [1, 1]} : vector<32x16xf32> to vector<16x4xf32>
    %1234 = vector.broadcast %1213 : f32 to vector<16x4xf32>
    %1235 = arith.mulf %1233, %1234 : vector<16x4xf32>
    %1236 = arith.mulf %1220, %1220 : vector<8x4xf32>
    %1237 = arith.mulf %1223, %1223 : vector<8x4xf32>
    %1238 = arith.addf %1236, %1237 : vector<8x4xf32>
    %1239 = arith.mulf %1226, %1226 : vector<8x4xf32>
    %1240 = arith.addf %1238, %1239 : vector<8x4xf32>
    %cst_287 = arith.constant dense<0.000000e+00> : vector<8xf32>
    %1241 = vector.multi_reduction <add>, %1240, %cst_287 [1] : vector<8x4xf32> to vector<8xf32>
    %1242 = vector.shape_cast %1241 : vector<8xf32> to vector<8x1xf32>
    %cst_288 = arith.constant 5.000000e-01 : f32
    %1243 = vector.broadcast %cst_288 : f32 to vector<8x1xf32>
    %1244 = arith.mulf %1243, %1242 : vector<8x1xf32>
    %1245 = arith.mulf %1229, %1229 : vector<16x4xf32>
    %1246 = arith.mulf %1232, %1232 : vector<16x4xf32>
    %1247 = arith.addf %1245, %1246 : vector<16x4xf32>
    %1248 = arith.mulf %1235, %1235 : vector<16x4xf32>
    %1249 = arith.addf %1247, %1248 : vector<16x4xf32>
    %cst_289 = arith.constant dense<0.000000e+00> : vector<16xf32>
    %1250 = vector.multi_reduction <add>, %1249, %cst_289 [1] : vector<16x4xf32> to vector<16xf32>
    %1251 = vector.shape_cast %1250 : vector<16xf32> to vector<16x1xf32>
    %cst_290 = arith.constant 5.000000e-01 : f32
    %1252 = vector.broadcast %cst_290 : f32 to vector<16x1xf32>
    %1253 = arith.mulf %1252, %1251 : vector<16x1xf32>
    %cst_291 = arith.constant 0.000000e+00 : f32
    %1254 = vector.broadcast %cst_291 : f32 to vector<8x1xf32>
    %1255 = arith.subf %1254, %1244 : vector<8x1xf32>
    %1256 = tpu.concatenate %1216, %1220, %1223, %1226, %1255, %149 in 1 : vector<8x8xf32>, vector<8x4xf32>, vector<8x4xf32>, vector<8x4xf32>, vector<8x1xf32>, vector<8x1xf32> -> vector<8x22xf32>
    %1257 = tpu.concatenate %1217, %1229, %1232, %1235, %148, %1253 in 1 : vector<16x8xf32>, vector<16x4xf32>, vector<16x4xf32>, vector<16x4xf32>, vector<16x1xf32>, vector<16x1xf32> -> vector<16x22xf32>
    %cst_292 = arith.constant dense<0.000000e+00> : vector<8x16xf32>
    %1258 = tpu.matmul %1256, %1257, %cst_292 {dimension_numbers = #tpu.dot_dimension_numbers<[1], [1], [0], [0], [0, 0, 1, 0], [], []>, precision = #tpu.contract_precision<fp32>} : vector<8x22xf32>, vector<16x22xf32>, vector<8x16xf32> -> vector<8x16xf32>
    %c2_293 = arith.constant 2 : index
    %c0_294 = arith.constant 0 : index
    %1259 = memref.load %arg11[%c2_293, %c0_294] : memref<4x8xf32, #tpu.memory_space<smem>>
    %1260 = vector.broadcast %1259 : f32 to vector<8x16xf32>
    %1261 = arith.mulf %1260, %856 : vector<8x16xf32>
    %c2_295 = arith.constant 2 : index
    %c1_296 = arith.constant 1 : index
    %1262 = memref.load %arg11[%c2_295, %c1_296] : memref<4x8xf32, #tpu.memory_space<smem>>
    %1263 = vector.broadcast %1262 : f32 to vector<8x16xf32>
    %1264 = arith.mulf %1263, %858 : vector<8x16xf32>
    %1265 = arith.addf %1261, %1264 : vector<8x16xf32>
    %c2_297 = arith.constant 2 : index
    %c2_298 = arith.constant 2 : index
    %1266 = memref.load %arg11[%c2_297, %c2_298] : memref<4x8xf32, #tpu.memory_space<smem>>
    %1267 = vector.broadcast %1266 : f32 to vector<8x16xf32>
    %1268 = arith.mulf %1267, %860 : vector<8x16xf32>
    %1269 = arith.addf %1265, %1268 : vector<8x16xf32>
    %c2_299 = arith.constant 2 : index
    %c3_300 = arith.constant 3 : index
    %1270 = memref.load %arg11[%c2_299, %c3_300] : memref<4x8xf32, #tpu.memory_space<smem>>
    %1271 = vector.broadcast %1270 : f32 to vector<8x16xf32>
    %1272 = arith.mulf %1271, %862 : vector<8x16xf32>
    %1273 = arith.addf %1269, %1272 : vector<8x16xf32>
    %c2_301 = arith.constant 2 : index
    %c4_302 = arith.constant 4 : index
    %1274 = memref.load %arg11[%c2_301, %c4_302] : memref<4x8xf32, #tpu.memory_space<smem>>
    %1275 = vector.broadcast %1274 : f32 to vector<8x16xf32>
    %1276 = arith.mulf %1275, %864 : vector<8x16xf32>
    %1277 = arith.addf %1273, %1276 : vector<8x16xf32>
    %c2_303 = arith.constant 2 : index
    %c5_304 = arith.constant 5 : index
    %1278 = memref.load %arg11[%c2_303, %c5_304] : memref<4x8xf32, #tpu.memory_space<smem>>
    %1279 = vector.broadcast %1278 : f32 to vector<8x16xf32>
    %1280 = arith.mulf %1279, %866 : vector<8x16xf32>
    %1281 = arith.addf %1277, %1280 : vector<8x16xf32>
    %c2_305 = arith.constant 2 : index
    %c6_306 = arith.constant 6 : index
    %1282 = memref.load %arg11[%c2_305, %c6_306] : memref<4x8xf32, #tpu.memory_space<smem>>
    %1283 = vector.broadcast %1282 : f32 to vector<8x16xf32>
    %1284 = arith.mulf %1283, %868 : vector<8x16xf32>
    %1285 = arith.addf %1281, %1284 : vector<8x16xf32>
    %c2_307 = arith.constant 2 : index
    %c7_308 = arith.constant 7 : index
    %1286 = memref.load %arg11[%c2_307, %c7_308] : memref<4x8xf32, #tpu.memory_space<smem>>
    %1287 = vector.broadcast %1286 : f32 to vector<8x16xf32>
    %1288 = arith.mulf %1287, %870 : vector<8x16xf32>
    %1289 = arith.addf %1285, %1288 : vector<8x16xf32>
    %1290 = arith.addf %1258, %1289 : vector<8x16xf32>
    %cst_309 = arith.constant dense<0xFF800000> : vector<8xf32>
    %1291 = vector.multi_reduction <maximumf>, %1290, %cst_309 [1] : vector<8x16xf32> to vector<8xf32>
    %1292 = vector.shape_cast %1291 : vector<8xf32> to vector<8x1xf32>
    %1293 = vector.broadcast %1292 : vector<8x1xf32> to vector<8x16xf32>
    %1294 = arith.subf %1290, %1293 : vector<8x16xf32>
    %1295 = math.exp %1294 : vector<8x16xf32>
    %cst_310 = arith.constant dense<0.000000e+00> : vector<8xf32>
    %1296 = vector.multi_reduction <add>, %1295, %cst_310 [1] : vector<8x16xf32> to vector<8xf32>
    %1297 = vector.shape_cast %1296 : vector<8xf32> to vector<8x1xf32>
    %1298 = vector.broadcast %1297 : vector<8x1xf32> to vector<8x16xf32>
    %1299 = arith.divf %1295, %1298 : vector<8x16xf32>
    %1300 = vector.extract_strided_slice %11 {offsets = [16, 16], sizes = [16, 8], strides = [1, 1]} : vector<32x32xf32> to vector<16x8xf32>
    %1301 = vector.extract_strided_slice %119 {offsets = [16, 8], sizes = [16, 4], strides = [1, 1]} : vector<32x16xf32> to vector<16x4xf32>
    %1302 = vector.extract_strided_slice %133 {offsets = [16, 8], sizes = [16, 4], strides = [1, 1]} : vector<32x16xf32> to vector<16x4xf32>
    %1303 = vector.extract_strided_slice %147 {offsets = [16, 8], sizes = [16, 4], strides = [1, 1]} : vector<32x16xf32> to vector<16x4xf32>
    %1304 = tpu.concatenate %1300, %1301, %1302, %1303 in 1 : vector<16x8xf32>, vector<16x4xf32>, vector<16x4xf32>, vector<16x4xf32> -> vector<16x20xf32>
    %cst_311 = arith.constant dense<0.000000e+00> : vector<8x20xf32>
    %1305 = tpu.matmul %1299, %1304, %cst_311 {dimension_numbers = #tpu.dot_dimension_numbers<[1], [0], [0], [1], [0, 0, 1, 1], [], []>, precision = #tpu.contract_precision<fp32>} : vector<8x16xf32>, vector<16x20xf32>, vector<8x20xf32> -> vector<8x20xf32>
    %1306 = vector.extract_strided_slice %1305 {offsets = [0, 0], sizes = [8, 8], strides = [1, 1]} : vector<8x20xf32> to vector<8x8xf32>
    %1307 = vector.extract_strided_slice %1305 {offsets = [0, 8], sizes = [8, 4], strides = [1, 1]} : vector<8x20xf32> to vector<8x4xf32>
    %1308 = vector.extract_strided_slice %1305 {offsets = [0, 12], sizes = [8, 4], strides = [1, 1]} : vector<8x20xf32> to vector<8x4xf32>
    %1309 = vector.extract_strided_slice %1305 {offsets = [0, 16], sizes = [8, 4], strides = [1, 1]} : vector<8x20xf32> to vector<8x4xf32>
    %1310 = arith.mulf %1299, %856 : vector<8x16xf32>
    %cst_312 = arith.constant dense<0.000000e+00> : vector<8xf32>
    %1311 = vector.multi_reduction <add>, %1310, %cst_312 [1] : vector<8x16xf32> to vector<8xf32>
    %1312 = vector.shape_cast %1311 : vector<8xf32> to vector<8x1xf32>
    %1313 = arith.mulf %1299, %858 : vector<8x16xf32>
    %cst_313 = arith.constant dense<0.000000e+00> : vector<8xf32>
    %1314 = vector.multi_reduction <add>, %1313, %cst_313 [1] : vector<8x16xf32> to vector<8xf32>
    %1315 = vector.shape_cast %1314 : vector<8xf32> to vector<8x1xf32>
    %1316 = arith.mulf %1299, %860 : vector<8x16xf32>
    %cst_314 = arith.constant dense<0.000000e+00> : vector<8xf32>
    %1317 = vector.multi_reduction <add>, %1316, %cst_314 [1] : vector<8x16xf32> to vector<8xf32>
    %1318 = vector.shape_cast %1317 : vector<8xf32> to vector<8x1xf32>
    %1319 = arith.mulf %1299, %862 : vector<8x16xf32>
    %cst_315 = arith.constant dense<0.000000e+00> : vector<8xf32>
    %1320 = vector.multi_reduction <add>, %1319, %cst_315 [1] : vector<8x16xf32> to vector<8xf32>
    %1321 = vector.shape_cast %1320 : vector<8xf32> to vector<8x1xf32>
    %1322 = arith.mulf %1299, %864 : vector<8x16xf32>
    %cst_316 = arith.constant dense<0.000000e+00> : vector<8xf32>
    %1323 = vector.multi_reduction <add>, %1322, %cst_316 [1] : vector<8x16xf32> to vector<8xf32>
    %1324 = vector.shape_cast %1323 : vector<8xf32> to vector<8x1xf32>
    %1325 = arith.mulf %1299, %866 : vector<8x16xf32>
    %cst_317 = arith.constant dense<0.000000e+00> : vector<8xf32>
    %1326 = vector.multi_reduction <add>, %1325, %cst_317 [1] : vector<8x16xf32> to vector<8xf32>
    %1327 = vector.shape_cast %1326 : vector<8xf32> to vector<8x1xf32>
    %1328 = arith.mulf %1299, %868 : vector<8x16xf32>
    %cst_318 = arith.constant dense<0.000000e+00> : vector<8xf32>
    %1329 = vector.multi_reduction <add>, %1328, %cst_318 [1] : vector<8x16xf32> to vector<8xf32>
    %1330 = vector.shape_cast %1329 : vector<8xf32> to vector<8x1xf32>
    %1331 = arith.mulf %1299, %870 : vector<8x16xf32>
    %cst_319 = arith.constant dense<0.000000e+00> : vector<8xf32>
    %1332 = vector.multi_reduction <add>, %1331, %cst_319 [1] : vector<8x16xf32> to vector<8xf32>
    %1333 = vector.shape_cast %1332 : vector<8xf32> to vector<8x1xf32>
    %1334 = tpu.concatenate %1312, %1315, %1318, %1321, %1324, %1327, %1330, %1333 in 1 : vector<8x1xf32>, vector<8x1xf32>, vector<8x1xf32>, vector<8x1xf32>, vector<8x1xf32>, vector<8x1xf32>, vector<8x1xf32>, vector<8x1xf32> -> vector<8x8xf32>
    %1335 = vector.extract_strided_slice %854 {offsets = [0, 0], sizes = [8, 1], strides = [1, 1]} : vector<8x3xf32> to vector<8x1xf32>
    %1336 = vector.broadcast %1335 : vector<8x1xf32> to vector<8x4xf32>
    %1337 = arith.subf %1307, %1336 : vector<8x4xf32>
    %1338 = vector.extract_strided_slice %854 {offsets = [0, 1], sizes = [8, 1], strides = [1, 1]} : vector<8x3xf32> to vector<8x1xf32>
    %1339 = vector.broadcast %1338 : vector<8x1xf32> to vector<8x4xf32>
    %1340 = arith.subf %1308, %1339 : vector<8x4xf32>
    %1341 = vector.extract_strided_slice %854 {offsets = [0, 2], sizes = [8, 1], strides = [1, 1]} : vector<8x3xf32> to vector<8x1xf32>
    %1342 = vector.broadcast %1341 : vector<8x1xf32> to vector<8x4xf32>
    %1343 = arith.subf %1309, %1342 : vector<8x4xf32>
    %1344 = vector.extract_strided_slice %853 {offsets = [0, 0], sizes = [8, 1], strides = [1, 1]} : vector<8x9xf32> to vector<8x1xf32>
    %1345 = vector.broadcast %1344 : vector<8x1xf32> to vector<8x4xf32>
    %1346 = arith.mulf %1345, %1337 : vector<8x4xf32>
    %1347 = vector.extract_strided_slice %853 {offsets = [0, 3], sizes = [8, 1], strides = [1, 1]} : vector<8x9xf32> to vector<8x1xf32>
    %1348 = vector.broadcast %1347 : vector<8x1xf32> to vector<8x4xf32>
    %1349 = arith.mulf %1348, %1340 : vector<8x4xf32>
    %1350 = arith.addf %1346, %1349 : vector<8x4xf32>
    %1351 = vector.extract_strided_slice %853 {offsets = [0, 6], sizes = [8, 1], strides = [1, 1]} : vector<8x9xf32> to vector<8x1xf32>
    %1352 = vector.broadcast %1351 : vector<8x1xf32> to vector<8x4xf32>
    %1353 = arith.mulf %1352, %1343 : vector<8x4xf32>
    %1354 = arith.addf %1350, %1353 : vector<8x4xf32>
    %1355 = vector.extract_strided_slice %853 {offsets = [0, 1], sizes = [8, 1], strides = [1, 1]} : vector<8x9xf32> to vector<8x1xf32>
    %1356 = vector.broadcast %1355 : vector<8x1xf32> to vector<8x4xf32>
    %1357 = arith.mulf %1356, %1337 : vector<8x4xf32>
    %1358 = vector.extract_strided_slice %853 {offsets = [0, 4], sizes = [8, 1], strides = [1, 1]} : vector<8x9xf32> to vector<8x1xf32>
    %1359 = vector.broadcast %1358 : vector<8x1xf32> to vector<8x4xf32>
    %1360 = arith.mulf %1359, %1340 : vector<8x4xf32>
    %1361 = arith.addf %1357, %1360 : vector<8x4xf32>
    %1362 = vector.extract_strided_slice %853 {offsets = [0, 7], sizes = [8, 1], strides = [1, 1]} : vector<8x9xf32> to vector<8x1xf32>
    %1363 = vector.broadcast %1362 : vector<8x1xf32> to vector<8x4xf32>
    %1364 = arith.mulf %1363, %1343 : vector<8x4xf32>
    %1365 = arith.addf %1361, %1364 : vector<8x4xf32>
    %1366 = vector.extract_strided_slice %853 {offsets = [0, 2], sizes = [8, 1], strides = [1, 1]} : vector<8x9xf32> to vector<8x1xf32>
    %1367 = vector.broadcast %1366 : vector<8x1xf32> to vector<8x4xf32>
    %1368 = arith.mulf %1367, %1337 : vector<8x4xf32>
    %1369 = vector.extract_strided_slice %853 {offsets = [0, 5], sizes = [8, 1], strides = [1, 1]} : vector<8x9xf32> to vector<8x1xf32>
    %1370 = vector.broadcast %1369 : vector<8x1xf32> to vector<8x4xf32>
    %1371 = arith.mulf %1370, %1340 : vector<8x4xf32>
    %1372 = arith.addf %1368, %1371 : vector<8x4xf32>
    %1373 = vector.extract_strided_slice %853 {offsets = [0, 8], sizes = [8, 1], strides = [1, 1]} : vector<8x9xf32> to vector<8x1xf32>
    %1374 = vector.broadcast %1373 : vector<8x1xf32> to vector<8x4xf32>
    %1375 = arith.mulf %1374, %1343 : vector<8x4xf32>
    %1376 = arith.addf %1372, %1375 : vector<8x4xf32>
    %1377 = arith.mulf %1354, %1354 : vector<8x4xf32>
    %1378 = arith.mulf %1365, %1365 : vector<8x4xf32>
    %1379 = arith.addf %1377, %1378 : vector<8x4xf32>
    %1380 = arith.mulf %1376, %1376 : vector<8x4xf32>
    %1381 = arith.addf %1379, %1380 : vector<8x4xf32>
    %1382 = math.sqrt %1381 : vector<8x4xf32>
    %1383 = tpu.concatenate %1334, %1306, %1354, %1365, %1376, %1382 in 1 : vector<8x8xf32>, vector<8x8xf32>, vector<8x4xf32>, vector<8x4xf32>, vector<8x4xf32>, vector<8x4xf32> -> vector<8x32xf32>
    %c3_320 = arith.constant 3 : index
    %1384 = memref.load %arg12[%c3_320] : memref<4xf32, #tpu.memory_space<smem>>
    %1385 = vector.extract_strided_slice %6 {offsets = [8, 24], sizes = [8, 8], strides = [1, 1]} : vector<16x32xf32> to vector<8x8xf32>
    %cst_321 = arith.constant 0.204124153 : f32
    %1386 = vector.broadcast %cst_321 : f32 to vector<8x8xf32>
    %1387 = arith.mulf %1385, %1386 : vector<8x8xf32>
    %1388 = vector.extract_strided_slice %10 {offsets = [16, 24], sizes = [16, 8], strides = [1, 1]} : vector<32x32xf32> to vector<16x8xf32>
    %1389 = vector.extract_strided_slice %35 {offsets = [8, 12], sizes = [8, 4], strides = [1, 1]} : vector<16x16xf32> to vector<8x4xf32>
    %1390 = vector.broadcast %1384 : f32 to vector<8x4xf32>
    %1391 = arith.mulf %1389, %1390 : vector<8x4xf32>
    %1392 = vector.extract_strided_slice %49 {offsets = [8, 12], sizes = [8, 4], strides = [1, 1]} : vector<16x16xf32> to vector<8x4xf32>
    %1393 = vector.broadcast %1384 : f32 to vector<8x4xf32>
    %1394 = arith.mulf %1392, %1393 : vector<8x4xf32>
    %1395 = vector.extract_strided_slice %63 {offsets = [8, 12], sizes = [8, 4], strides = [1, 1]} : vector<16x16xf32> to vector<8x4xf32>
    %1396 = vector.broadcast %1384 : f32 to vector<8x4xf32>
    %1397 = arith.mulf %1395, %1396 : vector<8x4xf32>
    %1398 = vector.extract_strided_slice %77 {offsets = [16, 12], sizes = [16, 4], strides = [1, 1]} : vector<32x16xf32> to vector<16x4xf32>
    %1399 = vector.broadcast %1384 : f32 to vector<16x4xf32>
    %1400 = arith.mulf %1398, %1399 : vector<16x4xf32>
    %1401 = vector.extract_strided_slice %91 {offsets = [16, 12], sizes = [16, 4], strides = [1, 1]} : vector<32x16xf32> to vector<16x4xf32>
    %1402 = vector.broadcast %1384 : f32 to vector<16x4xf32>
    %1403 = arith.mulf %1401, %1402 : vector<16x4xf32>
    %1404 = vector.extract_strided_slice %105 {offsets = [16, 12], sizes = [16, 4], strides = [1, 1]} : vector<32x16xf32> to vector<16x4xf32>
    %1405 = vector.broadcast %1384 : f32 to vector<16x4xf32>
    %1406 = arith.mulf %1404, %1405 : vector<16x4xf32>
    %1407 = arith.mulf %1391, %1391 : vector<8x4xf32>
    %1408 = arith.mulf %1394, %1394 : vector<8x4xf32>
    %1409 = arith.addf %1407, %1408 : vector<8x4xf32>
    %1410 = arith.mulf %1397, %1397 : vector<8x4xf32>
    %1411 = arith.addf %1409, %1410 : vector<8x4xf32>
    %cst_322 = arith.constant dense<0.000000e+00> : vector<8xf32>
    %1412 = vector.multi_reduction <add>, %1411, %cst_322 [1] : vector<8x4xf32> to vector<8xf32>
    %1413 = vector.shape_cast %1412 : vector<8xf32> to vector<8x1xf32>
    %cst_323 = arith.constant 5.000000e-01 : f32
    %1414 = vector.broadcast %cst_323 : f32 to vector<8x1xf32>
    %1415 = arith.mulf %1414, %1413 : vector<8x1xf32>
    %1416 = arith.mulf %1400, %1400 : vector<16x4xf32>
    %1417 = arith.mulf %1403, %1403 : vector<16x4xf32>
    %1418 = arith.addf %1416, %1417 : vector<16x4xf32>
    %1419 = arith.mulf %1406, %1406 : vector<16x4xf32>
    %1420 = arith.addf %1418, %1419 : vector<16x4xf32>
    %cst_324 = arith.constant dense<0.000000e+00> : vector<16xf32>
    %1421 = vector.multi_reduction <add>, %1420, %cst_324 [1] : vector<16x4xf32> to vector<16xf32>
    %1422 = vector.shape_cast %1421 : vector<16xf32> to vector<16x1xf32>
    %cst_325 = arith.constant 5.000000e-01 : f32
    %1423 = vector.broadcast %cst_325 : f32 to vector<16x1xf32>
    %1424 = arith.mulf %1423, %1422 : vector<16x1xf32>
    %cst_326 = arith.constant 0.000000e+00 : f32
    %1425 = vector.broadcast %cst_326 : f32 to vector<8x1xf32>
    %1426 = arith.subf %1425, %1415 : vector<8x1xf32>
    %1427 = tpu.concatenate %1387, %1391, %1394, %1397, %1426, %149 in 1 : vector<8x8xf32>, vector<8x4xf32>, vector<8x4xf32>, vector<8x4xf32>, vector<8x1xf32>, vector<8x1xf32> -> vector<8x22xf32>
    %1428 = tpu.concatenate %1388, %1400, %1403, %1406, %148, %1424 in 1 : vector<16x8xf32>, vector<16x4xf32>, vector<16x4xf32>, vector<16x4xf32>, vector<16x1xf32>, vector<16x1xf32> -> vector<16x22xf32>
    %cst_327 = arith.constant dense<0.000000e+00> : vector<8x16xf32>
    %1429 = tpu.matmul %1427, %1428, %cst_327 {dimension_numbers = #tpu.dot_dimension_numbers<[1], [1], [0], [0], [0, 0, 1, 0], [], []>, precision = #tpu.contract_precision<fp32>} : vector<8x22xf32>, vector<16x22xf32>, vector<8x16xf32> -> vector<8x16xf32>
    %c3_328 = arith.constant 3 : index
    %c0_329 = arith.constant 0 : index
    %1430 = memref.load %arg11[%c3_328, %c0_329] : memref<4x8xf32, #tpu.memory_space<smem>>
    %1431 = vector.broadcast %1430 : f32 to vector<8x16xf32>
    %1432 = arith.mulf %1431, %856 : vector<8x16xf32>
    %c3_330 = arith.constant 3 : index
    %c1_331 = arith.constant 1 : index
    %1433 = memref.load %arg11[%c3_330, %c1_331] : memref<4x8xf32, #tpu.memory_space<smem>>
    %1434 = vector.broadcast %1433 : f32 to vector<8x16xf32>
    %1435 = arith.mulf %1434, %858 : vector<8x16xf32>
    %1436 = arith.addf %1432, %1435 : vector<8x16xf32>
    %c3_332 = arith.constant 3 : index
    %c2_333 = arith.constant 2 : index
    %1437 = memref.load %arg11[%c3_332, %c2_333] : memref<4x8xf32, #tpu.memory_space<smem>>
    %1438 = vector.broadcast %1437 : f32 to vector<8x16xf32>
    %1439 = arith.mulf %1438, %860 : vector<8x16xf32>
    %1440 = arith.addf %1436, %1439 : vector<8x16xf32>
    %c3_334 = arith.constant 3 : index
    %c3_335 = arith.constant 3 : index
    %1441 = memref.load %arg11[%c3_334, %c3_335] : memref<4x8xf32, #tpu.memory_space<smem>>
    %1442 = vector.broadcast %1441 : f32 to vector<8x16xf32>
    %1443 = arith.mulf %1442, %862 : vector<8x16xf32>
    %1444 = arith.addf %1440, %1443 : vector<8x16xf32>
    %c3_336 = arith.constant 3 : index
    %c4_337 = arith.constant 4 : index
    %1445 = memref.load %arg11[%c3_336, %c4_337] : memref<4x8xf32, #tpu.memory_space<smem>>
    %1446 = vector.broadcast %1445 : f32 to vector<8x16xf32>
    %1447 = arith.mulf %1446, %864 : vector<8x16xf32>
    %1448 = arith.addf %1444, %1447 : vector<8x16xf32>
    %c3_338 = arith.constant 3 : index
    %c5_339 = arith.constant 5 : index
    %1449 = memref.load %arg11[%c3_338, %c5_339] : memref<4x8xf32, #tpu.memory_space<smem>>
    %1450 = vector.broadcast %1449 : f32 to vector<8x16xf32>
    %1451 = arith.mulf %1450, %866 : vector<8x16xf32>
    %1452 = arith.addf %1448, %1451 : vector<8x16xf32>
    %c3_340 = arith.constant 3 : index
    %c6_341 = arith.constant 6 : index
    %1453 = memref.load %arg11[%c3_340, %c6_341] : memref<4x8xf32, #tpu.memory_space<smem>>
    %1454 = vector.broadcast %1453 : f32 to vector<8x16xf32>
    %1455 = arith.mulf %1454, %868 : vector<8x16xf32>
    %1456 = arith.addf %1452, %1455 : vector<8x16xf32>
    %c3_342 = arith.constant 3 : index
    %c7_343 = arith.constant 7 : index
    %1457 = memref.load %arg11[%c3_342, %c7_343] : memref<4x8xf32, #tpu.memory_space<smem>>
    %1458 = vector.broadcast %1457 : f32 to vector<8x16xf32>
    %1459 = arith.mulf %1458, %870 : vector<8x16xf32>
    %1460 = arith.addf %1456, %1459 : vector<8x16xf32>
    %1461 = arith.addf %1429, %1460 : vector<8x16xf32>
    %cst_344 = arith.constant dense<0xFF800000> : vector<8xf32>
    %1462 = vector.multi_reduction <maximumf>, %1461, %cst_344 [1] : vector<8x16xf32> to vector<8xf32>
    %1463 = vector.shape_cast %1462 : vector<8xf32> to vector<8x1xf32>
    %1464 = vector.broadcast %1463 : vector<8x1xf32> to vector<8x16xf32>
    %1465 = arith.subf %1461, %1464 : vector<8x16xf32>
    %1466 = math.exp %1465 : vector<8x16xf32>
    %cst_345 = arith.constant dense<0.000000e+00> : vector<8xf32>
    %1467 = vector.multi_reduction <add>, %1466, %cst_345 [1] : vector<8x16xf32> to vector<8xf32>
    %1468 = vector.shape_cast %1467 : vector<8xf32> to vector<8x1xf32>
    %1469 = vector.broadcast %1468 : vector<8x1xf32> to vector<8x16xf32>
    %1470 = arith.divf %1466, %1469 : vector<8x16xf32>
    %1471 = vector.extract_strided_slice %11 {offsets = [16, 24], sizes = [16, 8], strides = [1, 1]} : vector<32x32xf32> to vector<16x8xf32>
    %1472 = vector.extract_strided_slice %119 {offsets = [16, 12], sizes = [16, 4], strides = [1, 1]} : vector<32x16xf32> to vector<16x4xf32>
    %1473 = vector.extract_strided_slice %133 {offsets = [16, 12], sizes = [16, 4], strides = [1, 1]} : vector<32x16xf32> to vector<16x4xf32>
    %1474 = vector.extract_strided_slice %147 {offsets = [16, 12], sizes = [16, 4], strides = [1, 1]} : vector<32x16xf32> to vector<16x4xf32>
    %1475 = tpu.concatenate %1471, %1472, %1473, %1474 in 1 : vector<16x8xf32>, vector<16x4xf32>, vector<16x4xf32>, vector<16x4xf32> -> vector<16x20xf32>
    %cst_346 = arith.constant dense<0.000000e+00> : vector<8x20xf32>
    %1476 = tpu.matmul %1470, %1475, %cst_346 {dimension_numbers = #tpu.dot_dimension_numbers<[1], [0], [0], [1], [0, 0, 1, 1], [], []>, precision = #tpu.contract_precision<fp32>} : vector<8x16xf32>, vector<16x20xf32>, vector<8x20xf32> -> vector<8x20xf32>
    %1477 = vector.extract_strided_slice %1476 {offsets = [0, 0], sizes = [8, 8], strides = [1, 1]} : vector<8x20xf32> to vector<8x8xf32>
    %1478 = vector.extract_strided_slice %1476 {offsets = [0, 8], sizes = [8, 4], strides = [1, 1]} : vector<8x20xf32> to vector<8x4xf32>
    %1479 = vector.extract_strided_slice %1476 {offsets = [0, 12], sizes = [8, 4], strides = [1, 1]} : vector<8x20xf32> to vector<8x4xf32>
    %1480 = vector.extract_strided_slice %1476 {offsets = [0, 16], sizes = [8, 4], strides = [1, 1]} : vector<8x20xf32> to vector<8x4xf32>
    %1481 = arith.mulf %1470, %856 : vector<8x16xf32>
    %cst_347 = arith.constant dense<0.000000e+00> : vector<8xf32>
    %1482 = vector.multi_reduction <add>, %1481, %cst_347 [1] : vector<8x16xf32> to vector<8xf32>
    %1483 = vector.shape_cast %1482 : vector<8xf32> to vector<8x1xf32>
    %1484 = arith.mulf %1470, %858 : vector<8x16xf32>
    %cst_348 = arith.constant dense<0.000000e+00> : vector<8xf32>
    %1485 = vector.multi_reduction <add>, %1484, %cst_348 [1] : vector<8x16xf32> to vector<8xf32>
    %1486 = vector.shape_cast %1485 : vector<8xf32> to vector<8x1xf32>
    %1487 = arith.mulf %1470, %860 : vector<8x16xf32>
    %cst_349 = arith.constant dense<0.000000e+00> : vector<8xf32>
    %1488 = vector.multi_reduction <add>, %1487, %cst_349 [1] : vector<8x16xf32> to vector<8xf32>
    %1489 = vector.shape_cast %1488 : vector<8xf32> to vector<8x1xf32>
    %1490 = arith.mulf %1470, %862 : vector<8x16xf32>
    %cst_350 = arith.constant dense<0.000000e+00> : vector<8xf32>
    %1491 = vector.multi_reduction <add>, %1490, %cst_350 [1] : vector<8x16xf32> to vector<8xf32>
    %1492 = vector.shape_cast %1491 : vector<8xf32> to vector<8x1xf32>
    %1493 = arith.mulf %1470, %864 : vector<8x16xf32>
    %cst_351 = arith.constant dense<0.000000e+00> : vector<8xf32>
    %1494 = vector.multi_reduction <add>, %1493, %cst_351 [1] : vector<8x16xf32> to vector<8xf32>
    %1495 = vector.shape_cast %1494 : vector<8xf32> to vector<8x1xf32>
    %1496 = arith.mulf %1470, %866 : vector<8x16xf32>
    %cst_352 = arith.constant dense<0.000000e+00> : vector<8xf32>
    %1497 = vector.multi_reduction <add>, %1496, %cst_352 [1] : vector<8x16xf32> to vector<8xf32>
    %1498 = vector.shape_cast %1497 : vector<8xf32> to vector<8x1xf32>
    %1499 = arith.mulf %1470, %868 : vector<8x16xf32>
    %cst_353 = arith.constant dense<0.000000e+00> : vector<8xf32>
    %1500 = vector.multi_reduction <add>, %1499, %cst_353 [1] : vector<8x16xf32> to vector<8xf32>
    %1501 = vector.shape_cast %1500 : vector<8xf32> to vector<8x1xf32>
    %1502 = arith.mulf %1470, %870 : vector<8x16xf32>
    %cst_354 = arith.constant dense<0.000000e+00> : vector<8xf32>
    %1503 = vector.multi_reduction <add>, %1502, %cst_354 [1] : vector<8x16xf32> to vector<8xf32>
    %1504 = vector.shape_cast %1503 : vector<8xf32> to vector<8x1xf32>
    %1505 = tpu.concatenate %1483, %1486, %1489, %1492, %1495, %1498, %1501, %1504 in 1 : vector<8x1xf32>, vector<8x1xf32>, vector<8x1xf32>, vector<8x1xf32>, vector<8x1xf32>, vector<8x1xf32>, vector<8x1xf32>, vector<8x1xf32> -> vector<8x8xf32>
    %1506 = vector.extract_strided_slice %854 {offsets = [0, 0], sizes = [8, 1], strides = [1, 1]} : vector<8x3xf32> to vector<8x1xf32>
    %1507 = vector.broadcast %1506 : vector<8x1xf32> to vector<8x4xf32>
    %1508 = arith.subf %1478, %1507 : vector<8x4xf32>
    %1509 = vector.extract_strided_slice %854 {offsets = [0, 1], sizes = [8, 1], strides = [1, 1]} : vector<8x3xf32> to vector<8x1xf32>
    %1510 = vector.broadcast %1509 : vector<8x1xf32> to vector<8x4xf32>
    %1511 = arith.subf %1479, %1510 : vector<8x4xf32>
    %1512 = vector.extract_strided_slice %854 {offsets = [0, 2], sizes = [8, 1], strides = [1, 1]} : vector<8x3xf32> to vector<8x1xf32>
    %1513 = vector.broadcast %1512 : vector<8x1xf32> to vector<8x4xf32>
    %1514 = arith.subf %1480, %1513 : vector<8x4xf32>
    %1515 = vector.extract_strided_slice %853 {offsets = [0, 0], sizes = [8, 1], strides = [1, 1]} : vector<8x9xf32> to vector<8x1xf32>
    %1516 = vector.broadcast %1515 : vector<8x1xf32> to vector<8x4xf32>
    %1517 = arith.mulf %1516, %1508 : vector<8x4xf32>
    %1518 = vector.extract_strided_slice %853 {offsets = [0, 3], sizes = [8, 1], strides = [1, 1]} : vector<8x9xf32> to vector<8x1xf32>
    %1519 = vector.broadcast %1518 : vector<8x1xf32> to vector<8x4xf32>
    %1520 = arith.mulf %1519, %1511 : vector<8x4xf32>
    %1521 = arith.addf %1517, %1520 : vector<8x4xf32>
    %1522 = vector.extract_strided_slice %853 {offsets = [0, 6], sizes = [8, 1], strides = [1, 1]} : vector<8x9xf32> to vector<8x1xf32>
    %1523 = vector.broadcast %1522 : vector<8x1xf32> to vector<8x4xf32>
    %1524 = arith.mulf %1523, %1514 : vector<8x4xf32>
    %1525 = arith.addf %1521, %1524 : vector<8x4xf32>
    %1526 = vector.extract_strided_slice %853 {offsets = [0, 1], sizes = [8, 1], strides = [1, 1]} : vector<8x9xf32> to vector<8x1xf32>
    %1527 = vector.broadcast %1526 : vector<8x1xf32> to vector<8x4xf32>
    %1528 = arith.mulf %1527, %1508 : vector<8x4xf32>
    %1529 = vector.extract_strided_slice %853 {offsets = [0, 4], sizes = [8, 1], strides = [1, 1]} : vector<8x9xf32> to vector<8x1xf32>
    %1530 = vector.broadcast %1529 : vector<8x1xf32> to vector<8x4xf32>
    %1531 = arith.mulf %1530, %1511 : vector<8x4xf32>
    %1532 = arith.addf %1528, %1531 : vector<8x4xf32>
    %1533 = vector.extract_strided_slice %853 {offsets = [0, 7], sizes = [8, 1], strides = [1, 1]} : vector<8x9xf32> to vector<8x1xf32>
    %1534 = vector.broadcast %1533 : vector<8x1xf32> to vector<8x4xf32>
    %1535 = arith.mulf %1534, %1514 : vector<8x4xf32>
    %1536 = arith.addf %1532, %1535 : vector<8x4xf32>
    %1537 = vector.extract_strided_slice %853 {offsets = [0, 2], sizes = [8, 1], strides = [1, 1]} : vector<8x9xf32> to vector<8x1xf32>
    %1538 = vector.broadcast %1537 : vector<8x1xf32> to vector<8x4xf32>
    %1539 = arith.mulf %1538, %1508 : vector<8x4xf32>
    %1540 = vector.extract_strided_slice %853 {offsets = [0, 5], sizes = [8, 1], strides = [1, 1]} : vector<8x9xf32> to vector<8x1xf32>
    %1541 = vector.broadcast %1540 : vector<8x1xf32> to vector<8x4xf32>
    %1542 = arith.mulf %1541, %1511 : vector<8x4xf32>
    %1543 = arith.addf %1539, %1542 : vector<8x4xf32>
    %1544 = vector.extract_strided_slice %853 {offsets = [0, 8], sizes = [8, 1], strides = [1, 1]} : vector<8x9xf32> to vector<8x1xf32>
    %1545 = vector.broadcast %1544 : vector<8x1xf32> to vector<8x4xf32>
    %1546 = arith.mulf %1545, %1514 : vector<8x4xf32>
    %1547 = arith.addf %1543, %1546 : vector<8x4xf32>
    %1548 = arith.mulf %1525, %1525 : vector<8x4xf32>
    %1549 = arith.mulf %1536, %1536 : vector<8x4xf32>
    %1550 = arith.addf %1548, %1549 : vector<8x4xf32>
    %1551 = arith.mulf %1547, %1547 : vector<8x4xf32>
    %1552 = arith.addf %1550, %1551 : vector<8x4xf32>
    %1553 = math.sqrt %1552 : vector<8x4xf32>
    %1554 = tpu.concatenate %1505, %1477, %1525, %1536, %1547, %1553 in 1 : vector<8x8xf32>, vector<8x8xf32>, vector<8x4xf32>, vector<8x4xf32>, vector<8x4xf32>, vector<8x4xf32> -> vector<8x32xf32>
    %1555 = tpu.concatenate %1041, %1212, %1383, %1554 in 1 : vector<8x32xf32>, vector<8x32xf32>, vector<8x32xf32>, vector<8x32xf32> -> vector<8x128xf32>
    %1556 = tpu.concatenate %852, %1555 in 0 : vector<8x128xf32>, vector<8x128xf32> -> vector<16x128xf32>
    %c0_355 = arith.constant 0 : index
    %c0_356 = arith.constant 0 : index
    %1557 = vector.load %arg9[%c0_355, %c0_356] : memref<128x32xf32, #tpu.memory_space<vmem>>, vector<128x32xf32>
    %cst_357 = arith.constant dense<0.000000e+00> : vector<16x32xf32>
    %1558 = tpu.matmul %1556, %1557, %cst_357 {dimension_numbers = #tpu.dot_dimension_numbers<[1], [0], [0], [1], [0, 0, 1, 1], [], []>, precision = #tpu.contract_precision<fp32>} : vector<16x128xf32>, vector<128x32xf32>, vector<16x32xf32> -> vector<16x32xf32>
    %c0_358 = arith.constant 0 : index
    %c0_359 = arith.constant 0 : index
    %1559 = vector.load %arg10[%c0_358, %c0_359] : memref<1x32xf32, #tpu.memory_space<vmem>>, vector<1x32xf32>
    %1560 = vector.broadcast %1559 : vector<1x32xf32> to vector<16x32xf32>
    %1561 = arith.addf %1558, %1560 : vector<16x32xf32>
    %c0_360 = arith.constant 0 : index
    %c0_361 = arith.constant 0 : index
    %1562 = vector.load %arg13[%c0_360, %c0_361] : memref<16x32xf32, #tpu.memory_space<vmem>>, vector<16x32xf32>
    tpu.vector_store %arg13[%c0_360, %c0_361], %1561 {strides = array<i32>} : memref<16x32xf32, #tpu.memory_space<vmem>>, vector<16x32xf32>,
    return
  }
}

</mosaic_0001>

<bundles_post_ra>
// kernel: tpu_custom_call.1
= control target key start
LH: loop header
LB: loop body
LE: loop exit
PB: predicated region body
PF: predicated region fallthrough
CT: control target
= control target key end

     0   :  { %s11897_s0 = inlined_call_operand.vmem [shape: f32[16,32], index: 0, kind: input, shape index: {}]   ;;  %s11898_s1 = inlined_call_operand.hbm [shape: f32[32,32], index: 1, kind: input, shape index: {}]   ;;  %s11899_s2 = inlined_call_operand.vmem [shape: f32[2,8,8,16], index: 2, kind: input, shape index: {}]   ;;  %s11900_s3 = inlined_call_operand.hbm [shape: f32[16,9], index: 3, kind: input, shape index: {}]   ;;  %s11901_s4 = inlined_call_operand.vmem [shape: f32[16,3], index: 4, kind: input, shape index: {}]   ;;  %s11902_s5 = inlined_call_operand.vmem [shape: f32[32,9], index: 5, kind: input, shape index: {}]   ;;  %s11903_s6 = inlined_call_operand.vmem [shape: f32[32,3], index: 6, kind: input, shape index: {}]   ;;  %s11904_s7 = inlined_call_operand.hbm [shape: f32[32,80], index: 7, kind: input, shape index: {}]   ;;  %s11905_s8 = inlined_call_operand.vmem [shape: f32[32,160], index: 8, kind: input, shape index: {}]   ;;  %s11906_s9 = inlined_call_operand.vmem [shape: f32[128,32], index: 9, kind: input, shape index: {}]   ;;  %s11907_s10 = inlined_call_operand.vmem [shape: f32[1,32], index: 10, kind: input, shape index: {}]   ;;  %s11908_s11 = inlined_call_operand.vmem [shape: f32[4,8], index: 11, kind: input, shape index: {}]   ;;  %s11909_s12 = inlined_call_operand.vmem [shape: f32[4], index: 12, kind: input, shape index: {}]   ;;  %s11910_s13 = inlined_call_operand.hbm [shape: f32[16,32], index: 13, kind: output, shape index: {}]  }
   0x1   :  { %12134 = sst [smem:[#allocation91_spill]] %s11906_s9 }
   0x2   :  { %12135 = sst [smem:[#allocation92_spill]] %s11907_s10 }
   0x3   :  { %12136 = sst [smem:[#allocation93_spill]] %s11910_s13 }
   0x4   :  { %18 = vsyncpa [#allocation3], 0 }
   0x5   :  { %19 = vsyncpa [#allocation7], 0 }
   0x6   :  { %20 = vsyncpa [#allocation5], 0 }
   0x7   :  { %21 = vsyncpa [#allocation11], 0 }
   0x8   :  { %22 = vsyncpa [#allocation4], 0  ;;  %s44_s27 = sshll.u32 %s11900_s3, 4  ;;  %s7621_s28 = smov [#allocation6]   ;;  %s45_s27 = int_to_ptr.hbm [resolvable:$true] %s44_s27 }
   0x9   :  { %s46_s29 = sshll.u32 %s7621_s28, 4  ;;  %s29_s15 = sshll.u32 %s11898_s1, 4  ;;  %s47_s29 = int_to_ptr.vmem [resolvable:$true] %s46_s29  ;;  %s30_s15 = int_to_ptr.hbm [resolvable:$true] %s29_s15 }
   0xa   :  { %s11957_s16 = smov 128   ;;  %s11958_s17 = smov 8  }
   0xb   :  { %52 = dma.hbm_to_vmem [thread:$0]  %s45_s27, 256, %s47_s29, [#allocation7], %s11957_s16, %s11957_s16, %s11958_s17  }
   0xc   :  { %s7624_s18 = smov [#allocation2]   ;;  %s63_s3 = sshll.u32 %s11904_s7, 4  ;;  %s64_s3 = int_to_ptr.hbm [resolvable:$true] %s63_s3 }
   0xd   :  { %s31_s19 = sshll.u32 %s7624_s18, 4  ;;  %s83_s23 = sshll.u32 %s11908_s11, 4  ;;  %s32_s19 = int_to_ptr.vmem [resolvable:$true] %s31_s19  ;;  %s84_s23 = int_to_ptr.vmem [resolvable:$true] %s83_s23 }
   0xe   :  { %37 = dma.hbm_to_vmem [thread:$0]  %s30_s15, 512, %s32_s19, [#allocation3], %s11957_s16, %s11957_s16, %s11958_s17  }
   0xf   :  { %s7625_s24 = smov [#allocation8]   ;;  %s7626_s26 = smov [#allocation9]  }
  0x10   :  { %s65_s25 = sshll.u32 %s7625_s24, 4  ;;  %s92_s28 = sshll.u32 %s11909_s12, 4  ;;  %s66_s25 = int_to_ptr.vmem [resolvable:$true] %s65_s25  ;;  %s93_s28 = int_to_ptr.vmem [resolvable:$true] %s92_s28 }
  0x11   :  { %71 = dma.hbm_to_vmem [thread:$0]  %s64_s3, 512, %s66_s25, [#allocation7], %s11957_s16, %s11957_s16, %s11958_s17  }
  0x12   :  { %86 = dma.vmem_to_smem %s84_s23, 64, %s7626_s26, [#allocation5]  }
  0x13   :  { %s7627_s29 = smov [#allocation10]  }
  0x14   :  { %95 = dma.vmem_to_smem %s93_s28, 16, %s7627_s29, [#allocation11]  }
  0x15   :  { %7611 = dma.done.wait [#allocation3], 512  }
  0x16   :  { %7612 = vsyncadd [#allocation3], 4294966784 }
  0x17   :  { %7613 = dma.done.wait [#allocation7], 768  }
  0x18   :  { %7614 = vsyncadd [#allocation7], 4294966528 }
  0x19   :  { %7615 = dma.done.wait [#allocation5], 64  }
  0x1a   :  { %7616 = vsyncadd [#allocation5], 4294967232 }
  0x1b   :  { %7617 = dma.done.wait [#allocation11], 16  }
  0x1c   :  { %7618 = vsyncadd [#allocation11], 4294967280 }
  0x1d   :  { %116 = sfence }
  0x1e   :  { %v7756_v0 = vld [vmem:[#allocation6] sm:$0xff]  ;;  %v122_v1 = vld [vmem:[#allocation8 + $0x18] sm:$0xff]  ;;  %vm12131_vm0 = vcmask 261120   ;;  %v11915_v3 = vmov 1   ;;  %v120_v6 = vld [vmem:[#allocation8 + $0x8] sm:$0xff]  ;;  %v11927_v12 = vmov 2  }
  0x1f   :  { %v121_v2 = vld [vmem:[#allocation8 + $0x10] sm:$0xff]  ;;  %7354 = vset.pattern.permute.xlu1 %v11915_v3  ;;  %v7759_v4 = vand.u32 4294901760, %v122_v1  ;;  %v119_v7 = vld [vmem:[#allocation8] sm:$0xff]  ;;  %7352 = vset.pattern.permute.xlu0 %v11915_v3  ;;  %v7768_v9 = vand.u32 4294901760, %v120_v6  ;;  %v7777_v13 = vld [vmem:[%s11902_s5 + $0x8] sm:$0xff]  ;;  %v11923_v42 = vmov 4  }
  0x20   :  { %v7761_v5 = vand.u32 4294901760, %v121_v2  ;;  %v117_v8 = vld [vmem:[%s11897_s0] sm:$0xff]  ;;  %951 = vperm.xlu1 %7354, %v7756_v0   ;;  %v7770_v10 = vand.u32 4294901760, %v119_v7  ;;  %7356 = vset.pattern.permute.xlu2 %v11927_v12  ;;  %v118_v14 = vld [vmem:[%s11897_s0 + $0x8] sm:$0xff]  ;;  %v356_v22 = vld [vmem:[%s11905_s8 + $0x30] sm:$0xff]  ;;  %v11917_v48 = vmov 5  }
  0x21   :  { %v125_v11 = vsel %vm12131_vm0, %v117_v8, 0  ;;  %143 = vmatpush.msra.mxu2 %v7759_v4  ;;  %v180_v15 = vsub.f32 %v122_v1, %v7759_v4  ;;  %1191 = vperm.xlu2 %7356, %v7777_v13   ;;  %v128_v18 = vsel %vm12131_vm0, %v118_v14, 0  ;;  %v7790_v19 = vsub.f32 %v120_v6, %v7768_v9  ;;  %v354_v26 = vld [vmem:[%s11905_s8 + $0x20] sm:$0xff]  ;;  %v352_v37 = vld [vmem:[%s11905_s8 + $0x10] sm:$0xff]  ;;  %s11995_s20 = smov 112   ;;  %s11989_s21 = smov 96  }
  0x22   :  { %v7784_v16 = vand.u32 4294901760, %v125_v11  ;;  %v186_v17 = vsub.f32 %v121_v2, %v7761_v5  ;;  %v7793_v20 = vsub.f32 %v119_v7, %v7770_v10  ;;  %v7795_v21 = vand.u32 4294901760, %v128_v18  ;;  %1151 = vperm.xlu0 %7352, %v7777_v13   ;;  %330 = vmatpush.msra.mxu1 %v7759_v4  ;;  %v350_v43 = vld [vmem:[%s11905_s8] sm:$0xff]  ;;  %s1661_s3 = sld [smem:[#allocation10]]  ;;  %s12012_s1 = smov 104  }
  0x23   :  { %145 = vmatpush.msra.mxu2 %v7761_v5  ;;  %v181_v23 = vand.u32 4294901760, %v180_v15  ;;  %v193_v27 = vand.u32 4294901760, %v7790_v19  ;;  %v7817_v33 = vand.u32 4294901760, %v356_v22  ;;  %v7823_v36 = vand.u32 4294901760, %v354_v26  ;;  %v346_v60 = vld [vmem:[#allocation2] sm:$0xff]  ;;  %s11987_s22 = smov 72  }
  0x24   :  { %v7804_v24 = vsub.f32 %v125_v11, %v7784_v16  ;;  %v187_v25 = vand.u32 4294901760, %v186_v17  ;;  %v199_v28 = vand.u32 4294901760, %v7793_v20  ;;  %v7812_v29 = vsub.f32 %v128_v18, %v7795_v21  ;;  %332 = vmatpush.msra.mxu1 %v7761_v5  ;;  %v348_v18 = vld [vmem:[#allocation2 + $0x10] sm:$0xff]  ;;  %s12004_s23 = smov 80   ;;  %s11991_s24 = smov 64  }
  0x25   :  { %147 = vmatpush.msra.mxu2 %v7768_v9  ;;  %v182_v30 = vsub.f32 %v180_v15, %v181_v23  ;;  %295 = vmatpush.msra.mxu0 %v181_v23  ;;  %v194_v34 = vsub.f32 %v7790_v19, %v193_v27  ;;  %v7840_v46 = vsub.f32 %v356_v22, %v7817_v33  ;;  %v7842_v47 = vand.u32 4294901760, %v352_v37  ;;  %s11985_s25 = smov 76   ;;  %s11966_s26 = smov 108  }
  0x26   :  { %v152_v31 = vand.u32 4294901760, %v7804_v24  ;;  %v188_v32 = vsub.f32 %v186_v17, %v187_v25  ;;  %v200_v35 = vsub.f32 %v7793_v20, %v199_v28  ;;  %334 = vmatpush.msra.mxu1 %v7768_v9  ;;  %v160_v41 = vand.u32 4294901760, %v7812_v29  ;;  %s7276_s7 = sld [smem:[#allocation10 + $0x1]]  ;;  %s11993_s27 = smov 60  }
  0x27   :  { %149 = vmatpush.msra.mxu2 %v7770_v10  ;;  %v183_v38 = vand.u32 4294901760, %v182_v30  ;;  %299 = vmatpush.msra.mxu0 %v187_v25  ;;  %v195_v45 = vand.u32 4294901760, %v194_v34  ;;  %v7848_v51 = vand.u32 4294901760, %v350_v43  ;;  %v7851_v52 = vsub.f32 %v354_v26, %v7823_v36  ;;  %v349_v26 = vld [vmem:[#allocation2 + $0x18] sm:$0xff]  ;;  %s11968_s28 = smov 92   ;;  %s12000_s29 = smov 24  }
  0x28   :  { %v153_v39 = vsub.f32 %v7804_v24, %v152_v31  ;;  %v189_v40 = vand.u32 4294901760, %v188_v32  ;;  %7355 = vset.pattern.permute.xlu1 %v11923_v42  ;;  %v201_v49 = vand.u32 4294901760, %v200_v35  ;;  %v161_v50 = vsub.f32 %v7812_v29, %v160_v41  ;;  %336 = vmatpush.msra.mxu1 %v7770_v10  ;;  %v353_v35 = vld [vmem:[%s11905_s8 + $0x18] sm:$0xff]  ;;  %s11983_s11 = smov 28   ;;  %s11962_s12 = smov 120  }
  0x29   :  { %226 = vmatpush.msrb.mxu2 %v180_v15  ;;  %1013 = vperm.xlu1 %7355, %v7756_v0   ;;  %v437_v53 = vand.u32 4294901760, %v7840_v46  ;;  %v7858_v54 = vsub.f32 %v352_v37, %v7842_v47  ;;  %v443_v56 = vand.u32 4294901760, %v7851_v52  ;;  %v7865_v57 = vsub.f32 %v350_v43, %v7848_v51  ;;  %v7914_v15 = vld [vmem:[%s11902_s5] sm:$0xff]  ;;  %v351_v43 = vld [vmem:[%s11905_s8 + $0x8] sm:$0xff]  ;;  %s7285_s30 = sld [smem:[#allocation10 + $0x2]]  ;;  %s11960_s15 = smov 56  }
  0x2a   :  { %184 = vmatpush.msra.mxu3 %v183_v38  ;;  %v154_v44 = vand.u32 4294901760, %v153_v39  ;;  %7357 = vset.pattern.permute.xlu2 %v11917_v48  ;;  %v162_v55 = vand.u32 4294901760, %v161_v50  ;;  %v11925_v58 = vmov 7   ;;  %v359_v1 = vsel %vm12131_vm0, %v346_v60, 0  ;;  %s8608_s14 = sld [smem:[#allocation9 + $0x1]]  ;;  %s11979_s0 = smov 88  }
  0x2b   :  { %229 = vmatpush.msrb.mxu2 %v186_v17  ;;  %1315 = vperm.xlu2 %7357, %v7777_v13   ;;  %v438_v59 = vsub.f32 %v7840_v46, %v437_v53  ;;  %v449_v61 = vand.u32 4294901760, %v7858_v54  ;;  %v444_v62 = vsub.f32 %v7851_v52, %v443_v56  ;;  %v455_v63 = vand.u32 4294901760, %v7865_v57  ;;  %s8621_s18 = sld [smem:[#allocation9 + $0x2]]  ;;  %s12002_s19 = smov 20  }
  0x2c   :  { %155 = vmatmul.f32.vlgmr.msra.gmra.mxu2 %v154_v44  ;;  %190 = vmatpush.msra.mxu3 %v189_v40  ;;  %v11913_v22 = vmov 8   ;;  %v368_v32 = vsel %vm12131_vm0, %v349_v26, 0  ;;  %v7995_v37 = vand.u32 4294901760, %v353_v35  ;;  %vm1682_vm1 = vcmask 31744   ;;  %s8665_s17 = sld [smem:[#allocation9 + $0x5]]  ;;  %s12215_s13 = smov 96  }
  0x2d   :  { %232 = vmatpush.msrb.mxu2 %v7790_v19  ;;  %7353 = vset.pattern.permute.xlu0 %v11923_v42  ;;  %v439_v2 = vand.u32 4294901760, %v438_v59  ;;  %v445_v6 = vand.u32 4294901760, %v444_v62  ;;  %v456_v7 = vsub.f32 %v7865_v57, %v455_v63  ;;  %vm1726_vm2 = vcmask 64512   ;;  %s8678_s16 = sld [smem:[#allocation9 + $0x6]] }
  0x2e   :  { %196 = vmatpush.msra.mxu3 %v195_v45  ;;  %1275 = vperm.xlu0 %7353, %v7777_v13   ;;  %vm1728_vm3 = vcmask 97280   ;;  %vm1730_vm4 = vcmask 130048   ;;  %vm1734_vm5 = vcmask 171008   ;;  %vm1732_vm6 = vcmask 162816   ;;  %s9144_s9 = sld [smem:[#allocation9 + $0x104]] }
  0x2f   :  { %235 = vmatpush.msrb.mxu2 %v7793_v20  ;;  %303 = vmatpush.msra.mxu0 %v193_v27  ;;  %v457_v11 = vand.u32 4294901760, %v456_v7  ;;  %v357_v27 = vld [vmem:[%s11905_s8 + $0x38] sm:$0xff]  ;;  %v11919_v7 = vmov 6   ;;  %vm1801_vm7 = vcmask 179200   ;;  %s9155_s10 = sld [smem:[#allocation9 + $0x105]] }
  0x30   :  { %202 = vmatpush.msra.mxu3 %v201_v49  ;;  %338 = vmatmul.f32.vlgmr.msra.gmra.mxu1 %v7784_v16 }
  0x31   :  { %383 = vmatpush.msra.mxu2 %v7817_v33  ;;  %204 = vmatmul.f32.vlgmr.msra.gmra.mxu3 %v7784_v16 }
  0x32   :  { %7358 = vset.pattern.permute.xlu1 %v11925_v58  ;;  %260 = vmatpush.msrb.mxu3 %v7759_v4  ;;  %v450_v4 = vsub.f32 %v7858_v54, %v449_v61 }
  0x33   :  { %1395 = vperm.xlu1 %7358, %v7777_v13   ;;  %385 = vmatpush.msra.mxu2 %v7823_v36 }
  0x34   :  { %163 = vmatmul.f32.gmra.mxu2 %v162_v55  ;;  %262 = vmatpush.msrb.mxu3 %v7761_v5  ;;  %v7894_v5 = vand.u32 4294901760, %v359_v1  ;;  %v451_v8 = vand.u32 4294901760, %v450_v4  ;;  %v11921_v4 = vmov 3   ;;  %12201 = sst [smem:[#allocation73_spill]] %s9144_s9 }
  0x35   :  { %7359 = vset.pattern.permute.xlu2 %v11927_v12  ;;  %307 = vmatpush.msra.mxu0 %v199_v28  ;;  %v7966_v28 = vand.u32 4294901760, %v357_v27  ;;  %12202 = sst [smem:[#allocation74_spill]] %s9155_s10 }
  0x36   :  { %264 = vmatpush.msrb.mxu3 %v7768_v9  ;;  %971 = vperm.xlu2 %7359, %v7756_v0   ;;  %v347_v9 = vld [vmem:[#allocation2 + $0x8] sm:$0xff] }
  0x37   :  { %387 = vmatpush.msra.mxu2 %v7842_v47  ;;  %309 = vmatmul.f32.vlgmr.msra.gmra.mxu0 %v7784_v16  ;;  %v362_v14 = vsel %vm12131_vm0, %v347_v9, 0 }
  0x38   :  { %266 = vmatpush.msrb.mxu3 %v7770_v10  ;;  %7360 = vset.pattern.permute.xlu0 %v11917_v48  ;;  %v7906_v10 = vsub.f32 %v359_v1, %v7894_v5  ;;  %v7922_v17 = vand.u32 4294901760, %v362_v14  ;;  %v11911_v1 = vmov 0  }
  0x39   :  { %208 = vmatmul.f32.gmra.mxu3 %v7795_v21  ;;  %389 = vmatpush.msra.mxu2 %v7848_v51 }
  0x3a   :  { %440 = vmatpush.msra.mxu3 %v439_v2  ;;  %1033 = vperm.xlu0 %7360, %v7756_v0   ;;  %v7920_v16 = vand.u32 4294901760, %v7906_v10  ;;  %v7937_v20 = vsub.f32 %v362_v14, %v7922_v17 }
  0x3b   :  { %1073 = vperm.xlu1 %7358, %v7756_v0   ;;  %490 = vmatpush.msrb.mxu0 %v7840_v46  ;;  %v8019_v46 = vand.u32 4294901760, %v351_v43 }
  0x3c   :  { %238 = vmatmul.f32.vlgmr.msrb.gmra.mxu2 %v7804_v24  ;;  %446 = vmatpush.msra.mxu3 %v445_v6  ;;  %v393_v19 = vsub.f32 %v7906_v10, %v7920_v16  ;;  %v7949_v24 = vand.u32 4294901760, %v7937_v20 }
  0x3d   :  { %493 = vmatpush.msrb.mxu0 %v7851_v52  ;;  %534 = vmatpush.msrb.mxu1 %v7817_v33 }
  0x3e   :  { %7361 = vset.pattern.permute.xlu2 %v11915_v3  ;;  %452 = vmatpush.msra.mxu3 %v451_v8  ;;  %v7946_v23 = vand.u32 4294901760, %v393_v19  ;;  %v935_v8 = vld [vmem:[%s11903_s6 + $0x8] sm:$0xff] }
  0x3f   :  { %1147 = vperm.xlu2 %7361, %v7914_v15   ;;  %313 = vmatmul.f32.gmra.mxu0 %v7795_v21 }
  0x40   :  { %458 = vmatpush.msra.mxu3 %v457_v11  ;;  %342 = vmatmul.f32.gmra.mxu1 %v7795_v21  ;;  %v365_v21 = vsel %vm12131_vm0, %v348_v18, 0 }
  0x41   :  { %270 = vmatmul.f32.vlgmr.msrb.gmra.mxu3 %v152_v31  ;;  %496 = vmatpush.msrb.mxu0 %v7858_v54  ;;  %v7953_v25 = vand.u32 4294901760, %v365_v21  ;;  %v355_v31 = vld [vmem:[%s11905_s8 + $0x28] sm:$0xff]  ;;  %s8606_s8 = sld [smem:[#allocation9]] }
  0x42   :  { %536 = vmatpush.msrb.mxu1 %v7823_v36  ;;  %7364 = vset.pattern.permute.xlu0 %v11913_v22  ;;  %v7984_v34 = vand.u32 4294901760, %v355_v31 }
  0x43   :  { %7362 = vset.pattern.permute.xlu1 %v11923_v42  ;;  %499 = vmatpush.msrb.mxu0 %v7865_v57  ;;  %v7973_v30 = vsub.f32 %v365_v21, %v7953_v25 }
  0x44   :  { %243 = vmatmul.f32.gmra.mxu2 %v7812_v29  ;;  %1271 = vperm.xlu1 %7362, %v7914_v15   ;;  %v401_v29 = vsub.f32 %v7937_v20, %v7949_v24  ;;  %v7998_v38 = vsub.f32 %v355_v31, %v7984_v34 }
  0x45   :  { %1093 = vperm.xlu0 %7364, %v7756_v0   ;;  %538 = vmatpush.msrb.mxu1 %v7842_v47  ;;  %v8003_v40 = vand.u32 4294901760, %v7973_v30 }
  0x46   :  { %581 = vmatpush.msrb.mxu2 %v437_v53  ;;  %624 = vmatpush.msrb.mxu3 %v7817_v33  ;;  %v7982_v33 = vsub.f32 %v357_v27, %v7966_v28  ;;  %v8000_v39 = vand.u32 4294901760, %v401_v29  ;;  %v721_v45 = vand.u32 4294901760, %v7998_v38  ;;  %v732_v53 = vsub.f32 %v351_v43, %v8019_v46 }
  0x47   :  { %7363 = vset.pattern.permute.xlu2 %v11913_v22  ;;  %502 = vmatmul.f32.vlgmr.msrb.gmra.mxu0 %v7906_v10  ;;  %v409_v54 = vsub.f32 %v7973_v30, %v8003_v40 }
  0x48   :  { %1435 = vperm.xlu2 %7363, %v7777_v13   ;;  %540 = vmatpush.msrb.mxu1 %v7848_v51  ;;  %v722_v50 = vsub.f32 %v7998_v38, %v721_v45  ;;  %v733_v57 = vand.u32 4294901760, %v732_v53 }
  0x49   :  { %276 = vmatmul.f32.gmra.mxu3 %v160_v41  ;;  %544 = vmatmul.f32.vlgmr.msrb.gmra.mxu1 %v7920_v16  ;;  %v8006_v41 = vand.u32 4294901760, %v368_v32 }
  0x4a   :  { %585 = vmatpush.msrb.mxu2 %v443_v56  ;;  %626 = vmatpush.msrb.mxu3 %v7823_v36  ;;  %v715_v36 = vand.u32 4294901760, %v7982_v33  ;;  %v734_v60 = vsub.f32 %v732_v53, %v733_v57 }
  0x4b   :  { %661 = vmatpush.msra.mxu0 %v7966_v28  ;;  %v8032_v55 = vsub.f32 %v368_v32, %v8006_v41 }
  0x4c   :  { %395 = vmatmul.f32.vlgmr.msra.gmra.mxu2 %v7946_v23  ;;  %7365 = vset.pattern.permute.xlu1 %v11927_v12  ;;  %v716_v44 = vsub.f32 %v7982_v33, %v715_v36 }
  0x4d   :  { %1187 = vperm.xlu1 %7365, %v7914_v15   ;;  %589 = vmatpush.msrb.mxu2 %v449_v61  ;;  %v410_v61 = vand.u32 4294901760, %v409_v54  ;;  %v8040_v62 = vand.u32 4294901760, %v8032_v55 }
  0x4e   :  { %628 = vmatpush.msrb.mxu3 %v7842_v47  ;;  %v726_v47 = vsub.f32 %v353_v35, %v7995_v37  ;;  %663 = vmatpush.msra.mxu0 %v7984_v34  ;;  %v717_v49 = vand.u32 4294901760, %v716_v44 }
  0x4f   :  { %507 = vmatmul.f32.gmra.mxu0 %v7937_v20  ;;  %593 = vmatpush.msrb.mxu2 %v455_v63  ;;  %v735_v63 = vand.u32 4294901760, %v734_v60  ;;  %v417_v2 = vsub.f32 %v8032_v55, %v8040_v62 }
  0x50   :  { %7366 = vset.pattern.permute.xlu2 %v11917_v48  ;;  %630 = vmatpush.msrb.mxu3 %v7848_v51  ;;  %v727_v52 = vand.u32 4294901760, %v726_v47  ;;  %v723_v51 = vand.u32 4294901760, %v722_v50 }
  0x51   :  { %460 = vmatmul.f32.vlgmr.msra.gmra.mxu3 %v7894_v5  ;;  %1311 = vperm.xlu2 %7366, %v7914_v15   ;;  %v418_v6 = vand.u32 4294901760, %v417_v2 }
  0x52   :  { %550 = vmatmul.f32.gmra.mxu1 %v7949_v24  ;;  %768 = vmatpush.msra.mxu2 %v7982_v33  ;;  %v728_v56 = vsub.f32 %v726_v47, %v727_v52 }
  0x53   :  { %812 = vmatpush.msra.mxu3 %v7966_v28  ;;  %718 = vmatpush.msra.mxu1 %v717_v49 }
  0x54   :  { %403 = vmatmul.f32.gmra.mxu2 %v8000_v39  ;;  %665 = vmatpush.msra.mxu0 %v7995_v37  ;;  %v729_v59 = vand.u32 4294901760, %v728_v56 }
  0x55   :  { %7367 = vset.pattern.permute.xlu1 %v11925_v58  ;;  %724 = vmatpush.msra.mxu1 %v723_v51 }
  0x56   :  { %1391 = vperm.xlu1 %7367, %v7914_v15   ;;  %667 = vmatpush.msra.mxu0 %v8019_v46 }
  0x57   :  { %512 = vmatmul.f32.gmra.mxu0 %v7973_v30  ;;  %771 = vmatpush.msra.mxu2 %v7998_v38 }
  0x58   :  { %730 = vmatpush.msra.mxu1 %v729_v59  ;;  %7369 = vset.pattern.permute.xlu0 %v11911_v1 }
  0x59   :  { %464 = vmatmul.f32.gmra.mxu3 %v7922_v17  ;;  %7368 = vset.pattern.permute.xlu2 %v11913_v22 }
  0x5a   :  { %1431 = vperm.xlu2 %7368, %v7914_v15   ;;  %556 = vmatmul.f32.gmra.mxu1 %v8003_v40 }
  0x5b   :  { %1129 = vperm.xlu0 %7369, %v7777_v13   ;;  %736 = vmatpush.msra.mxu1 %v735_v63 }
  0x5c   :  { %411 = vmatmul.f32.gmra.mxu2 %v410_v61  ;;  %814 = vmatpush.msra.mxu3 %v7984_v34 }
  0x5d   :  { %774 = vmatpush.msra.mxu2 %v726_v47  ;;  %859 = vmatpush.msrb.mxu0 %v715_v36 }
  0x5e   :  { %7370 = vset.pattern.permute.xlu1 %v11921_v4  ;;  %816 = vmatpush.msra.mxu3 %v7995_v37 }
  0x5f   :  { %1255 = vperm.xlu1 %7370, %v7777_v13   ;;  %517 = vmatmul.f32.gmra.mxu0 %v8032_v55 }
  0x60   :  { %777 = vmatpush.msra.mxu2 %v732_v53  ;;  %818 = vmatpush.msra.mxu3 %v8019_v46 }
  0x61   :  { %468 = vmatmul.f32.gmra.mxu3 %v7953_v25  ;;  %863 = vmatpush.msrb.mxu0 %v721_v45 }
  0x62   :  { %7371 = vset.pattern.permute.xlu2 %v11911_v1  ;;  %562 = vmatmul.f32.gmra.mxu1 %v8040_v62 }
  0x63   :  { %940 = vperm.xlu2 %7371, %v7756_v0   ;;  %902 = vmatpush.msrb.mxu1 %v7966_v28 }
  0x64   :  { %419 = vmatmul.f32.gmra.mxu2 %v418_v6  ;;  %867 = vmatpush.msrb.mxu0 %v727_v52 }
  0x65   :  { %904 = vmatpush.msrb.mxu1 %v7984_v34 }
  0x66   :  { %871 = vmatpush.msrb.mxu0 %v733_v57 }
  0x67   :  { %1003 = vperm.xlu1 %7370, %v7756_v0   ;;  %673 = vmatmul.f32.vlgmr.msra.gmra.mxu0 %v7946_v23 }
  0x68   :  { %906 = vmatpush.msrb.mxu1 %v7995_v37 }
  0x69   :  { %472 = vmatmul.f32.gmra.mxu3 %v8006_v41 }
  0x6a   :  { %738 = vmatmul.f32.vlgmr.msra.gmra.mxu1 %v7894_v5 }
  0x6b   :  { %1124 = vperm.xlu2 %7371, %v7914_v15   ;;  %908 = vmatpush.msrb.mxu1 %v8019_v46 }
  0x6c   :  { %595 = vmatmul.f32.vlgmr.msrb.gmra.mxu2 %v7894_v5 }
  0x6f   :  { %7372 = vset.pattern.permute.xlu1 %v11919_v7  ;;  %681 = vmatmul.f32.gmra.mxu0 %v8000_v39 }
  0x70   :  { %1375 = vperm.xlu1 %7372, %v7777_v13  }
  0x71   :  { %632 = vmatmul.f32.vlgmr.msrb.gmra.mxu3 %v7894_v5 }
  0x72   :  { %742 = vmatmul.f32.gmra.mxu1 %v7922_v17 }
  0x73   :  { %1233 = vperm.xlu2 %7371, %v935_v8  }
  0x74   :  { %599 = vmatmul.f32.gmra.mxu2 %v7922_v17 }
  0x77   :  { %689 = vmatmul.f32.gmra.mxu0 %v410_v61 }
  0x78   :  { %1063 = vperm.xlu1 %7372, %v7756_v0   ;;  %v928_v0 = vld [vmem:[%s11901_s4] sm:$0xff] }
  0x79   :  { %636 = vmatmul.f32.gmra.mxu3 %v7922_v17 }
  0x7a   :  { %746 = vmatmul.f32.gmra.mxu1 %v7953_v25 }
  0x7b   :  { %7375 = vset.pattern.permute.xlu2 %v11919_v7  ;;  %v8134_v14 = vpop.permute.xlu2 %1191 }
  0x7c   :  { %603 = vmatmul.f32.gmra.mxu2 %v7953_v25  ;;  %1371 = vperm.xlu2 %7375, %v7914_v15  }
  0x7f   :  { %697 = vmatmul.f32.gmra.mxu0 %v418_v6 }
  0x80   :  { %7373 = vset.pattern.permute.xlu1 %v11921_v4 }
  0x81   :  { %640 = vmatmul.f32.gmra.mxu3 %v7953_v25  ;;  %1251 = vperm.xlu1 %7373, %v7914_v15  }
  0x82   :  { %750 = vmatmul.f32.gmra.mxu1 %v8006_v41 }
  0x84   :  { %607 = vmatmul.f32.gmra.mxu2 %v8006_v41  ;;  %7377 = vset.pattern.permute.xlu2 %v11915_v3 }
  0x85   :  { %1053 = vperm.xlu2 %7377, %v928_v0  }
  0x87   :  { %873 = vmatmul.f32.vlgmr.msrb.gmra.mxu0 %v7894_v5 }
  0x89   :  { %644 = vmatmul.f32.gmra.mxu3 %v8006_v41  ;;  %7374 = vset.pattern.permute.xlu1 %v11915_v3 }
  0x8a   :  { %910 = vmatmul.f32.vlgmr.msrb.gmra.mxu1 %v7894_v5  ;;  %1355 = vperm.xlu1 %7374, %v935_v8   ;;  %v8125_v5 = vld [vmem:[%s11903_s6] sm:$0xff] }
  0x8b   :  { %1228 = vperm.xlu0 %7369, %v8125_v5  }
  0x8c   :  { %780 = vmatmul.f32.vlgmr.msra.gmra.mxu2 %v7906_v10 }
  0x8d   :  { %7379 = vset.pattern.permute.xlu2 %v11927_v12 }
  0x8e   :  { %1113 = vperm.xlu2 %7379, %v928_v0  }
  0x8f   :  { %877 = vmatmul.f32.gmra.mxu0 %v7922_v17 }
  0x91   :  { %822 = vmatmul.f32.vlgmr.msra.gmra.mxu3 %v7920_v16 }
  0x92   :  { %914 = vmatmul.f32.gmra.mxu1 %v7922_v17  ;;  %7376 = vset.pattern.permute.xlu1 %v11911_v1  ;;  %v8118_v13 = vpop.permute.xlu1 %951  ;;  %v8282_v1 = vstv %s1661_s3  ;;  %s8654_s3 = sld [smem:[#allocation9 + $0x4]] }
  0x93   :  { %992 = vperm.xlu1 %7376, %v928_v0   ;;  %12137 = vst [vmem:[#allocation18_spill] sm:$0xff] %v8118_v13  ;;  %7381 = vset.pattern.permute.xlu0 %v11927_v12 }
  0x94   :  { %785 = vmatmul.f32.gmra.mxu2 %v7937_v20  ;;  %v8140_v17 = vpop.permute.xlu0 %1151  ;;  %v8144_v20 = vpop.permute.xlu2 %1315  ;;  %12157 = vst [vmem:[#allocation38_spill] sm:$0xff] %v8282_v1 }
  0x96   :  { %7382 = vset.pattern.permute.xlu2 %v11915_v3 }
  0x97   :  { %881 = vmatmul.f32.gmra.mxu0 %v7953_v25 }
  0x99   :  { %828 = vmatmul.f32.gmra.mxu3 %v7949_v24 }
  0x9a   :  { %918 = vmatmul.f32.gmra.mxu1 %v7953_v25 }
  0x9b   :  { %7378 = vset.pattern.permute.xlu1 %v11927_v12  ;;  %v8130_v9 = vpop.permute.xlu1 %1013 }
  0x9c   :  { %1475 = vperm.xlu1 %7378, %v935_v8   ;;  %790 = vmatmul.f32.gmra.mxu2 %v7973_v30  ;;  %12138 = vst [vmem:[#allocation19_spill] sm:$0xff] %v8130_v9  ;;  %v8154_v33 = vpop.permute.xlu2 %971 }
  0x9d   :  { %12143 = vst [vmem:[#allocation24_spill] sm:$0xff] %v8154_v33 }
  0x9f   :  { %885 = vmatmul.f32.gmra.mxu0 %v8006_v41 }
  0xa0   :  { %v8148_v24 = vpop.permute.xlu0 %1275 }
  0xa1   :  { %834 = vmatmul.f32.gmra.mxu3 %v8003_v40 }
  0xa2   :  { %922 = vmatmul.f32.gmra.mxu1 %v8006_v41 }
  0xa4   :  { %7380 = vset.pattern.permute.xlu1 %v11915_v3  ;;  %795 = vmatmul.f32.gmra.mxu2 %v8032_v55  ;;  %v8181_v49 = vpop.permute.xlu2 %1147 }
  0xa5   :  { %1351 = vperm.xlu1 %7380, %v8125_v5   ;;  %v8136_v15 = vpop.permute.xlu1 %1395 }
  0xa9   :  { %840 = vmatmul.f32.gmra.mxu3 %v8040_v62 }
  0xac   :  { %v8168_v39 = vpop.permute.xlu0 %1033  ;;  %v8196_v57 = vpop.permute.xlu2 %1435 }
  0xad   :  { %7383 = vset.pattern.permute.xlu1 %v11923_v42  ;;  %v8146_v21 = vpop.permute.xlu1 %1073  ;;  %v339_v29 = vpop.f32.mrf.mxu1  ;;  %12145 = vst [vmem:[#allocation26_spill] sm:$0xff] %v8168_v39 }
  0xae   :  { %12141 = vst [vmem:[#allocation22_spill] sm:$0xff] %v8146_v21 }
  0xaf   :  { %v156_v10 = vpop.f32.mrf.mxu2 }
  0xb4   :  { %v205_v11 = vpop.f32.mrf.mxu3  ;;  %v310_v27 = vpop.f32.mrf.mxu0 }
  0xb5   :  { %v206_v23 = vadd.f32 %v205_v11, %v156_v10  ;;  %v8204_v8 = vpop.permute.xlu2 %1311 }
  0xb6   :  { %v8156_v34 = vpop.permute.xlu1 %1271 }
  0xb7   :  { %v8138_v16 = vpop.f32.mrf.mxu2  ;;  %v8179_v47 = vpop.permute.xlu0 %1093 }
  0xb8   :  { %12139 = vst [vmem:[#allocation20_spill] sm:$0xff] %v8138_v16 }
  0xb9   :  { %12146 = vst [vmem:[#allocation27_spill] sm:$0xff] %v8179_v47 }
  0xbc   :  { %v8142_v18 = vpop.f32.mrf.mxu3  ;;  %v8190_v55 = vpop.f32.mrf.mxu0 }
  0xbd   :  { %12140 = vst [vmem:[#allocation21_spill] sm:$0xff] %v8142_v18  ;;  %v8192_v51 = vpop.f32.mrf.mxu1 }
  0xbe   :  { %12148 = vst [vmem:[#allocation29_spill] sm:$0xff] %v8190_v55 }
  0xbf   :  { %v239_v19 = vpop.f32.mrf.mxu2  ;;  %v8175_v45 = vpop.permute.xlu1 %1187  ;;  %12149 = vst [vmem:[#allocation30_spill] sm:$0xff] %v8192_v51 }
  0xc0   :  { %v240_v25 = vadd.f32 %v239_v19, %v206_v23 }
  0xc4   :  { %v271_v26 = vpop.f32.mrf.mxu3  ;;  %v503_v62 = vpop.f32.mrf.mxu0 }
  0xc5   :  { %v272_v28 = vadd.f32 %v271_v26, %v240_v25 }
  0xc6   :  { %v545_v6 = vpop.f32.mrf.mxu1 }
  0xc7   :  { %v8150_v30 = vpop.f32.mrf.mxu2  ;;  %v311_v31 = vadd.f32 %v310_v27, %v272_v28 }
  0xc8   :  { %12142 = vst [vmem:[#allocation23_spill] sm:$0xff] %v8150_v30  ;;  %v8186_v53 = vpop.permute.xlu1 %1391 }
  0xc9   :  { %v8152_v32 = vadd.f32 %v339_v29, %v311_v31 }
  0xcb   :  { %v1020_v35 = vmul.f32 %v8130_v9, %v8152_v32  ;;  %v978_v36 = vmul.f32 %v8154_v33, %v8152_v32  ;;  %v958_v37 = vmul.f32 %v8118_v13, %v8152_v32  ;;  %v1080_v41 = vmul.f32 %v8146_v21, %v8152_v32 }
  0xcc   :  { %v8164_v38 = vpop.f32.mrf.mxu3  ;;  %v1040_v44 = vmul.f32 %v8168_v39, %v8152_v32  ;;  %v1100_v50 = vmul.f32 %v8179_v47, %v8152_v32  ;;  %v508_v29 = vpop.f32.mrf.mxu0 }
  0xcd   :  { %12144 = vst [vmem:[#allocation25_spill] sm:$0xff] %v8164_v38  ;;  %1024 = vrot.lane.b32.xlu0 %v1020_v35, %s11995_s20  ;;  %982 = vrot.lane.b32.xlu1 %v978_v36, %s11989_s21  ;;  %v8216_v35 = vpop.permute.xlu2 %1431 }
  0xce   :  { %962 = vrot.lane.b32.xlu2 %v958_v37, %s11995_s20 }
  0xcf   :  { %v396_v40 = vpop.f32.mrf.mxu2  ;;  %v551_v37 = vpop.f32.mrf.mxu1 }
  0xd1   :  { %v8200_v60 = vpop.permute.xlu1 %1255 }
  0xd4   :  { %v461_v43 = vpop.f32.mrf.mxu3 }
  0xd5   :  { %1084 = vrot.lane.b32.xlu0 %v1080_v41, %s11995_s20  ;;  %v462_v61 = vadd.f32 %v461_v43, %v396_v40 }
  0xd6   :  { %1044 = vrot.lane.b32.xlu2 %v1040_v44, %s11989_s21 }
  0xd7   :  { %v404_v46 = vpop.f32.mrf.mxu2  ;;  %v504_v2 = vadd.f32 %v503_v62, %v462_v61  ;;  %v8232_v62 = vpop.permute.xlu2 %940 }
  0xd8   :  { %12152 = vst [vmem:[#allocation33_spill] sm:$0xff] %v8232_v62 }
  0xd9   :  { %v546_v10 = vadd.f32 %v545_v6, %v504_v2  ;;  %v8206_v11 = vpop.permute.xlu1 %1003 }
  0xda   :  { %12151 = vst [vmem:[#allocation32_spill] sm:$0xff] %v8206_v11 }
  0xdc   :  { %v465_v52 = vpop.f32.mrf.mxu3 }
  0xdd   :  { %1104 = vrot.lane.b32.xlu0 %v1100_v50, %s11989_s21  ;;  %v466_v26 = vadd.f32 %v465_v52, %v404_v46 }
  0xdf   :  { %v8188_v54 = vpop.f32.mrf.mxu2  ;;  %v509_v36 = vadd.f32 %v508_v29, %v466_v26 }
  0xe0   :  { %12147 = vst [vmem:[#allocation28_spill] sm:$0xff] %v8188_v54 }
  0xe1   :  { %v552_v43 = vadd.f32 %v551_v37, %v509_v36 }
  0xe2   :  { %v8221_v40 = vpop.permute.xlu1 %1375 }
  0xe4   :  { %v8194_v56 = vpop.f32.mrf.mxu3 }
  0xe5   :  { %12150 = vst [vmem:[#allocation31_spill] sm:$0xff] %v8194_v56 }
  0xe7   :  { %v8198_v59 = vpop.f32.mrf.mxu2 }
  0xea   :  { %v8236_v6 = vpop.permute.xlu1 %1063 }
  0xeb   :  { %12153 = vst [vmem:[#allocation34_spill] sm:$0xff] %v8236_v6 }
  0xec   :  { %v8202_v63 = vpop.f32.mrf.mxu3 }
  0xef   :  { %v596_v0 = vpop.f32.mrf.mxu2 }
  0xf0   :  { %v597_v19 = vadd.f32 %v596_v0, %v546_v10 }
  0xf4   :  { %v633_v23 = vpop.f32.mrf.mxu3 }
  0xf5   :  { %v8208_v25 = vadd.f32 %v633_v23, %v597_v19  ;;  %v1125_v19 = vpop.permute.xlu2 %1124  ;;  %v8244_v23 = vpop.permute.xlu1 %1251 }
  0xf7   :  { %v1286_v27 = vmul.f32 %v8156_v34, %v8208_v25  ;;  %v1162_v28 = vmul.f32 %v8181_v49, %v8208_v25  ;;  %v1326_v31 = vmul.f32 %v8204_v8, %v8208_v25  ;;  %v600_v41 = vpop.f32.mrf.mxu2  ;;  %v1406_v44 = vmul.f32 %v8186_v53, %v8208_v25 }
  0xf8   :  { %v1202_v46 = vmul.f32 %v8175_v45, %v8208_v25  ;;  %v1446_v52 = vmul.f32 %v8216_v35, %v8208_v25  ;;  %v601_v61 = vadd.f32 %v600_v41, %v552_v43  ;;  %v8333_v47 = vmul.f32 %v8244_v23, %v8208_v25 }
  0xf9   :  { %1294 = vrot.lane.b32.xlu0 %v1286_v27, %s11995_s20  ;;  %1170 = vrot.lane.b32.xlu1 %v1162_v28, %s11995_s20 }
  0xfa   :  { %1334 = vrot.lane.b32.xlu2 %v1326_v31, %s11989_s21 }
  0xfc   :  { %v637_v50 = vpop.f32.mrf.mxu3 }
  0xfd   :  { %v8234_v2 = vadd.f32 %v637_v50, %v601_v61  ;;  %v8252_v28 = vpop.permute.xlu2 %1233  ;;  %v8256_v31 = vpop.permute.xlu1 %1355 }
  0xff   :  { %v1287_v0 = vmul.f32 %v8148_v24, %v8234_v2  ;;  %v1163_v10 = vmul.f32 %v8140_v17, %v8234_v2  ;;  %v1203_v26 = vmul.f32 %v8134_v14, %v8234_v2  ;;  %v1327_v27 = vmul.f32 %v8144_v20, %v8234_v2 }
 0x100   :  { %v1407_v29 = vmul.f32 %v8136_v15, %v8234_v2  ;;  %v1447_v37 = vmul.f32 %v8196_v57, %v8234_v2 }
 0x101   :  { %1414 = vrot.lane.b32.xlu0 %v1406_v44, %s11995_s20  ;;  %1210 = vrot.lane.b32.xlu1 %v1202_v46, %s11989_s21  ;;  %v1130_v46 = vpop.permute.xlu0 %1129 }
 0x102   :  { %1454 = vrot.lane.b32.xlu2 %v1446_v52, %s11989_s21 }
 0x105   :  { %v8259_v36 = vpop.permute.xlu2 %1371  ;;  %v8264_v41 = vpop.permute.xlu1 %992 }
 0x106   :  { %12154 = vst [vmem:[#allocation35_spill] sm:$0xff] %v8264_v41 }
 0x109   :  { %1296 = vrot.lane.b32.xlu0 %v1287_v0, %s11995_s20  ;;  %v8274_v52 = vpop.permute.xlu0 %1228 }
 0x10a   :  { %1172 = vrot.lane.b32.xlu2 %v1163_v10, %s11995_s20  ;;  %v948_v10 = vmul.f32 %v8232_v62, %v8152_v32 }
 0x10d   :  { %v8266_v43 = vpop.permute.xlu2 %1053 }
 0x10e   :  { %12155 = vst [vmem:[#allocation36_spill] sm:$0xff] %v8266_v43  ;;  %v8269_v44 = vpop.permute.xlu1 %1475 }
 0x111   :  { %1212 = vrot.lane.b32.xlu0 %v1203_v26, %s11989_s21 }
 0x112   :  { %1336 = vrot.lane.b32.xlu2 %v1327_v27, %s11989_s21 }
 0x115   :  { %v8271_v50 = vpop.permute.xlu2 %1113 }
 0x116   :  { %12156 = vst [vmem:[#allocation37_spill] sm:$0xff] %v8271_v50 }
 0x117   :  { %v8276_v61 = vpop.permute.xlu1 %1351 }
 0x119   :  { %1416 = vrot.lane.b32.xlu0 %v1407_v29, %s11995_s20 }
 0x121   :  { %1456 = vrot.lane.b32.xlu0 %v1447_v37, %s11989_s21 }
 0x128   :  { %v963_v0 = vpop.permute.xlu2 %962 }
 0x129   :  { %1471 = vperm.xlu0 %7381, %v8125_v5   ;;  %v968_v26 = vadd.f32 %v963_v0, %v948_v10  ;;  %v1010_v5 = vmul.f32 %v8206_v11, %v8152_v32 }
 0x130   :  { %v1045_v7 = vpop.permute.xlu2 %1044 }
 0x131   :  { %7384 = vset.pattern.permute.xlu0 %v11915_v3 }
 0x13f   :  { %v1025_v27 = vpop.permute.xlu0 %1024  ;;  %v983_v29 = vpop.permute.xlu1 %982 }
 0x140   :  { %v988_v37 = vadd.f32 %v983_v29, %v968_v26  ;;  %v1030_v22 = vadd.f32 %v1025_v27, %v1010_v5  ;;  %v1070_v26 = vmul.f32 %v8236_v6, %v8152_v32  ;;  %v8343_v6 = vmul.f32 %v8259_v36, %v8208_v25 }
 0x142   :  { %v8285_v3 = vadd.f32 %v8264_v41, %v988_v37  ;;  %v1050_v4 = vadd.f32 %v1045_v7, %v1030_v22 }
 0x144   :  { %v1664_v48 = vmul.f32 %v8282_v1, %v8285_v3  ;;  %v8291_v10 = vadd.f32 %v8266_v43, %v1050_v4 }
 0x146   :  { %1715 = vrot.lane.b32.xlu0 %v1664_v48, %s12012_s1  ;;  %v8297_v27 = vmul.f32 %v8282_v1, %v8291_v10  ;;  %v1673_v7 = vmul.f32 %v1664_v48, %v1664_v48 }
 0x147   :  { %v1085_v0 = vpop.permute.xlu0 %1084 }
 0x148   :  { %v1090_v29 = vadd.f32 %v1085_v0, %v1070_v26  ;;  %v1674_v22 = vmul.f32 %v8297_v27, %v8297_v27 }
 0x14a   :  { %v1675_v58 = vadd.f32 %v1674_v22, %v1673_v7 }
 0x14f   :  { %v1105_v5 = vpop.permute.xlu0 %1104 }
 0x150   :  { %v1110_v37 = vadd.f32 %v1105_v5, %v1090_v29 }
 0x152   :  { %v8300_v42 = vadd.f32 %v8271_v50, %v1110_v37  ;;  %v8312_v37 = vmul.f32 %v1125_v19, %v8208_v25  ;;  %v8322_v19 = vmul.f32 %v1130_v46, %v8234_v2 }
 0x154   :  { %v8306_v4 = vmul.f32 %v8282_v1, %v8300_v42  ;;  %v1335_v12 = vpop.permute.xlu2 %1334 }
 0x156   :  { %v1676_v0 = vmul.f32 %v8306_v4, %v8306_v4 }
 0x158   :  { %v1677_v26 = vadd.f32 %v1676_v0, %v1675_v58 }
 0x15a   :  { %1679 = vrot.lane.b32.xlu2 %v1677_v26, %s11989_s21 }
 0x15c   :  { %v1455_v33 = vpop.permute.xlu2 %1454 }
 0x164   :  { %v1173_v0 = vpop.permute.xlu2 %1172 }
 0x165   :  { %v1183_v26 = vadd.f32 %v1173_v0, %v8322_v19  ;;  %v8338_v0 = vmul.f32 %v8221_v40, %v8234_v2 }
 0x16b   :  { %v1295_v29 = vpop.permute.xlu0 %1294  ;;  %v1171_v5 = vpop.permute.xlu1 %1170 }
 0x16c   :  { %v1182_v62 = vadd.f32 %v1171_v5, %v8312_v37  ;;  %v1306_v46 = vadd.f32 %v1295_v29, %v8333_v47  ;;  %v1337_v11 = vpop.permute.xlu2 %1336 }
 0x173   :  { %v1415_v48 = vpop.permute.xlu0 %1414  ;;  %v1211_v13 = vpop.permute.xlu1 %1210 }
 0x174   :  { %v1222_v21 = vadd.f32 %v1211_v13, %v1182_v62  ;;  %v1426_v23 = vadd.f32 %v1415_v48, %v8343_v6 }
 0x176   :  { %v8316_v22 = vadd.f32 %v8274_v52, %v1222_v21 }
 0x178   :  { %v1667_v58 = vmul.f32 %v8282_v1, %v8316_v22 }
 0x17a   :  { %1738 = vrot.lane.b32.xlu2 %v1667_v58, %s11987_s22 }
 0x17b   :  { %v1297_v7 = vpop.permute.xlu0 %1296 }
 0x183   :  { %v1213_v5 = vpop.permute.xlu0 %1212 }
 0x184   :  { %v1223_v41 = vadd.f32 %v1213_v5, %v1183_v26  ;;  %v1346_v26 = vadd.f32 %v1335_v12, %v1306_v46  ;;  %v1466_v12 = vadd.f32 %v1455_v33, %v1426_v23  ;;  %v1687_v46 = vmul.f32 %v1667_v58, %v1667_v58 }
 0x186   :  { %v8326_v13 = vadd.f32 %v8252_v28, %v1223_v41  ;;  %v8346_v39 = vadd.f32 %v8276_v61, %v1346_v26  ;;  %v8361_v26 = vmul.f32 %v8200_v60, %v8234_v2 }
 0x188   :  { %v1668_v21 = vmul.f32 %v8282_v1, %v8326_v13  ;;  %v1669_v36 = vmul.f32 %v8282_v1, %v8346_v39  ;;  %v1307_v48 = vadd.f32 %v1297_v7, %v8361_v26 }
 0x18a   :  { %1740 = vrot.lane.b32.xlu2 %v1668_v21, %s11987_s22  ;;  %v1347_v9 = vadd.f32 %v1337_v11, %v1307_v48  ;;  %v8378_v11 = vpop.f32.mrf.mxu0  ;;  %v8380_v48 = vpop.f32.mrf.mxu1 }
 0x18b   :  { %v1417_v62 = vpop.permute.xlu0 %1416  ;;  %12158 = vst [vmem:[#allocation39_spill] sm:$0xff] %v8378_v11 }
 0x18c   :  { %v1427_v41 = vadd.f32 %v1417_v62, %v8338_v0  ;;  %v8372_v60 = vadd.f32 %v8256_v31, %v1347_v9  ;;  %12159 = vst [vmem:[#allocation40_spill] sm:$0xff] %v8380_v48 }
 0x18e   :  { %v1670_v7 = vmul.f32 %v8282_v1, %v8372_v60 }
 0x190   :  { %v1690_v43 = vmul.f32 %v1670_v7, %v1670_v7 }
 0x192   :  { %v8384_v9 = vpop.f32.mrf.mxu1 }
 0x193   :  { %v1457_v5 = vpop.permute.xlu0 %1456 }
 0x194   :  { %v1467_v50 = vadd.f32 %v1457_v5, %v1427_v41  ;;  %v1689_v41 = vmul.f32 %v1669_v36, %v1669_v36 }
 0x196   :  { %v8350_v29 = vadd.f32 %v8269_v44, %v1467_v50  ;;  %v1691_v5 = vadd.f32 %v1689_v41, %v1687_v46  ;;  %v8382_v41 = vpop.f32.mrf.mxu0 }
 0x198   :  { %v1672_v40 = vmul.f32 %v8282_v1, %v8350_v29 }
 0x19a   :  { %1756 = vrot.lane.b32.xlu2 %v1672_v40, %s12004_s23  ;;  %v1694_v56 = vmul.f32 %v1672_v40, %v1672_v40 }
 0x19b   :  { %v8357_v62 = vpop.permute.xlu0 %1471 }
 0x19c   :  { %v8364_v50 = vadd.f32 %v8357_v62, %v1466_v12  ;;  %v1688_v12 = vmul.f32 %v1668_v21, %v1668_v21 }
 0x19e   :  { %v1671_v33 = vmul.f32 %v8282_v1, %v8364_v50  ;;  %v1692_v46 = vadd.f32 %v1690_v43, %v1688_v12  ;;  %v8386_v1 = vpop.f32.mrf.mxu2  ;;  %v8388_v43 = vpop.f32.mrf.mxu3 }
 0x19f   :  { %12160 = vst [vmem:[#allocation41_spill] sm:$0xff] %v8386_v1 }
 0x1a0   :  { %1754 = vrot.lane.b32.xlu0 %v1671_v33, %s12004_s23  ;;  %v1693_v23 = vmul.f32 %v1671_v33, %v1671_v33  ;;  %v1696_v33 = vadd.f32 %v1694_v56, %v1692_v46  ;;  %12161 = vst [vmem:[#allocation42_spill] sm:$0xff] %v8388_v43 }
 0x1a2   :  { %v1695_v58 = vadd.f32 %v1693_v23, %v1691_v5  ;;  %v674_v5 = vpop.f32.mrf.mxu0  ;;  %v739_v23 = vpop.f32.mrf.mxu1 }
 0x1a3   :  { %v740_v11 = vadd.f32 %v739_v23, %v674_v5 }
 0x1a4   :  { %1699 = vrot.lane.b32.xlu1 %v1695_v58, %s11991_s24 }
 0x1a6   :  { %v8393_v12 = vpop.f32.mrf.mxu2 }
 0x1a7   :  { %12163 = vst [vmem:[#allocation44_spill] sm:$0xff] %v8393_v12 }
 0x1aa   :  { %v682_v21 = vpop.f32.mrf.mxu0  ;;  %v743_v58 = vpop.f32.mrf.mxu1 }
 0x1ac   :  { %1748 = vrot.lane.b32.xlu1 %v1670_v7, %s11985_s25 }
 0x1ae   :  { %v781_v54 = vpop.f32.mrf.mxu2 }
 0x1af   :  { %v782_v51 = vadd.f32 %v781_v54, %v740_v11  ;;  %v744_v54 = vadd.f32 %v743_v58, %v682_v21 }
 0x1b2   :  { %v8391_v40 = vpop.f32.mrf.mxu0  ;;  %v8395_v46 = vpop.f32.mrf.mxu1 }
 0x1b3   :  { %12162 = vst [vmem:[#allocation43_spill] sm:$0xff] %v8391_v40 }
 0x1b4   :  { %1701 = vrot.lane.b32.xlu1 %v1696_v33, %s11991_s24  ;;  %v1680_v7 = vpop.permute.xlu2 %1679  ;;  %12164 = vst [vmem:[#allocation45_spill] sm:$0xff] %v8395_v46  ;;  %v8397_v33 = vpop.f32.mrf.mxu3 }
 0x1b5   :  { %v1683_v56 = vsel %vm1682_vm1, %v1680_v7, 0.0  ;;  %12165 = vst [vmem:[#allocation46_spill] sm:$0xff] %v8397_v33 }
 0x1ba   :  { %v8399_v48 = vpop.f32.mrf.mxu0  ;;  %v8401_v1 = vpop.f32.mrf.mxu1 }
 0x1bb   :  { %12166 = vst [vmem:[#allocation47_spill] sm:$0xff] %v8399_v48 }
 0x1bc   :  { %12167 = vst [vmem:[#allocation48_spill] sm:$0xff] %v8401_v1  ;;  %v823_v55 = vpop.f32.mrf.mxu3 }
 0x1bd   :  { %v824_v43 = vadd.f32 %v823_v55, %v782_v51  ;;  %v786_v55 = vpop.f32.mrf.mxu2 }
 0x1be   :  { %v787_v51 = vadd.f32 %v786_v55, %v744_v54 }
 0x1c2   :  { %v874_v38 = vpop.f32.mrf.mxu0 }
 0x1c3   :  { %v875_v7 = vadd.f32 %v874_v38, %v824_v43 }
 0x1c4   :  { %v829_v11 = vpop.f32.mrf.mxu3 }
 0x1c5   :  { %v830_v43 = vadd.f32 %v829_v11, %v787_v51 }
 0x1de   :  { %1684 = vadd.xlane.f32.xlu1 %v1683_v56  ;;  %v911_v56 = vpop.f32.mrf.mxu1 }
 0x1df   :  { %v8404_v40 = vadd.f32 %v911_v56, %v875_v7  ;;  %v878_v7 = vpop.f32.mrf.mxu0 }
 0x1e0   :  { %v879_v56 = vadd.f32 %v878_v7, %v830_v43 }
 0x1e1   :  { %v1566_v46 = vmul.f32 %v8204_v8, %v8404_v40  ;;  %v1594_v7 = vmul.f32 %v8186_v53, %v8404_v40 }
 0x1e6   :  { %v915_v8 = vpop.f32.mrf.mxu1 }
 0x1f7   :  { %1746 = vrot.lane.b32.xlu1 %v1669_v36, %s11985_s25 }
 0x1ff   :  { %1574 = vrot.lane.b32.xlu1 %v1566_v46, %s11989_s21 }
 0x216   :  { %v1700_v48 = vpop.permute.xlu1 %1699 }
 0x217   :  { %v1705_v5 = vsel %vm1682_vm1, %v1700_v48, 0.0  ;;  %v916_v48 = vadd.f32 %v915_v8, %v879_v56 }
 0x218   :  { %1706 = vadd.xlane.f32.xlu2 %v1705_v5  ;;  %v1542_v5 = vmul.f32 %v8156_v34, %v8404_v40 }
 0x219   :  { %v1543_v46 = vmul.f32 %v8148_v24, %v916_v48  ;;  %v1515_v21 = vmul.f32 %v8134_v14, %v916_v48  ;;  %v1491_v58 = vmul.f32 %v8140_v17, %v916_v48  ;;  %v1490_v24 = vmul.f32 %v8181_v49, %v8404_v40 }
 0x21a   :  { %v1514_v14 = vmul.f32 %v8175_v45, %v8404_v40  ;;  %v1595_v17 = vmul.f32 %v8136_v15, %v916_v48  ;;  %v1619_v49 = vmul.f32 %v8196_v57, %v916_v48  ;;  %v1567_v54 = vmul.f32 %v8144_v20, %v916_v48 }
 0x21e   :  { %v8410_v23 = vpop.permute.xlu1 %1748 }
 0x226   :  { %v1702_v38 = vpop.permute.xlu1 %1701 }
 0x227   :  { %v1708_v36 = vsel %vm1682_vm1, %v1702_v38, 0.0 }
 0x228   :  { %1709 = vadd.xlane.f32.xlu0 %v1708_v36 }
 0x230   :  { %1719 = vrot.lane.b32.xlu2 %v8297_v27, %s11966_s26  ;;  %v8433_v27 = vstv %s7276_s7  ;;  %s8894_s7 = sld [smem:[#allocation9 + $0x80]] }
 0x231   :  { %12168 = vst [vmem:[#allocation49_spill] sm:$0xff] %v8433_v27  ;;  %v8438_v34 = vmul.f32 %v8433_v27, %v8326_v13  ;;  %v8447_v45 = vmul.f32 %v8433_v27, %v8350_v29  ;;  %v8460_v38 = vmul.f32 %v8433_v27, %v8316_v22  ;;  %v8464_v36 = vmul.f32 %v8433_v27, %v8346_v39 }
 0x232   :  { %v8468_v20 = vmul.f32 %v8433_v27, %v8364_v50  ;;  %v8489_v53 = vmul.f32 %v8433_v27, %v8285_v3 }
 0x233   :  { %v2350_v15 = vmul.f32 %v8438_v34, %v8438_v34  ;;  %v2356_v57 = vmul.f32 %v8447_v45, %v8447_v45  ;;  %v2349_v43 = vmul.f32 %v8460_v38, %v8460_v38  ;;  %v2351_v56 = vmul.f32 %v8464_v36, %v8464_v36 }
 0x234   :  { %v2355_v8 = vmul.f32 %v8468_v20, %v8468_v20 }
 0x235   :  { %v2353_v48 = vadd.f32 %v2351_v56, %v2349_v43 }
 0x238   :  { %1552 = vrot.lane.b32.xlu2 %v1543_v46, %s11995_s20  ;;  %v2357_v46 = vadd.f32 %v2355_v8, %v2353_v48 }
 0x23c   :  { %1723 = vrot.lane.b32.xlu0 %v8306_v4, %s11995_s20  ;;  %v8443_v4 = vmul.f32 %v8433_v27, %v8372_v60 }
 0x23e   :  { %v2352_v55 = vmul.f32 %v8443_v4, %v8443_v4 }
 0x240   :  { %1524 = vrot.lane.b32.xlu2 %v1515_v21, %s11989_s21  ;;  %v2354_v51 = vadd.f32 %v2352_v55, %v2350_v15  ;;  %v8483_v21 = vmul.f32 %v8433_v27, %v8291_v10 }
 0x242   :  { %v2358_v11 = vadd.f32 %v2356_v57, %v2354_v51  ;;  %v1716_v57 = vpop.permute.xlu0 %1715 }
 0x244   :  { %1500 = vrot.lane.b32.xlu0 %v1491_v58, %s11995_s20  ;;  %v1618_v58 = vmul.f32 %v8216_v35, %v8404_v40 }
 0x248   :  { %1550 = vrot.lane.b32.xlu2 %v1542_v5, %s11995_s20  ;;  %v8493_v5 = vmul.f32 %v8433_v27, %v8300_v42 }
 0x24a   :  { %v1755_v56 = vpop.permute.xlu0 %1754 }
 0x24c   :  { %1498 = vrot.lane.b32.xlu0 %v1490_v24, %s11995_s20  ;;  %v2337_v24 = vmul.f32 %v8483_v21, %v8483_v21 }
 0x250   :  { %1522 = vrot.lane.b32.xlu2 %v1514_v14, %s11989_s21  ;;  %v2336_v14 = vmul.f32 %v8489_v53, %v8489_v53 }
 0x251   :  { %v1685_v55 = vpop.xlane.xlu1 %1684 }
 0x252   :  { %v2338_v35 = vadd.f32 %v2337_v24, %v2336_v14 }
 0x254   :  { %1604 = vrot.lane.b32.xlu0 %v1595_v17, %s11995_s20  ;;  %v2339_v17 = vmul.f32 %v8493_v5, %v8493_v5 }
 0x256   :  { %v2340_v40 = vadd.f32 %v2339_v17, %v2338_v35 }
 0x258   :  { %1628 = vrot.lane.b32.xlu2 %v1619_v49, %s11989_s21  ;;  %v1739_v49 = vpop.permute.xlu2 %1738 }
 0x259   :  { %v1760_v43 = vsel %vm1726_vm2, %v8208_v25, %v1739_v49 }
 0x25c   :  { %1576 = vrot.lane.b32.xlu0 %v1567_v54, %s11989_s21 }
 0x260   :  { %2363 = vrot.lane.b32.xlu2 %v2358_v11, %s11993_s27  ;;  %v1741_v15 = vpop.permute.xlu2 %1740 }
 0x261   :  { %v1761_v24 = vsel %vm1726_vm2, %v8234_v2, %v1741_v15 }
 0x262   :  { %v1763_v17 = vsel %vm1728_vm3, %v1761_v24, %v8410_v23 }
 0x264   :  { %1602 = vrot.lane.b32.xlu0 %v1594_v7, %s11995_s20 }
 0x268   :  { %2361 = vrot.lane.b32.xlu2 %v2357_v46, %s11993_s27  ;;  %v1757_v54 = vpop.permute.xlu2 %1756  ;;  %s7294_s27 = sld [smem:[#allocation10 + $0x3]] }
 0x269   :  { %v1747_v11 = vpop.permute.xlu1 %1746 }
 0x26a   :  { %v1762_v7 = vsel %vm1728_vm3, %v1760_v43, %v1747_v11 }
 0x26b   :  { %v1764_v8 = vsel %vm1730_vm4, %v1762_v7, %v1755_v56 }
 0x26c   :  { %1626 = vrot.lane.b32.xlu0 %v1618_v58, %s11989_s21  ;;  %v1766_v58 = vsel %vm1732_vm6, %v1764_v8, 1.0 }
 0x270   :  { %1998 = vrot.lane.b32.xlu2 %v8234_v2, %s11989_s21 }
 0x274   :  { %2342 = vrot.lane.b32.xlu0 %v2340_v40, %s11968_s28  ;;  %v1765_v40 = vsel %vm1730_vm4, %v1763_v17, %v1757_v54  ;;  %s11981_s28 = smov 32  }
 0x275   :  { %v1767_v7 = vsel %vm1732_vm6, %v1765_v40, 1.0  ;;  %v1686_v40 = vmul.f32 0.5, %v1685_v55 }
 0x28b   :  { %v1707_v51 = vpop.xlane.xlu2 %1706 }
 0x28c   :  { %v1711_v48 = vmul.f32 0.5, %v1707_v51 }
 0x28e   :  { %v1768_v14 = vsel %vm1734_vm5, %v1766_v58, %v1711_v48 }
 0x28f   :  { %v1806_v35 = vsel %vm1801_vm7, %v1768_v14, 0 }
 0x290   :  { %v1827_v43 = vand.u32 4294901760, %v1806_v35 }
 0x292   :  { %v1859_v48 = vsub.f32 %v1806_v35, %v1827_v43 }
 0x293   :  { %v1720_v46 = vpop.permute.xlu2 %1719 }
 0x294   :  { %v1860_v14 = vand.u32 4294901760, %v1859_v48 }
 0x29b   :  { %v1710_v49 = vpop.xlane.xlu0 %1709  ;;  %v8517_v51 = vpop.permute.xlu2 %1552 }
 0x29c   :  { %v1712_v11 = vmul.f32 0.5, %v1710_v49  ;;  %v1861_v49 = vsub.f32 %v1859_v48, %v1860_v14 }
 0x29e   :  { %v1769_v56 = vsel %vm1734_vm5, %v1767_v7, %v1712_v11  ;;  %v8523_v11 = vmul.f32 0.20412415, %v8152_v32  ;;  %v1862_v7 = vand.u32 4294901760, %v1861_v49 }
 0x29f   :  { %v1809_v15 = vsel %vm1801_vm7, %v1769_v56, 0 }
 0x2a0   :  { %v1825_v8 = vand.u32 4294901760, %v1809_v15  ;;  %v1727_v56 = vsel %vm1726_vm2, %v8523_v11, %v1716_v57 }
 0x2a1   :  { %v1729_v27 = vsel %vm1728_vm3, %v1727_v56, %v1720_v46 }
 0x2a2   :  { %1826 = vmatpush.xpose.msrb.mxu2 %v1825_v8  ;;  %1962 = vmatpush.xpose.msra.mxu1 %v1825_v8  ;;  %v1853_v23 = vsub.f32 %v1809_v15, %v1825_v8  ;;  %v1713_v15 = vsub.f32 0.0, %v1686_v40 }
 0x2a3   :  { %v1525_v58 = vpop.permute.xlu2 %1524 }
 0x2a4   :  { %v1854_v24 = vand.u32 4294901760, %v1853_v23 }
 0x2a6   :  { %1828 = vmatpush.xpose.msrb.mxu2 %v1827_v43  ;;  %1937 = vmatpush.xpose.msra.mxu0 %v1854_v24  ;;  %v1855_v54 = vsub.f32 %v1853_v23, %v1854_v24 }
 0x2a7   :  { %1964 = vmatpush.xpose.msra.mxu1 %v1827_v43 }
 0x2a8   :  { %v1856_v17 = vand.u32 4294901760, %v1855_v54 }
 0x2aa   :  { %1885 = vmatpush.xpose.msra.mxu2 %v1853_v23  ;;  %1857 = vmatpush.xpose.msrb.mxu3 %v1856_v17 }
 0x2ab   :  { %1941 = vmatpush.xpose.msra.mxu0 %v1860_v14  ;;  %v1551_v35 = vpop.permute.xlu2 %1550 }
 0x2ae   :  { %1888 = vmatpush.xpose.msra.mxu2 %v1859_v48  ;;  %v1724_v24 = vpop.permute.xlu0 %1723  ;;  %1863 = vmatpush.xpose.msrb.mxu3 %v1862_v7 }
 0x2af   :  { %v1731_v23 = vsel %vm1730_vm4, %v1729_v27, %v1724_v24 }
 0x2b0   :  { %v1733_v55 = vsel %vm1732_vm6, %v1731_v23, %v1713_v15 }
 0x2b1   :  { %v1735_v14 = vsel %vm1734_vm5, %v1733_v55, -1.0 }
 0x2b2   :  { %1910 = vmatpush.xpose.msra.mxu3 %v1825_v8  ;;  %v1803_v32 = vsel %vm1801_vm7, %v1735_v14, 0 }
 0x2b3   :  { %v1829_v48 = vand.u32 4294901760, %v1803_v32  ;;  %v1523_v54 = vpop.permute.xlu2 %1522 }
 0x2b5   :  { %v1830_v17 = vsub.f32 %v1803_v32, %v1829_v48  ;;  %1865 = vmatmul.f32.vlgmr.msrb.gmra.mxu3 %v1829_v48  ;;  %1943 = vmatmul.f32.vlgmr.msra.gmra.mxu0 %v1829_v48 }
 0x2b6   :  { %1912 = vmatpush.xpose.msra.mxu3 %v1827_v43  ;;  %1966 = vmatmul.f32.vlgmr.msra.gmra.mxu1 %v1829_v48  ;;  %v1501_v57 = vpop.permute.xlu0 %1500 }
 0x2b7   :  { %v1511_v46 = vadd.f32 %v1501_v57, %v8322_v19  ;;  %v1831_v49 = vand.u32 4294901760, %v1830_v17  ;;  %v1563_v19 = vadd.f32 %v8517_v51, %v8361_v26  ;;  %v1575_v26 = vpop.permute.xlu1 %1574 }
 0x2b9   :  { %v1535_v40 = vadd.f32 %v1525_v58, %v1511_v46  ;;  %v1832_v27 = vsub.f32 %v1830_v17, %v1831_v49 }
 0x2bb   :  { %v8534_v8 = vadd.f32 %v1535_v40, %v8252_v28  ;;  %v8536_v7 = vpop.permute.xlu2 %1628  ;;  %v1833_v56 = vand.u32 4294901760, %v1832_v27 }
 0x2bd   :  { %1834 = vmatmul.f32.vlgmr.msrb.gmra.mxu2 %v1833_v56  ;;  %1916 = vmatmul.f32.vlgmr.msra.gmra.mxu3 %v1831_v49 }
 0x2be   :  { %2006 = vrot.lane.b32.xlu1 %v8534_v8, %s12000_s29  ;;  %v1499_v43 = vpop.permute.xlu0 %1498 }
 0x2bf   :  { %v1510_v55 = vadd.f32 %v1499_v43, %v8312_v37 }
 0x2c1   :  { %v1534_v32 = vadd.f32 %v1523_v54, %v1510_v55 }
 0x2c3   :  { %v2364_v15 = vpop.permute.xlu2 %2363  ;;  %v8557_v57 = vadd.f32 %v1534_v32, %v8274_v52  ;;  %v8630_v32 = vld [vmem:[%s11899_s2] sm:$0xff] }
 0x2c4   :  { %v2370_v24 = vsel %vm1682_vm1, %v2364_v15, 0.0 }
 0x2c5   :  { %1891 = vmatmul.f32.vlgmr.msra.gmra.mxu2 %v1830_v17  ;;  %2371 = vadd.xlane.f32.xlu0 %v2370_v24  ;;  %v1562_v17 = vadd.f32 %v1551_v35, %v8333_v47 }
 0x2c6   :  { %1996 = vrot.lane.b32.xlu1 %v8208_v25, %s11989_s21  ;;  %v8543_v28 = vpop.permute.xlu0 %1604 }
 0x2c7   :  { %v1586_v37 = vadd.f32 %v1575_v26, %v1562_v17  ;;  %v8635_v17 = vld [vmem:[%s11899_s2 + $0x8] sm:$0xff]  ;;  %v11972_v26 = vstv %s8606_s8  ;;  %v1615_v30 = vadd.f32 %v8543_v28, %v8338_v0 }
 0x2c9   :  { %v1639_v16 = vadd.f32 %v8536_v7, %v1615_v30 }
 0x2cb   :  { %v2362_v47 = vpop.permute.xlu2 %2361 }
 0x2cc   :  { %v2367_v52 = vsel %vm1682_vm1, %v2362_v47, 0.0 }
 0x2ce   :  { %v1577_v58 = vpop.permute.xlu0 %1576 }
 0x2cf   :  { %v1587_v23 = vadd.f32 %v1577_v58, %v1563_v19 }
 0x2d1   :  { %v8549_v14 = vadd.f32 %v1587_v23, %v8256_v31  ;;  %v8564_v31 = vadd.f32 %v1586_v37, %v8276_v61  ;;  %v8580_v61 = vstv %s7285_s30  ;;  %v11971_v37 = vstv %s8608_s14  ;;  %s8639_s30 = sld [smem:[#allocation9 + $0x3]] }
 0x2d2   :  { %12169 = vst [vmem:[#allocation50_spill] sm:$0xff] %v8580_v61  ;;  %v8584_v35 = vmul.f32 %v8580_v61, %v8326_v13  ;;  %v8588_v49 = vmul.f32 %v8580_v61, %v8372_v60  ;;  %v8604_v43 = vmul.f32 %v8580_v61, %v8316_v22  ;;  %v8612_v15 = vmul.f32 %v8580_v61, %v8346_v39 }
 0x2d3   :  { %2014 = vrot.lane.b32.xlu2 %v8549_v14, %s11983_s11  ;;  %v8616_v24 = vmul.f32 %v8580_v61, %v8364_v50  ;;  %v1775_v47 = vmul.f32 %v8635_v17, %v11971_v37 }
 0x2d4   :  { %v3002_v40 = vmul.f32 %v8588_v49, %v8588_v49  ;;  %v2999_v19 = vmul.f32 %v8604_v43, %v8604_v43  ;;  %v3001_v58 = vmul.f32 %v8612_v15, %v8612_v15 }
 0x2d5   :  { %v3005_v23 = vmul.f32 %v8616_v24, %v8616_v24 }
 0x2d6   :  { %v8553_v48 = vpop.permute.xlu0 %1602  ;;  %v3003_v55 = vadd.f32 %v3001_v58, %v2999_v19 }
 0x2d7   :  { %v1614_v0 = vadd.f32 %v8553_v48, %v8343_v6  ;;  %v1999_v6 = vpop.permute.xlu2 %1998 }
 0x2db   :  { %2004 = vrot.lane.b32.xlu2 %v8557_v57, %s12000_s29 }
 0x2de   :  { %v8561_v51 = vpop.permute.xlu0 %1626 }
 0x2e3   :  { %2012 = vrot.lane.b32.xlu2 %v8564_v31, %s11983_s11 }
 0x2e6   :  { %v2343_v54 = vpop.permute.xlu0 %2342 }
 0x2e7   :  { %v2345_v46 = vsel %vm1682_vm1, %v2343_v54, 0.0  ;;  %v3007_v54 = vadd.f32 %v3005_v23, %v3003_v55  ;;  %v8675_v23 = vld [vmem:[%s11899_s2 + $0x20] sm:$0xff]  ;;  %v11970_v55 = vstv %s8654_s3 }
 0x2e8   :  { %2346 = vadd.xlane.f32.xlu0 %v2345_v46  ;;  %v1772_v46 = vmul.f32 %v11972_v26, %v8630_v32 }
 0x2eb   :  { %2399 = vrot.lane.b32.xlu2 %v8234_v2, %s11962_s12 }
 0x2f0   :  { %2368 = vadd.xlane.f32.xlu0 %v2367_v52  ;;  %v8651_v52 = vld [vmem:[%s11899_s2 + $0x10] sm:$0xff] }
 0x2f3   :  { %2415 = vrot.lane.b32.xlu2 %v8443_v4, %s11987_s22  ;;  %v8592_v4 = vmul.f32 %v8580_v61, %v8350_v29 }
 0x2f5   :  { %v3006_v27 = vmul.f32 %v8592_v4, %v8592_v4 }
 0x2fb   :  { %2397 = vrot.lane.b32.xlu2 %v8208_v25, %s11962_s12 }
 0x303   :  { %2377 = vrot.lane.b32.xlu2 %v8523_v11, %s11962_s12  ;;  %s12008_s12 = smov 100  }
 0x30b   :  { %2385 = vrot.lane.b32.xlu2 %v8483_v21, %s12012_s1  ;;  %v3000_v21 = vmul.f32 %v8584_v35, %v8584_v35 }
 0x30d   :  { %v3004_v56 = vadd.f32 %v3002_v40, %v3000_v21  ;;  %v11965_v21 = vstv %s8621_s18  ;;  %v1776_v40 = vadd.f32 %v1775_v47, %v1772_v46  ;;  %v8682_v46 = vpop.f32.mrf.mxu3 }
 0x30e   :  { %12171 = vst [vmem:[#allocation52_spill] sm:$0xff] %v8682_v46 }
 0x313   :  { %2389 = vrot.lane.b32.xlu2 %v8493_v5, %s11966_s26  ;;  %v3008_v5 = vadd.f32 %v3006_v27, %v3004_v56  ;;  %v1779_v27 = vmul.f32 %v8651_v52, %v11965_v21  ;;  %v8662_v56 = vld [vmem:[%s11899_s2 + $0x18] sm:$0xff]  ;;  %s12010_s26 = smov 68  }
 0x315   :  { %v1780_v19 = vadd.f32 %v1779_v27, %v1776_v40  ;;  %v1787_v40 = vmul.f32 %v8675_v23, %v11970_v55  ;;  %v8690_v27 = vld [vmem:[%s11899_s2 + $0x28] sm:$0xff]  ;;  %v11974_v55 = vstv %s8678_s16 }
 0x31b   :  { %3013 = vrot.lane.b32.xlu2 %v3008_v5, %s11960_s15  ;;  %v11964_v5 = vstv %s8639_s30 }
 0x31c   :  { %v1783_v58 = vmul.f32 %v8662_v56, %v11964_v5  ;;  %v11973_v5 = vstv %s8665_s17 }
 0x31e   :  { %v1784_v47 = vadd.f32 %v1783_v58, %v1780_v19  ;;  %v1791_v19 = vmul.f32 %v8690_v27, %v11973_v5  ;;  %v8703_v58 = vld [vmem:[%s11899_s2 + $0x30] sm:$0xff]  ;;  %v8719_v5 = vpop.f32.mrf.mxu0 }
 0x31f   :  { %v1795_v26 = vmul.f32 %v8703_v58, %v11974_v55  ;;  %12174 = vst [vmem:[#allocation55_spill] sm:$0xff] %v8719_v5 }
 0x320   :  { %v1788_v21 = vadd.f32 %v1787_v40, %v1784_v47  ;;  %v8716_v47 = vld [vmem:[%s11899_s2 + $0x38] sm:$0xff] }
 0x322   :  { %v1792_v37 = vadd.f32 %v1791_v19, %v1788_v21  ;;  %v8726_v19 = vpop.f32.mrf.mxu1 }
 0x323   :  { %3011 = vrot.lane.b32.xlu2 %v3007_v54, %s11960_s15  ;;  %v8680_v54 = vpop.f32.mrf.mxu2  ;;  %s8693_s15 = sld [smem:[#allocation9 + $0x7]]  ;;  %12175 = vst [vmem:[#allocation56_spill] sm:$0xff] %v8726_v19  ;;  %v8738_v19 = vadd.f32 %v1639_v16, %v8269_v44 }
 0x324   :  { %12170 = vst [vmem:[#allocation51_spill] sm:$0xff] %v8680_v54  ;;  %v8711_v54 = vpop.f32.mrf.mxu3  ;;  %v1796_v1 = vadd.f32 %v1795_v26, %v1792_v37 }
 0x325   :  { %12173 = vst [vmem:[#allocation54_spill] sm:$0xff] %v8711_v54 }
 0x326   :  { %v8732_v5 = vpop.f32.mrf.mxu0 }
 0x327   :  { %12176 = vst [vmem:[#allocation57_spill] sm:$0xff] %v8732_v5 }
 0x329   :  { %v11975_v40 = vstv %s8693_s15 }
 0x32a   :  { %v1799_v21 = vmul.f32 %v8716_v47, %v11975_v40  ;;  %v8735_v26 = vpop.f32.mrf.mxu1 }
 0x32b   :  { %2662 = vrot.lane.b32.xlu2 %v8234_v2, %s11979_s0  ;;  %v8709_v46 = vpop.f32.mrf.mxu2  ;;  %12177 = vst [vmem:[#allocation58_spill] sm:$0xff] %v8735_v26 }
 0x32c   :  { %12172 = vst [vmem:[#allocation53_spill] sm:$0xff] %v8709_v46  ;;  %v1800_v55 = vadd.f32 %v1799_v21, %v1796_v1 }
 0x330   :  { %v2007_v44 = vpop.permute.xlu1 %2006 }
 0x333   :  { %2668 = vrot.lane.b32.xlu2 %v8534_v8, %s12002_s19  ;;  %v1967_v7 = vpop.f32.mrf.mxu1 }
 0x338   :  { %v1866_v46 = vpop.f32.mrf.mxu3 }
 0x33b   :  { %2674 = vrot.lane.b32.xlu2 %v8549_v14, %s12000_s29 }
 0x340   :  { %v1835_v54 = vpop.f32.mrf.mxu2  ;;  %v1917_v21 = vpop.f32.mrf.mxu3 }
 0x341   :  { %v1836_v18 = vadd.f32 %v1835_v54, %v1800_v55  ;;  %v1944_v55 = vpop.f32.mrf.mxu0  ;;  %v1638_v54 = vadd.f32 %v8561_v51, %v1614_v0 }
 0x343   :  { %2666 = vrot.lane.b32.xlu2 %v8557_v57, %s12002_s19  ;;  %v1867_v37 = vadd.f32 %v1866_v46, %v1836_v18  ;;  %v8746_v18 = vadd.f32 %v1638_v54, %v8357_v62  ;;  %v2015_v62 = vpop.permute.xlu2 %2014  ;;  %v2027_v46 = vsel %vm1726_vm2, %v1999_v6, %v2007_v44 }
 0x348   :  { %v1892_v40 = vpop.f32.mrf.mxu2 }
 0x349   :  { %v1893_v1 = vadd.f32 %v1892_v40, %v1867_v37  ;;  %v2029_v37 = vsel %vm1728_vm3, %v2027_v46, %v2015_v62 }
 0x34b   :  { %v1918_v28 = vadd.f32 %v1917_v21, %v1893_v1  ;;  %2680 = vrot.lane.b32.xlu2 %v8738_v19, %s11983_s11  ;;  %v2005_v48 = vpop.permute.xlu2 %2004 }
 0x34d   :  { %v1945_v30 = vadd.f32 %v1944_v55, %v1918_v28  ;;  %v8780_v28 = vmul.f32 %v8580_v61, %v8291_v10 }
 0x34f   :  { %v1968_v26 = vadd.f32 %v1967_v7, %v1945_v30  ;;  %v8785_v30 = vmul.f32 %v8580_v61, %v8285_v3  ;;  %v8789_v7 = vmul.f32 %v8580_v61, %v8300_v42 }
 0x351   :  { %v1970_v16 = vsel %vm1730_vm4, %v1968_v26, -inf }
 0x352   :  { %1971 = vmax.xlane.f32.xlu1 %v1970_v16 }
 0x353   :  { %2678 = vrot.lane.b32.xlu2 %v8746_v18, %s11983_s11  ;;  %s8902_s11 = sld [smem:[#allocation9 + $0x83]] }
 0x359   :  { %12181 = sst [smem:[#allocation61_spill]] %s8902_s11 }
 0x35b   :  { %3056 = vrot.lane.b32.xlu2 %v8584_v35, %s11991_s24 }
 0x363   :  { %3064 = vrot.lane.b32.xlu2 %v8588_v49, %s12010_s26 }
 0x36b   :  { %2022 = vrot.lane.b32.xlu1 %v8738_v19, %s11981_s28 }
 0x373   :  { %2020 = vrot.lane.b32.xlu1 %v8746_v18, %s11981_s28  ;;  %s8898_s28 = sld [smem:[#allocation9 + $0x82]] }
 0x379   :  { %12180 = sst [smem:[#allocation60_spill]] %s8898_s28 }
 0x37b   :  { %2407 = vrot.lane.b32.xlu1 %v8438_v34, %s12010_s26  ;;  %v1997_v34 = vpop.permute.xlu1 %1996 }
 0x37c   :  { %v2026_v54 = vsel %vm1726_vm2, %v1997_v34, %v2005_v48  ;;  %v2987_v34 = vmul.f32 %v8780_v28, %v8780_v28 }
 0x383   :  { %2423 = vrot.lane.b32.xlu1 %v8447_v45, %s11985_s25 }
 0x38b   :  { %2405 = vrot.lane.b32.xlu1 %v8460_v38, %s12010_s26  ;;  %v2013_v38 = vpop.permute.xlu2 %2012 }
 0x38c   :  { %v2028_v16 = vsel %vm1728_vm3, %v2026_v54, %v2013_v38 }
 0x393   :  { %2381 = vrot.lane.b32.xlu1 %v8489_v53, %s12008_s12 }
 0x39b   :  { %2421 = vrot.lane.b32.xlu1 %v8468_v20, %s11985_s25  ;;  %v2400_v20 = vpop.permute.xlu2 %2399  ;;  %s8911_s25 = sld [smem:[#allocation9 + $0x84]] }
 0x3a1   :  { %12182 = sst [smem:[#allocation62_spill]] %s8911_s25 }
 0x3a3   :  { %2660 = vrot.lane.b32.xlu1 %v8208_v25, %s11979_s0  ;;  %v2416_v21 = vpop.permute.xlu2 %2415 }
 0x3c5   :  { %v1972_v51 = vpop.xlane.xlu1 %1971 }
 0x3c6   :  { %v1973_v45 = vsub.f32 %v1968_v26, %v1972_v51 }
 0x3c8   :  { %v1974_v35 = vmul.f32 1.442695, %v1973_v45  ;;  %v2986_v45 = vmul.f32 %v8785_v30, %v8785_v30 }
 0x3ca   :  { %7411 = vpow2.f32 %v1974_v35  ;;  %v2989_v35 = vmul.f32 %v8789_v7, %v8789_v7  ;;  %v2988_v46 = vadd.f32 %v2987_v34, %v2986_v45 }
 0x3d0   :  { %v8771_v49 = vpop.eup %7411 }
 0x3d1   :  { %v1976_v53 = vsel %vm1730_vm4, %v8771_v49, 0.0 }
 0x3d2   :  { %1977 = vadd.xlane.f32.xlu0 %v1976_v53  ;;  %v8801_v53 = vpop.permute.xlu2 %2397 }
 0x3dd   :  { %v2023_v40 = vpop.permute.xlu1 %2022 }
 0x3de   :  { %v2031_v1 = vsel %vm1730_vm4, %v2029_v37, %v2023_v40  ;;  %v2990_v40 = vadd.f32 %v2989_v35, %v2988_v46 }
 0x3df   :  { %v2049_v0 = vand.u32 4294901760, %v2031_v1 }
 0x3e1   :  { %v2077_v26 = vsub.f32 %v2031_v1, %v2049_v0  ;;  %2050 = vmatpush.msrb.mxu2 %v2049_v0  ;;  %2134 = vmatpush.msrb.mxu1 %v2049_v0 }
 0x3e3   :  { %v2078_v55 = vand.u32 4294901760, %v2077_v26  ;;  %2109 = vmatpush.msrb.mxu0 %v2077_v26 }
 0x3e5   :  { %v2079_v6 = vsub.f32 %v2077_v26, %v2078_v55  ;;  %v2021_v44 = vpop.permute.xlu1 %2020 }
 0x3e6   :  { %v2030_v62 = vsel %vm1730_vm4, %v2028_v16, %v2021_v44  ;;  %2413 = vrot.lane.b32.xlu0 %v8464_v36, %s11987_s22  ;;  %v2372_v16 = vpop.xlane.xlu0 %2371 }
 0x3e7   :  { %v2051_v48 = vand.u32 4294901760, %v2030_v62  ;;  %v2080_v51 = vand.u32 4294901760, %v2079_v6  ;;  %v2378_v6 = vpop.permute.xlu2 %2377 }
 0x3e9   :  { %v2083_v38 = vsub.f32 %v2030_v62, %v2051_v48  ;;  %2052 = vmatpush.msrb.mxu2 %v2051_v48  ;;  %2081 = vmatpush.msrb.mxu3 %v2080_v51  ;;  %v2374_v62 = vmul.f32 0.5, %v2372_v16 }
 0x3ea   :  { %2136 = vmatpush.msrb.mxu1 %v2051_v48 }
 0x3eb   :  { %2161 = vmatpush.msra.mxu2 %v2078_v55  ;;  %2112 = vmatpush.msrb.mxu0 %v2083_v38  ;;  %v2084_v36 = vand.u32 4294901760, %v2083_v38 }
 0x3ed   :  { %v2408_v37 = vpop.permute.xlu1 %2407  ;;  %2165 = vmatpush.msra.mxu2 %v2084_v36  ;;  %v2085_v1 = vsub.f32 %v2083_v38, %v2084_v36 }
 0x3ee   :  { %2992 = vrot.lane.b32.xlu0 %v2990_v40, %s11979_s0  ;;  %v2428_v54 = vsel %vm1726_vm2, %v2400_v20, %v2408_v37  ;;  %s8896_s0 = sld [smem:[#allocation9 + $0x81]] }
 0x3ef   :  { %v2086_v26 = vand.u32 4294901760, %v2085_v1  ;;  %v2430_v55 = vsel %vm1728_vm3, %v2428_v54, %v2416_v21  ;;  %v2386_v21 = vpop.permute.xlu2 %2385 }
 0x3f1   :  { %2087 = vmatpush.msrb.mxu3 %v2086_v26  ;;  %v2347_v26 = vpop.xlane.xlu0 %2346 }
 0x3f3   :  { %2186 = vmatpush.msra.mxu3 %v2049_v0 }
 0x3f5   :  { %2188 = vmatpush.msra.mxu3 %v2051_v48  ;;  %v2424_v44 = vpop.permute.xlu1 %2423 }
 0x3f6   :  { %v2432_v34 = vsel %vm1730_vm4, %v2430_v55, %v2424_v44  ;;  %2672 = vrot.lane.b32.xlu0 %v8564_v31, %s12000_s29 }
 0x3f7   :  { %v2434_v51 = vsel %vm1732_vm6, %v2432_v34, 1.0  ;;  %v2390_v36 = vpop.permute.xlu2 %2389 }
 0x3f8   :  { %v2436_v45 = vsel %vm1734_vm5, %v2434_v51, %v2374_v62 }
 0x3f9   :  { %v2475_v35 = vsel %vm1801_vm7, %v2436_v45, 0  ;;  %v2369_v55 = vpop.xlane.xlu0 %2368 }
 0x3fa   :  { %v8812_v20 = vand.u32 4294901760, %v2475_v35 }
 0x3fc   :  { %v8815_v0 = vsub.f32 %v2475_v35, %v8812_v20  ;;  %2492 = vmatpush.xpose.msra.mxu0 %v8812_v20  ;;  %v2348_v35 = vmul.f32 0.5, %v2347_v26 }
 0x3fd   :  { %v2406_v54 = vpop.permute.xlu1 %2405 }
 0x3fe   :  { %3072 = vrot.lane.b32.xlu0 %v8592_v4, %s11987_s22  ;;  %v11976_v48 = vand.u32 4294901760, %v8815_v0 }
 0x3ff   :  { %v8828_v40 = vpop.permute.xlu2 %3013 }
 0x400   :  { %v2521_v38 = vsub.f32 %v8815_v0, %v11976_v48 }
 0x402   :  { %v2522_v46 = vand.u32 4294901760, %v2521_v38 }
 0x404   :  { %2523 = vmatpush.xpose.msra.mxu1 %v2522_v46  ;;  %v2375_v46 = vsub.f32 0.0, %v2348_v35 }
 0x405   :  { %v2382_v62 = vpop.permute.xlu1 %2381 }
 0x406   :  { %3046 = vrot.lane.b32.xlu0 %v8208_v25, %s11995_s20  ;;  %v2392_v51 = vsel %vm1726_vm2, %v2378_v6, %v2382_v62 }
 0x407   :  { %v3012_v37 = vpop.permute.xlu2 %3011 }
 0x408   :  { %v3017_v16 = vsel %vm1682_vm1, %v3012_v37, 0.0 }
 0x40e   :  { %3054 = vrot.lane.b32.xlu0 %v8604_v43, %s11991_s24  ;;  %v2393_v43 = vsel %vm1728_vm3, %v2392_v51, %v2386_v21  ;;  %s8929_s24 = sld [smem:[#allocation9 + $0x87]] }
 0x40f   :  { %v2663_v1 = vpop.permute.xlu2 %2662  ;;  %v2394_v38 = vsel %vm1730_vm4, %v2393_v43, %v2390_v36 }
 0x410   :  { %v2395_v5 = vsel %vm1732_vm6, %v2394_v38, %v2375_v46 }
 0x411   :  { %v2396_v12 = vsel %vm1734_vm5, %v2395_v5, -1.0 }
 0x412   :  { %v2469_v36 = vsel %vm1801_vm7, %v2396_v12, 0  ;;  %v2427_v12 = vsel %vm1726_vm2, %v8801_v53, %v2406_v54 }
 0x414   :  { %12185 = sst [smem:[#allocation65_spill]] %s8929_s24 }
 0x417   :  { %v2669_v4 = vpop.permute.xlu2 %2668 }
 0x418   :  { %v2685_v61 = vsel %vm1726_vm2, %v2663_v1, %v2669_v4  ;;  %v8844_v1 = vand.u32 4294901760, %v2469_v36 }
 0x41a   :  { %v8855_v46 = vsub.f32 %v2469_v36, %v8844_v1 }
 0x41f   :  { %v2675_v44 = vpop.permute.xlu2 %2674 }
 0x420   :  { %v2687_v33 = vsel %vm1728_vm3, %v2685_v61, %v2675_v44 }
 0x427   :  { %v8831_v34 = vpop.permute.xlu2 %2666 }
 0x42f   :  { %v2681_v37 = vpop.permute.xlu2 %2680 }
 0x430   :  { %v2689_v26 = vsel %vm1730_vm4, %v2687_v33, %v2681_v37 }
 0x431   :  { %v8842_v35 = vand.u32 4294901760, %v2689_v26 }
 0x433   :  { %v8847_v4 = vsub.f32 %v2689_v26, %v8842_v35 }
 0x438   :  { %3018 = vadd.xlane.f32.xlu0 %v3017_v16 }
 0x445   :  { %v1978_v45 = vpop.xlane.xlu0 %1977 }
 0x446   :  { %7413 = vrcp.f32 %v1978_v45  ;;  %v1990_v62 = vand.u32 2147483648, %v1978_v45  ;;  %v1988_v51 = vand.u32 2147483647, %v1978_v45  ;;  %vm1984_vm9 = vweird.f32 %v1978_v45 }
 0x448   :  { %v1991_v38 = vor.u32 1.1754944e-38, %v1990_v62  ;;  %vm1989_vm11 = vcmp.eq.f32.partialorder %v1988_v51, 8.507059e+37  ;;  %v2497_v51 = vand.u32 4294901760, %v8855_v46 }
 0x44c   :  { %v7414_v48 = vpop.eup %7413 }
 0x44d   :  { %v1980_v16 = vmul.f32 %v7414_v48, %v1978_v45  ;;  %vm1985_vm8 = vweird.f32 %v7414_v48  ;;  %v2422_v45 = vpop.permute.xlu1 %2421 }
 0x44e   :  { %vm1986_vm10 = vmor %vm1984_vm9, %vm1985_vm8 }
 0x44f   :  { %v1981_v6 = vsub.f32 1.0, %v1980_v16  ;;  %v2373_v16 = vmul.f32 0.5, %v2369_v55 }
 0x451   :  { %v1982_v21 = vmul.f32 %v7414_v48, %v1981_v6 }
 0x453   :  { %v1983_v43 = vadd.f32 %v7414_v48, %v1982_v21 }
 0x455   :  { %v1987_v61 = vsel %vm1986_vm10, %v7414_v48, %v1983_v43 }
 0x456   :  { %v1992_v5 = vsel %vm1989_vm11, %v1991_v38, %v1987_v61 }
 0x457   :  { %v8850_v33 = vmul.f32 %v8771_v49, %v1992_v5  ;;  %v2736_v49 = vand.u32 4294901760, %v8847_v4 }
 0x458   :  { %v2414_v44 = vpop.permute.xlu0 %2413 }
 0x459   :  { %12178 = vst [vmem:[#allocation59_spill] sm:$0xff] %v8850_v33  ;;  %v2429_v37 = vsel %vm1728_vm3, %v2427_v12, %v2414_v44  ;;  %v2033_v48 = vsel %vm1730_vm4, %v8850_v33, 0  ;;  %v2737_v43 = vsub.f32 %v8847_v4, %v2736_v49  ;;  %v12179_v12 = vand.u32 4294901760, %v8815_v0 }
 0x45a   :  { %v2431_v6 = vsel %vm1730_vm4, %v2429_v37, %v2422_v45  ;;  %v2053_v26 = vand.u32 4294901760, %v2033_v48  ;;  %v2498_v45 = vsub.f32 %v8855_v46, %v2497_v51 }
 0x45b   :  { %v2433_v62 = vsel %vm1732_vm6, %v2431_v6, 1.0 }
 0x45c   :  { %v2435_v53 = vsel %vm1734_vm5, %v2433_v62, %v2373_v16  ;;  %2089 = vmatmul.f32.vlgmr.msrb.gmra.mxu3 %v2053_v26  ;;  %v2054_v54 = vsub.f32 %v2033_v48, %v2053_v26  ;;  %v2738_v16 = vand.u32 4294901760, %v2737_v43  ;;  %v2661_v62 = vpop.permute.xlu1 %2660 }
 0x45d   :  { %v2472_v21 = vsel %vm1801_vm7, %v2435_v53, 0  ;;  %2576 = vmatpush.xpose.msrb.mxu3 %v8812_v20  ;;  %v2499_v53 = vand.u32 4294901760, %v2498_v45 }
 0x45e   :  { %2115 = vmatmul.f32.vlgmr.msrb.gmra.mxu0 %v2054_v54  ;;  %v2055_v36 = vand.u32 4294901760, %v2054_v54  ;;  %v2493_v55 = vand.u32 4294901760, %v2472_v21 }
 0x460   :  { %v2993_v38 = vpop.permute.xlu0 %2992  ;;  %2140 = vmatmul.f32.vlgmr.msrb.gmra.mxu1 %v2055_v36  ;;  %2494 = vmatpush.xpose.msra.mxu0 %v2493_v55  ;;  %v2056_v61 = vsub.f32 %v2054_v54, %v2055_v36  ;;  %v2525_v5 = vsub.f32 %v2472_v21, %v2493_v55  ;;  %v2684_v21 = vsel %vm1726_vm2, %v2661_v62, %v8831_v34 }
 0x461   :  { %2578 = vmatpush.xpose.msrb.mxu3 %v2493_v55  ;;  %v2995_v44 = vsel %vm1682_vm1, %v2993_v38, 0.0  ;;  %v2679_v38 = vpop.permute.xlu2 %2678 }
 0x462   :  { %2996 = vadd.xlane.f32.xlu2 %v2995_v44  ;;  %v2057_v37 = vand.u32 4294901760, %v2056_v61  ;;  %v2526_v48 = vand.u32 4294901760, %v2525_v5 }
 0x464   :  { %2603 = vmatpush.xpose.msrb.mxu0 %v12179_v12  ;;  %2058 = vmatmul.f32.vlgmr.msrb.gmra.mxu2 %v2057_v37  ;;  %v2527_v6 = vsub.f32 %v2525_v5, %v2526_v48  ;;  %v12029_v12 = vstv %s8911_s25  ;;  %s12383_s25 = sld [smem:[#allocation73_spill]] }
 0x465   :  { %2190 = vmatmul.f32.vlgmr.msra.gmra.mxu3 %v2053_v26  ;;  %2551 = vmatpush.xpose.msrb.mxu2 %v8815_v0  ;;  %v2454_v44 = vmul.f32 %v8675_v23, %v12029_v12 }
 0x466   :  { %2739 = vmatpush.msra.mxu3 %v2738_v16  ;;  %v2528_v54 = vand.u32 4294901760, %v2527_v6  ;;  %2500 = vmatmul.f32.vlgmr.msra.gmra.mxu0 %v2499_v53 }
 0x468   :  { %2607 = vmatpush.xpose.msrb.mxu0 %v2526_v48  ;;  %v2673_v36 = vpop.permute.xlu0 %2672  ;;  %2529 = vmatpush.xpose.msra.mxu1 %v2528_v54 }
 0x469   :  { %v2686_v43 = vsel %vm1728_vm3, %v2684_v21, %v2673_v36  ;;  %2554 = vmatpush.xpose.msrb.mxu2 %v2525_v5  ;;  %v12025_v21 = vstv %s8929_s24  ;;  %s12279_s24 = smov 32  }
 0x46a   :  { %v2688_v0 = vsel %vm1730_vm4, %v2686_v43, %v2679_v38  ;;  %v2466_v43 = vmul.f32 %v8716_v47, %v12025_v21 }
 0x46b   :  { %v2709_v61 = vand.u32 4294901760, %v2688_v0  ;;  %2531 = vmatmul.f32.vlgmr.msra.gmra.mxu1 %v8844_v1 }
 0x46c   :  { %2767 = vmatpush.msra.mxu0 %v8847_v4  ;;  %2628 = vmatpush.xpose.msrb.mxu1 %v8812_v20 }
 0x46d   :  { %2167 = vmatmul.f32.vlgmr.msra.gmra.mxu2 %v2053_v26  ;;  %2582 = vmatmul.f32.vlgmr.msrb.gmra.mxu3 %v2497_v51  ;;  %v2741_v34 = vsub.f32 %v2688_v0, %v2709_v61  ;;  %v12030_v51 = vstv %s8902_s11 }
 0x46e   :  { %2708 = vmatpush.msra.mxu2 %v8842_v35  ;;  %2609 = vmatmul.f32.vlgmr.msrb.gmra.mxu0 %v8844_v1 }
 0x46f   :  { %v2742_v4 = vand.u32 4294901760, %v2741_v34  ;;  %2770 = vmatpush.msra.mxu0 %v2741_v34 }
 0x470   :  { %2630 = vmatpush.xpose.msrb.mxu1 %v2493_v55  ;;  %2710 = vmatpush.msra.mxu2 %v2709_v61 }
 0x471   :  { %v2743_v20 = vsub.f32 %v2741_v34, %v2742_v4 }
 0x473   :  { %2632 = vmatmul.f32.vlgmr.msrb.gmra.mxu1 %v8844_v1  ;;  %v2744_v5 = vand.u32 4294901760, %v2743_v20 }
 0x474   :  { %2792 = vmatpush.msra.mxu1 %v8842_v35 }
 0x475   :  { %2557 = vmatmul.f32.vlgmr.msrb.gmra.mxu2 %v8855_v46  ;;  %2745 = vmatpush.msra.mxu3 %v2744_v5  ;;  %v12031_v46 = vstv %s8898_s28 }
 0x476   :  { %2794 = vmatpush.msra.mxu1 %v2709_v61  ;;  %2819 = vmatpush.msrb.mxu2 %v2736_v49  ;;  %v2446_v49 = vmul.f32 %v8651_v52, %v12031_v46 }
 0x477   :  { %2844 = vmatpush.msrb.mxu3 %v8842_v35 }
 0x478   :  { %2823 = vmatpush.msrb.mxu2 %v2742_v4 }
 0x479   :  { %2846 = vmatpush.msrb.mxu3 %v2709_v61 }
 0x47a   :  { %3030 = vrot.lane.b32.xlu2 %v8785_v30, %s11989_s21  ;;  %v12037_v30 = vstv %s8894_s7  ;;  %s8923_s21 = sld [smem:[#allocation9 + $0x86]] }
 0x47b   :  { %v2439_v35 = vmul.f32 %v12037_v30, %v8630_v32  ;;  %v2450_v32 = vmul.f32 %v8662_v56, %v12030_v51 }
 0x480   :  { %12184 = sst [smem:[#allocation64_spill]] %s8923_s21  ;;  %v12026_v56 = vstv %s8923_s21  ;;  %s12280_s21 = smov 120  }
 0x481   :  { %v2462_v53 = vmul.f32 %v8703_v58, %v12026_v56 }
 0x482   :  { %3070 = vrot.lane.b32.xlu2 %v8616_v24, %s11987_s22  ;;  %v12036_v24 = vstv %s8896_s0  ;;  %s8917_s22 = sld [smem:[#allocation9 + $0x85]] }
 0x483   :  { %v2442_v1 = vmul.f32 %v8635_v17, %v12036_v24 }
 0x485   :  { %v2443_v26 = vadd.f32 %v2442_v1, %v2439_v35 }
 0x487   :  { %v2447_v55 = vadd.f32 %v2446_v49, %v2443_v26 }
 0x488   :  { %12183 = sst [smem:[#allocation63_spill]] %s8917_s22  ;;  %v12027_v45 = vstv %s8917_s22  ;;  %s12282_s22 = smov 88  }
 0x489   :  { %v2451_v17 = vadd.f32 %v2450_v32, %v2447_v55  ;;  %v2458_v37 = vmul.f32 %v8690_v27, %v12027_v45 }
 0x48a   :  { %3309 = vrot.lane.b32.xlu2 %v8208_v25, %s12004_s23 }
 0x48b   :  { %v2455_v52 = vadd.f32 %v2454_v44, %v2451_v17 }
 0x48d   :  { %v2459_v62 = vadd.f32 %v2458_v37, %v2455_v52 }
 0x48f   :  { %v2463_v38 = vadd.f32 %v2462_v53, %v2459_v62 }
 0x491   :  { %v2467_v27 = vadd.f32 %v2466_v43, %v2463_v38 }
 0x492   :  { %3697 = vrot.lane.b32.xlu2 %v8234_v2, %s12012_s1 }
 0x4db   :  { %v2116_v16 = vpop.f32.mrf.mxu0 }
 0x4dd   :  { %v2141_v36 = vpop.f32.mrf.mxu1 }
 0x4df   :  { %v2090_v48 = vpop.f32.mrf.mxu3 }
 0x4e3   :  { %v2501_v20 = vpop.f32.mrf.mxu0 }
 0x4e4   :  { %v2502_v1 = vadd.f32 %v2501_v20, %v2467_v27 }
 0x4e7   :  { %v2059_v6 = vpop.f32.mrf.mxu2 }
 0x4e8   :  { %v2091_v54 = vadd.f32 %v2090_v48, %v2059_v6  ;;  %v2191_v61 = vpop.f32.mrf.mxu3  ;;  %v2532_v35 = vpop.f32.mrf.mxu1  ;;  %v3020_v48 = vsel %vm1682_vm1, %v8828_v40, 0.0 }
 0x4e9   :  { %v2533_v26 = vadd.f32 %v2532_v35, %v2502_v1 }
 0x4ea   :  { %v2117_v23 = vadd.f32 %v2116_v16, %v2091_v54  ;;  %v8953_v16 = vstv %s7294_s27  ;;  %s11997_s27 = smov 52  }
 0x4eb   :  { %v2610_v17 = vpop.f32.mrf.mxu0  ;;  %12187 = vst [vmem:[#allocation67_spill] sm:$0xff] %v8953_v16  ;;  %v3630_v6 = vmul.f32 %v8953_v16, %v8326_v13  ;;  %v3632_v62 = vmul.f32 %v8953_v16, %v8372_v60  ;;  %v3634_v53 = vmul.f32 %v8953_v16, %v8350_v29  ;;  %v8967_v13 = vmul.f32 %v8953_v16, %v8346_v39 }
 0x4ec   :  { %v2142_v0 = vadd.f32 %v2141_v36, %v2117_v23  ;;  %v8971_v60 = vmul.f32 %v8953_v16, %v8364_v50  ;;  %v8993_v20 = vmul.f32 %v8953_v16, %v8285_v3  ;;  %v8997_v35 = vmul.f32 %v8953_v16, %v8300_v42  ;;  %v3057_v42 = vpop.permute.xlu2 %3056 }
 0x4ed   :  { %v3649_v40 = vmul.f32 %v3630_v6, %v3630_v6  ;;  %v3651_v54 = vmul.f32 %v3632_v62, %v3632_v62  ;;  %v3655_v23 = vmul.f32 %v3634_v53, %v3634_v53 }
 0x4ee   :  { %v3638_v3 = vmul.f32 %v8997_v35, %v8997_v35 }
 0x4ef   :  { %v3653_v36 = vadd.f32 %v3651_v54, %v3649_v40 }
 0x4f0   :  { %v2168_v34 = vpop.f32.mrf.mxu2  ;;  %v2583_v55 = vpop.f32.mrf.mxu3 }
 0x4f1   :  { %v2169_v4 = vadd.f32 %v2168_v34, %v2142_v0  ;;  %v2633_v52 = vpop.f32.mrf.mxu1  ;;  %v3657_v38 = vadd.f32 %v3655_v23, %v3653_v36 }
 0x4f3   :  { %v8942_v5 = vadd.f32 %v2191_v61, %v2169_v4  ;;  %v3650_v61 = vmul.f32 %v8967_v13, %v8967_v13  ;;  %v8989_v4 = vmul.f32 %v8953_v16, %v8291_v10  ;;  %v3635_v10 = vmul.f32 %v8993_v20, %v8993_v20 }
 0x4f5   :  { %12186 = vst [vmem:[#allocation66_spill] sm:$0xff] %v8942_v5  ;;  %v3636_v1 = vmul.f32 %v8989_v4, %v8989_v4 }
 0x4f8   :  { %v2558_v58 = vpop.f32.mrf.mxu2 }
 0x4f9   :  { %v2559_v49 = vadd.f32 %v2558_v58, %v2533_v26  ;;  %v3637_v26 = vadd.f32 %v3636_v1, %v3635_v10 }
 0x4fb   :  { %v2584_v32 = vadd.f32 %v2583_v55, %v2559_v49  ;;  %v3639_v58 = vadd.f32 %v3638_v3, %v3637_v26  ;;  %v3065_v55 = vpop.permute.xlu2 %3064 }
 0x4fd   :  { %v2611_v44 = vadd.f32 %v2610_v17, %v2584_v32  ;;  %v3073_v17 = vpop.permute.xlu0 %3072 }
 0x4ff   :  { %v2634_v37 = vadd.f32 %v2633_v52, %v2611_v44 }
 0x501   :  { %v2636_v47 = vsel %vm1730_vm4, %v2634_v37, -inf }
 0x502   :  { %2637 = vmax.xlane.f32.xlu1 %v2636_v47 }
 0x51b   :  { %3048 = vrot.lane.b32.xlu1 %v8234_v2, %s11995_s20 }
 0x545   :  { %3021 = vadd.xlane.f32.xlu1 %v3020_v48 }
 0x55e   :  { %3026 = vrot.lane.b32.xlu1 %v8523_v11, %s11995_s20  ;;  %s12006_s20 = smov 16  }
 0x566   :  { %3034 = vrot.lane.b32.xlu1 %v8780_v28, %s12008_s12  ;;  %v3629_v28 = vmul.f32 %v8953_v16, %v8316_v22  ;;  %v3654_v22 = vmul.f32 %v8971_v60, %v8971_v60 }
 0x56e   :  { %3038 = vrot.lane.b32.xlu1 %v8789_v7, %s12012_s1  ;;  %v3648_v7 = vmul.f32 %v3629_v28, %v3629_v28 }
 0x570   :  { %v3652_v39 = vadd.f32 %v3650_v61, %v3648_v7 }
 0x572   :  { %v3656_v34 = vadd.f32 %v3654_v22, %v3652_v39 }
 0x575   :  { %v2638_v29 = vpop.xlane.xlu1 %2637 }
 0x576   :  { %v2639_v43 = vsub.f32 %v2634_v37, %v2638_v29  ;;  %3662 = vrot.lane.b32.xlu1 %v3657_v38, %s11997_s27 }
 0x578   :  { %v2640_v0 = vmul.f32 1.442695, %v2639_v43  ;;  %v3047_v43 = vpop.permute.xlu0 %3046 }
 0x57a   :  { %7415 = vpow2.f32 %v2640_v0 }
 0x57e   :  { %3660 = vrot.lane.b32.xlu1 %v3656_v34, %s11997_s27  ;;  %s11999_s27 = smov 84  }
 0x580   :  { %v8979_v50 = vpop.eup %7415 }
 0x581   :  { %v2642_v27 = vsel %vm1730_vm4, %v8979_v50, 0.0 }
 0x582   :  { %2643 = vadd.xlane.f32.xlu0 %v2642_v27 }
 0x586   :  { %3311 = vrot.lane.b32.xlu1 %v8234_v2, %s12004_s23  ;;  %s9120_s23 = sld [smem:[#allocation9 + $0x102]] }
 0x58c   :  { %12198 = sst [smem:[#allocation71_spill]] %s9120_s23 }
 0x58e   :  { %3317 = vrot.lane.b32.xlu1 %v8534_v8, %s12006_s20 }
 0x596   :  { %3323 = vrot.lane.b32.xlu1 %v8549_v14, %s12002_s19  ;;  %3062 = vrot.lane.b32.xlu0 %v8612_v15, %s12010_s26  ;;  %v3049_v15 = vpop.permute.xlu1 %3048 }
 0x597   :  { %v3077_v49 = vsel %vm1726_vm2, %v3049_v15, %v3057_v42 }
 0x598   :  { %v3079_v32 = vsel %vm1728_vm3, %v3077_v49, %v3065_v55 }
 0x599   :  { %v3081_v44 = vsel %vm1730_vm4, %v3079_v32, %v3073_v17 }
 0x59a   :  { %v3083_v47 = vsel %vm1732_vm6, %v3081_v44, 1.0 }
 0x59e   :  { %3315 = vrot.lane.b32.xlu1 %v8557_v57, %s12006_s20  ;;  %3641 = vrot.lane.b32.xlu0 %v3639_v58, %s11999_s27  ;;  %s12188_s27 = smov 60   ;;  %s9115_s20 = sld [smem:[#allocation9 + $0x100]] }
 0x5a4   :  { %12196 = sst [smem:[#allocation69_spill]] %s9115_s20 }
 0x5a6   :  { %3329 = vrot.lane.b32.xlu1 %v8738_v19, %s12000_s29  ;;  %3321 = vrot.lane.b32.xlu0 %v8564_v31, %s12002_s19  ;;  %s12191_s19 = smov 92  }
 0x5ae   :  { %3327 = vrot.lane.b32.xlu1 %v8746_v18, %s12000_s29  ;;  %3721 = vrot.lane.b32.xlu0 %v3634_v53, %s12010_s26  ;;  %s12189_s29 = smov 64   ;;  %s9124_s26 = sld [smem:[#allocation9 + $0x103]] }
 0x5b4   :  { %12199 = sst [smem:[#allocation72_spill]] %s9124_s26 }
 0x5b6   :  { %3705 = vrot.lane.b32.xlu1 %v3630_v6, %s12188_s27  ;;  %3695 = vrot.lane.b32.xlu0 %v8208_v25, %s12012_s1  ;;  %s9166_s1 = sld [smem:[#allocation9 + $0x106]] }
 0x5b8   :  { %v3022_v52 = vpop.xlane.xlu1 %3021 }
 0x5b9   :  { %v3024_v37 = vmul.f32 0.5, %v3022_v52 }
 0x5bb   :  { %v3085_v48 = vsel %vm1734_vm5, %v3083_v47, %v3024_v37 }
 0x5bc   :  { %v3124_v53 = vsel %vm1801_vm7, %v3085_v48, 0  ;;  %12203 = sst [smem:[#allocation75_spill]] %s9166_s1 }
 0x5bd   :  { %v9028_v40 = vand.u32 4294901760, %v3124_v53 }
 0x5be   :  { %3713 = vrot.lane.b32.xlu1 %v3632_v62, %s12189_s29  ;;  %3703 = vrot.lane.b32.xlu0 %v3629_v28, %s12188_s27  ;;  %v3055_v62 = vpop.permute.xlu0 %3054  ;;  %v2997_v28 = vpop.xlane.xlu2 %2996 }
 0x5bf   :  { %3141 = vmatpush.xpose.msrb.mxu0 %v9028_v40  ;;  %v9034_v6 = vsub.f32 %v3124_v53, %v9028_v40  ;;  %v2998_v34 = vmul.f32 0.5, %v2997_v28  ;;  %v3076_v28 = vsel %vm1726_vm2, %v3047_v43, %v3055_v62 }
 0x5c1   :  { %v3169_v54 = vand.u32 4294901760, %v9034_v6  ;;  %v3025_v42 = vsub.f32 0.0, %v2998_v34 }
 0x5c3   :  { %v3170_v23 = vsub.f32 %v9034_v6, %v3169_v54 }
 0x5c5   :  { %v3171_v36 = vand.u32 4294901760, %v3170_v23 }
 0x5c6   :  { %v3019_v61 = vpop.xlane.xlu0 %3018  ;;  %v3031_v27 = vpop.permute.xlu2 %3030 }
 0x5c7   :  { %3172 = vmatpush.xpose.msrb.mxu1 %v3171_v36 }
 0x5d0   :  { %v3027_v38 = vpop.permute.xlu1 %3026 }
 0x5d1   :  { %v3041_v10 = vsel %vm1726_vm2, %v3027_v38, %v3031_v27  ;;  %v3071_v27 = vpop.permute.xlu2 %3070 }
 0x5d8   :  { %v3035_v29 = vpop.permute.xlu1 %3034 }
 0x5d9   :  { %v3042_v3 = vsel %vm1728_vm3, %v3041_v10, %v3035_v29 }
 0x5e0   :  { %v3039_v7 = vpop.permute.xlu1 %3038 }
 0x5e1   :  { %v3043_v26 = vsel %vm1730_vm4, %v3042_v3, %v3039_v7  ;;  %v3023_v3 = vmul.f32 0.5, %v3019_v61 }
 0x5e2   :  { %v3044_v15 = vsel %vm1732_vm6, %v3043_v26, %v3025_v42 }
 0x5e3   :  { %v3045_v32 = vsel %vm1734_vm5, %v3044_v15, -1.0 }
 0x5e4   :  { %v3118_v37 = vsel %vm1801_vm7, %v3045_v32, 0 }
 0x5e5   :  { %v9051_v23 = vand.u32 4294901760, %v3118_v37 }
 0x5e8   :  { %v9040_v0 = vpop.permute.xlu1 %3662 }
 0x5f0   :  { %v3661_v22 = vpop.permute.xlu1 %3660 }
 0x5f1   :  { %v3666_v39 = vsel %vm1682_vm1, %v3661_v22, 0.0  ;;  %v9058_v22 = vsub.f32 %v3118_v37, %v9051_v23 }
 0x5f2   :  { %3667 = vadd.xlane.f32.xlu0 %v3666_v39 }
 0x5f3   :  { %v3146_v62 = vand.u32 4294901760, %v9058_v22 }
 0x5f5   :  { %v2644_v1 = vpop.xlane.xlu0 %2643 }
 0x5f6   :  { %7417 = vrcp.f32 %v2644_v1  ;;  %v2656_v44 = vand.u32 2147483648, %v2644_v1  ;;  %v2654_v48 = vand.u32 2147483647, %v2644_v1  ;;  %vm2650_vm13 = vweird.f32 %v2644_v1 }
 0x5f8   :  { %v9046_v58 = vpop.permute.xlu1 %3311  ;;  %v2657_v36 = vor.u32 1.1754944e-38, %v2656_v44  ;;  %vm2655_vm15 = vcmp.eq.f32.partialorder %v2654_v48, 8.507059e+37 }
 0x5fc   :  { %v7418_v49 = vpop.eup %7417 }
 0x5fd   :  { %v2646_v55 = vmul.f32 %v7418_v49, %v2644_v1  ;;  %vm2651_vm12 = vweird.f32 %v7418_v49 }
 0x5fe   :  { %vm2652_vm14 = vmor %vm2650_vm13, %vm2651_vm12 }
 0x5ff   :  { %v2647_v17 = vsub.f32 1.0, %v2646_v55 }
 0x600   :  { %v3318_v52 = vpop.permute.xlu1 %3317 }
 0x601   :  { %v2648_v47 = vmul.f32 %v7418_v49, %v2647_v17 }
 0x603   :  { %v2649_v53 = vadd.f32 %v7418_v49, %v2648_v47  ;;  %v3147_v47 = vsub.f32 %v9058_v22, %v3146_v62 }
 0x605   :  { %v2653_v38 = vsel %vm2652_vm14, %v7418_v49, %v2649_v53 }
 0x606   :  { %v2658_v29 = vsel %vm2655_vm15, %v2657_v36, %v2653_v38  ;;  %v3148_v38 = vand.u32 4294901760, %v3147_v47 }
 0x607   :  { %v9054_v7 = vmul.f32 %v8979_v50, %v2658_v29 }
 0x608   :  { %v3324_v39 = vpop.permute.xlu1 %3323  ;;  %v3063_v34 = vpop.permute.xlu0 %3062 }
 0x609   :  { %12190 = vst [vmem:[#allocation68_spill] sm:$0xff] %v9054_v7  ;;  %v3078_v1 = vsel %vm1728_vm3, %v3076_v28, %v3063_v34  ;;  %v2691_v10 = vsel %vm1730_vm4, %v9054_v7, 0  ;;  %v3334_v34 = vsel %vm1726_vm2, %v9046_v58, %v3318_v52 }
 0x60a   :  { %v3080_v26 = vsel %vm1730_vm4, %v3078_v1, %v3071_v27  ;;  %v2711_v42 = vand.u32 4294901760, %v2691_v10  ;;  %v3336_v27 = vsel %vm1728_vm3, %v3334_v34, %v3324_v39 }
 0x60b   :  { %v3082_v50 = vsel %vm1732_vm6, %v3080_v26, 1.0  ;;  %v3310_v26 = vpop.permute.xlu2 %3309 }
 0x60c   :  { %v3084_v15 = vsel %vm1734_vm5, %v3082_v50, %v3023_v3  ;;  %2747 = vmatmul.f32.vlgmr.msra.gmra.mxu3 %v2711_v42  ;;  %v2712_v43 = vsub.f32 %v2691_v10, %v2711_v42 }
 0x60d   :  { %v3121_v49 = vsel %vm1801_vm7, %v3084_v15, 0  ;;  %3225 = vmatpush.xpose.msra.mxu3 %v9028_v40 }
 0x60e   :  { %2773 = vmatmul.f32.vlgmr.msra.gmra.mxu0 %v2712_v43  ;;  %v2713_v55 = vand.u32 4294901760, %v2712_v43  ;;  %v3142_v32 = vand.u32 4294901760, %v3121_v49 }
 0x610   :  { %v3316_v17 = vpop.permute.xlu1 %3315  ;;  %v3642_v61 = vpop.permute.xlu0 %3641  ;;  %2798 = vmatmul.f32.vlgmr.msra.gmra.mxu1 %v2713_v55  ;;  %3143 = vmatpush.xpose.msrb.mxu0 %v3142_v32  ;;  %v2714_v44 = vsub.f32 %v2712_v43, %v2713_v55  ;;  %v3174_v37 = vsub.f32 %v3121_v49, %v3142_v32 }
 0x611   :  { %3227 = vmatpush.xpose.msra.mxu3 %v3142_v32  ;;  %v3644_v48 = vsel %vm1682_vm1, %v3642_v61, 0.0  ;;  %v3333_v52 = vsel %vm1726_vm2, %v3310_v26, %v3316_v17  ;;  %v12193_v17 = vmov 7   ;;  %v12194_v61 = vmov 4  }
 0x612   :  { %3645 = vadd.xlane.f32.xlu1 %v3644_v48  ;;  %v2715_v53 = vand.u32 4294901760, %v2714_v44  ;;  %v3175_v36 = vand.u32 4294901760, %v3174_v37  ;;  %v12195_v44 = vmov 3   ;;  %v12200_v48 = vmov 6  }
 0x613   :  { %v12019_v26 = vstv %s9144_s9  ;;  %s9494_s9 = sld [smem:[#allocation9 + $0x184]] }
 0x614   :  { %3252 = vmatpush.xpose.msra.mxu0 %v3169_v54  ;;  %2716 = vmatmul.f32.vlgmr.msra.gmra.mxu2 %v2715_v53  ;;  %v3176_v29 = vsub.f32 %v3174_v37, %v3175_v36  ;;  %v9130_v53 = vld [vmem:[%s11899_s2] sm:$0xff] }
 0x615   :  { %2848 = vmatmul.f32.vlgmr.msrb.gmra.mxu3 %v2711_v42  ;;  %3200 = vmatpush.xpose.msra.mxu2 %v9034_v6 }
 0x616   :  { %3149 = vmatmul.f32.vlgmr.msrb.gmra.mxu0 %v3148_v38  ;;  %v3177_v28 = vand.u32 4294901760, %v3176_v29  ;;  %v9138_v38 = vld [vmem:[%s11899_s2 + $0x8] sm:$0xff] }
 0x618   :  { %3256 = vmatpush.xpose.msra.mxu0 %v3175_v36  ;;  %v3330_v54 = vpop.permute.xlu1 %3329  ;;  %3178 = vmatpush.xpose.msrb.mxu1 %v3177_v28  ;;  %v3322_v6 = vpop.permute.xlu0 %3321  ;;  %v12021_v28 = vstv %s9120_s23  ;;  %s12206_s23 = smov 104  }
 0x619   :  { %v3338_v1 = vsel %vm1730_vm4, %v3336_v27, %v3330_v54  ;;  %3203 = vmatpush.xpose.msra.mxu2 %v3174_v37  ;;  %v12024_v37 = vstv %s9115_s20  ;;  %v9149_v27 = vld [vmem:[%s11899_s2 + $0x10] sm:$0xff]  ;;  %12244 = sst [smem:[#allocation82_spill]] %s9494_s9  ;;  %s12277_s20 = smov 24  }
 0x61a   :  { %v3356_v10 = vand.u32 4294901760, %v3338_v1  ;;  %v3088_v36 = vmul.f32 %v9130_v53, %v12024_v37  ;;  %v3095_v54 = vmul.f32 %v9149_v27, %v12021_v28 }
 0x61b   :  { %3180 = vmatmul.f32.vlgmr.msrb.gmra.mxu1 %v9051_v23 }
 0x61c   :  { %3277 = vmatpush.xpose.msra.mxu1 %v9028_v40  ;;  %v3384_v3 = vsub.f32 %v3338_v1, %v3356_v10  ;;  %2825 = vmatmul.f32.vlgmr.msrb.gmra.mxu2 %v2711_v42  ;;  %v3335_v40 = vsel %vm1728_vm3, %v3333_v52, %v3322_v6  ;;  %v12020_v1 = vstv %s9124_s26  ;;  %v9171_v52 = vld [vmem:[%s11899_s2 + $0x20] sm:$0xff]  ;;  %s12214_s26 = smov 112  }
 0x61d   :  { %3231 = vmatmul.f32.vlgmr.msra.gmra.mxu3 %v3146_v62  ;;  %3357 = vmatpush.msrb.mxu2 %v3356_v10 }
 0x61e   :  { %v3385_v58 = vand.u32 4294901760, %v3384_v3  ;;  %3258 = vmatmul.f32.vlgmr.msra.gmra.mxu0 %v9051_v23 }
 0x61f   :  { %3416 = vmatpush.msrb.mxu0 %v3384_v3 }
 0x620   :  { %3279 = vmatpush.xpose.msra.mxu1 %v3142_v32  ;;  %v3386_v39 = vsub.f32 %v3384_v3, %v3385_v58  ;;  %v3328_v50 = vpop.permute.xlu1 %3327  ;;  %v9160_v3 = vld [vmem:[%s11899_s2 + $0x18] sm:$0xff] }
 0x621   :  { %v3337_v15 = vsel %vm1730_vm4, %v3335_v40, %v3328_v50  ;;  %v3099_v6 = vmul.f32 %v9160_v3, %v12020_v1  ;;  %v12018_v40 = vstv %s9155_s10  ;;  %s12235_s10 = smov 72  }
 0x622   :  { %v3358_v43 = vand.u32 4294901760, %v3337_v15  ;;  %v3387_v42 = vand.u32 4294901760, %v3386_v39  ;;  %v3103_v39 = vmul.f32 %v9171_v52, %v12019_v26 }
 0x623   :  { %3281 = vmatmul.f32.vlgmr.msra.gmra.mxu1 %v9051_v23  ;;  %v9093_v23 = vld [vmem:[%s11902_s5 + $0x18] sm:$0xff] }
 0x624   :  { %3441 = vmatpush.msrb.mxu1 %v3356_v10  ;;  %v3390_v62 = vsub.f32 %v3337_v15, %v3358_v43  ;;  %3206 = vmatmul.f32.vlgmr.msra.gmra.mxu2 %v9058_v22  ;;  %v12192_v22 = vmov 2   ;;  %v9182_v15 = vld [vmem:[%s11899_s2 + $0x28] sm:$0xff] }
 0x625   :  { %3388 = vmatpush.msrb.mxu3 %v3387_v42  ;;  %3359 = vmatpush.msrb.mxu2 %v3358_v43 }
 0x626   :  { %3443 = vmatpush.msrb.mxu1 %v3358_v43  ;;  %3419 = vmatpush.msrb.mxu0 %v3390_v62  ;;  %v3391_v49 = vand.u32 4294901760, %v3390_v62 }
 0x627   :  { %3468 = vmatpush.msra.mxu2 %v3385_v58 }
 0x628   :  { %v3392_v55 = vsub.f32 %v3390_v62, %v3391_v49  ;;  %v12022_v62 = vstv %s9166_s1  ;;  %s9473_s1 = sld [smem:[#allocation9 + $0x181]] }
 0x629   :  { %3472 = vmatpush.msra.mxu2 %v3391_v49 }
 0x62a   :  { %v3393_v32 = vand.u32 4294901760, %v3392_v55 }
 0x62b   :  { %3679 = vrot.lane.b32.xlu1 %v8993_v20, %s12191_s19  ;;  %v9100_v20 = vld [vmem:[#allocation6 + $0x8] sm:$0xff] }
 0x62c   :  { %3394 = vmatpush.msrb.mxu3 %v3393_v32 }
 0x62e   :  { %3493 = vmatpush.msra.mxu3 %v3356_v10  ;;  %12241 = sst [smem:[#allocation79_spill]] %s9473_s1 }
 0x630   :  { %3495 = vmatpush.msra.mxu3 %v3358_v43  ;;  %v3107_v43 = vmul.f32 %v9182_v15, %v12018_v40 }
 0x633   :  { %3687 = vrot.lane.b32.xlu1 %v8997_v35, %s12008_s12  ;;  %v9106_v35 = vld [vmem:[%s11902_s5 + $0x10] sm:$0xff]  ;;  %s9118_s5 = sld [smem:[#allocation9 + $0x101]]  ;;  %s12207_s12 = smov 68  }
 0x639   :  { %12197 = sst [smem:[#allocation70_spill]] %s9118_s5  ;;  %v12023_v47 = vstv %s9118_s5 }
 0x63a   :  { %v3091_v29 = vmul.f32 %v9138_v38, %v12023_v47  ;;  %s9177_s5 = sld [smem:[#allocation9 + $0x107]] }
 0x63b   :  { %1283 = vperm.xlu1 %7383, %v9093_v23  }
 0x63c   :  { %v3092_v34 = vadd.f32 %v3091_v29, %v3088_v36 }
 0x63e   :  { %v3096_v10 = vadd.f32 %v3095_v54, %v3092_v34 }
 0x640   :  { %v3100_v58 = vadd.f32 %v3099_v6, %v3096_v10  ;;  %12204 = sst [smem:[#allocation76_spill]] %s9177_s5  ;;  %v12028_v34 = vstv %s9177_s5 }
 0x641   :  { %s9477_s5 = sld [smem:[#allocation9 + $0x182]] }
 0x642   :  { %v3104_v50 = vadd.f32 %v3103_v39, %v3100_v58  ;;  %v9200_v58 = vld [vmem:[%s11899_s2 + $0x38] sm:$0xff]  ;;  %s12389_s28 = sld [smem:[#allocation76_spill]] }
 0x643   :  { %7386 = vset.pattern.permute.xlu1 %v12192_v22  ;;  %v3115_v39 = vmul.f32 %v9200_v58, %v12028_v34 }
 0x644   :  { %1199 = vperm.xlu1 %7386, %v9093_v23   ;;  %v3108_v32 = vadd.f32 %v3107_v43, %v3104_v50 }
 0x647   :  { %12242 = sst [smem:[#allocation80_spill]] %s9477_s5  ;;  %v12069_v5 = vstv %s9477_s5 }
 0x648   :  { %s9520_s5 = sld [smem:[#allocation9 + $0x186]] }
 0x64c   :  { %7388 = vset.pattern.permute.xlu1 %v12193_v17 }
 0x64d   :  { %1403 = vperm.xlu1 %7388, %v9093_v23  }
 0x64e   :  { %12248 = sst [smem:[#allocation84_spill]] %s9520_s5 }
 0x655   :  { %1077 = vperm.xlu1 %7388, %v9100_v20  }
 0x65d   :  { %7391 = vset.pattern.permute.xlu1 %v12194_v61 }
 0x65e   :  { %1279 = vperm.xlu1 %7391, %v9106_v35  }
 0x666   :  { %7394 = vset.pattern.permute.xlu1 %v12192_v22 }
 0x667   :  { %1195 = vperm.xlu1 %7394, %v9106_v35  }
 0x66f   :  { %7396 = vset.pattern.permute.xlu1 %v12193_v17  ;;  %v9191_v17 = vld [vmem:[%s11899_s2 + $0x30] sm:$0xff] }
 0x670   :  { %1399 = vperm.xlu1 %7396, %v9106_v35   ;;  %v3111_v36 = vmul.f32 %v9191_v17, %v12022_v62 }
 0x672   :  { %v3112_v6 = vadd.f32 %v3111_v36, %v3108_v32 }
 0x674   :  { %v3116_v26 = vadd.f32 %v3115_v39, %v3112_v6  ;;  %v474_v39 = vadd.f32 %v8202_v63, %v8198_v59 }
 0x678   :  { %7398 = vset.pattern.permute.xlu1 %v12195_v44 }
 0x679   :  { %1263 = vperm.xlu1 %7398, %v9093_v23  }
 0x681   :  { %7401 = vset.pattern.permute.xlu1 %v12200_v48 }
 0x68b   :  { %v2774_v49 = vpop.f32.mrf.mxu0 }
 0x68d   :  { %v2799_v10 = vpop.f32.mrf.mxu1 }
 0x68f   :  { %v2748_v42 = vpop.f32.mrf.mxu3 }
 0x693   :  { %v3150_v28 = vpop.f32.mrf.mxu0 }
 0x697   :  { %v2717_v55 = vpop.f32.mrf.mxu2 }
 0x698   :  { %v2749_v29 = vadd.f32 %v2748_v42, %v2717_v55  ;;  %v2849_v43 = vpop.f32.mrf.mxu3  ;;  %v3181_v42 = vpop.f32.mrf.mxu1 }
 0x69a   :  { %v2775_v54 = vadd.f32 %v2774_v49, %v2749_v29  ;;  %v3151_v49 = vadd.f32 %v3150_v28, %v3116_v26  ;;  %v12211_v26 = vmov 0  }
 0x69b   :  { %v3259_v37 = vpop.f32.mrf.mxu0 }
 0x69c   :  { %v2800_v50 = vadd.f32 %v2799_v10, %v2775_v54  ;;  %v3182_v55 = vadd.f32 %v3181_v42, %v3151_v49 }
 0x69f   :  { %v2826_v40 = vpop.f32.mrf.mxu2 }
 0x6a0   :  { %v2827_v1 = vadd.f32 %v2826_v40, %v2800_v50  ;;  %v3232_v29 = vpop.f32.mrf.mxu3  ;;  %v3282_v56 = vpop.f32.mrf.mxu1  ;;  %v3669_v40 = vsel %vm1682_vm1, %v9040_v0, 0.0  ;;  %v12210_v0 = vmov 8  }
 0x6a2   :  { %v9205_v62 = vadd.f32 %v2849_v43, %v2827_v1  ;;  %v3722_v1 = vpop.permute.xlu0 %3721 }
 0x6a4   :  { %12205 = vst [vmem:[#allocation77_spill] sm:$0xff] %v9205_v62 }
 0x6a7   :  { %v3207_v32 = vpop.f32.mrf.mxu2 }
 0x6a8   :  { %v3208_v36 = vadd.f32 %v3207_v32, %v3182_v55 }
 0x6aa   :  { %v3233_v47 = vadd.f32 %v3232_v29, %v3208_v36  ;;  %v3696_v63 = vpop.permute.xlu0 %3695 }
 0x6ac   :  { %v3260_v21 = vadd.f32 %v3259_v37, %v3233_v47 }
 0x6ae   :  { %v3283_v45 = vadd.f32 %v3282_v56, %v3260_v21  ;;  %v12208_v56 = vmov 5   ;;  %v3706_v21 = vpop.permute.xlu1 %3705 }
 0x6b0   :  { %v3285_v54 = vsel %vm1730_vm4, %v3283_v45, -inf }
 0x6b1   :  { %3286 = vmax.xlane.f32.xlu2 %v3285_v54 }
 0x6b9   :  { %3670 = vadd.xlane.f32.xlu2 %v3669_v40 }
 0x6d1   :  { %3675 = vrot.lane.b32.xlu2 %v8523_v11, %s12206_s23  ;;  %v12209_v11 = vmov 1  }
 0x6d9   :  { %3711 = vrot.lane.b32.xlu2 %v8967_v13, %s12189_s29  ;;  %v3714_v13 = vpop.permute.xlu1 %3713 }
 0x6e1   :  { %3719 = vrot.lane.b32.xlu2 %v8971_v60, %s12207_s12  ;;  %v9226_v60 = vpop.xlane.xlu1 %3645 }
 0x6e9   :  { %1159 = vperm.xlu2 %7382, %v9093_v23   ;;  %v9230_v37 = vpop.permute.xlu1 %3679 }
 0x6f1   :  { %7385 = vset.pattern.permute.xlu2 %v12194_v61  ;;  %v3698_v61 = vpop.permute.xlu2 %3697  ;;  %v9238_v43 = vpop.permute.xlu1 %3687 }
 0x6f2   :  { %1017 = vperm.xlu2 %7385, %v9100_v20   ;;  %v3726_v10 = vsel %vm1726_vm2, %v3698_v61, %v3706_v21 }
 0x6f3   :  { %v3728_v50 = vsel %vm1728_vm3, %v3726_v10, %v3714_v13 }
 0x6f4   :  { %v3730_v42 = vsel %vm1730_vm4, %v3728_v50, %v3722_v1  ;;  %v3704_v50 = vpop.permute.xlu0 %3703 }
 0x6f5   :  { %v3732_v32 = vsel %vm1732_vm6, %v3730_v42, 1.0 }
 0x6f9   :  { %v9255_v13 = vpop.permute.xlu1 %1283 }
 0x6fa   :  { %7387 = vset.pattern.permute.xlu2 %v12208_v56 }
 0x6fb   :  { %1323 = vperm.xlu2 %7387, %v9093_v23  }
 0x703   :  { %1037 = vperm.xlu2 %7387, %v9100_v20  }
 0x70b   :  { %7390 = vset.pattern.permute.xlu2 %v12209_v11 }
 0x70c   :  { %1155 = vperm.xlu2 %7390, %v9106_v35  }
 0x714   :  { %7393 = vset.pattern.permute.xlu2 %v12210_v0 }
 0x715   :  { %1097 = vperm.xlu2 %7393, %v9100_v20  }
 0x71d   :  { %7395 = vset.pattern.permute.xlu2 %v12208_v56  ;;  %v12212_v56 = vld [vmem:[#allocation44_spill] sm:$0xff] }
 0x71e   :  { %1319 = vperm.xlu2 %7395, %v9106_v35  }
 0x724   :  { %v3287_v47 = vpop.xlane.xlu2 %3286 }
 0x725   :  { %v3288_v28 = vsub.f32 %v3283_v45, %v3287_v47  ;;  %v519_v45 = vadd.f32 %v8382_v41, %v474_v39 }
 0x726   :  { %7397 = vset.pattern.permute.xlu2 %v12211_v26 }
 0x727   :  { %v3289_v6 = vmul.f32 1.442695, %v3288_v28  ;;  %1139 = vperm.xlu2 %7397, %v9093_v23   ;;  %v564_v59 = vadd.f32 %v8384_v9, %v519_v45  ;;  %v12213_v9 = vld [vmem:[#allocation46_spill] sm:$0xff]  ;;  %v3668_v45 = vpop.xlane.xlu0 %3667 }
 0x729   :  { %7419 = vpow2.f32 %v3289_v6  ;;  %v609_v21 = vadd.f32 %v12212_v56, %v564_v59  ;;  %v12217_v56 = vld [vmem:[#allocation21_spill] sm:$0xff] }
 0x72b   :  { %v9262_v47 = vadd.f32 %v12213_v9, %v609_v21 }
 0x72c   :  { %v3671_v49 = vpop.xlane.xlu2 %3670 }
 0x72d   :  { %v3673_v55 = vmul.f32 0.5, %v3671_v49  ;;  %v1289_v10 = vmul.f32 %v9255_v13, %v9262_v47  ;;  %v3725_v49 = vsel %vm1726_vm2, %v3696_v63, %v3704_v50  ;;  %v12219_v50 = vld [vmem:[#allocation25_spill] sm:$0xff] }
 0x72f   :  { %v9243_v36 = vpop.eup %7419  ;;  %v3734_v29 = vsel %vm1734_vm5, %v3732_v32, %v3673_v55  ;;  %7400 = vset.pattern.permute.xlu2 %v12195_v44 }
 0x730   :  { %v3773_v54 = vsel %vm1801_vm7, %v3734_v29, 0  ;;  %1007 = vperm.xlu2 %7400, %v9100_v20   ;;  %v3291_v41 = vsel %vm1730_vm4, %v9243_v36, 0.0  ;;  %v3672_v29 = vmul.f32 0.5, %v3668_v45 }
 0x731   :  { %3292 = vadd.xlane.f32.xlu0 %v3291_v41  ;;  %v9252_v40 = vand.u32 4294901760, %v3773_v54  ;;  %v12216_v41 = vld [vmem:[#allocation20_spill] sm:$0xff] }
 0x732   :  { %v210_v21 = vadd.f32 %v12217_v56, %v12216_v41  ;;  %v12221_v41 = vld [vmem:[#allocation30_spill] sm:$0xff] }
 0x733   :  { %3790 = vmatpush.xpose.msra.mxu0 %v9252_v40  ;;  %v9259_v61 = vsub.f32 %v3773_v54, %v9252_v40 }
 0x734   :  { %v9264_v28 = vpop.permute.xlu2 %3675 }
 0x735   :  { %v3818_v1 = vand.u32 4294901760, %v9259_v61 }
 0x737   :  { %v3819_v6 = vsub.f32 %v9259_v61, %v3818_v1 }
 0x738   :  { %1300 = vrot.lane.b32.xlu2 %v1289_v10, %s12214_s26 }
 0x739   :  { %v3820_v39 = vand.u32 4294901760, %v3819_v6  ;;  %7406 = vset.pattern.permute.xlu2 %v12209_v11  ;;  %v12218_v6 = vld [vmem:[#allocation23_spill] sm:$0xff] }
 0x73a   :  { %v245_v63 = vadd.f32 %v12218_v6, %v210_v21 }
 0x73b   :  { %3821 = vmatpush.xpose.msra.mxu1 %v3820_v39 }
 0x73c   :  { %v3712_v42 = vpop.permute.xlu2 %3711 }
 0x73d   :  { %v3727_v55 = vsel %vm1728_vm3, %v3725_v49, %v3712_v42  ;;  %v278_v42 = vadd.f32 %v12219_v50, %v245_v63 }
 0x744   :  { %v3720_v32 = vpop.permute.xlu2 %3719 }
 0x745   :  { %v3729_v59 = vsel %vm1730_vm4, %v3727_v55, %v3720_v32  ;;  %3683 = vrot.lane.b32.xlu0 %v8989_v4, %s12215_s13  ;;  %v12220_v32 = vld [vmem:[#allocation29_spill] sm:$0xff] }
 0x746   :  { %v3731_v54 = vsel %vm1732_vm6, %v3729_v59, 1.0 }
 0x747   :  { %v3733_v9 = vsel %vm1734_vm5, %v3731_v54, %v3672_v29  ;;  %v315_v29 = vadd.f32 %v12220_v32, %v278_v42  ;;  %v12223_v42 = vld [vmem:[#allocation28_spill] sm:$0xff] }
 0x748   :  { %v3770_v10 = vsel %vm1801_vm7, %v3733_v9, 0  ;;  %v9308_v9 = vpop.permute.xlu1 %1199 }
 0x749   :  { %v9285_v39 = vand.u32 4294901760, %v3770_v10  ;;  %v9304_v56 = vadd.f32 %v12221_v41, %v315_v29  ;;  %v1205_v6 = vmul.f32 %v9308_v9, %v9262_v47 }
 0x74b   :  { %v9289_v45 = vsub.f32 %v3770_v10, %v9285_v39  ;;  %3792 = vmatpush.xpose.msra.mxu0 %v9285_v39 }
 0x74c   :  { %v9292_v4 = vpop.permute.xlu2 %1159 }
 0x74d   :  { %v1165_v49 = vmul.f32 %v9292_v4, %v9262_v47  ;;  %955 = vperm.xlu0 %7384, %v9100_v20   ;;  %v3824_v55 = vand.u32 4294901760, %v9289_v45 }
 0x74f   :  { %1176 = vrot.lane.b32.xlu1 %v1165_v49, %s12214_s26  ;;  %v3825_v59 = vsub.f32 %v9289_v45, %v3824_v55  ;;  %v12224_v49 = vld [vmem:[#allocation31_spill] sm:$0xff] }
 0x750   :  { %v9319_v63 = vpop.permute.xlu1 %1403  ;;  %v470_v32 = vadd.f32 %v12224_v49, %v12223_v42 }
 0x751   :  { %v3826_v54 = vand.u32 4294901760, %v3825_v59  ;;  %v1409_v50 = vmul.f32 %v9319_v63, %v9262_v47 }
 0x753   :  { %3827 = vmatpush.xpose.msra.mxu1 %v3826_v54  ;;  %v12227_v54 = vld [vmem:[#allocation40_spill] sm:$0xff] }
 0x754   :  { %v9306_v21 = vpop.permute.xlu2 %1017 }
 0x755   :  { %12222 = vst [vmem:[#allocation44_spill] sm:$0xff] %v9306_v21  ;;  %7389 = vset.pattern.permute.xlu0 %v12192_v22  ;;  %v1021_v10 = vmul.f32 %v9306_v21, %v9304_v56 }
 0x756   :  { %975 = vperm.xlu0 %7389, %v9100_v20  }
 0x757   :  { %1383 = vperm.xlu1 %7401, %v9093_v23   ;;  %1026 = vrot.lane.b32.xlu2 %v1021_v10, %s12214_s26 }
 0x75c   :  { %v9358_v51 = vpop.permute.xlu2 %1323 }
 0x75e   :  { %7392 = vset.pattern.permute.xlu0 %v12210_v0  ;;  %v9332_v0 = vpop.permute.xlu1 %1077 }
 0x75f   :  { %1443 = vperm.xlu0 %7392, %v9093_v23   ;;  %1067 = vperm.xlu1 %7401, %v9100_v20   ;;  %12225 = vst [vmem:[#allocation46_spill] sm:$0xff] %v9332_v0  ;;  %v12226_v23 = vld [vmem:[#allocation39_spill] sm:$0xff]  ;;  %v1081_v59 = vmul.f32 %v9332_v0, %v9304_v56 }
 0x760   :  { %1216 = vrot.lane.b32.xlu2 %v1205_v6, %s12215_s13  ;;  %v514_v29 = vadd.f32 %v12226_v23, %v470_v32 }
 0x762   :  { %v558_v41 = vadd.f32 %v12227_v54, %v514_v29 }
 0x766   :  { %v9343_v6 = vpop.permute.xlu1 %1279 }
 0x767   :  { %1439 = vperm.xlu0 %7392, %v9106_v35   ;;  %7402 = vset.pattern.permute.xlu1 %v12195_v44  ;;  %v12228_v44 = vld [vmem:[#allocation41_spill] sm:$0xff] }
 0x768   :  { %1420 = vrot.lane.b32.xlu2 %v1409_v50, %s12214_s26  ;;  %1259 = vperm.xlu1 %7402, %v9106_v35   ;;  %v605_v10 = vadd.f32 %v12228_v44, %v558_v41  ;;  %v12229_v50 = vld [vmem:[#allocation42_spill] sm:$0xff] }
 0x76a   :  { %v9346_v42 = vadd.f32 %v12229_v50, %v605_v10  ;;  %v3647_v10 = vmul.f32 0.5, %v9226_v60 }
 0x76c   :  { %v1288_v49 = vmul.f32 %v9343_v6, %v9346_v42  ;;  %v3674_v46 = vsub.f32 0.0, %v3647_v10  ;;  %v9377_v10 = vpop.permute.xlu2 %1037 }
 0x76d   :  { %12232 = vst [vmem:[#allocation23_spill] sm:$0xff] %v9377_v10 }
 0x76f   :  { %7399 = vset.pattern.permute.xlu0 %v12211_v26 }
 0x770   :  { %1086 = vrot.lane.b32.xlu2 %v1081_v59, %s12214_s26  ;;  %945 = vperm.xlu0 %7399, %v9100_v20  }
 0x771   :  { %7403 = vset.pattern.permute.xlu1 %v12209_v11 }
 0x778   :  { %1298 = vrot.lane.b32.xlu2 %v1288_v49, %s12214_s26 }
 0x7a4   :  { %v3293_v32 = vpop.xlane.xlu0 %3292 }
 0x7a5   :  { %7421 = vrcp.f32 %v3293_v32  ;;  %v3305_v20 = vand.u32 2147483648, %v3293_v32  ;;  %v3303_v34 = vand.u32 2147483647, %v3293_v32  ;;  %vm3299_vm9 = vweird.f32 %v3293_v32 }
 0x7a7   :  { %v3306_v44 = vor.u32 1.1754944e-38, %v3305_v20  ;;  %vm3304_vm11 = vcmp.eq.f32.partialorder %v3303_v34, 8.507059e+37 }
 0x7ab   :  { %v7422_v23 = vpop.eup %7421 }
 0x7ac   :  { %v3295_v29 = vmul.f32 %v7422_v23, %v3293_v32  ;;  %vm3300_vm8 = vweird.f32 %v7422_v23 }
 0x7ad   :  { %vm3301_vm10 = vmor %vm3299_vm9, %vm3300_vm8 }
 0x7ae   :  { %v3296_v59 = vsub.f32 1.0, %v3295_v29  ;;  %v3690_v29 = vsel %vm1726_vm2, %v9264_v28, %v9230_v37 }
 0x7b0   :  { %v3297_v54 = vmul.f32 %v7422_v23, %v3296_v59 }
 0x7b2   :  { %v3298_v41 = vadd.f32 %v7422_v23, %v3297_v54 }
 0x7b4   :  { %v3302_v50 = vsel %vm3301_vm10, %v7422_v23, %v3298_v41 }
 0x7b5   :  { %v3307_v12 = vsel %vm3304_vm11, %v3306_v44, %v3302_v50 }
 0x7b6   :  { %v9353_v49 = vmul.f32 %v9243_v36, %v3307_v12 }
 0x7b7   :  { %v3684_v59 = vpop.permute.xlu0 %3683 }
 0x7b8   :  { %12230 = vst [vmem:[#allocation20_spill] sm:$0xff] %v9353_v49  ;;  %v3691_v32 = vsel %vm1728_vm3, %v3690_v29, %v3684_v59  ;;  %v3340_v20 = vsel %vm1730_vm4, %v9353_v49, 0 }
 0x7b9   :  { %v3692_v34 = vsel %vm1730_vm4, %v3691_v32, %v9238_v43  ;;  %v3360_v60 = vand.u32 4294901760, %v3340_v20 }
 0x7ba   :  { %v3693_v12 = vsel %vm1732_vm6, %v3692_v34, %v3674_v46 }
 0x7bb   :  { %v3694_v36 = vsel %vm1734_vm5, %v3693_v12, -1.0  ;;  %3396 = vmatmul.f32.vlgmr.msrb.gmra.mxu3 %v3360_v60  ;;  %v3361_v23 = vsub.f32 %v3340_v20, %v3360_v60  ;;  %v937_v12 = vld [vmem:[%s11903_s6 + $0x18] sm:$0xff] }
 0x7bc   :  { %v3767_v37 = vsel %vm1801_vm7, %v3694_v36, 0  ;;  %3874 = vmatpush.xpose.msrb.mxu3 %v9252_v40  ;;  %v929_v36 = vld [vmem:[%s11901_s4 + $0x8] sm:$0xff]  ;;  %s9485_s4 = sld [smem:[#allocation9 + $0x183]] }
 0x7bd   :  { %v3793_v28 = vand.u32 4294901760, %v3767_v37  ;;  %3422 = vmatmul.f32.vlgmr.msrb.gmra.mxu0 %v3361_v23  ;;  %v3362_v54 = vand.u32 4294901760, %v3361_v23 }
 0x7be   :  { %3901 = vmatpush.xpose.msrb.mxu0 %v3818_v1 }
 0x7bf   :  { %v3794_v41 = vsub.f32 %v3767_v37, %v3793_v28  ;;  %v3363_v44 = vsub.f32 %v3361_v23, %v3362_v54  ;;  %3447 = vmatmul.f32.vlgmr.msrb.gmra.mxu1 %v3362_v54  ;;  %v9371_v43 = vpop.permute.xlu0 %955 }
 0x7c0   :  { %12231 = vst [vmem:[#allocation21_spill] sm:$0xff] %v9371_v43  ;;  %3876 = vmatpush.xpose.msrb.mxu3 %v9285_v39  ;;  %3926 = vmatpush.xpose.msrb.mxu1 %v9252_v40  ;;  %v959_v46 = vmul.f32 %v9371_v43, %v9304_v56 }
 0x7c1   :  { %v3364_v50 = vand.u32 4294901760, %v3363_v44  ;;  %v3795_v29 = vand.u32 4294901760, %v3794_v41  ;;  %v936_v44 = vld [vmem:[%s11903_s6 + $0x10] sm:$0xff]  ;;  %s9471_s6 = sld [smem:[#allocation9 + $0x180]] }
 0x7c2   :  { %3905 = vmatpush.xpose.msrb.mxu0 %v3824_v55  ;;  %964 = vrot.lane.b32.xlu0 %v959_v46, %s12214_s26  ;;  %v9390_v55 = vpop.permute.xlu2 %1155  ;;  %12243 = sst [smem:[#allocation81_spill]] %s9485_s4 }
 0x7c3   :  { %3365 = vmatmul.f32.vlgmr.msrb.gmra.mxu2 %v3364_v50  ;;  %3497 = vmatmul.f32.vlgmr.msra.gmra.mxu3 %v3360_v60  ;;  %v3796_v1 = vsub.f32 %v3794_v41, %v3795_v29 }
 0x7c4   :  { %3849 = vmatpush.xpose.msrb.mxu2 %v9259_v61  ;;  %3928 = vmatpush.xpose.msrb.mxu1 %v9285_v39  ;;  %v1329_v61 = vmul.f32 %v9358_v51, %v9262_v47 }
 0x7c5   :  { %v3797_v40 = vand.u32 4294901760, %v3796_v1 }
 0x7c7   :  { %3798 = vmatmul.f32.vlgmr.msra.gmra.mxu0 %v3797_v40  ;;  %3829 = vmatmul.f32.vlgmr.msra.gmra.mxu1 %v3793_v28  ;;  %12240 = sst [smem:[#allocation78_spill]] %s9471_s6  ;;  %v12062_v7 = vstv %s9471_s6  ;;  %s12261_s6 = smov 20  }
 0x7c8   :  { %3852 = vmatpush.xpose.msrb.mxu2 %v9289_v45  ;;  %v9385_v59 = vpop.permute.xlu0 %975  ;;  %v1164_v45 = vmul.f32 %v9390_v55, %v9346_v42  ;;  %v3737_v0 = vmul.f32 %v9130_v53, %v12062_v7  ;;  %v3744_v53 = vmul.f32 %v9149_v27, %v12069_v5 }
 0x7c9   :  { %12233 = vst [vmem:[#allocation25_spill] sm:$0xff] %v9385_v59  ;;  %v979_v32 = vmul.f32 %v9385_v59, %v9304_v56 }
 0x7ca   :  { %1134 = vperm.xlu0 %7399, %v9106_v35   ;;  %v9404_v34 = vpop.permute.xlu2 %1097 }
 0x7cb   :  { %3474 = vmatmul.f32.vlgmr.msra.gmra.mxu2 %v3360_v60  ;;  %3880 = vmatmul.f32.vlgmr.msrb.gmra.mxu3 %v3795_v29  ;;  %12234 = vst [vmem:[#allocation29_spill] sm:$0xff] %v9404_v34  ;;  %v1041_v60 = vmul.f32 %v9377_v10, %v9304_v56  ;;  %v1101_v54 = vmul.f32 %v9404_v34, %v9304_v56  ;;  %v12061_v34 = vstv %s9473_s1  ;;  %s9508_s1 = sld [smem:[#allocation9 + $0x185]] }
 0x7cc   :  { %984 = vrot.lane.b32.xlu1 %v979_v32, %s12215_s13  ;;  %v3740_v21 = vmul.f32 %v9138_v38, %v12061_v34 }
 0x7ce   :  { %v3741_v16 = vadd.f32 %v3740_v21, %v3737_v0 }
 0x7cf   :  { %3907 = vmatmul.f32.vlgmr.msrb.gmra.mxu0 %v3793_v28  ;;  %3930 = vmatmul.f32.vlgmr.msrb.gmra.mxu1 %v3793_v28  ;;  %v9422_v28 = vpop.permute.xlu1 %1195 }
 0x7d1   :  { %v9395_v39 = vpop.permute.xlu0 %1443  ;;  %12246 = sst [smem:[#allocation83_spill]] %s9508_s1 }
 0x7d2   :  { %v1449_v20 = vmul.f32 %v9395_v39, %v9262_v47  ;;  %1340 = vrot.lane.b32.xlu0 %v1329_v61, %s12215_s13  ;;  %v9415_v23 = vpop.permute.xlu2 %1319 }
 0x7d3   :  { %3855 = vmatmul.f32.vlgmr.msrb.gmra.mxu2 %v3794_v41  ;;  %v1328_v37 = vmul.f32 %v9415_v23, %v9346_v42 }
 0x7d4   :  { %1174 = vrot.lane.b32.xlu1 %v1164_v45, %s12214_s26  ;;  %1460 = vrot.lane.b32.xlu2 %v1449_v20, %s12215_s13 }
 0x7d7   :  { %v9429_v41 = vpop.permute.xlu1 %1399 }
 0x7d9   :  { %v9444_v46 = vpop.permute.xlu0 %1439 }
 0x7da   :  { %1046 = vrot.lane.b32.xlu0 %v1041_v60, %s12215_s13  ;;  %12236 = vst [vmem:[#allocation30_spill] sm:$0xff] %v9444_v46  ;;  %v1448_v29 = vmul.f32 %v9444_v46, %v9346_v42 }
 0x7dc   :  { %1363 = vperm.xlu1 %7403, %v937_v12   ;;  %1057 = vperm.xlu2 %7406, %v929_v36  }
 0x7e2   :  { %1243 = vperm.xlu0 %7399, %v937_v12   ;;  %v9461_v20 = vpop.permute.xlu0 %945 }
 0x7e3   :  { %12239 = vst [vmem:[#allocation39_spill] sm:$0xff] %v9461_v20  ;;  %v949_v27 = vmul.f32 %v9461_v20, %v9304_v56 }
 0x7e4   :  { %7405 = vset.pattern.permute.xlu1 %v12211_v26  ;;  %1338 = vrot.lane.b32.xlu2 %v1328_v37, %s12215_s13  ;;  %v1204_v26 = vmul.f32 %v9422_v28, %v9346_v42 }
 0x7e5   :  { %997 = vperm.xlu1 %7405, %v929_v36   ;;  %7408 = vset.pattern.permute.xlu2 %v12192_v22 }
 0x7ea   :  { %7404 = vset.pattern.permute.xlu0 %v12200_v48  ;;  %v1408_v48 = vmul.f32 %v9429_v41, %v9346_v42 }
 0x7eb   :  { %1379 = vperm.xlu0 %7404, %v9106_v35   ;;  %v1140_v35 = vpop.permute.xlu2 %1139 }
 0x7ec   :  { %1117 = vperm.xlu2 %7408, %v929_v36   ;;  %v9499_v33 = vmul.f32 %v1140_v35, %v9262_v47  ;;  %v3745_v35 = vadd.f32 %v3744_v53, %v3741_v16 }
 0x7ed   :  { %1106 = vrot.lane.b32.xlu1 %v1101_v54, %s12215_s13 }
 0x7f3   :  { %1214 = vrot.lane.b32.xlu0 %v1204_v26, %s12215_s13  ;;  %v9446_v50 = vpop.permute.xlu2 %1007 }
 0x7f4   :  { %7409 = vset.pattern.permute.xlu2 %v12209_v11  ;;  %7407 = vset.pattern.permute.xlu0 %v12192_v22  ;;  %12237 = vst [vmem:[#allocation28_spill] sm:$0xff] %v9446_v50  ;;  %v9453_v11 = vpop.permute.xlu1 %1263  ;;  %v1011_v21 = vmul.f32 %v9446_v50, %v9304_v56 }
 0x7f5   :  { %1418 = vrot.lane.b32.xlu1 %v1408_v48, %s12214_s26  ;;  %1359 = vperm.xlu2 %7409, %v936_v44   ;;  %v9577_v5 = vmul.f32 %v9453_v11, %v9262_v47 }
 0x7fb   :  { %1483 = vperm.xlu0 %7407, %v937_v12   ;;  %v9451_v22 = vpop.permute.xlu2 %1300 }
 0x7fc   :  { %v1177_v40 = vpop.permute.xlu1 %1176 }
 0x7fd   :  { %1238 = vperm.xlu1 %7405, %v936_v44   ;;  %3958 = vrot.lane.b32.xlu2 %v8208_v25, %s12235_s10 }
 0x803   :  { %1479 = vperm.xlu0 %7407, %v936_v44   ;;  %v1027_v1 = vpop.permute.xlu2 %1026 }
 0x804   :  { %v9455_v61 = vpop.permute.xlu1 %1383 }
 0x805   :  { %1458 = vrot.lane.b32.xlu1 %v1448_v29, %s12215_s13 }
 0x80b   :  { %v1217_v32 = vpop.permute.xlu2 %1216 }
 0x80c   :  { %v9459_v45 = vpop.permute.xlu1 %1067 }
 0x80d   :  { %12238 = vst [vmem:[#allocation31_spill] sm:$0xff] %v9459_v45 }
 0x813   :  { %v9457_v25 = vpop.permute.xlu2 %1420 }
 0x814   :  { %v9465_v36 = vpop.permute.xlu1 %1259 }
 0x81b   :  { %v9463_v60 = vpop.permute.xlu2 %1086 }
 0x823   :  { %v9467_v37 = vpop.permute.xlu2 %1298 }
 0x82e   :  { %v9475_v44 = vpop.permute.xlu2 %1460 }
 0x834   :  { %v965_v12 = vpop.permute.xlu0 %964 }
 0x83a   :  { %v3423_v49 = vpop.f32.mrf.mxu0 }
 0x83c   :  { %v9469_v54 = vpop.permute.xlu0 %1134  ;;  %v3448_v43 = vpop.f32.mrf.mxu1 }
 0x83e   :  { %v985_v26 = vpop.permute.xlu1 %984  ;;  %v3397_v48 = vpop.f32.mrf.mxu3 }
 0x844   :  { %v9479_v29 = vpop.permute.xlu0 %1340 }
 0x846   :  { %v9481_v24 = vpop.permute.xlu1 %1174  ;;  %v3366_v30 = vpop.f32.mrf.mxu2 }
 0x847   :  { %v3398_v59 = vadd.f32 %v3397_v48, %v3366_v30  ;;  %v9496_v30 = vpop.permute.xlu2 %1057  ;;  %v3498_v34 = vpop.f32.mrf.mxu3 }
 0x848   :  { %12245 = vst [vmem:[#allocation40_spill] sm:$0xff] %v9496_v30 }
 0x849   :  { %v3424_v10 = vadd.f32 %v3423_v49, %v3398_v59 }
 0x84b   :  { %v3449_v62 = vadd.f32 %v3448_v43, %v3424_v10  ;;  %v1185_v43 = vadd.f32 %v1177_v40, %v9499_v33  ;;  %v12065_v10 = vstv %s9485_s4  ;;  %s9535_s4 = sld [smem:[#allocation9 + $0x187]] }
 0x84c   :  { %v1047_v48 = vpop.permute.xlu0 %1046  ;;  %v3748_v46 = vmul.f32 %v9160_v3, %v12065_v10  ;;  %v12068_v10 = vstv %s9508_s1  ;;  %s12093_s1 = smov 12  }
 0x84d   :  { %v1225_v0 = vadd.f32 %v1217_v32, %v1185_v43 }
 0x84e   :  { %v9501_v49 = vpop.permute.xlu1 %1363  ;;  %v3475_v59 = vpop.f32.mrf.mxu2  ;;  %v3749_v53 = vadd.f32 %v3748_v46, %v3745_v35  ;;  %v12072_v35 = vstv %s9520_s5  ;;  %s12259_s5 = smov 80  }
 0x84f   :  { %v3476_v38 = vadd.f32 %v3475_v59, %v3449_v62  ;;  %v12067_v62 = vstv %s9494_s9  ;;  %v1031_v59 = vadd.f32 %v1027_v1, %v1011_v21  ;;  %v9527_v3 = vpop.permute.xlu2 %1338  ;;  %s12260_s9 = smov 76  }
 0x850   :  { %v3752_v32 = vmul.f32 %v9171_v52, %v12067_v62  ;;  %v1071_v52 = vmul.f32 %v9459_v45, %v9304_v56 }
 0x851   :  { %v9510_v7 = vadd.f32 %v3498_v34, %v3476_v38  ;;  %v969_v34 = vadd.f32 %v965_v12, %v949_v27  ;;  %12250 = sst [smem:[#allocation85_spill]] %s9535_s4  ;;  %v1051_v1 = vadd.f32 %v1047_v48, %v1031_v59  ;;  %v12251_v12 = vld [vmem:[#allocation38_spill] sm:$0xff] }
 0x852   :  { %v3753_v46 = vadd.f32 %v3752_v32, %v3749_v53  ;;  %v1091_v59 = vadd.f32 %v9463_v60, %v1071_v52 }
 0x853   :  { %12247 = vst [vmem:[#allocation41_spill] sm:$0xff] %v9510_v7  ;;  %v989_v43 = vadd.f32 %v985_v26, %v969_v34  ;;  %v3756_v26 = vmul.f32 %v9182_v15, %v12068_v10  ;;  %v9550_v27 = vadd.f32 %v9496_v30, %v1051_v1  ;;  %v3760_v15 = vmul.f32 %v9191_v17, %v12072_v35 }
 0x854   :  { %v9522_v40 = vpop.permute.xlu0 %1243  ;;  %v1309_v35 = vadd.f32 %v9451_v22, %v9577_v5  ;;  %v9607_v22 = vmul.f32 %v9455_v61, %v9262_v47  ;;  %v3799_v61 = vpop.f32.mrf.mxu0 }
 0x855   :  { %v9525_v16 = vadd.f32 %v9522_v40, %v1225_v0  ;;  %v3757_v53 = vadd.f32 %v3756_v26, %v3753_v46  ;;  %v9569_v10 = vmul.f32 %v12251_v12, %v9550_v27 }
 0x857   :  { %v9532_v38 = vpop.permute.xlu1 %997  ;;  %v4311_v21 = vmul.f32 %v12251_v12, %v9525_v16  ;;  %v9579_v20 = vpop.permute.xlu2 %1117  ;;  %v3761_v1 = vadd.f32 %v3760_v15, %v3757_v53 }
 0x858   :  { %12249 = vst [vmem:[#allocation42_spill] sm:$0xff] %v9532_v38  ;;  %v9540_v0 = vadd.f32 %v9532_v38, %v989_v43  ;;  %v12252_v43 = vld [vmem:[#allocation50_spill] sm:$0xff] }
 0x859   :  { %4377 = vrot.lane.b32.xlu2 %v4311_v21, %s12235_s10  ;;  %v9573_v60 = vmul.f32 %v12252_v43, %v9550_v27  ;;  %12255 = vst [vmem:[#allocation87_spill] sm:$0xff] %v9579_v20 }
 0x85a   :  { %v9557_v34 = vmul.f32 %v12251_v12, %v9540_v0  ;;  %v9561_v62 = vmul.f32 %v12252_v43, %v9540_v0 }
 0x85b   :  { %12254 = vst [vmem:[#allocation86_spill] sm:$0xff] %v9573_v60  ;;  %v5579_v50 = vmul.f32 %v9573_v60, %v9573_v60 }
 0x85c   :  { %12253 = vst [vmem:[#allocation38_spill] sm:$0xff] %v9561_v62  ;;  %v4316_v17 = vmul.f32 %v9557_v34, %v9557_v34  ;;  %v5578_v26 = vmul.f32 %v9561_v62, %v9561_v62 }
 0x85d   :  { %v9552_v48 = vpop.permute.xlu0 %1379 }
 0x85e   :  { %v5580_v30 = vadd.f32 %v5579_v50, %v5578_v26  ;;  %v9624_v50 = vmul.f32 %v9465_v36, %v9346_v42  ;;  %v3830_v26 = vpop.f32.mrf.mxu1 }
 0x85f   :  { %v1107_v32 = vpop.permute.xlu1 %1106 }
 0x860   :  { %v1111_v52 = vadd.f32 %v1107_v32, %v1091_v59  ;;  %v12256_v59 = vstv %s9535_s4  ;;  %s12258_s4 = smov 16  }
 0x861   :  { %v3764_v32 = vmul.f32 %v9200_v58, %v12256_v59  ;;  %v1349_v58 = vadd.f32 %v9479_v29, %v1309_v35  ;;  %v1429_v29 = vadd.f32 %v9457_v25, %v9607_v22 }
 0x862   :  { %v9582_v46 = vadd.f32 %v9579_v20, %v1111_v52  ;;  %v4317_v52 = vmul.f32 %v9569_v10, %v9569_v10 }
 0x863   :  { %v3765_v7 = vadd.f32 %v3764_v32, %v3761_v1  ;;  %v9615_v62 = vadd.f32 %v9501_v49, %v1349_v58  ;;  %v1469_v35 = vadd.f32 %v9475_v44, %v1429_v29  ;;  %v9629_v1 = vmul.f32 %v9469_v54, %v9346_v42  ;;  %v3856_v32 = vpop.f32.mrf.mxu2 }
 0x864   :  { %v9595_v11 = vmul.f32 %v12251_v12, %v9582_v46  ;;  %v9601_v38 = vmul.f32 %v12252_v43, %v9582_v46  ;;  %v4318_v15 = vadd.f32 %v4317_v52, %v4316_v17  ;;  %v1308_v44 = vadd.f32 %v9467_v37, %v9624_v50 }
 0x865   :  { %v1215_v53 = vpop.permute.xlu0 %1214  ;;  %v3800_v17 = vadd.f32 %v3799_v61, %v3765_v7  ;;  %v1184_v25 = vadd.f32 %v9481_v24, %v9629_v1  ;;  %v9647_v61 = vpop.permute.xlu2 %1359 }
 0x866   :  { %12257 = vst [vmem:[#allocation88_spill] sm:$0xff] %v9601_v38  ;;  %v4319_v59 = vmul.f32 %v9595_v11, %v9595_v11  ;;  %v5581_v45 = vmul.f32 %v9601_v38, %v9601_v38 }
 0x867   :  { %v1419_v20 = vpop.permute.xlu1 %1418  ;;  %v3831_v7 = vadd.f32 %v3830_v26, %v3800_v17  ;;  %v1224_v52 = vadd.f32 %v1215_v53, %v1184_v25  ;;  %v9659_v53 = vmul.f32 %v9552_v48, %v9346_v42 }
 0x868   :  { %v4320_v60 = vadd.f32 %v4319_v59, %v4318_v15  ;;  %v9617_v43 = vadd.f32 %v5581_v45, %v5580_v30  ;;  %v4313_v45 = vmul.f32 %v12251_v12, %v9615_v62  ;;  %v1348_v59 = vadd.f32 %v9527_v3, %v1308_v44  ;;  %v3881_v3 = vpop.f32.mrf.mxu3 }
 0x869   :  { %v3857_v24 = vadd.f32 %v3856_v32, %v3831_v7  ;;  %v1428_v25 = vadd.f32 %v1419_v20, %v9659_v53  ;;  %v3908_v7 = vpop.f32.mrf.mxu0 }
 0x86a   :  { %4322 = vrot.lane.b32.xlu0 %v4320_v60, %s12215_s13  ;;  %v4330_v60 = vmul.f32 %v4311_v21, %v4311_v21  ;;  %v4332_v15 = vmul.f32 %v4313_v45, %v4313_v45 }
 0x86b   :  { %v3882_v26 = vadd.f32 %v3881_v3, %v3857_v24 }
 0x86c   :  { %v4334_v37 = vadd.f32 %v4332_v15, %v4330_v60 }
 0x86d   :  { %v9633_v30 = vpop.permute.xlu0 %1483  ;;  %v3909_v48 = vadd.f32 %v3908_v7, %v3882_v26 }
 0x86e   :  { %v9638_v36 = vadd.f32 %v9633_v30, %v1469_v35  ;;  %v9655_v35 = vadd.f32 %v9647_v61, %v1348_v59 }
 0x86f   :  { %v9642_v54 = vpop.permute.xlu1 %1238 }
 0x870   :  { %v4315_v58 = vmul.f32 %v12251_v12, %v9638_v36  ;;  %v9650_v21 = vadd.f32 %v9642_v54, %v1224_v52  ;;  %v4312_v60 = vmul.f32 %v12251_v12, %v9655_v35 }
 0x872   :  { %3970 = vrot.lane.b32.xlu0 %v8564_v31, %s12258_s4  ;;  %v4336_v29 = vmul.f32 %v4315_v58, %v4315_v58  ;;  %v4310_v44 = vmul.f32 %v12251_v12, %v9650_v21  ;;  %v4331_v24 = vmul.f32 %v4312_v60, %v4312_v60 }
 0x874   :  { %v4338_v17 = vadd.f32 %v4336_v29, %v4334_v37  ;;  %v4329_v20 = vmul.f32 %v4310_v44, %v4310_v44  ;;  %v3931_v37 = vpop.f32.mrf.mxu1 }
 0x875   :  { %v9667_v52 = vpop.permute.xlu0 %1479  ;;  %v3932_v3 = vadd.f32 %v3931_v37, %v3909_v48  ;;  %v12266_v48 = vld [vmem:[#allocation57_spill] sm:$0xff] }
 0x876   :  { %4343 = vrot.lane.b32.xlu1 %v4338_v17, %s12189_s29  ;;  %v4333_v29 = vadd.f32 %v4331_v24, %v4329_v20 }
 0x877   :  { %v1459_v31 = vpop.permute.xlu1 %1458  ;;  %v3934_v26 = vsel %vm1730_vm4, %v3932_v3, -inf }
 0x878   :  { %v1468_v32 = vadd.f32 %v1459_v31, %v1428_v25  ;;  %v12263_v25 = vld [vmem:[#allocation48_spill] sm:$0xff] }
 0x87a   :  { %v9670_v15 = vadd.f32 %v9667_v52, %v1468_v32  ;;  %4393 = vrot.lane.b32.xlu0 %v4315_v58, %s12259_s5 }
 0x87c   :  { %v4314_v59 = vmul.f32 %v12251_v12, %v9670_v15  ;;  %v3959_v12 = vpop.permute.xlu2 %3958 }
 0x87e   :  { %v4335_v17 = vmul.f32 %v4314_v59, %v4314_v59 }
 0x880   :  { %v4337_v38 = vadd.f32 %v4335_v17, %v4333_v29  ;;  %v12267_v17 = vld [vmem:[#allocation58_spill] sm:$0xff] }
 0x882   :  { %4341 = vrot.lane.b32.xlu1 %v4337_v38, %s12189_s29  ;;  %4375 = vrot.lane.b32.xlu0 %v4310_v44, %s12235_s10  ;;  %v12264_v44 = vld [vmem:[#allocation53_spill] sm:$0xff] }
 0x883   :  { %3935 = vmax.xlane.f32.xlu2 %v3934_v26 }
 0x88a   :  { %3960 = vrot.lane.b32.xlu1 %v8234_v2, %s12235_s10 }
 0x892   :  { %3966 = vrot.lane.b32.xlu1 %v8534_v8, %s12093_s1 }
 0x89a   :  { %3972 = vrot.lane.b32.xlu1 %v8549_v14, %s12258_s4  ;;  %v12262_v14 = vld [vmem:[#allocation47_spill] sm:$0xff]  ;;  %s12303_s4 = sld [smem:[#allocation61_spill]] }
 0x89b   :  { %4385 = vrot.lane.b32.xlu2 %v4313_v45, %s12260_s9  ;;  %v752_v45 = vadd.f32 %v12263_v25, %v12262_v14  ;;  %v12270_v14 = vld [vmem:[#allocation45_spill] sm:$0xff] }
 0x8a2   :  { %3964 = vrot.lane.b32.xlu1 %v8557_v57, %s12093_s1  ;;  %v797_v57 = vadd.f32 %v12264_v44, %v752_v45  ;;  %s12268_s1 = smov 108   ;;  %v12271_v45 = vld [vmem:[#allocation51_spill] sm:$0xff] }
 0x8aa   :  { %3978 = vrot.lane.b32.xlu1 %v8738_v19, %s12261_s6  ;;  %v12265_v19 = vld [vmem:[#allocation54_spill] sm:$0xff] }
 0x8ab   :  { %v842_v32 = vadd.f32 %v12265_v19, %v797_v57  ;;  %v12272_v19 = vld [vmem:[#allocation52_spill] sm:$0xff] }
 0x8ad   :  { %v887_v20 = vadd.f32 %v12266_v48, %v842_v32 }
 0x8af   :  { %v924_v26 = vadd.f32 %v12267_v17, %v887_v20 }
 0x8b2   :  { %3976 = vrot.lane.b32.xlu1 %v8746_v18, %s12261_s6 }
 0x8b3   :  { %v9696_v31 = vpop.permute.xlu2 %4377 }
 0x8dc   :  { %v4323_v38 = vpop.permute.xlu0 %4322 }
 0x8dd   :  { %v4325_v2 = vsel %vm1682_vm1, %v4323_v38, 0.0  ;;  %v1621_v38 = vmul.f32 %v9395_v39, %v924_v26 }
 0x8de   :  { %4326 = vadd.xlane.f32.xlu2 %v4325_v2 }
 0x8e8   :  { %v4344_v8 = vpop.permute.xlu1 %4343 }
 0x8e9   :  { %v4350_v58 = vsel %vm1682_vm1, %v4344_v8, 0.0 }
 0x8ea   :  { %4351 = vadd.xlane.f32.xlu1 %v4350_v58 }
 0x8f4   :  { %v4342_v7 = vpop.permute.xlu1 %4341 }
 0x8f5   :  { %v4347_v18 = vsel %vm1682_vm1, %v4342_v7, 0.0  ;;  %v12273_v7 = vld [vmem:[#allocation55_spill] sm:$0xff] }
 0x8f6   :  { %v3936_v24 = vpop.xlane.xlu2 %3935  ;;  %4348 = vadd.xlane.f32.xlu0 %v4347_v18  ;;  %4383 = vrot.lane.b32.xlu2 %v4312_v60, %s12260_s9 }
 0x8f7   :  { %v3937_v37 = vsub.f32 %v3932_v3, %v3936_v24  ;;  %v12269_v3 = vld [vmem:[#allocation43_spill] sm:$0xff]  ;;  %v1545_v24 = vmul.f32 %v9255_v13, %v924_v26 }
 0x8f8   :  { %v748_v25 = vadd.f32 %v12270_v14, %v12269_v3  ;;  %v1517_v3 = vmul.f32 %v9308_v9, %v924_v26 }
 0x8f9   :  { %v3938_v29 = vmul.f32 1.442695, %v3937_v37 }
 0x8fa   :  { %v792_v44 = vadd.f32 %v12271_v45, %v748_v25 }
 0x8fb   :  { %7423 = vpow2.f32 %v3938_v29  ;;  %v12274_v29 = vld [vmem:[#allocation56_spill] sm:$0xff] }
 0x8fc   :  { %v3961_v2 = vpop.permute.xlu1 %3960  ;;  %v836_v32 = vadd.f32 %v12272_v19, %v792_v44 }
 0x8fe   :  { %1632 = vrot.lane.b32.xlu2 %v1621_v38, %s12215_s13  ;;  %v883_v18 = vadd.f32 %v12273_v7, %v836_v32  ;;  %v1569_v32 = vmul.f32 %v9358_v51, %v924_v26  ;;  %v12275_v7 = vld [vmem:[#allocation49_spill] sm:$0xff] }
 0x8ff   :  { %v9755_v51 = vmul.f32 %v12275_v7, %v9615_v62 }
 0x900   :  { %v920_v17 = vadd.f32 %v12274_v29, %v883_v18  ;;  %v9749_v18 = vmul.f32 %v12275_v7, %v9525_v16 }
 0x901   :  { %v9705_v8 = vpop.eup %7423 }
 0x902   :  { %v3940_v58 = vsel %vm1730_vm4, %v9705_v8, 0.0  ;;  %v1544_v9 = vmul.f32 %v9343_v6, %v920_v17  ;;  %v1568_v6 = vmul.f32 %v9415_v23, %v920_v17  ;;  %v9771_v23 = vmul.f32 %v12275_v7, %v9550_v27 }
 0x903   :  { %3941 = vadd.xlane.f32.xlu0 %v3940_v58  ;;  %4357 = vrot.lane.b32.xlu1 %v9557_v34, %s12206_s23  ;;  %v1493_v34 = vmul.f32 %v9292_v4, %v924_v26  ;;  %v1492_v4 = vmul.f32 %v9390_v55, %v920_v17  ;;  %v3971_v58 = vpop.permute.xlu0 %3970 }
 0x904   :  { %v3967_v60 = vpop.permute.xlu1 %3966 }
 0x906   :  { %4618 = vrot.lane.b32.xlu2 %v9262_v47, %s12215_s13 }
 0x90b   :  { %4361 = vrot.lane.b32.xlu1 %v9569_v10, %s12268_s1  ;;  %v3983_v10 = vsel %vm1726_vm2, %v3961_v2, %v3967_v60 }
 0x90c   :  { %v3973_v39 = vpop.permute.xlu1 %3972 }
 0x90d   :  { %v3985_v48 = vsel %vm1728_vm3, %v3983_v10, %v3973_v39  ;;  %v12276_v10 = vld [vmem:[#allocation30_spill] sm:$0xff] }
 0x913   :  { %4365 = vrot.lane.b32.xlu1 %v9595_v11, %s12214_s26 }
 0x914   :  { %v3965_v57 = vpop.permute.xlu1 %3964 }
 0x915   :  { %v3982_v38 = vsel %vm1726_vm2, %v3959_v12, %v3965_v57  ;;  %v1597_v12 = vmul.f32 %v9319_v63, %v924_v26  ;;  %v1516_v63 = vmul.f32 %v9422_v28, %v920_v17  ;;  %v9759_v26 = vmul.f32 %v12275_v7, %v9638_v36 }
 0x916   :  { %v3984_v39 = vsel %vm1728_vm3, %v3982_v38, %v3971_v58  ;;  %v4960_v28 = vmul.f32 %v9749_v18, %v9749_v18  ;;  %v4947_v38 = vmul.f32 %v9771_v23, %v9771_v23  ;;  %v9798_v58 = vmul.f32 %v12275_v7, %v9670_v15 }
 0x917   :  { %4391 = vrot.lane.b32.xlu0 %v4314_v59, %s12259_s5 }
 0x91b   :  { %1504 = vrot.lane.b32.xlu1 %v1493_v34, %s12214_s26  ;;  %v1596_v34 = vmul.f32 %v9429_v41, %v920_v17  ;;  %v9766_v41 = vmul.f32 %v12275_v7, %v9540_v0 }
 0x91c   :  { %v3979_v20 = vpop.permute.xlu1 %3978 }
 0x91d   :  { %v3987_v11 = vsel %vm1730_vm4, %v3985_v48, %v3979_v20  ;;  %v1620_v48 = vmul.f32 %v12276_v10, %v920_v17  ;;  %v4962_v20 = vmul.f32 %v9755_v51, %v9755_v51  ;;  %v4946_v17 = vmul.f32 %v9766_v41, %v9766_v41 }
 0x91e   :  { %v4005_v37 = vand.u32 4294901760, %v3987_v11 }
 0x91f   :  { %1556 = vrot.lane.b32.xlu0 %v1545_v24, %s12214_s26  ;;  %v4966_v24 = vmul.f32 %v9759_v26, %v9759_v26  ;;  %v4964_v29 = vadd.f32 %v4962_v20, %v4960_v28 }
 0x920   :  { %v4033_v59 = vsub.f32 %v3987_v11, %v4005_v37  ;;  %4006 = vmatpush.msra.mxu2 %v4005_v37  ;;  %4090 = vmatpush.msra.mxu1 %v4005_v37  ;;  %v9779_v11 = vmul.f32 %v12275_v7, %v9582_v46 }
 0x922   :  { %v4034_v2 = vand.u32 4294901760, %v4033_v59  ;;  %4065 = vmatpush.msra.mxu0 %v4033_v59 }
 0x923   :  { %1502 = vrot.lane.b32.xlu1 %v1492_v4, %s12214_s26  ;;  %v4968_v4 = vadd.f32 %v4966_v24, %v4964_v29 }
 0x924   :  { %v4035_v13 = vsub.f32 %v4033_v59, %v4034_v2  ;;  %v3977_v60 = vpop.permute.xlu1 %3976  ;;  %v9790_v59 = vmul.f32 %v12275_v7, %v9655_v35 }
 0x925   :  { %v3986_v14 = vsel %vm1730_vm4, %v3984_v39, %v3977_v60 }
 0x926   :  { %v4007_v25 = vand.u32 4294901760, %v3986_v14  ;;  %v4036_v45 = vand.u32 4294901760, %v4035_v13  ;;  %v4948_v13 = vadd.f32 %v4947_v38, %v4946_v17 }
 0x927   :  { %1528 = vrot.lane.b32.xlu0 %v1517_v3, %s12215_s13  ;;  %v4961_v3 = vmul.f32 %v9790_v59, %v9790_v59 }
 0x928   :  { %v4039_v55 = vsub.f32 %v3986_v14, %v4007_v25  ;;  %4008 = vmatpush.msra.mxu2 %v4007_v25  ;;  %4037 = vmatpush.msra.mxu3 %v4036_v45  ;;  %v4965_v14 = vmul.f32 %v9798_v58, %v9798_v58 }
 0x929   :  { %4092 = vmatpush.msra.mxu1 %v4007_v25 }
 0x92a   :  { %4117 = vmatpush.msrb.mxu2 %v4034_v2  ;;  %4068 = vmatpush.msra.mxu0 %v4039_v55  ;;  %v4040_v44 = vand.u32 4294901760, %v4039_v55  ;;  %v4949_v2 = vmul.f32 %v9779_v11, %v9779_v11 }
 0x92b   :  { %1608 = vrot.lane.b32.xlu1 %v1597_v12, %s12214_s26  ;;  %v4398_v12 = vsel %vm1726_vm2, %v9262_v47, %v9696_v31 }
 0x92c   :  { %4121 = vmatpush.msrb.mxu2 %v4040_v44  ;;  %v4041_v57 = vsub.f32 %v4039_v55, %v4040_v44  ;;  %v4950_v39 = vadd.f32 %v4949_v2, %v4948_v13  ;;  %v4386_v55 = vpop.permute.xlu2 %4385 }
 0x92d   :  { %v4400_v44 = vsel %vm1728_vm3, %v4398_v12, %v4386_v55 }
 0x92e   :  { %v4042_v19 = vand.u32 4294901760, %v4041_v57  ;;  %v4394_v57 = vpop.permute.xlu0 %4393 }
 0x92f   :  { %1554 = vrot.lane.b32.xlu0 %v1544_v9, %s12214_s26  ;;  %v4402_v9 = vsel %vm1730_vm4, %v4400_v44, %v4394_v57 }
 0x930   :  { %4043 = vmatpush.msra.mxu3 %v4042_v19 }
 0x932   :  { %4142 = vmatpush.msrb.mxu3 %v4005_v37  ;;  %v9783_v37 = vmul.f32 %v12275_v7, %v9650_v21 }
 0x933   :  { %1580 = vrot.lane.b32.xlu1 %v1569_v32, %s12215_s13 }
 0x934   :  { %4144 = vmatpush.msrb.mxu3 %v4007_v25  ;;  %v4959_v60 = vmul.f32 %v9783_v37, %v9783_v37 }
 0x936   :  { %v4963_v25 = vadd.f32 %v4961_v3, %v4959_v60  ;;  %v4376_v31 = vpop.permute.xlu0 %4375 }
 0x937   :  { %1526 = vrot.lane.b32.xlu0 %v1516_v63, %s12215_s13  ;;  %v4404_v63 = vsel %vm1732_vm6, %v4402_v9, 1.0 }
 0x938   :  { %v4967_v45 = vadd.f32 %v4965_v14, %v4963_v25  ;;  %v9826_v14 = vmul.f32 0.20412415, %v9304_v56 }
 0x93b   :  { %1606 = vrot.lane.b32.xlu1 %v1596_v34, %s12214_s26 }
 0x93f   :  { %1578 = vrot.lane.b32.xlu0 %v1568_v6, %s12215_s13 }
 0x943   :  { %1630 = vrot.lane.b32.xlu1 %v1620_v48, %s12215_s13 }
 0x947   :  { %4973 = vrot.lane.b32.xlu0 %v4968_v4, %s12188_s27 }
 0x94b   :  { %4952 = vrot.lane.b32.xlu1 %v4950_v39, %s12191_s19  ;;  %s12278_s19 = smov 28  }
 0x94f   :  { %4971 = vrot.lane.b32.xlu0 %v4967_v45, %s12188_s27 }
 0x951   :  { %v4327_v4 = vpop.xlane.xlu2 %4326 }
 0x952   :  { %v4328_v39 = vmul.f32 0.5, %v4327_v4 }
 0x954   :  { %v4355_v44 = vsub.f32 0.0, %v4328_v39 }
 0x95d   :  { %v4352_v19 = vpop.xlane.xlu1 %4351 }
 0x95e   :  { %v4354_v32 = vmul.f32 0.5, %v4352_v19 }
 0x960   :  { %v4406_v34 = vsel %vm1734_vm5, %v4404_v63, %v4354_v32  ;;  %v4384_v32 = vpop.permute.xlu2 %4383 }
 0x961   :  { %v4429_v7 = vsel %vm1801_vm7, %v4406_v34, 0 }
 0x962   :  { %v9817_v6 = vand.u32 4294901760, %v4429_v7 }
 0x964   :  { %4446 = vmatpush.xpose.msrb.mxu0 %v9817_v6  ;;  %v9821_v28 = vsub.f32 %v4429_v7, %v9817_v6 }
 0x966   :  { %v4474_v10 = vand.u32 4294901760, %v9821_v28 }
 0x968   :  { %v4475_v48 = vsub.f32 %v9821_v28, %v4474_v10 }
 0x969   :  { %v4349_v24 = vpop.xlane.xlu0 %4348 }
 0x96a   :  { %v4476_v20 = vand.u32 4294901760, %v4475_v48  ;;  %v4397_v48 = vsel %vm1726_vm2, %v9346_v42, %v4376_v31 }
 0x96c   :  { %4477 = vmatpush.xpose.msrb.mxu1 %v4476_v20 }
 0x975   :  { %v4358_v29 = vpop.permute.xlu1 %4357 }
 0x976   :  { %v3942_v17 = vpop.xlane.xlu0 %3941  ;;  %v4368_v55 = vsel %vm1726_vm2, %v9826_v14, %v4358_v29 }
 0x977   :  { %7425 = vrcp.f32 %v3942_v17  ;;  %v3954_v3 = vand.u32 2147483648, %v3942_v17  ;;  %v3952_v45 = vand.u32 2147483647, %v3942_v17  ;;  %vm3948_vm13 = vweird.f32 %v3942_v17 }
 0x979   :  { %v3955_v57 = vor.u32 1.1754944e-38, %v3954_v3  ;;  %vm3953_vm15 = vcmp.eq.f32.partialorder %v3952_v45, 8.507059e+37 }
 0x97d   :  { %v7426_v38 = vpop.eup %7425  ;;  %v4362_v2 = vpop.permute.xlu1 %4361 }
 0x97e   :  { %v3944_v13 = vmul.f32 %v7426_v38, %v3942_v17  ;;  %vm3949_vm12 = vweird.f32 %v7426_v38  ;;  %v4369_v9 = vsel %vm1728_vm3, %v4368_v55, %v4362_v2  ;;  %v4399_v17 = vsel %vm1728_vm3, %v4397_v48, %v4384_v32 }
 0x97f   :  { %vm3950_vm14 = vmor %vm3948_vm13, %vm3949_vm12 }
 0x980   :  { %v3945_v60 = vsub.f32 1.0, %v3944_v13 }
 0x982   :  { %v3946_v25 = vmul.f32 %v7426_v38, %v3945_v60 }
 0x984   :  { %v3947_v12 = vadd.f32 %v7426_v38, %v3946_v25 }
 0x985   :  { %v4366_v19 = vpop.permute.xlu1 %4365 }
 0x986   :  { %v3951_v63 = vsel %vm3950_vm14, %v7426_v38, %v3947_v12  ;;  %v4370_v56 = vsel %vm1730_vm4, %v4369_v9, %v4366_v19  ;;  %v4353_v38 = vmul.f32 0.5, %v4349_v24 }
 0x987   :  { %v3956_v34 = vsel %vm3953_vm15, %v3955_v57, %v3951_v63  ;;  %v4371_v7 = vsel %vm1732_vm6, %v4370_v56, %v4355_v44 }
 0x988   :  { %v9836_v20 = vmul.f32 %v9705_v8, %v3956_v34  ;;  %v4372_v29 = vsel %vm1734_vm5, %v4371_v7, -1.0 }
 0x989   :  { %v4423_v4 = vsel %vm1801_vm7, %v4372_v29, 0  ;;  %v4392_v2 = vpop.permute.xlu0 %4391 }
 0x98a   :  { %v4449_v13 = vand.u32 4294901760, %v4423_v4  ;;  %v4401_v60 = vsel %vm1730_vm4, %v4399_v17, %v4392_v2  ;;  %v3989_v39 = vsel %vm1730_vm4, %v9836_v20, 0 }
 0x98b   :  { %v4403_v3 = vsel %vm1732_vm6, %v4401_v60, 1.0  ;;  %v4009_v31 = vand.u32 4294901760, %v3989_v39 }
 0x98c   :  { %v4450_v25 = vsub.f32 %v4423_v4, %v4449_v13  ;;  %v4405_v8 = vsel %vm1734_vm5, %v4403_v3, %v4353_v38 }
 0x98d   :  { %v4426_v45 = vsel %vm1801_vm7, %v4405_v8, 0  ;;  %4045 = vmatmul.f32.vlgmr.msra.gmra.mxu3 %v4009_v31  ;;  %v1505_v55 = vpop.permute.xlu1 %1504  ;;  %v4010_v12 = vsub.f32 %v3989_v39, %v4009_v31 }
 0x98e   :  { %v4451_v44 = vand.u32 4294901760, %v4450_v25  ;;  %v4447_v57 = vand.u32 4294901760, %v4426_v45  ;;  %4530 = vmatpush.xpose.msra.mxu3 %v9817_v6  ;;  %v1513_v4 = vadd.f32 %v1505_v55, %v9499_v33 }
 0x98f   :  { %4071 = vmatmul.f32.vlgmr.msra.gmra.mxu0 %v4010_v12  ;;  %v4011_v24 = vand.u32 4294901760, %v4010_v12 }
 0x990   :  { %v4479_v9 = vsub.f32 %v4426_v45, %v4447_v57  ;;  %4448 = vmatpush.xpose.msrb.mxu0 %v4447_v57  ;;  %v4452_v19 = vsub.f32 %v4450_v25, %v4451_v44 }
 0x991   :  { %4096 = vmatmul.f32.vlgmr.msra.gmra.mxu1 %v4011_v24  ;;  %v1557_v32 = vpop.permute.xlu0 %1556  ;;  %v4012_v63 = vsub.f32 %v4010_v12, %v4011_v24 }
 0x992   :  { %4532 = vmatpush.xpose.msra.mxu3 %v4447_v57  ;;  %v4480_v56 = vand.u32 4294901760, %v4479_v9  ;;  %v4453_v29 = vand.u32 4294901760, %v4452_v19  ;;  %v1565_v33 = vadd.f32 %v1557_v32, %v9577_v5 }
 0x993   :  { %v4013_v34 = vand.u32 4294901760, %v4012_v63  ;;  %v12285_v63 = vstv %s8608_s14  ;;  %s12330_s14 = smov 120  }
 0x994   :  { %4557 = vmatpush.xpose.msra.mxu0 %v4474_v10  ;;  %v4481_v7 = vsub.f32 %v4479_v9, %v4480_v56 }
 0x995   :  { %4014 = vmatmul.f32.vlgmr.msra.gmra.mxu2 %v4013_v34  ;;  %4146 = vmatmul.f32.vlgmr.msrb.gmra.mxu3 %v4009_v31  ;;  %v1503_v48 = vpop.permute.xlu1 %1502  ;;  %v9944_v34 = vld [vmem:[%s11899_s2 + $0x50] sm:$0xff] }
 0x996   :  { %4505 = vmatpush.xpose.msra.mxu2 %v9821_v28  ;;  %v4482_v17 = vand.u32 4294901760, %v4481_v7  ;;  %v1512_v55 = vadd.f32 %v1503_v48, %v9629_v1 }
 0x997   :  { %4454 = vmatmul.f32.vlgmr.msrb.gmra.mxu0 %v4453_v29  ;;  %v12286_v29 = vstv %s8621_s18 }
 0x998   :  { %4561 = vmatpush.xpose.msra.mxu0 %v4480_v56  ;;  %4483 = vmatpush.xpose.msrb.mxu1 %v4482_v17  ;;  %v4410_v17 = vmul.f32 %v9944_v34, %v12286_v29 }
 0x999   :  { %v1529_v10 = vpop.permute.xlu0 %1528 }
 0x99a   :  { %4508 = vmatpush.xpose.msra.mxu2 %v4479_v9  ;;  %v1537_v2 = vadd.f32 %v1529_v10, %v1513_v4  ;;  %v9958_v4 = vld [vmem:[%s11899_s2 + $0x58] sm:$0xff] }
 0x99b   :  { %4485 = vmatmul.f32.vlgmr.msrb.gmra.mxu1 %v4449_v13 }
 0x99c   :  { %4582 = vmatpush.xpose.msra.mxu1 %v9817_v6  ;;  %v9852_v38 = vadd.f32 %v1537_v2, %v9522_v40  ;;  %v1633_v40 = vpop.permute.xlu2 %1632 }
 0x99d   :  { %4123 = vmatmul.f32.vlgmr.msrb.gmra.mxu2 %v4009_v31  ;;  %4536 = vmatmul.f32.vlgmr.msra.gmra.mxu3 %v4451_v44  ;;  %v1609_v60 = vpop.permute.xlu1 %1608 }
 0x99e   :  { %4626 = vrot.lane.b32.xlu0 %v9852_v38, %s12277_s20  ;;  %v1617_v6 = vadd.f32 %v1609_v60, %v9607_v22  ;;  %v12287_v60 = vstv %s8639_s30 }
 0x99f   :  { %4563 = vmatmul.f32.vlgmr.msra.gmra.mxu0 %v4449_v13 }
 0x9a0   :  { %4584 = vmatpush.xpose.msra.mxu1 %v4447_v57  ;;  %v1641_v31 = vadd.f32 %v1633_v40, %v1617_v6 }
 0x9a1   :  { %v1555_v28 = vpop.permute.xlu0 %1554 }
 0x9a2   :  { %v9867_v5 = vadd.f32 %v1641_v31, %v9633_v30  ;;  %v9976_v31 = vld [vmem:[%s11899_s2 + $0x68] sm:$0xff] }
 0x9a3   :  { %4586 = vmatmul.f32.vlgmr.msra.gmra.mxu1 %v4449_v13 }
 0x9a4   :  { %v4619_v10 = vpop.permute.xlu2 %4618 }
 0x9a5   :  { %4511 = vmatmul.f32.vlgmr.msra.gmra.mxu2 %v4450_v25  ;;  %v1581_v39 = vpop.permute.xlu1 %1580 }
 0x9a6   :  { %v1589_v3 = vadd.f32 %v1581_v39, %v1565_v33  ;;  %4616 = vrot.lane.b32.xlu0 %v9346_v42, %s12215_s13  ;;  %v9966_v33 = vld [vmem:[%s11899_s2 + $0x60] sm:$0xff] }
 0x9a8   :  { %v9861_v8 = vadd.f32 %v1589_v3, %v9501_v49  ;;  %v1564_v49 = vadd.f32 %v1555_v28, %v9624_v50  ;;  %v4412_v28 = vmul.f32 %v9958_v4, %v12287_v60  ;;  %v12288_v3 = vstv %s8654_s3 }
 0x9a9   :  { %v1527_v45 = vpop.permute.xlu0 %1526  ;;  %v4414_v40 = vmul.f32 %v9966_v33, %v12288_v3 }
 0x9aa   :  { %4634 = vrot.lane.b32.xlu2 %v9861_v8, %s12278_s19  ;;  %v1536_v22 = vadd.f32 %v1527_v45, %v1512_v55 }
 0x9ac   :  { %v9872_v25 = vadd.f32 %v1536_v22, %v9642_v54  ;;  %v12289_v22 = vstv %s8665_s17 }
 0x9ad   :  { %v1607_v13 = vpop.permute.xlu1 %1606 }
 0x9ae   :  { %4642 = vrot.lane.b32.xlu0 %v9867_v5, %s12279_s24  ;;  %v1616_v1 = vadd.f32 %v1607_v13, %v9659_v53  ;;  %v4416_v13 = vmul.f32 %v9976_v31, %v12289_v22 }
 0x9b1   :  { %v1579_v12 = vpop.permute.xlu0 %1578 }
 0x9b2   :  { %4624 = vrot.lane.b32.xlu2 %v9872_v25, %s12277_s20  ;;  %v1588_v44 = vadd.f32 %v1579_v12, %v1564_v49  ;;  %v9984_v49 = vld [vmem:[%s11899_s2 + $0x70] sm:$0xff] }
 0x9b4   :  { %v9879_v24 = vadd.f32 %v1588_v44, %v9647_v61 }
 0x9b5   :  { %v1631_v57 = vpop.permute.xlu1 %1630 }
 0x9b6   :  { %v1640_v30 = vadd.f32 %v1631_v57, %v1616_v1 }
 0x9b8   :  { %v9882_v9 = vadd.f32 %v1640_v30, %v9667_v52 }
 0x9b9   :  { %v4974_v19 = vpop.permute.xlu0 %4973 }
 0x9ba   :  { %4640 = vrot.lane.b32.xlu0 %v9882_v9, %s12279_s24  ;;  %4632 = vrot.lane.b32.xlu2 %v9879_v24, %s12278_s19  ;;  %v4980_v50 = vsel %vm1682_vm1, %v4974_v19, 0.0  ;;  %s12281_s24 = smov 100   ;;  %v12290_v19 = vstv %s8678_s16  ;;  %s12292_s16 = smov 56  }
 0x9bb   :  { %4981 = vadd.xlane.f32.xlu1 %v4980_v50  ;;  %v4418_v50 = vmul.f32 %v9984_v49, %v12290_v19 }
 0x9bd   :  { %v4953_v54 = vpop.permute.xlu1 %4952 }
 0x9be   :  { %v4955_v61 = vsel %vm1682_vm1, %v4953_v54, 0.0 }
 0x9c1   :  { %v4972_v53 = vpop.permute.xlu0 %4971 }
 0x9c2   :  { %5017 = vrot.lane.b32.xlu0 %v9749_v18, %s12207_s12  ;;  %5009 = vrot.lane.b32.xlu2 %v9262_v47, %s12280_s21  ;;  %v4977_v52 = vsel %vm1682_vm1, %v4972_v53, 0.0  ;;  %v12283_v18 = vld [vmem:[#allocation50_spill] sm:$0xff]  ;;  %v9996_v53 = vld [vmem:[%s11899_s2 + $0x78] sm:$0xff] }
 0x9c3   :  { %4956 = vadd.xlane.f32.xlu1 %v4955_v61  ;;  %v9948_v7 = vmul.f32 %v12283_v18, %v9638_v36  ;;  %v9988_v57 = vmul.f32 %v12283_v18, %v9650_v21 }
 0x9ca   :  { %5033 = vrot.lane.b32.xlu0 %v9759_v26, %s12260_s9  ;;  %5025 = vrot.lane.b32.xlu2 %v9755_v51, %s12235_s10  ;;  %v9915_v51 = vmul.f32 %v12283_v18, %v9525_v16  ;;  %v9921_v26 = vmul.f32 %v12283_v18, %v9615_v62 }
 0x9cb   :  { %4978 = vadd.xlane.f32.xlu1 %v4977_v52 }
 0x9d2   :  { %5015 = vrot.lane.b32.xlu0 %v9783_v37, %s12207_s12  ;;  %5007 = vrot.lane.b32.xlu2 %v9346_v42, %s12280_s21  ;;  %v9933_v37 = vld [vmem:[%s11899_s2 + $0x48] sm:$0xff] }
 0x9d3   :  { %v4408_v56 = vmul.f32 %v9933_v37, %v12285_v63 }
 0x9da   :  { %4991 = vrot.lane.b32.xlu0 %v9766_v41, %s12281_s24  ;;  %4987 = vrot.lane.b32.xlu2 %v9826_v14, %s12280_s21  ;;  %v9928_v41 = vld [vmem:[%s11899_s2 + $0x40] sm:$0xff]  ;;  %s12439_s21 = sld [smem:[#allocation85_spill]] }
 0x9e2   :  { %5031 = vrot.lane.b32.xlu0 %v9798_v58, %s12260_s9  ;;  %v12284_v58 = vstv %s8606_s8  ;;  %s7660_s8 = smov 124   ;;  %s12436_s9 = sld [smem:[#allocation84_spill]] }
 0x9e3   :  { %v4407_v32 = vmul.f32 %v9928_v41, %v12284_v58 }
 0x9e5   :  { %v4409_v48 = vadd.f32 %v4408_v56, %v4407_v32  ;;  %v12291_v56 = vstv %s8693_s15  ;;  %s12297_s15 = smov 84  }
 0x9e7   :  { %v4411_v2 = vadd.f32 %v4410_v17, %v4409_v48  ;;  %v4420_v48 = vmul.f32 %v9996_v53, %v12291_v56 }
 0x9e9   :  { %v4413_v39 = vadd.f32 %v4412_v28, %v4411_v2 }
 0x9ea   :  { %5254 = vrot.lane.b32.xlu0 %v9346_v42, %s12282_s22 }
 0x9eb   :  { %v4415_v55 = vadd.f32 %v4414_v40, %v4413_v39 }
 0x9ed   :  { %v4417_v30 = vadd.f32 %v4416_v13, %v4415_v55 }
 0x9ef   :  { %v4419_v63 = vadd.f32 %v4418_v50, %v4417_v30 }
 0x9f1   :  { %v4421_v28 = vadd.f32 %v4420_v48, %v4419_v63 }
 0x9f2   :  { %5266 = vrot.lane.b32.xlu0 %v9879_v24, %s12277_s20 }
 0x9fa   :  { %5648 = vrot.lane.b32.xlu0 %v9915_v51, %s12189_s29 }
 0xa02   :  { %5656 = vrot.lane.b32.xlu0 %v9921_v26, %s12207_s12 }
 0xa04   :  { %v4635_v45 = vpop.permute.xlu2 %4634 }
 0xa0a   :  { %5664 = vrot.lane.b32.xlu0 %v9948_v7, %s12235_s10 }
 0xa0c   :  { %v4072_v1 = vpop.f32.mrf.mxu0  ;;  %v4625_v32 = vpop.permute.xlu2 %4624 }
 0xa0e   :  { %v4097_v58 = vpop.f32.mrf.mxu1 }
 0xa10   :  { %v4627_v6 = vpop.permute.xlu0 %4626  ;;  %v4046_v12 = vpop.f32.mrf.mxu3 }
 0xa11   :  { %v4647_v17 = vsel %vm1726_vm2, %v4619_v10, %v4627_v6 }
 0xa12   :  { %5638 = vrot.lane.b32.xlu0 %v9346_v42, %s12214_s26  ;;  %v4649_v3 = vsel %vm1728_vm3, %v4647_v17, %v4635_v45 }
 0xa14   :  { %v4455_v55 = vpop.f32.mrf.mxu0  ;;  %v4633_v19 = vpop.permute.xlu2 %4632 }
 0xa18   :  { %v4015_v44 = vpop.f32.mrf.mxu2  ;;  %v4617_v61 = vpop.permute.xlu0 %4616 }
 0xa19   :  { %v4047_v54 = vadd.f32 %v4046_v12, %v4015_v44  ;;  %v4147_v2 = vpop.f32.mrf.mxu3  ;;  %v4456_v44 = vadd.f32 %v4455_v55, %v4421_v28 }
 0xa1a   :  { %5646 = vrot.lane.b32.xlu0 %v9988_v57, %s12189_s29 }
 0xa1b   :  { %v4073_v52 = vadd.f32 %v4072_v1, %v4047_v54  ;;  %v4486_v1 = vpop.f32.mrf.mxu1  ;;  %v4646_v54 = vsel %vm1726_vm2, %v4617_v61, %v4625_v32 }
 0xa1c   :  { %v4487_v10 = vadd.f32 %v4486_v1, %v4456_v44  ;;  %v4564_v48 = vpop.f32.mrf.mxu0  ;;  %v5010_v61 = vpop.permute.xlu2 %5009 }
 0xa1d   :  { %v4098_v29 = vadd.f32 %v4097_v58, %v4073_v52 }
 0xa20   :  { %v4124_v60 = vpop.f32.mrf.mxu2  ;;  %v4643_v40 = vpop.permute.xlu0 %4642 }
 0xa21   :  { %v4125_v39 = vadd.f32 %v4124_v60, %v4098_v29  ;;  %v4651_v22 = vsel %vm1730_vm4, %v4649_v3, %v4643_v40  ;;  %v4537_v58 = vpop.f32.mrf.mxu3  ;;  %v4648_v29 = vsel %vm1728_vm3, %v4646_v54, %v4633_v19 }
 0xa22   :  { %v4669_v12 = vand.u32 4294901760, %v4651_v22 }
 0xa23   :  { %v10006_v13 = vadd.f32 %v4147_v2, %v4125_v39  ;;  %v4587_v28 = vpop.f32.mrf.mxu1 }
 0xa24   :  { %v4697_v30 = vsub.f32 %v4651_v22, %v4669_v12  ;;  %4670 = vmatpush.msrb.mxu2 %v4669_v12  ;;  %4754 = vmatpush.msrb.mxu1 %v4669_v12 }
 0xa26   :  { %v4698_v6 = vand.u32 4294901760, %v4697_v30  ;;  %4729 = vmatpush.msrb.mxu0 %v4697_v30 }
 0xa28   :  { %v4512_v50 = vpop.f32.mrf.mxu2  ;;  %v4699_v45 = vsub.f32 %v4697_v30, %v4698_v6 }
 0xa29   :  { %v4513_v52 = vadd.f32 %v4512_v50, %v4487_v10  ;;  %v5026_v10 = vpop.permute.xlu2 %5025 }
 0xa2a   :  { %v4700_v56 = vand.u32 4294901760, %v4699_v45 }
 0xa2b   :  { %v4538_v63 = vadd.f32 %v4537_v58, %v4513_v52 }
 0xa2c   :  { %v4641_v17 = vpop.permute.xlu0 %4640  ;;  %4701 = vmatpush.msrb.mxu3 %v4700_v56 }
 0xa2d   :  { %v4565_v2 = vadd.f32 %v4564_v48, %v4538_v63  ;;  %v4650_v60 = vsel %vm1730_vm4, %v4648_v29, %v4641_v17 }
 0xa2e   :  { %v4671_v39 = vand.u32 4294901760, %v4650_v60  ;;  %v4982_v19 = vpop.xlane.xlu1 %4981 }
 0xa2f   :  { %v4588_v3 = vadd.f32 %v4587_v28, %v4565_v2  ;;  %v4984_v45 = vmul.f32 0.5, %v4982_v19  ;;  %v5592_v2 = vmul.f32 %v9915_v51, %v9915_v51  ;;  %v5598_v28 = vmul.f32 %v9948_v7, %v9948_v7 }
 0xa30   :  { %v4703_v40 = vsub.f32 %v4650_v60, %v4671_v39  ;;  %4672 = vmatpush.msrb.mxu2 %v4671_v39  ;;  %4756 = vmatpush.msrb.mxu1 %v4671_v39  ;;  %v5594_v60 = vmul.f32 %v9921_v26, %v9921_v26  ;;  %v5591_v51 = vmul.f32 %v9988_v57, %v9988_v57 }
 0xa31   :  { %v4590_v32 = vsel %vm1730_vm4, %v4588_v3, -inf }
 0xa32   :  { %4781 = vmatpush.msra.mxu2 %v4698_v6  ;;  %4591 = vmax.xlane.f32.xlu2 %v4590_v32  ;;  %v4704_v55 = vand.u32 4294901760, %v4703_v40 }
 0xa33   :  { %4732 = vmatpush.msrb.mxu0 %v4703_v40 }
 0xa34   :  { %4785 = vmatpush.msra.mxu2 %v4704_v55  ;;  %v5018_v22 = vpop.permute.xlu0 %5017  ;;  %v4705_v1 = vsub.f32 %v4703_v40, %v4704_v55  ;;  %v5574_v40 = vmul.f32 %v12283_v18, %v9655_v35 }
 0xa35   :  { %v5038_v30 = vsel %vm1726_vm2, %v5010_v61, %v5018_v22 }
 0xa36   :  { %v4706_v44 = vand.u32 4294901760, %v4705_v1  ;;  %v5040_v50 = vsel %vm1728_vm3, %v5038_v30, %v5026_v10 }
 0xa38   :  { %4707 = vmatpush.msrb.mxu3 %v4706_v44 }
 0xa3a   :  { %4806 = vmatpush.msra.mxu3 %v4669_v12 }
 0xa3c   :  { %4808 = vmatpush.msra.mxu3 %v4671_v39  ;;  %v5034_v54 = vpop.permute.xlu0 %5033  ;;  %v5596_v39 = vadd.f32 %v5594_v60, %v5592_v2 }
 0xa3d   :  { %v5042_v6 = vsel %vm1730_vm4, %v5040_v50, %v5034_v54 }
 0xa3e   :  { %v5044_v52 = vsel %vm1732_vm6, %v5042_v6, 1.0  ;;  %v5600_v61 = vadd.f32 %v5598_v28, %v5596_v39 }
 0xa3f   :  { %v5046_v58 = vsel %vm1734_vm5, %v5044_v52, %v4984_v45 }
 0xa40   :  { %v5069_v63 = vsel %vm1801_vm7, %v5046_v58, 0 }
 0xa41   :  { %v10018_v56 = vand.u32 4294901760, %v5069_v63 }
 0xa43   :  { %v10021_v48 = vsub.f32 %v5069_v63, %v10018_v56  ;;  %5086 = vmatpush.xpose.msra.mxu0 %v10018_v56 }
 0xa45   :  { %v5114_v12 = vand.u32 4294901760, %v10021_v48 }
 0xa47   :  { %v5115_v29 = vsub.f32 %v10021_v48, %v5114_v12 }
 0xa49   :  { %v5116_v17 = vand.u32 4294901760, %v5115_v29 }
 0xa4a   :  { %4995 = vrot.lane.b32.xlu2 %v9771_v23, %s12206_s23  ;;  %v5576_v23 = vmul.f32 %v12283_v18, %v9670_v15  ;;  %v10058_v18 = vpop.permute.xlu2 %5007 }
 0xa4b   :  { %5117 = vmatpush.xpose.msra.mxu1 %v5116_v17  ;;  %v10096_v17 = vpop.permute.xlu0 %5015 }
 0xa4c   :  { %v5597_v32 = vmul.f32 %v5576_v23, %v5576_v23 }
 0xa52   :  { %4999 = vrot.lane.b32.xlu2 %v9779_v11, %s12268_s1  ;;  %v5593_v11 = vmul.f32 %v5574_v40, %v5574_v40  ;;  %v10060_v7 = vpop.permute.xlu2 %4987  ;;  %s12302_s1 = smov 16  }
 0xa53   :  { %v4992_v28 = vpop.permute.xlu0 %4991 }
 0xa54   :  { %v5595_v55 = vadd.f32 %v5593_v11, %v5591_v51 }
 0xa56   :  { %v5599_v26 = vadd.f32 %v5597_v32, %v5595_v55 }
 0xa5a   :  { %5605 = vrot.lane.b32.xlu2 %v5600_v61, %s12292_s16 }
 0xa5b   :  { %v10131_v55 = vpop.permute.xlu0 %5031 }
 0xa62   :  { %5603 = vrot.lane.b32.xlu2 %v5599_v26, %s12292_s16 }
 0xa6a   :  { %5256 = vrot.lane.b32.xlu2 %v9262_v47, %s12282_s22 }
 0xa72   :  { %5262 = vrot.lane.b32.xlu2 %v9852_v38, %s12261_s6 }
 0xa7a   :  { %5268 = vrot.lane.b32.xlu2 %v9861_v8, %s12277_s20 }
 0xa82   :  { %5260 = vrot.lane.b32.xlu2 %v9872_v25, %s12261_s6 }
 0xa8a   :  { %5274 = vrot.lane.b32.xlu2 %v9867_v5, %s12278_s19 }
 0xa92   :  { %5640 = vrot.lane.b32.xlu2 %v9262_v47, %s12214_s26 }
 0xaa5   :  { %v4592_v57 = vpop.xlane.xlu2 %4591 }
 0xaa6   :  { %v4593_v22 = vsub.f32 %v4588_v3, %v4592_v57  ;;  %v12293_v3 = vld [vmem:[#allocation67_spill] sm:$0xff] }
 0xaa7   :  { %v6203_v52 = vmul.f32 %v12293_v3, %v9650_v21  ;;  %v10082_v58 = vmul.f32 %v12293_v3, %v9655_v35  ;;  %v10086_v63 = vmul.f32 %v12293_v3, %v9670_v15  ;;  %v12295_v15 = vld [vmem:[#allocation86_spill] sm:$0xff]  ;;  %v10103_v2 = vmul.f32 %v12293_v3, %v9525_v16 }
 0xaa8   :  { %v4594_v1 = vmul.f32 1.442695, %v4593_v22  ;;  %v10109_v60 = vmul.f32 %v12293_v3, %v9615_v62  ;;  %v6208_v39 = vmul.f32 %v12293_v3, %v9638_v36  ;;  %v10121_v11 = vmul.f32 %v12293_v3, %v9540_v0 }
 0xaa9   :  { %v6224_v21 = vmul.f32 %v10082_v58, %v10082_v58  ;;  %v6223_v61 = vmul.f32 %v10103_v2, %v10103_v2  ;;  %v10125_v62 = vmul.f32 %v12293_v3, %v9550_v27  ;;  %v10129_v32 = vmul.f32 %v12293_v3, %v9582_v46  ;;  %v10141_v46 = vpop.permute.xlu0 %5254 }
 0xaaa   :  { %7427 = vpow2.f32 %v4594_v1  ;;  %v6225_v16 = vmul.f32 %v10109_v60, %v10109_v60  ;;  %v6209_v26 = vmul.f32 %v10121_v11, %v10121_v11 }
 0xaab   :  { %v6210_v0 = vmul.f32 %v10125_v62, %v10125_v62  ;;  %v6212_v57 = vmul.f32 %v10129_v32, %v10129_v32 }
 0xaac   :  { %v6227_v51 = vadd.f32 %v6225_v16, %v6223_v61 }
 0xaad   :  { %v10062_v44 = vpop.permute.xlu2 %4995  ;;  %v6211_v27 = vadd.f32 %v6210_v0, %v6209_v26 }
 0xaaf   :  { %v6213_v1 = vadd.f32 %v6212_v57, %v6211_v27 }
 0xab0   :  { %v10064_v30 = vpop.eup %7427 }
 0xab1   :  { %v4596_v19 = vsel %vm1730_vm4, %v10064_v30, 0.0 }
 0xab2   :  { %4597 = vadd.xlane.f32.xlu1 %v4596_v19 }
 0xab5   :  { %v10068_v10 = vpop.permute.xlu2 %4999 }
 0xabd   :  { %v5606_v50 = vpop.permute.xlu2 %5605 }
 0xabe   :  { %v5612_v54 = vsel %vm1682_vm1, %v5606_v50, 0.0  ;;  %v10145_v50 = vpop.permute.xlu0 %5266 }
 0xabf   :  { %5613 = vadd.xlane.f32.xlu2 %v5612_v54 }
 0xac5   :  { %v5604_v45 = vpop.permute.xlu2 %5603 }
 0xac6   :  { %v5609_v6 = vsel %vm1682_vm1, %v5604_v45, 0.0  ;;  %v4957_v45 = vpop.xlane.xlu1 %4956 }
 0xac7   :  { %5610 = vadd.xlane.f32.xlu0 %v5609_v6  ;;  %v5649_v6 = vpop.permute.xlu0 %5648 }
 0xacb   :  { %5023 = vrot.lane.b32.xlu1 %v9790_v59, %s12235_s10  ;;  %v6228_v59 = vmul.f32 %v10086_v63, %v10086_v63 }
 0xacd   :  { %v5257_v22 = vpop.permute.xlu2 %5256 }
 0xad3   :  { %5584 = vrot.lane.b32.xlu1 %v9617_v43, %s12282_s22  ;;  %v6222_v43 = vmul.f32 %v6203_v52, %v6203_v52  ;;  %s12294_s22 = smov 52  }
 0xad5   :  { %v6226_v35 = vadd.f32 %v6224_v21, %v6222_v43  ;;  %v5263_v19 = vpop.permute.xlu2 %5262  ;;  %v4979_v43 = vpop.xlane.xlu1 %4978 }
 0xad6   :  { %v5657_v21 = vpop.permute.xlu0 %5656  ;;  %v5279_v57 = vsel %vm1726_vm2, %v5257_v22, %v5263_v19 }
 0xad7   :  { %5618 = vrot.lane.b32.xlu2 %v9826_v14, %s12214_s26  ;;  %v6230_v29 = vadd.f32 %v6228_v59, %v6226_v35  ;;  %s12301_s26 = smov 12  }
 0xadb   :  { %5662 = vrot.lane.b32.xlu0 %v5576_v23, %s12235_s10  ;;  %5272 = vrot.lane.b32.xlu1 %v9882_v9, %s12278_s19  ;;  %v6229_v23 = vmul.f32 %v6208_v39, %v6208_v39  ;;  %s12300_s19 = sld [smem:[#allocation60_spill]] }
 0xadd   :  { %v6231_v36 = vadd.f32 %v6229_v23, %v6227_v51  ;;  %v5269_v54 = vpop.permute.xlu2 %5268 }
 0xadf   :  { %5654 = vrot.lane.b32.xlu2 %v5574_v40, %s12207_s12  ;;  %v12296_v40 = vld [vmem:[#allocation88_spill] sm:$0xff] }
 0xae3   :  { %6234 = vrot.lane.b32.xlu0 %v6230_v29, %s12294_s22  ;;  %v4958_v29 = vmul.f32 0.5, %v4957_v45 }
 0xae5   :  { %v10150_v3 = vpop.permute.xlu2 %5260  ;;  %v4985_v16 = vsub.f32 0.0, %v4958_v29 }
 0xae7   :  { %5626 = vrot.lane.b32.xlu2 %v12295_v15, %s12281_s24  ;;  %v5002_v15 = vsel %vm1726_vm2, %v10060_v7, %v4992_v28  ;;  %v5281_v7 = vsel %vm1728_vm3, %v5279_v57, %v5269_v54 }
 0xaeb   :  { %5887 = vrot.lane.b32.xlu0 %v9262_v47, %s12259_s5 }
 0xaed   :  { %v5275_v59 = vpop.permute.xlu2 %5274 }
 0xaef   :  { %5630 = vrot.lane.b32.xlu2 %v12296_v40, %s12206_s23  ;;  %v5003_v40 = vsel %vm1728_vm3, %v5002_v15, %v10062_v44 }
 0xaf0   :  { %v5004_v61 = vsel %vm1730_vm4, %v5003_v40, %v10068_v10 }
 0xaf1   :  { %v5005_v51 = vsel %vm1732_vm6, %v5004_v61, %v4985_v16 }
 0xaf2   :  { %v5006_v0 = vsel %vm1734_vm5, %v5005_v51, -1.0 }
 0xaf3   :  { %v5063_v45 = vsel %vm1801_vm7, %v5006_v0, 0 }
 0xaf4   :  { %v10169_v22 = vand.u32 4294901760, %v5063_v45 }
 0xaf7   :  { %6236 = vrot.lane.b32.xlu2 %v6231_v36, %s12294_s22 }
 0xaff   :  { %6215 = vrot.lane.b32.xlu2 %v6213_v1, %s12297_s15  ;;  %v5283_v1 = vsel %vm1730_vm4, %v5281_v7, %v5275_v59 }
 0xb00   :  { %v10167_v40 = vand.u32 4294901760, %v5283_v1 }
 0xb02   :  { %v10176_v51 = vsub.f32 %v5283_v1, %v10167_v40  ;;  %v4983_v1 = vmul.f32 0.5, %v4979_v43 }
 0xb07   :  { %5897 = vrot.lane.b32.xlu2 %v9879_v24, %s12261_s6 }
 0xb0f   :  { %6295 = vrot.lane.b32.xlu2 %v6208_v39, %s12207_s12  ;;  %v5665_v39 = vpop.permute.xlu0 %5664 }
 0xb17   :  { %6269 = vrot.lane.b32.xlu2 %v9346_v42, %s12206_s23  ;;  %v10164_v10 = vpop.permute.xlu0 %5638 }
 0xb1f   :  { %6277 = vrot.lane.b32.xlu2 %v6203_v52, %s12188_s27  ;;  %v5641_v52 = vpop.permute.xlu2 %5640 }
 0xb20   :  { %v5669_v16 = vsel %vm1726_vm2, %v5641_v52, %v5649_v6  ;;  %v5037_v6 = vsel %vm1726_vm2, %v10058_v18, %v10096_v17  ;;  %v5330_v52 = vand.u32 4294901760, %v10176_v51 }
 0xb25   :  { %v4598_v35 = vpop.xlane.xlu1 %4597 }
 0xb26   :  { %7429 = vrcp.f32 %v4598_v35  ;;  %v4610_v27 = vand.u32 2147483648, %v4598_v35  ;;  %v4608_v44 = vand.u32 2147483647, %v4598_v35  ;;  %vm4604_vm9 = vweird.f32 %v4598_v35 }
 0xb28   :  { %v4611_v15 = vor.u32 1.1754944e-38, %v4610_v27  ;;  %vm4609_vm11 = vcmp.eq.f32.partialorder %v4608_v44, 8.507059e+37 }
 0xb2c   :  { %v7430_v23 = vpop.eup %7429 }
 0xb2d   :  { %v4600_v36 = vmul.f32 %v7430_v23, %v4598_v35  ;;  %vm4605_vm8 = vweird.f32 %v7430_v23 }
 0xb2e   :  { %vm4606_vm10 = vmor %vm4604_vm9, %vm4605_vm8  ;;  %vm2226_vm8 = vcmask 7168   ;;  %vm2228_vm9 = vcmask 15360  }
 0xb2f   :  { %v4601_v26 = vsub.f32 1.0, %v4600_v36  ;;  %v10181_v36 = vsub.f32 %v5063_v45, %v10169_v22 }
 0xb31   :  { %v4602_v28 = vmul.f32 %v7430_v23, %v4601_v26 }
 0xb32   :  { %v5614_v54 = vpop.xlane.xlu2 %5613 }
 0xb33   :  { %v4603_v29 = vadd.f32 %v7430_v23, %v4602_v28  ;;  %v5616_v27 = vmul.f32 0.5, %v5614_v54  ;;  %v5091_v28 = vand.u32 4294901760, %v10181_v36 }
 0xb35   :  { %v4607_v61 = vsel %vm4606_vm10, %v7430_v23, %v4603_v29  ;;  %v5671_v23 = vsel %vm1728_vm3, %v5669_v16, %v5657_v21  ;;  %v5092_v43 = vsub.f32 %v10181_v36, %v5091_v28  ;;  %vm2230_vm10 = vcmask 23552  }
 0xb36   :  { %v4612_v19 = vsel %vm4609_vm11, %v4611_v15, %v4607_v61  ;;  %v5673_v57 = vsel %vm1730_vm4, %v5671_v23, %v5665_v39  ;;  %v5331_v15 = vsub.f32 %v10176_v51, %v5330_v52  ;;  %vm2233_vm11 = vcmask 39936  }
 0xb37   :  { %v10173_v59 = vmul.f32 %v10064_v30, %v4612_v19  ;;  %v5647_v30 = vpop.permute.xlu0 %5646  ;;  %v5675_v18 = vsel %vm1732_vm6, %v5673_v57, 1.0 }
 0xb38   :  { %v5677_v61 = vsel %vm1734_vm5, %v5675_v18, %v5616_v27 }
 0xb39   :  { %12298 = vst [vmem:[#allocation47_spill] sm:$0xff] %v10173_v59  ;;  %v4653_v35 = vsel %vm1730_vm4, %v10173_v59, 0 }
 0xb3a   :  { %v4673_v26 = vand.u32 4294901760, %v4653_v35  ;;  %v10195_v17 = vpop.permute.xlu2 %5618 }
 0xb3c   :  { %4709 = vmatmul.f32.vlgmr.msrb.gmra.mxu3 %v4673_v26  ;;  %v4674_v0 = vsub.f32 %v4653_v35, %v4673_v26  ;;  %v5700_v35 = vsel %vm1801_vm7, %v5677_v61, 0 }
 0xb3d   :  { %5170 = vmatpush.xpose.msrb.mxu3 %v10018_v56  ;;  %v5024_v7 = vpop.permute.xlu1 %5023 }
 0xb3e   :  { %v5039_v21 = vsel %vm1728_vm3, %v5037_v6, %v5024_v7  ;;  %4735 = vmatmul.f32.vlgmr.msrb.gmra.mxu0 %v4674_v0  ;;  %v4675_v44 = vand.u32 4294901760, %v4674_v0  ;;  %v5332_v6 = vand.u32 4294901760, %v5331_v15  ;;  %v5093_v7 = vand.u32 4294901760, %v5092_v43 }
 0xb3f   :  { %v5041_v45 = vsel %vm1730_vm4, %v5039_v21, %v10131_v55  ;;  %v5611_v23 = vpop.xlane.xlu0 %5610 }
 0xb40   :  { %v5043_v39 = vsel %vm1732_vm6, %v5041_v45, 1.0  ;;  %4760 = vmatmul.f32.vlgmr.msrb.gmra.mxu1 %v4675_v44  ;;  %v4676_v29 = vsub.f32 %v4674_v0, %v4675_v44  ;;  %v10210_v44 = vand.u32 4294901760, %v5700_v35  ;;  %v5278_v45 = vsel %vm1726_vm2, %v10141_v46, %v10150_v3 }
 0xb41   :  { %v5045_v19 = vsel %vm1734_vm5, %v5043_v39, %v4983_v1  ;;  %v5668_v39 = vsel %vm1726_vm2, %v10164_v10, %v5647_v30  ;;  %v5280_v46 = vsel %vm1728_vm3, %v5278_v45, %v10145_v50  ;;  %v5615_v61 = vmul.f32 0.5, %v5611_v23 }
 0xb42   :  { %v5066_v55 = vsel %vm1801_vm7, %v5045_v19, 0  ;;  %v4677_v54 = vand.u32 4294901760, %v4676_v29  ;;  %v5655_v18 = vpop.permute.xlu2 %5654  ;;  %v12307_v45 = vstv %s8896_s0  ;;  %s12426_s0 = sld [smem:[#allocation81_spill]] }
 0xb43   :  { %v5087_v16 = vand.u32 4294901760, %v5066_v55  ;;  %v5670_v29 = vsel %vm1728_vm3, %v5668_v39, %v5655_v18 }
 0xb44   :  { %4678 = vmatmul.f32.vlgmr.msrb.gmra.mxu2 %v4677_v54  ;;  %4810 = vmatmul.f32.vlgmr.msra.gmra.mxu3 %v4673_v26 }
 0xb45   :  { %5145 = vmatpush.xpose.msrb.mxu2 %v10021_v48  ;;  %v5585_v0 = vpop.permute.xlu1 %5584  ;;  %5088 = vmatpush.xpose.msra.mxu0 %v5087_v16  ;;  %v5119_v57 = vsub.f32 %v5066_v55, %v5087_v16 }
 0xb46   :  { %5172 = vmatpush.xpose.msrb.mxu3 %v5087_v16  ;;  %v5587_v27 = vsel %vm1682_vm1, %v5585_v0, 0.0 }
 0xb47   :  { %5588 = vadd.xlane.f32.xlu1 %v5587_v27  ;;  %v5120_v21 = vand.u32 4294901760, %v5119_v57 }
 0xb48   :  { %5094 = vmatmul.f32.vlgmr.msra.gmra.mxu0 %v5093_v7 }
 0xb49   :  { %5197 = vmatpush.xpose.msrb.mxu0 %v5114_v12  ;;  %5148 = vmatpush.xpose.msrb.mxu2 %v5119_v57  ;;  %v5121_v1 = vsub.f32 %v5119_v57, %v5120_v21  ;;  %v10217_v12 = vsub.f32 %v5700_v35, %v10210_v44 }
 0xb4a   :  { %5333 = vmatpush.msra.mxu3 %v5332_v6 }
 0xb4b   :  { %v5122_v48 = vand.u32 4294901760, %v5121_v1  ;;  %v12107_v30 = vand.u32 4294901760, %v10217_v12 }
 0xb4c   :  { %4787 = vmatmul.f32.vlgmr.msra.gmra.mxu2 %v4673_v26  ;;  %5176 = vmatmul.f32.vlgmr.msrb.gmra.mxu3 %v5091_v28 }
 0xb4d   :  { %5201 = vmatpush.xpose.msrb.mxu0 %v5120_v21  ;;  %5302 = vmatpush.msra.mxu2 %v10167_v40  ;;  %v5273_v15 = vpop.permute.xlu1 %5272  ;;  %v5663_v3 = vpop.permute.xlu0 %5662  ;;  %v5746_v35 = vsub.f32 %v10217_v12, %v12107_v30  ;;  %v12306_v21 = vstv %s8894_s7  ;;  %s12430_s7 = sld [smem:[#allocation82_spill]] }
 0xb4e   :  { %5123 = vmatpush.xpose.msra.mxu1 %v5122_v48  ;;  %v5282_v19 = vsel %vm1730_vm4, %v5280_v46, %v5273_v15  ;;  %v5672_v43 = vsel %vm1730_vm4, %v5670_v29, %v5663_v3  ;;  %v5047_v1 = vmul.f32 %v9928_v41, %v12306_v21  ;;  %v12308_v48 = vstv %s12300_s19  ;;  %s12370_s19 = sld [smem:[#allocation69_spill]] }
 0xb4f   :  { %v5303_v10 = vand.u32 4294901760, %v5282_v19  ;;  %v5674_v26 = vsel %vm1732_vm6, %v5672_v43, 1.0  ;;  %v5747_v27 = vand.u32 4294901760, %v5746_v35  ;;  %v12310_v29 = vstv %s12303_s4  ;;  %s12372_s4 = sld [smem:[#allocation70_spill]] }
 0xb50   :  { %v5676_v28 = vsel %vm1734_vm5, %v5674_v26, %v5615_v61  ;;  %5203 = vmatmul.f32.vlgmr.msrb.gmra.mxu0 %v10169_v22  ;;  %v5052_v15 = vmul.f32 %v9958_v4, %v12310_v29 }
 0xb51   :  { %5361 = vmatpush.msra.mxu0 %v10176_v51  ;;  %5125 = vmatmul.f32.vlgmr.msra.gmra.mxu1 %v10169_v22  ;;  %v5335_v50 = vsub.f32 %v5282_v19, %v5303_v10  ;;  %v5697_v55 = vsel %vm1801_vm7, %v5676_v28, 0 }
 0xb52   :  { %5222 = vmatpush.xpose.msrb.mxu1 %v10018_v56  ;;  %5304 = vmatpush.msra.mxu2 %v5303_v10  ;;  %v10234_v54 = vand.u32 4294901760, %v5697_v55 }
 0xb53   :  { %5364 = vmatpush.msra.mxu0 %v5335_v50  ;;  %v5336_v56 = vand.u32 4294901760, %v5335_v50 }
 0xb54   :  { %v10241_v23 = vsub.f32 %v5697_v55, %v10234_v54  ;;  %5151 = vmatmul.f32.vlgmr.msrb.gmra.mxu2 %v10181_v36 }
 0xb55   :  { %5717 = vmatpush.xpose.msrb.mxu0 %v10210_v44  ;;  %5413 = vmatpush.msrb.mxu2 %v5330_v52  ;;  %v5337_v0 = vsub.f32 %v5335_v50, %v5336_v56  ;;  %v12299_v52 = vld [vmem:[#allocation38_spill] sm:$0xff] }
 0xb56   :  { %5224 = vmatpush.xpose.msrb.mxu1 %v5087_v16  ;;  %v6235_v16 = vpop.permute.xlu0 %6234  ;;  %v12106_v57 = vand.u32 4294901760, %v10241_v23 }
 0xb57   :  { %v6240_v6 = vsel %vm1682_vm1, %v6235_v16, 0.0  ;;  %5417 = vmatpush.msrb.mxu2 %v5336_v56  ;;  %v5338_v7 = vand.u32 4294901760, %v5337_v0  ;;  %v10322_v0 = vld [vmem:[%s11899_s2 + $0x20] sm:$0xff] }
 0xb58   :  { %6241 = vadd.xlane.f32.xlu2 %v6240_v6  ;;  %v5752_v51 = vsub.f32 %v10241_v23, %v12106_v57 }
 0xb59   :  { %5226 = vmatmul.f32.vlgmr.msrb.gmra.mxu1 %v10169_v22  ;;  %5719 = vmatpush.xpose.msrb.mxu0 %v10234_v54 }
 0xb5a   :  { %5386 = vmatpush.msra.mxu1 %v10167_v40  ;;  %5339 = vmatpush.msra.mxu3 %v5338_v7  ;;  %v5753_v36 = vand.u32 4294901760, %v5752_v51 }
 0xb5c   :  { %5388 = vmatpush.msra.mxu1 %v5303_v10  ;;  %5438 = vmatpush.msrb.mxu3 %v10167_v40  ;;  %v10267_v40 = vpop.permute.xlu2 %5626 }
 0xb5e   :  { %5748 = vmatpush.xpose.msrb.mxu1 %v5747_v27  ;;  %5440 = vmatpush.msrb.mxu3 %v5303_v10 }
 0xb60   :  { %5622 = vrot.lane.b32.xlu1 %v12299_v52, %s12215_s13 }
 0xb62   :  { %5754 = vmatpush.xpose.msrb.mxu1 %v5753_v36 }
 0xb64   :  { %v10271_v22 = vpop.permute.xlu2 %5630 }
 0xb68   :  { %5885 = vrot.lane.b32.xlu1 %v9346_v42, %s12259_s5  ;;  %s12305_s5 = sld [smem:[#allocation63_spill]] }
 0xb6e   :  { %v12313_v19 = vstv %s12305_s5  ;;  %s12423_s5 = sld [smem:[#allocation79_spill]] }
 0xb6f   :  { %v5056_v4 = vmul.f32 %v9976_v31, %v12313_v19 }
 0xb70   :  { %6261 = vrot.lane.b32.xlu2 %v10129_v32, %s12281_s24  ;;  %6271 = vrot.lane.b32.xlu1 %v9262_v47, %s12206_s23  ;;  %s12304_s24 = sld [smem:[#allocation62_spill]]  ;;  %v6237_v32 = vpop.permute.xlu2 %6236 }
 0xb76   :  { %v12311_v3 = vstv %s12304_s24  ;;  %s12375_s24 = sld [smem:[#allocation71_spill]] }
 0xb77   :  { %v5054_v41 = vmul.f32 %v9966_v33, %v12311_v3 }
 0xb78   :  { %6518 = vrot.lane.b32.xlu2 %v9262_v47, %s12235_s10  ;;  %v6243_v47 = vsel %vm1682_vm1, %v6237_v32, 0.0  ;;  %v10296_v46 = vpop.permute.xlu2 %6215 }
 0xb80   :  { %6524 = vrot.lane.b32.xlu2 %v9852_v38, %s12301_s26  ;;  %v10313_v10 = vpop.permute.xlu2 %5897 }
 0xb88   :  { %6530 = vrot.lane.b32.xlu2 %v9861_v8, %s12302_s1  ;;  %v10330_v21 = vpop.permute.xlu2 %6295 }
 0xb90   :  { %6516 = vrot.lane.b32.xlu2 %v9346_v42, %s12235_s10  ;;  %v5048_v42 = vmul.f32 %v9933_v37, %v12307_v45  ;;  %s12309_s10 = sld [smem:[#allocation64_spill]]  ;;  %v10306_v37 = vld [vmem:[%s11899_s2 + $0x8] sm:$0xff] }
 0xb92   :  { %v5049_v18 = vadd.f32 %v5048_v42, %v5047_v1 }
 0xb96   :  { %v12315_v28 = vstv %s12309_s10  ;;  %s12424_s10 = sld [smem:[#allocation80_spill]] }
 0xb97   :  { %v5058_v50 = vmul.f32 %v9984_v49, %v12315_v28 }
 0xb98   :  { %6528 = vrot.lane.b32.xlu2 %v9879_v24, %s12302_s1  ;;  %v5050_v24 = vmul.f32 %v9944_v34, %v12308_v48  ;;  %v12312_v34 = vld [vmem:[#allocation59_spill] sm:$0xff] }
 0xb99   :  { %v2210_v31 = vmul.f32 %v10322_v0, %v12312_v34 }
 0xb9a   :  { %6244 = vadd.xlane.f32.xlu1 %v6243_v47  ;;  %v5051_v39 = vadd.f32 %v5050_v24, %v5049_v18  ;;  %v10337_v18 = vld [vmem:[%s11899_s2 + $0x38] sm:$0xff] }
 0xb9b   :  { %v2211_v52 = vsel %vm1730_vm4, %v2210_v31, 0.0  ;;  %v12322_v31 = vld [vmem:[#allocation32_spill] sm:$0xff] }
 0xba0   :  { %6534 = vrot.lane.b32.xlu2 %v9882_v9, %s12261_s6 }
 0xbb3   :  { %6249 = vrot.lane.b32.xlu1 %v9826_v14, %s12206_s23  ;;  %v5053_v14 = vadd.f32 %v5052_v15, %v5051_v39  ;;  %s12314_s23 = sld [smem:[#allocation65_spill]] }
 0xbb5   :  { %v5055_v61 = vadd.f32 %v5054_v41, %v5053_v14  ;;  %v10342_v41 = vpop.permute.xlu2 %6269 }
 0xbb9   :  { %v12316_v27 = vstv %s12314_s23  ;;  %s12380_s23 = sld [smem:[#allocation72_spill]] }
 0xbba   :  { %v5060_v7 = vmul.f32 %v9996_v53, %v12316_v27  ;;  %v2222_v53 = vmul.f32 %v10337_v18, %v12312_v34 }
 0xbbb   :  { %6285 = vrot.lane.b32.xlu1 %v10082_v58, %s12189_s29  ;;  %v2198_v58 = vmul.f32 %v10306_v37, %v12312_v34  ;;  %v4736_v56 = vpop.f32.mrf.mxu0 }
 0xbbc   :  { %v2223_v29 = vsel %vm1730_vm4, %v2222_v53, 0.0 }
 0xbbd   :  { %v2199_v26 = vsel %vm1730_vm4, %v2198_v58, 0.0  ;;  %v4761_v16 = vpop.f32.mrf.mxu1 }
 0xbbf   :  { %v4710_v43 = vpop.f32.mrf.mxu3 }
 0xbc3   :  { %6257 = vrot.lane.b32.xlu1 %v10125_v62, %s12215_s13  ;;  %v5057_v62 = vadd.f32 %v5056_v4, %v5055_v61 }
 0xbc5   :  { %v5059_v6 = vadd.f32 %v5058_v50, %v5057_v62  ;;  %v5095_v1 = vpop.f32.mrf.mxu0  ;;  %v12319_v62 = vld [vmem:[#allocation66_spill] sm:$0xff] }
 0xbc7   :  { %v4679_v33 = vpop.f32.mrf.mxu2  ;;  %v4811_v36 = vpop.f32.mrf.mxu3  ;;  %v5061_v32 = vadd.f32 %v5060_v7, %v5059_v6  ;;  %v12324_v7 = vld [vmem:[#allocation41_spill] sm:$0xff] }
 0xbc8   :  { %v4711_v55 = vadd.f32 %v4710_v43, %v4679_v33  ;;  %v10345_v33 = vpop.permute.xlu2 %6277 }
 0xbc9   :  { %2200 = vadd.xlane.f32.xlu2 %v2199_v26  ;;  %v5096_v48 = vadd.f32 %v5095_v1, %v5061_v32  ;;  %v12318_v26 = vld [vmem:[#allocation36_spill] sm:$0xff]  ;;  %v12327_v32 = vld [vmem:[#allocation37_spill] sm:$0xff]  ;;  %v12329_v1 = vld [vmem:[#allocation34_spill] sm:$0xff] }
 0xbca   :  { %v4737_v35 = vadd.f32 %v4736_v56, %v4711_v55  ;;  %v10349_v28 = vsub.f32 %v12319_v62, %v12318_v26  ;;  %v12320_v55 = vld [vmem:[#allocation19_spill] sm:$0xff] }
 0xbcc   :  { %v4762_v51 = vadd.f32 %v4761_v16, %v4737_v35  ;;  %v2256_v56 = vmul.f32 %v10349_v28, %v12320_v55  ;;  %v12321_v35 = vld [vmem:[#allocation77_spill] sm:$0xff] }
 0xbcd   :  { %v5204_v58 = vpop.f32.mrf.mxu0  ;;  %v10358_v16 = vsub.f32 %v12321_v35, %v12318_v26  ;;  %v10396_v53 = vsub.f32 %v12321_v35, %v12327_v32 }
 0xbce   :  { %v5126_v42 = vpop.f32.mrf.mxu1 }
 0xbcf   :  { %v4788_v49 = vpop.f32.mrf.mxu2  ;;  %v5127_v24 = vadd.f32 %v5126_v42, %v5096_v48  ;;  %v5177_v14 = vpop.f32.mrf.mxu3  ;;  %v2895_v6 = vmul.f32 %v10358_v16, %v12322_v31 }
 0xbd0   :  { %v4789_v47 = vadd.f32 %v4788_v49, %v4762_v51  ;;  %v10351_v50 = vpop.xlane.xlu2 %6241  ;;  %v10369_v51 = vsub.f32 %v12324_v7, %v12318_v26  ;;  %v12326_v49 = vld [vmem:[#allocation26_spill] sm:$0xff] }
 0xbd1   :  { %2212 = vadd.xlane.f32.xlu2 %v2211_v52  ;;  %v2921_v52 = vmul.f32 %v10358_v16, %v12326_v49 }
 0xbd2   :  { %v10332_v45 = vadd.f32 %v4811_v36, %v4789_v47  ;;  %v3557_v36 = vmul.f32 %v10369_v51, %v12320_v55  ;;  %v10385_v47 = vsub.f32 %v12324_v7, %v12327_v32 }
 0xbd4   :  { %12317 = vst [vmem:[#allocation48_spill] sm:$0xff] %v10332_v45  ;;  %v3550_v42 = vmul.f32 %v10385_v47, %v12329_v1 }
 0xbd6   :  { %v5227_v19 = vpop.f32.mrf.mxu1 }
 0xbd7   :  { %v5152_v39 = vpop.f32.mrf.mxu2 }
 0xbd8   :  { %v5153_v15 = vadd.f32 %v5152_v39, %v5127_v24  ;;  %v10364_v27 = vpop.permute.xlu2 %6261  ;;  %v12332_v24 = vld [vmem:[#allocation27_spill] sm:$0xff] }
 0xbd9   :  { %2224 = vadd.xlane.f32.xlu2 %v2223_v29  ;;  %12323 = vst [vmem:[#allocation53_spill] sm:$0xff] %v10364_v27  ;;  %v2927_v39 = vmul.f32 %v10396_v53, %v12332_v24  ;;  %v10407_v29 = vsub.f32 %v10006_v13, %v12318_v26  ;;  %v10518_v27 = vld [vmem:[%s11899_s2 + $0x30] sm:$0xff] }
 0xbda   :  { %v5178_v3 = vadd.f32 %v5177_v14, %v5153_v15 }
 0xbdb   :  { %v4219_v15 = vmul.f32 %v10407_v29, %v12326_v49 }
 0xbdc   :  { %v5205_v61 = vadd.f32 %v5204_v58, %v5178_v3  ;;  %v12335_v58 = vld [vmem:[#allocation87_spill] sm:$0xff] }
 0xbde   :  { %v5228_v4 = vadd.f32 %v5227_v19, %v5205_v61  ;;  %v10429_v61 = vsub.f32 %v10332_v45, %v12335_v58  ;;  %v12336_v19 = vld [vmem:[#allocation31_spill] sm:$0xff] }
 0xbe0   :  { %v5230_v43 = vsel %vm1730_vm4, %v5228_v4, -inf }
 0xbe1   :  { %5231 = vmax.xlane.f32.xlu0 %v5230_v43  ;;  %v4863_v43 = vmul.f32 %v10429_v61, %v12336_v19 }
 0xbf1   :  { %2258 = vrot.lane.b32.xlu2 %v2256_v56, %s7660_s8 }
 0xbf5   :  { %5893 = vrot.lane.b32.xlu0 %v9852_v38, %s12302_s1  ;;  %v10376_v38 = vpop.permute.xlu2 %6518 }
 0xbf6   :  { %12325 = vst [vmem:[#allocation54_spill] sm:$0xff] %v10376_v38  ;;  %v10511_v38 = vld [vmem:[%s11899_s2 + $0x28] sm:$0xff] }
 0xbf9   :  { %2897 = vrot.lane.b32.xlu2 %v2895_v6, %s7660_s8 }
 0xbfd   :  { %5899 = vrot.lane.b32.xlu0 %v9861_v8, %s12261_s6  ;;  %v10387_v8 = vpop.permute.xlu2 %6524 }
 0xbfe   :  { %12328 = vst [vmem:[#allocation57_spill] sm:$0xff] %v10387_v8  ;;  %v2214_v8 = vmul.f32 %v10511_v38, %v12312_v34 }
 0xc01   :  { %3559 = vrot.lane.b32.xlu2 %v3557_v36, %s7660_s8  ;;  %v10442_v36 = vpop.permute.xlu0 %5887 }
 0xc05   :  { %5891 = vrot.lane.b32.xlu0 %v9872_v25, %s12302_s1  ;;  %v10398_v48 = vpop.permute.xlu2 %6530 }
 0xc06   :  { %12331 = vst [vmem:[#allocation58_spill] sm:$0xff] %v10398_v48 }
 0xc09   :  { %2923 = vrot.lane.b32.xlu2 %v2921_v52, %s7660_s8  ;;  %v6218_v52 = vsel %vm1682_vm1, %v10296_v46, 0.0  ;;  %v12345_v46 = vld [vmem:[#allocation35_spill] sm:$0xff] }
 0xc0d   :  { %5905 = vrot.lane.b32.xlu0 %v9867_v5, %s12277_s20  ;;  %v10413_v14 = vpop.permute.xlu2 %6516 }
 0xc0e   :  { %12333 = vst [vmem:[#allocation43_spill] sm:$0xff] %v10413_v14 }
 0xc11   :  { %3552 = vrot.lane.b32.xlu2 %v3550_v42, %s12330_s14 }
 0xc15   :  { %5903 = vrot.lane.b32.xlu0 %v9882_v9, %s12277_s20  ;;  %v10418_v9 = vsub.f32 %v12319_v62, %v12327_v32  ;;  %s12385_s20 = sld [smem:[#allocation74_spill]] }
 0xc17   :  { %v2275_v3 = vmul.f32 %v10418_v9, %v12332_v24 }
 0xc19   :  { %2929 = vrot.lane.b32.xlu2 %v2927_v39, %s12330_s14 }
 0xc1d   :  { %6279 = vrot.lane.b32.xlu0 %v10103_v2, %s12188_s27  ;;  %v10425_v2 = vpop.permute.xlu2 %6528  ;;  %s12343_s27 = smov 92  }
 0xc1e   :  { %12334 = vst [vmem:[#allocation45_spill] sm:$0xff] %v10425_v2 }
 0xc21   :  { %4221 = vrot.lane.b32.xlu2 %v4219_v15, %s7660_s8 }
 0xc25   :  { %6287 = vrot.lane.b32.xlu0 %v10109_v60, %s12189_s29  ;;  %v10434_v26 = vpop.permute.xlu2 %6534 }
 0xc26   :  { %12337 = vst [vmem:[#allocation51_spill] sm:$0xff] %v10434_v26  ;;  %v10502_v26 = vld [vmem:[%s11899_s2 + $0x18] sm:$0xff] }
 0xc27   :  { %v2206_v2 = vmul.f32 %v10502_v26, %v12312_v34 }
 0xc29   :  { %2277 = vrot.lane.b32.xlu2 %v2275_v3, %s12330_s14 }
 0xc31   :  { %4865 = vrot.lane.b32.xlu2 %v4863_v43, %s12330_s14 }
 0xc3c   :  { %v10436_v56 = vpop.xlane.xlu2 %2200 }
 0xc3d   :  { %12338 = vst [vmem:[#allocation52_spill] sm:$0xff] %v10436_v56  ;;  %v10476_v56 = vsub.f32 %v10006_v13, %v12345_v46 }
 0xc44   :  { %v10438_v60 = vpop.xlane.xlu2 %2212 }
 0xc45   :  { %12339 = vst [vmem:[#allocation55_spill] sm:$0xff] %v10438_v60 }
 0xc4c   :  { %v10440_v6 = vpop.xlane.xlu2 %2224 }
 0xc4d   :  { %12340 = vst [vmem:[#allocation56_spill] sm:$0xff] %v10440_v6 }
 0xc4f   :  { %6219 = vadd.xlane.f32.xlu0 %v6218_v52  ;;  %v10460_v52 = vsub.f32 %v12321_v35, %v12345_v46 }
 0xc51   :  { %12346 = vst [vmem:[#allocation67_spill] sm:$0xff] %v10460_v52 }
 0xc54   :  { %v10446_v42 = vpop.permute.xlu2 %2258  ;;  %v5232_v39 = vpop.xlane.xlu0 %5231 }
 0xc55   :  { %12341 = vst [vmem:[#allocation49_spill] sm:$0xff] %v10446_v42  ;;  %v5233_v15 = vsub.f32 %v5228_v4, %v5232_v39  ;;  %v12347_v4 = vld [vmem:[#allocation24_spill] sm:$0xff] }
 0xc56   :  { %v2920_v39 = vmul.f32 %v10460_v52, %v12347_v4  ;;  %v2249_v52 = vmul.f32 %v10418_v9, %v12329_v1 }
 0xc57   :  { %v5234_v3 = vmul.f32 1.442695, %v5233_v15 }
 0xc59   :  { %7431 = vpow2.f32 %v5234_v3 }
 0xc5c   :  { %v10448_v43 = vpop.permute.xlu2 %2897 }
 0xc5d   :  { %12342 = vst [vmem:[#allocation30_spill] sm:$0xff] %v10448_v43 }
 0xc5f   :  { %v10450_v57 = vpop.eup %7431 }
 0xc60   :  { %v5236_v30 = vsel %vm1730_vm4, %v10450_v57, 0.0 }
 0xc61   :  { %5237 = vadd.xlane.f32.xlu1 %v5236_v30 }
 0xc63   :  { %6253 = vrot.lane.b32.xlu0 %v10121_v11, %s12343_s27 }
 0xc64   :  { %v10456_v6 = vpop.permute.xlu2 %3559 }
 0xc65   :  { %12344 = vst [vmem:[#allocation50_spill] sm:$0xff] %v10456_v6 }
 0xc6b   :  { %6293 = vrot.lane.b32.xlu0 %v10086_v63, %s12207_s12  ;;  %v4218_v63 = vmul.f32 %v10476_v56, %v12347_v4  ;;  %s12387_s12 = sld [smem:[#allocation75_spill]] }
 0xc6c   :  { %v2924_v15 = vpop.permute.xlu2 %2923 }
 0xc6d   :  { %v2926_v3 = vadd.f32 %v2924_v15, %v2920_v39  ;;  %v5589_v15 = vpop.xlane.xlu1 %5588 }
 0xc6e   :  { %v5590_v7 = vmul.f32 0.5, %v5589_v15 }
 0xc73   :  { %6536 = vrot.lane.b32.xlu0 %v9867_v5, %s12261_s6  ;;  %v5894_v5 = vpop.permute.xlu0 %5893 }
 0xc74   :  { %v10468_v30 = vpop.permute.xlu2 %3552 }
 0xc75   :  { %12348 = vst [vmem:[#allocation86_spill] sm:$0xff] %v10468_v30  ;;  %v5623_v59 = vpop.permute.xlu1 %5622 }
 0xc7a   :  { %6522 = vrot.lane.b32.xlu1 %v9872_v25, %s12301_s26  ;;  %v10487_v25 = vld [vmem:[%s11899_s2] sm:$0xff] }
 0xc7b   :  { %v10482_v62 = vpop.permute.xlu0 %5899 }
 0xc7c   :  { %v2930_v11 = vpop.permute.xlu2 %2929 }
 0xc7d   :  { %v10472_v60 = vadd.f32 %v2930_v11, %v2926_v3  ;;  %v2194_v3 = vmul.f32 %v10487_v25, %v12312_v34 }
 0xc7f   :  { %12349 = vst [vmem:[#allocation88_spill] sm:$0xff] %v10472_v60  ;;  %v2195_v11 = vsel %vm1730_vm4, %v2194_v3, 0.0  ;;  %v5886_v60 = vpop.permute.xlu1 %5885 }
 0xc83   :  { %v5892_v48 = vpop.permute.xlu0 %5891 }
 0xc84   :  { %v4222_v42 = vpop.permute.xlu2 %4221 }
 0xc85   :  { %v10480_v39 = vadd.f32 %v4222_v42, %v4218_v63  ;;  %v10495_v42 = vld [vmem:[%s11899_s2 + $0x10] sm:$0xff] }
 0xc86   :  { %v2202_v63 = vmul.f32 %v10495_v42, %v12312_v34 }
 0xc87   :  { %v6272_v14 = vpop.permute.xlu1 %6271 }
 0xc88   :  { %v2203_v3 = vsel %vm1730_vm4, %v2202_v63, 0.0  ;;  %v2218_v63 = vmul.f32 %v10518_v27, %v12312_v34  ;;  %v2243_v34 = vmul.f32 %v10349_v28, %v12322_v31 }
 0xc8f   :  { %v10524_v30 = vpop.xlane.xlu1 %6244 }
 0xc97   :  { %v10526_v43 = vpop.permute.xlu1 %6249 }
 0xc98   :  { %12350 = vst [vmem:[#allocation38_spill] sm:$0xff] %v10526_v43 }
 0xc9d   :  { %2196 = vadd.xlane.f32.xlu0 %v2195_v11  ;;  %v2207_v11 = vsel %vm1730_vm4, %v2206_v2, 0.0  ;;  %v2215_v2 = vsel %vm1730_vm4, %v2214_v8, 0.0  ;;  %v12351_v8 = vld [vmem:[#allocation22_spill] sm:$0xff] }
 0xc9f   :  { %v6286_v6 = vpop.permute.xlu1 %6285 }
 0xca4   :  { %2204 = vadd.xlane.f32.xlu1 %v2203_v3  ;;  %v5906_v3 = vpop.permute.xlu0 %5905 }
 0xca5   :  { %2208 = vadd.xlane.f32.xlu0 %v2207_v11  ;;  %v2219_v11 = vsel %vm1730_vm4, %v2218_v63, 0.0  ;;  %v2262_v63 = vmul.f32 %v10418_v9, %v12351_v8  ;;  %v3544_v9 = vmul.f32 %v10369_v51, %v12322_v31 }
 0xca7   :  { %v10539_v43 = vpop.permute.xlu1 %6257 }
 0xca8   :  { %12352 = vst [vmem:[#allocation59_spill] sm:$0xff] %v10539_v43 }
 0xcac   :  { %2216 = vadd.xlane.f32.xlu1 %v2215_v2  ;;  %v5904_v35 = vpop.permute.xlu0 %5903 }
 0xcad   :  { %2220 = vadd.xlane.f32.xlu0 %v2219_v11  ;;  %v2269_v11 = vmul.f32 %v10349_v28, %v12326_v49 }
 0xcb4   :  { %v6280_v4 = vpop.permute.xlu0 %6279 }
 0xcbc   :  { %v6288_v2 = vpop.permute.xlu0 %6287 }
 0xcc1   :  { %2251 = vrot.lane.b32.xlu0 %v2249_v52, %s12330_s14  ;;  %v2908_v52 = vmul.f32 %v10358_v16, %v12320_v55  ;;  %v2901_v16 = vmul.f32 %v10396_v53, %v12329_v1 }
 0xcc4   :  { %v10547_v46 = vpop.xlane.xlu0 %6219 }
 0xcc5   :  { %2245 = vrot.lane.b32.xlu1 %v2243_v34, %s7660_s8  ;;  %v5633_v34 = vsel %vm1726_vm2, %v10195_v17, %v5623_v59  ;;  %v5617_v59 = vsub.f32 0.0, %v5590_v7  ;;  %v5909_v7 = vsel %vm1726_vm2, %v5886_v60, %v5892_v48 }
 0xcc6   :  { %v5634_v28 = vsel %vm1728_vm3, %v5633_v34, %v10267_v40  ;;  %v2914_v40 = vmul.f32 %v10396_v53, %v12351_v8  ;;  %v4193_v53 = vmul.f32 %v10407_v29, %v12322_v31 }
 0xcc9   :  { %2264 = vrot.lane.b32.xlu0 %v2262_v63, %s12330_s14 }
 0xccd   :  { %2271 = vrot.lane.b32.xlu1 %v2269_v11, %s7660_s8  ;;  %v5635_v11 = vsel %vm1730_vm4, %v5634_v28, %v10271_v22 }
 0xcce   :  { %v5636_v15 = vsel %vm1732_vm6, %v5635_v11, %v5617_v59  ;;  %v6300_v11 = vsel %vm1726_vm2, %v6272_v14, %v6280_v4 }
 0xccf   :  { %v5637_v43 = vsel %vm1734_vm5, %v5636_v15, -1.0 }
 0xcd0   :  { %v5694_v15 = vsel %vm1801_vm7, %v5637_v43, 0 }
 0xcd1   :  { %2910 = vrot.lane.b32.xlu0 %v2908_v52, %s7660_s8  ;;  %v10587_v43 = vand.u32 4294901760, %v5694_v15 }
 0xcd4   :  { %v5238_v63 = vpop.xlane.xlu1 %5237 }
 0xcd5   :  { %7433 = vrcp.f32 %v5238_v63  ;;  %3546 = vrot.lane.b32.xlu1 %v3544_v9, %s7660_s8  ;;  %v10559_v17 = vpop.permute.xlu0 %6253  ;;  %v5910_v9 = vsel %vm1726_vm2, %v10442_v36, %v5894_v5  ;;  %v5250_v59 = vand.u32 2147483648, %v5238_v63  ;;  %v6302_v36 = vsel %vm1728_vm3, %v6300_v11, %v6288_v2 }
 0xcd6   :  { %v5912_v22 = vsel %vm1728_vm3, %v5910_v9, %v10482_v62  ;;  %v5911_v62 = vsel %vm1728_vm3, %v5909_v7, %v10313_v10  ;;  %vm5244_vm13 = vweird.f32 %v5238_v63  ;;  %v6304_v31 = vsel %vm1730_vm4, %v6302_v36, %v10330_v21 }
 0xcd7   :  { %v5913_v48 = vsel %vm1730_vm4, %v5911_v62, %v5904_v35  ;;  %v5251_v4 = vor.u32 1.1754944e-38, %v5250_v59  ;;  %v6299_v35 = vsel %vm1726_vm2, %v10342_v41, %v10345_v33  ;;  %v6306_v9 = vsel %vm1732_vm6, %v6304_v31, 1.0 }
 0xcd8   :  { %v6301_v21 = vsel %vm1728_vm3, %v6299_v35, %v6286_v6  ;;  %v3563_v41 = vmul.f32 %v10385_v47, %v12351_v8  ;;  %v10608_v33 = vsub.f32 %v5694_v15, %v10587_v43  ;;  %v4191_v11 = vsub.f32 %v10006_v13, %v12327_v32 }
 0xcd9   :  { %2903 = vrot.lane.b32.xlu0 %v2901_v16, %s12330_s14  ;;  %v5914_v16 = vsel %vm1730_vm4, %v5912_v22, %v5906_v3  ;;  %v4206_v3 = vmul.f32 %v10407_v29, %v12320_v55  ;;  %v6247_v29 = vmul.f32 0.5, %v10524_v30  ;;  %v6246_v59 = vmul.f32 0.5, %v10351_v50 }
 0xcda   :  { %v10581_v14 = vand.u32 4294901760, %v5914_v16  ;;  %v12353_v50 = vand.u32 4294901760, %v10217_v12  ;;  %v4199_v62 = vmul.f32 %v4191_v11, %v12329_v1  ;;  %v12354_v1 = vand.u32 4294901760, %v10241_v23 }
 0xcdb   :  { %v7434_v52 = vpop.eup %7433 }
 0xcdc   :  { %v5240_v34 = vmul.f32 %v7434_v52, %v5238_v63  ;;  %vm5245_vm12 = vweird.f32 %v7434_v52 }
 0xcdd   :  { %2916 = vrot.lane.b32.xlu1 %v2914_v40, %s12330_s14  ;;  %v5248_v40 = vand.u32 2147483647, %v5238_v63  ;;  %vm5246_vm14 = vmor %vm5244_vm13, %vm5245_vm12  ;;  %v6294_v10 = vpop.permute.xlu0 %6293  ;;  %v10592_v63 = vand.u32 4294901760, %v5913_v48  ;;  %vm2235_vm12 = vcmask 48128   ;;  %vm2237_vm13 = vcmask 56320  }
 0xcde   :  { %v5241_v28 = vsub.f32 1.0, %v5240_v34  ;;  %v6303_v22 = vsel %vm1730_vm4, %v6301_v21, %v6294_v10 }
 0xcdf   :  { %vm5249_vm15 = vcmp.eq.f32.partialorder %v5248_v40, 8.507059e+37  ;;  %v10613_v7 = vsub.f32 %v5913_v48, %v10592_v63  ;;  %v5722_v40 = vand.u32 4294901760, %v10608_v33 }
 0xce0   :  { %v5242_v5 = vmul.f32 %v7434_v52, %v5241_v28  ;;  %v6305_v28 = vsel %vm1732_vm6, %v6303_v22, 1.0 }
 0xce1   :  { %4195 = vrot.lane.b32.xlu0 %v4193_v53, %s7660_s8  ;;  %v6307_v15 = vsel %vm1734_vm5, %v6305_v28, %v6246_v59 }
 0xce2   :  { %v5243_v60 = vadd.f32 %v7434_v52, %v5242_v5  ;;  %v6328_v31 = vsel %vm1801_vm7, %v6307_v15, 0 }
 0xce3   :  { %v10648_v10 = vand.u32 4294901760, %v6328_v31 }
 0xce4   :  { %v5247_v2 = vsel %vm5246_vm14, %v7434_v52, %v5243_v60  ;;  %v10602_v52 = vsub.f32 %v5914_v16, %v10581_v14  ;;  %v3570_v16 = vmul.f32 %v10369_v51, %v12326_v49  ;;  %v5967_v49 = vand.u32 4294901760, %v10613_v7 }
 0xce5   :  { %v5252_v34 = vsel %vm5249_vm15, %v5251_v4, %v5247_v2  ;;  %4208 = vrot.lane.b32.xlu1 %v4206_v3, %s7660_s8  ;;  %v5723_v4 = vsub.f32 %v10608_v33, %v5722_v40 }
 0xce6   :  { %v10598_v55 = vmul.f32 %v10450_v57, %v5252_v34  ;;  %v6308_v57 = vsel %vm1734_vm5, %v6306_v9, %v6247_v29  ;;  %v5961_v53 = vand.u32 4294901760, %v10602_v52  ;;  %v5968_v2 = vsub.f32 %v10613_v7, %v5967_v49 }
 0xce7   :  { %v6331_v5 = vsel %vm1801_vm7, %v6308_v57, 0  ;;  %v4212_v34 = vmul.f32 %v4191_v11, %v12351_v8  ;;  %v5724_v21 = vand.u32 4294901760, %v5723_v4  ;;  %v10658_v29 = vsub.f32 %v6328_v31, %v10648_v10  ;;  %v12356_v57 = vld [vmem:[#allocation28_spill] sm:$0xff] }
 0xce8   :  { %v5285_v6 = vsel %vm1730_vm4, %v10598_v55, 0  ;;  %v5962_v32 = vsub.f32 %v10602_v52, %v5961_v53  ;;  %v10636_v60 = vand.u32 4294901760, %v6331_v5  ;;  %v5969_v9 = vand.u32 4294901760, %v5968_v2 }
 0xce9   :  { %3565 = vrot.lane.b32.xlu0 %v3563_v41, %s12330_s14  ;;  %v5305_v30 = vand.u32 4294901760, %v5285_v6  ;;  %v12355_v41 = vld [vmem:[#allocation40_spill] sm:$0xff] }
 0xcea   :  { %v5963_v35 = vand.u32 4294901760, %v5962_v32 }
 0xceb   :  { %5341 = vmatmul.f32.vlgmr.msra.gmra.mxu3 %v5305_v30  ;;  %v5306_v36 = vsub.f32 %v5285_v6, %v5305_v30 }
 0xcec   :  { %5801 = vmatpush.xpose.msra.mxu3 %v10210_v44  ;;  %v10709_v59 = vpop.permute.xlu1 %6522 }
 0xced   :  { %3572 = vrot.lane.b32.xlu1 %v3570_v16, %s7660_s8  ;;  %5367 = vmatmul.f32.vlgmr.msra.gmra.mxu0 %v5306_v36  ;;  %v5307_v51 = vand.u32 4294901760, %v5306_v36 }
 0xcee   :  { %5828 = vmatpush.xpose.msra.mxu0 %v12353_v50 }
 0xcef   :  { %5392 = vmatmul.f32.vlgmr.msra.gmra.mxu1 %v5307_v51  ;;  %v5308_v48 = vsub.f32 %v5306_v36, %v5307_v51 }
 0xcf0   :  { %5803 = vmatpush.xpose.msra.mxu3 %v10234_v54  ;;  %5853 = vmatpush.xpose.msra.mxu1 %v10210_v44  ;;  %v10652_v44 = vsub.f32 %v6331_v5, %v10636_v60 }
 0xcf1   :  { %4201 = vrot.lane.b32.xlu0 %v4199_v62, %s12330_s14  ;;  %v5309_v3 = vand.u32 4294901760, %v5308_v48 }
 0xcf2   :  { %5832 = vmatpush.xpose.msra.mxu0 %v12354_v1  ;;  %v12119_v8 = vand.u32 4294901760, %v10652_v44  ;;  %v12368_v1 = vld [vmem:[#allocation18_spill] sm:$0xff] }
 0xcf3   :  { %5310 = vmatmul.f32.vlgmr.msra.gmra.mxu2 %v5309_v3  ;;  %5442 = vmatmul.f32.vlgmr.msrb.gmra.mxu3 %v5305_v30 }
 0xcf4   :  { %5776 = vmatpush.xpose.msra.mxu2 %v10217_v12  ;;  %5855 = vmatpush.xpose.msra.mxu1 %v10234_v54  ;;  %v3576_v12 = vmul.f32 %v10385_v47, %v12332_v24  ;;  %v4225_v54 = vmul.f32 %v4191_v11, %v12332_v24  ;;  %v6377_v22 = vsub.f32 %v10652_v44, %v12119_v8  ;;  %v10705_v11 = vpop.permute.xlu0 %6536 }
 0xcf5   :  { %5964 = vmatpush.msrb.mxu3 %v5963_v35  ;;  %4214 = vrot.lane.b32.xlu1 %v4212_v34, %s12330_s14  ;;  %v10677_v47 = vsub.f32 %v10332_v45, %v12355_v41  ;;  %v4205_v35 = vmul.f32 %v10476_v56, %v12368_v1 }
 0xcf6   :  { %5725 = vmatmul.f32.vlgmr.msrb.gmra.mxu0 %v5724_v21  ;;  %v6378_v24 = vand.u32 4294901760, %v6377_v22  ;;  %v12369_v22 = vld [vmem:[#allocation42_spill] sm:$0xff] }
 0xcf7   :  { %5970 = vmatpush.msrb.mxu3 %v5969_v9  ;;  %5992 = vmatpush.msrb.mxu0 %v10602_v52 }
 0xcf8   :  { %5756 = vmatmul.f32.vlgmr.msrb.gmra.mxu1 %v10587_v43  ;;  %5779 = vmatpush.xpose.msra.mxu2 %v10241_v23  ;;  %v12118_v23 = vand.u32 4294901760, %v10658_v29 }
 0xcf9   :  { %5995 = vmatpush.msrb.mxu0 %v10613_v7  ;;  %6017 = vmatpush.msrb.mxu1 %v10581_v14 }
 0xcfa   :  { %3578 = vrot.lane.b32.xlu0 %v3576_v12, %s12330_s14  ;;  %v6383_v6 = vsub.f32 %v10658_v29, %v12118_v23 }
 0xcfb   :  { %6019 = vmatpush.msrb.mxu1 %v10592_v63  ;;  %5419 = vmatmul.f32.vlgmr.msrb.gmra.mxu2 %v5305_v30  ;;  %v12357_v30 = vld [vmem:[#allocation44_spill] sm:$0xff] }
 0xcfc   :  { %5807 = vmatmul.f32.vlgmr.msra.gmra.mxu3 %v5722_v40  ;;  %5933 = vmatpush.msrb.mxu2 %v10581_v14  ;;  %v4870_v28 = vmul.f32 %v10677_v47, %v12357_v30 }
 0xcfd   :  { %6069 = vmatpush.msra.mxu3 %v10581_v14  ;;  %4227 = vrot.lane.b32.xlu1 %v4225_v54, %s12330_s14  ;;  %v4857_v14 = vmul.f32 %v10677_v47, %v12356_v57 }
 0xcfe   :  { %5834 = vmatmul.f32.vlgmr.msra.gmra.mxu0 %v10587_v43  ;;  %5935 = vmatpush.msrb.mxu2 %v10592_v63 }
 0xcff   :  { %6071 = vmatpush.msra.mxu3 %v10592_v63  ;;  %6348 = vmatpush.xpose.msra.mxu0 %v10636_v60  ;;  %v6384_v63 = vand.u32 4294901760, %v6383_v6  ;;  %v10753_v6 = vpop.permute.xlu2 %2277 }
 0xd00   :  { %5857 = vmatmul.f32.vlgmr.msra.gmra.mxu1 %v10587_v43  ;;  %v12358_v43 = vld [vmem:[#allocation46_spill] sm:$0xff]  ;;  %12371 = vst [vmem:[#allocation18_spill] sm:$0xff] %v10753_v6 }
 0xd01   :  { %6379 = vmatpush.xpose.msra.mxu1 %v6378_v24  ;;  %v4876_v16 = vmul.f32 %v10429_v61, %v12358_v43  ;;  %v10751_v24 = vsub.f32 %v10332_v45, %v12369_v22 }
 0xd02   :  { %4859 = vrot.lane.b32.xlu0 %v4857_v14, %s7660_s8 }
 0xd03   :  { %6350 = vmatpush.xpose.msra.mxu0 %v10648_v10  ;;  %5782 = vmatmul.f32.vlgmr.msra.gmra.mxu2 %v10608_v33 }
 0xd04   :  { %6044 = vmatpush.msra.mxu2 %v5961_v53 }
 0xd05   :  { %6385 = vmatpush.xpose.msra.mxu1 %v6384_v63  ;;  %4872 = vrot.lane.b32.xlu1 %v4870_v28, %s7660_s8  ;;  %v12374_v63 = vld [vmem:[#allocation39_spill] sm:$0xff] }
 0xd06   :  { %6048 = vmatpush.msra.mxu2 %v5967_v49  ;;  %v4856_v28 = vmul.f32 %v10751_v24, %v12374_v63 }
 0xd0a   :  { %4878 = vrot.lane.b32.xlu0 %v4876_v16, %s12330_s14 }
 0xd10   :  { %v10707_v33 = vpop.xlane.xlu0 %2196 }
 0xd11   :  { %12359 = vst [vmem:[#allocation36_spill] sm:$0xff] %v10707_v33 }
 0xd17   :  { %v10713_v52 = vpop.xlane.xlu1 %2204 }
 0xd18   :  { %v10711_v36 = vpop.xlane.xlu0 %2208  ;;  %12361 = vst [vmem:[#allocation32_spill] sm:$0xff] %v10713_v52  ;;  %v4866_v52 = vpop.permute.xlu2 %4865 }
 0xd19   :  { %12360 = vst [vmem:[#allocation19_spill] sm:$0xff] %v10711_v36 }
 0xd1f   :  { %v10717_v5 = vpop.xlane.xlu1 %2216 }
 0xd20   :  { %v10715_v53 = vpop.xlane.xlu0 %2220  ;;  %12363 = vst [vmem:[#allocation37_spill] sm:$0xff] %v10717_v5  ;;  %v12376_v5 = vld [vmem:[#allocation21_spill] sm:$0xff] }
 0xd21   :  { %12362 = vst [vmem:[#allocation26_spill] sm:$0xff] %v10715_v53  ;;  %v4869_v36 = vmul.f32 %v10751_v24, %v12376_v5 }
 0xd33   :  { %v10719_v7 = vpop.permute.xlu0 %2251 }
 0xd34   :  { %12364 = vst [vmem:[#allocation34_spill] sm:$0xff] %v10719_v7  ;;  %v12382_v7 = vstv %s12375_s24  ;;  %s12422_s24 = sld [smem:[#allocation78_spill]] }
 0xd37   :  { %v10721_v40 = vpop.permute.xlu1 %2245 }
 0xd38   :  { %12365 = vst [vmem:[#allocation27_spill] sm:$0xff] %v10721_v40 }
 0xd3b   :  { %v10723_v15 = vpop.permute.xlu0 %2264 }
 0xd3c   :  { %12366 = vst [vmem:[#allocation22_spill] sm:$0xff] %v10723_v15 }
 0xd3f   :  { %v10725_v51 = vpop.permute.xlu1 %2271 }
 0xd40   :  { %12367 = vst [vmem:[#allocation40_spill] sm:$0xff] %v10725_v51 }
 0xd43   :  { %v10727_v49 = vpop.permute.xlu0 %2910 }
 0xd47   :  { %v10729_v50 = vpop.permute.xlu1 %3546 }
 0xd4b   :  { %v10731_v32 = vpop.permute.xlu0 %2903 }
 0xd4f   :  { %v10733_v62 = vpop.permute.xlu1 %2916 }
 0xd53   :  { %v10735_v48 = vpop.permute.xlu0 %4195 }
 0xd57   :  { %v4209_v31 = vpop.permute.xlu1 %4208 }
 0xd58   :  { %v4211_v34 = vadd.f32 %v4209_v31, %v4205_v35 }
 0xd5b   :  { %v10737_v4 = vpop.permute.xlu0 %3565 }
 0xd5f   :  { %v10739_v3 = vpop.permute.xlu1 %3572 }
 0xd63   :  { %v10741_v2 = vpop.permute.xlu0 %4201 }
 0xd67   :  { %v4215_v21 = vpop.permute.xlu1 %4214 }
 0xd68   :  { %v10745_v9 = vadd.f32 %v4215_v21, %v4211_v34 }
 0xd6a   :  { %v5368_v23 = vpop.f32.mrf.mxu0 }
 0xd6c   :  { %v10747_v12 = vpop.permute.xlu0 %3578 }
 0xd6e   :  { %v5342_v35 = vpop.f32.mrf.mxu3 }
 0xd6f   :  { %v4228_v54 = vpop.permute.xlu1 %4227 }
 0xd70   :  { %v10756_v14 = vadd.f32 %v4228_v54, %v10480_v39  ;;  %v10765_v39 = vld [vmem:[%s11899_s2 + $0x40] sm:$0xff]  ;;  %v12377_v54 = vstv %s12370_s19 }
 0xd71   :  { %v5678_v33 = vmul.f32 %v10765_v39, %v12377_v54  ;;  %v10785_v54 = vld [vmem:[%s11899_s2 + $0x50] sm:$0xff] }
 0xd72   :  { %12373 = vst [vmem:[#allocation42_spill] sm:$0xff] %v10756_v14  ;;  %v5681_v40 = vmul.f32 %v10785_v54, %v12382_v7  ;;  %v10801_v7 = vld [vmem:[%s11899_s2 + $0x58] sm:$0xff] }
 0xd74   :  { %v4860_v16 = vpop.permute.xlu0 %4859 }
 0xd75   :  { %v4862_v31 = vadd.f32 %v4860_v16, %v4856_v28  ;;  %v10773_v28 = vld [vmem:[%s11899_s2 + $0x48] sm:$0xff]  ;;  %v12378_v16 = vstv %s12372_s4  ;;  %s12399_s4 = smov 8  }
 0xd76   :  { %v5311_v34 = vpop.f32.mrf.mxu2 }
 0xd77   :  { %v5343_v21 = vadd.f32 %v5342_v35, %v5311_v34  ;;  %v4873_v8 = vpop.permute.xlu1 %4872  ;;  %v10778_v35 = vadd.f32 %v4866_v52, %v4862_v31 }
 0xd78   :  { %v4875_v34 = vadd.f32 %v4873_v8, %v4869_v36  ;;  %v5443_v36 = vpop.f32.mrf.mxu3 }
 0xd79   :  { %v5369_v53 = vadd.f32 %v5368_v23, %v5343_v21  ;;  %v5679_v23 = vmul.f32 %v10773_v28, %v12378_v16  ;;  %12379 = vst [vmem:[#allocation39_spill] sm:$0xff] %v10778_v35  ;;  %v5393_v21 = vpop.f32.mrf.mxu1  ;;  %v4895_v52 = vmul.f32 %v10778_v35, %v10778_v35  ;;  %v12386_v16 = vstv %s12380_s23  ;;  %s12434_s23 = sld [smem:[#allocation83_spill]] }
 0xd7b   :  { %v5394_v51 = vadd.f32 %v5393_v21, %v5369_v53  ;;  %v5680_v15 = vadd.f32 %v5679_v23, %v5678_v33  ;;  %v5683_v23 = vmul.f32 %v10801_v7, %v12386_v16  ;;  %v12390_v16 = vstv %s12385_s20 }
 0xd7c   :  { %v4879_v45 = vpop.permute.xlu0 %4878 }
 0xd7d   :  { %v10780_v6 = vadd.f32 %v4879_v45, %v4875_v34  ;;  %v5682_v31 = vadd.f32 %v5681_v40, %v5680_v15 }
 0xd7e   :  { %v5420_v14 = vpop.f32.mrf.mxu2 }
 0xd7f   :  { %12381 = vst [vmem:[#allocation21_spill] sm:$0xff] %v10780_v6  ;;  %v4896_v8 = vmul.f32 %v10780_v6, %v10780_v6  ;;  %v5421_v45 = vadd.f32 %v5420_v14, %v5394_v51  ;;  %v5684_v21 = vadd.f32 %v5683_v23, %v5682_v31  ;;  %v10827_v31 = vld [vmem:[%s11899_s2 + $0x68] sm:$0xff] }
 0xd80   :  { %v5687_v23 = vmul.f32 %v10827_v31, %v12390_v16  ;;  %v10847_v16 = vld [vmem:[%s11899_s2 + $0x78] sm:$0xff] }
 0xd81   :  { %v10794_v53 = vadd.f32 %v4896_v8, %v4895_v52  ;;  %v10796_v33 = vadd.f32 %v5443_v36, %v5421_v45  ;;  %v10816_v52 = vld [vmem:[%s11899_s2 + $0x60] sm:$0xff]  ;;  %v12388_v8 = vstv %s12383_s25  ;;  %s12474_s25 = smov 128  }
 0xd82   :  { %v5685_v45 = vmul.f32 %v10816_v52, %v12388_v8 }
 0xd83   :  { %12384 = vst [vmem:[#allocation89_spill] sm:$0xff] %v10794_v53  ;;  %v5486_v34 = vsub.f32 %v10796_v33, %v12355_v41  ;;  %v5487_v51 = vsub.f32 %v10796_v33, %v12335_v58 }
 0xd84   :  { %v5686_v36 = vadd.f32 %v5685_v45, %v5684_v21  ;;  %v12393_v21 = vld [vmem:[#allocation23_spill] sm:$0xff] }
 0xd85   :  { %v5508_v14 = vmul.f32 %v5487_v51, %v12358_v43  ;;  %v5502_v40 = vmul.f32 %v5486_v34, %v12357_v30  ;;  %v5489_v15 = vmul.f32 %v5486_v34, %v12356_v57  ;;  %v5495_v6 = vmul.f32 %v5487_v51, %v12336_v19  ;;  %v12395_v19 = vld [vmem:[#allocation29_spill] sm:$0xff]  ;;  %v5726_v57 = vpop.f32.mrf.mxu0 }
 0xd86   :  { %v5688_v35 = vadd.f32 %v5687_v23, %v5686_v36  ;;  %v5515_v8 = vmul.f32 %v5486_v34, %v12393_v21  ;;  %v12394_v36 = vstv %s12389_s28  ;;  %v5521_v43 = vmul.f32 %v5487_v51, %v12395_v19 }
 0xd87   :  { %5510 = vrot.lane.b32.xlu1 %v5508_v14, %s12330_s14  ;;  %5504 = vrot.lane.b32.xlu0 %v5502_v40, %s7660_s8  ;;  %v10836_v14 = vld [vmem:[%s11899_s2 + $0x70] sm:$0xff]  ;;  %v12392_v40 = vstv %s12387_s12  ;;  %v5691_v23 = vmul.f32 %v10847_v16, %v12394_v36 }
 0xd88   :  { %5491 = vrot.lane.b32.xlu2 %v5489_v15, %s7660_s8  ;;  %12391 = vst [vmem:[#allocation90_spill] sm:$0xff] %v10836_v14  ;;  %v5689_v15 = vmul.f32 %v10836_v14, %v12392_v40  ;;  %v5757_v40 = vpop.f32.mrf.mxu1 }
 0xd8a   :  { %v5690_v45 = vadd.f32 %v5689_v15, %v5688_v35  ;;  %v4889_v35 = vmul.f32 %v10429_v61, %v12395_v19  ;;  %v12397_v61 = vld [vmem:[#allocation20_spill] sm:$0xff] }
 0xd8c   :  { %v5692_v53 = vadd.f32 %v5691_v23, %v5690_v45 }
 0xd8d   :  { %v5835_v58 = vpop.f32.mrf.mxu0 }
 0xd8e   :  { %v5727_v34 = vadd.f32 %v5726_v57, %v5692_v53  ;;  %v12396_v57 = vld [vmem:[#allocation68_spill] sm:$0xff] }
 0xd8f   :  { %5497 = vrot.lane.b32.xlu0 %v5495_v6, %s12330_s14  ;;  %v5783_v6 = vpop.f32.mrf.mxu2  ;;  %v2852_v53 = vmul.f32 %v10487_v25, %v12396_v57 }
 0xd90   :  { %5517 = vrot.lane.b32.xlu2 %v5515_v8, %s7660_s8  ;;  %v5758_v14 = vadd.f32 %v5757_v40, %v5727_v34  ;;  %v5808_v8 = vpop.f32.mrf.mxu3  ;;  %v5858_v45 = vpop.f32.mrf.mxu1 }
 0xd91   :  { %v2853_v51 = vsel %vm1730_vm4, %v2852_v53, 0.0 }
 0xd92   :  { %v5784_v15 = vadd.f32 %v5783_v6, %v5758_v14  ;;  %v3501_v14 = vmul.f32 %v10487_v25, %v12397_v61 }
 0xd94   :  { %v5809_v30 = vadd.f32 %v5808_v8, %v5784_v15  ;;  %v3502_v34 = vsel %vm1730_vm4, %v3501_v14, 0.0  ;;  %v2864_v15 = vmul.f32 %v10502_v26, %v12396_v57  ;;  %v2868_v8 = vmul.f32 %v10322_v0, %v12396_v57 }
 0xd95   :  { %v4158_v14 = vmul.f32 %v10495_v42, %v9836_v20 }
 0xd96   :  { %v5836_v36 = vadd.f32 %v5835_v58, %v5809_v30  ;;  %v2860_v58 = vmul.f32 %v10495_v42, %v12396_v57  ;;  %v3509_v30 = vmul.f32 %v10495_v42, %v12397_v61 }
 0xd98   :  { %5523 = vrot.lane.b32.xlu2 %v5521_v43, %s12330_s14  ;;  %v10857_v23 = vadd.f32 %v5858_v45, %v5836_v36  ;;  %v2861_v40 = vsel %vm1730_vm4, %v2860_v58, 0.0  ;;  %v3510_v6 = vsel %vm1730_vm4, %v3509_v30, 0.0  ;;  %v2865_v36 = vsel %vm1730_vm4, %v2864_v15, 0.0 }
 0xd99   :  { %v2869_v45 = vsel %vm1730_vm4, %v2868_v8, 0.0  ;;  %v4159_v58 = vsel %vm1730_vm4, %v4158_v14, 0.0 }
 0xd9a   :  { %v5861_v43 = vsel %vm1730_vm4, %v10857_v23, -inf }
 0xda0   :  { %4891 = vrot.lane.b32.xlu2 %v4889_v35, %s12330_s14  ;;  %v4883_v35 = vmul.f32 %v10677_v47, %v12393_v21  ;;  %v2872_v47 = vmul.f32 %v10511_v38, %v12396_v57 }
 0xdb1   :  { %5862 = vmax.xlane.f32.xlu1 %v5861_v43  ;;  %v4154_v43 = vmul.f32 %v10306_v37, %v9836_v20 }
 0xdb3   :  { %v4155_v53 = vsel %vm1730_vm4, %v4154_v43, 0.0  ;;  %v3529_v43 = vmul.f32 %v10337_v18, %v12397_v61 }
 0xdb9   :  { %2854 = vadd.xlane.f32.xlu0 %v2853_v51  ;;  %v2873_v51 = vsel %vm1730_vm4, %v2872_v47, 0.0  ;;  %v12398_v47 = vld [vmem:[#allocation25_spill] sm:$0xff] }
 0xdc1   :  { %3503 = vadd.xlane.f32.xlu0 %v3502_v34  ;;  %v2876_v34 = vmul.f32 %v10518_v27, %v12396_v57 }
 0xdc3   :  { %v2877_v30 = vsel %vm1730_vm4, %v2876_v34, 0.0  ;;  %v3530_v34 = vsel %vm1730_vm4, %v3529_v43, 0.0 }
 0xdc9   :  { %2862 = vadd.xlane.f32.xlu2 %v2861_v40  ;;  %3511 = vadd.xlane.f32.xlu0 %v3510_v6  ;;  %v4162_v6 = vmul.f32 %v10502_v26, %v9836_v20 }
 0xdca   :  { %4885 = vrot.lane.b32.xlu1 %v4883_v35, %s7660_s8  ;;  %v2880_v35 = vmul.f32 %v10337_v18, %v12396_v57 }
 0xdcb   :  { %v4163_v15 = vsel %vm1730_vm4, %v4162_v6, 0.0 }
 0xdcc   :  { %v2881_v42 = vsel %vm1730_vm4, %v2880_v35, 0.0 }
 0xdd1   :  { %2866 = vadd.xlane.f32.xlu2 %v2865_v36  ;;  %2870 = vadd.xlane.f32.xlu0 %v2869_v45  ;;  %v5485_v36 = vsub.f32 %v10796_v33, %v12369_v22  ;;  %v4166_v45 = vmul.f32 %v10322_v0, %v9836_v20 }
 0xdd3   :  { %v4167_v14 = vsel %vm1730_vm4, %v4166_v45, 0.0  ;;  %v5501_v43 = vmul.f32 %v5485_v36, %v12376_v5 }
 0xdd9   :  { %4156 = vadd.xlane.f32.xlu2 %v4155_v53  ;;  %2874 = vadd.xlane.f32.xlu0 %v2873_v51  ;;  %v5514_v53 = vmul.f32 %v5485_v36, %v12398_v47  ;;  %v2856_v51 = vmul.f32 %v10306_v37, %v12396_v57  ;;  %v3505_v57 = vmul.f32 %v10306_v37, %v12397_v61 }
 0xdda   :  { %v5488_v37 = vmul.f32 %v5485_v36, %v12374_v63 }
 0xddb   :  { %v2857_v35 = vsel %vm1730_vm4, %v2856_v51, 0.0 }
 0xde1   :  { %4160 = vadd.xlane.f32.xlu2 %v4159_v58  ;;  %2878 = vadd.xlane.f32.xlu0 %v2877_v30 }
 0xde2   :  { %v5492_v40 = vpop.permute.xlu2 %5491 }
 0xde9   :  { %4164 = vadd.xlane.f32.xlu2 %v4163_v15  ;;  %2882 = vadd.xlane.f32.xlu0 %v2881_v42  ;;  %v4170_v15 = vmul.f32 %v10511_v38, %v9836_v20  ;;  %v4178_v42 = vmul.f32 %v10337_v18, %v9836_v20  ;;  %v5450_v18 = vmul.f32 %v10773_v28, %v10598_v55 }
 0xdea   :  { %v5518_v8 = vpop.permute.xlu2 %5517 }
 0xdeb   :  { %v5520_v58 = vadd.f32 %v5518_v8, %v5514_v53  ;;  %v4171_v45 = vsel %vm1730_vm4, %v4170_v15, 0.0  ;;  %v4179_v8 = vsel %vm1730_vm4, %v4178_v42, 0.0  ;;  %v5451_v15 = vsel %vm1730_vm4, %v5450_v18, 0.0  ;;  %v12400_v18 = vld [vmem:[#allocation41_spill] sm:$0xff] }
 0xdf1   :  { %4168 = vadd.xlane.f32.xlu2 %v4167_v14  ;;  %3531 = vadd.xlane.f32.xlu0 %v3530_v34  ;;  %v3506_v34 = vsel %vm1730_vm4, %v3505_v57, 0.0 }
 0xdf2   :  { %v5524_v30 = vpop.permute.xlu2 %5523 }
 0xdf3   :  { %v10911_v6 = vadd.f32 %v5524_v30, %v5520_v58  ;;  %v4150_v30 = vmul.f32 %v10487_v25, %v9836_v20 }
 0xdf4   :  { %2858 = vadd.xlane.f32.xlu1 %v2857_v35  ;;  %v5494_v35 = vadd.f32 %v5492_v40, %v5488_v37  ;;  %v3513_v40 = vmul.f32 %v10502_v26, %v12397_v61  ;;  %v3521_v37 = vmul.f32 %v10511_v38, %v12397_v61 }
 0xdf5   :  { %v4151_v57 = vsel %vm1730_vm4, %v4150_v30, 0.0  ;;  %v5530_v36 = vmul.f32 %v10911_v6, %v10911_v6  ;;  %v12401_v30 = vld [vmem:[#allocation35_spill] sm:$0xff] }
 0xdf6   :  { %v3540_v26 = vsub.f32 %v12400_v18, %v12401_v30 }
 0xdf9   :  { %4172 = vadd.xlane.f32.xlu2 %v4171_v45  ;;  %4180 = vadd.xlane.f32.xlu0 %v4179_v8  ;;  %v5505_v53 = vpop.permute.xlu0 %5504  ;;  %v5511_v14 = vpop.permute.xlu1 %5510 }
 0xdfa   :  { %v5507_v51 = vadd.f32 %v5505_v53, %v5501_v43 }
 0xdfc   :  { %v10924_v58 = vadd.f32 %v5511_v14, %v5507_v51  ;;  %3507 = vadd.xlane.f32.xlu1 %v3506_v34  ;;  %v3514_v51 = vsel %vm1730_vm4, %v3513_v40, 0.0  ;;  %v3517_v14 = vmul.f32 %v10322_v0, %v12397_v61  ;;  %v3556_v0 = vmul.f32 %v3540_v26, %v12368_v1 }
 0xdfe   :  { %v5528_v8 = vmul.f32 %v10924_v58, %v10924_v58  ;;  %v3518_v34 = vsel %vm1730_vm4, %v3517_v14, 0.0 }
 0xe01   :  { %5452 = vadd.xlane.f32.xlu0 %v5451_v15  ;;  %v5498_v42 = vpop.permute.xlu0 %5497  ;;  %v3525_v15 = vmul.f32 %v10518_v27, %v12397_v61  ;;  %v4174_v61 = vmul.f32 %v10518_v27, %v9836_v20 }
 0xe02   :  { %v10932_v45 = vadd.f32 %v5498_v42, %v5494_v35  ;;  %v3522_v35 = vsel %vm1730_vm4, %v3521_v37, 0.0  ;;  %v12402_v42 = vld [vmem:[#allocation50_spill] sm:$0xff]  ;;  %v4882_v37 = vmul.f32 %v10751_v24, %v12398_v47 }
 0xe03   :  { %v3526_v38 = vsel %vm1730_vm4, %v3525_v15, 0.0  ;;  %v4175_v14 = vsel %vm1730_vm4, %v4174_v61, 0.0 }
 0xe04   :  { %v5527_v43 = vmul.f32 %v10932_v45, %v10932_v45  ;;  %4152 = vadd.xlane.f32.xlu1 %v4151_v57  ;;  %v3562_v57 = vadd.f32 %v12402_v42, %v3556_v0 }
 0xe06   :  { %v5529_v25 = vadd.f32 %v5528_v8, %v5527_v43  ;;  %v10963_v8 = vadd.f32 %v10737_v4, %v3562_v57 }
 0xe08   :  { %v10943_v53 = vadd.f32 %v5530_v36, %v5529_v25 }
 0xe0c   :  { %3515 = vadd.xlane.f32.xlu1 %v3514_v51 }
 0xe14   :  { %3519 = vadd.xlane.f32.xlu1 %v3518_v34  ;;  %v5446_v34 = vmul.f32 %v10765_v39, %v10598_v55 }
 0xe15   :  { %3600 = vrot.lane.b32.xlu0 %v12400_v18, %s12399_s4 }
 0xe1c   :  { %3523 = vadd.xlane.f32.xlu1 %v3522_v35 }
 0xe1d   :  { %4249 = vrot.lane.b32.xlu0 %v10006_v13, %s12399_s4  ;;  %v12403_v13 = vld [vmem:[#allocation24_spill] sm:$0xff] }
 0xe1e   :  { %v3569_v25 = vmul.f32 %v3540_v26, %v12403_v13 }
 0xe20   :  { %v3575_v51 = vadd.f32 %v10739_v3, %v3569_v25  ;;  %v5447_v3 = vsel %vm1730_vm4, %v5446_v34, 0.0  ;;  %v12406_v25 = vld [vmem:[#allocation30_spill] sm:$0xff] }
 0xe22   :  { %v10974_v4 = vadd.f32 %v10747_v12, %v3575_v51  ;;  %v4892_v12 = vpop.permute.xlu2 %4891  ;;  %v12407_v51 = vld [vmem:[#allocation77_spill] sm:$0xff] }
 0xe24   :  { %3527 = vadd.xlane.f32.xlu1 %v3526_v38  ;;  %v5863_v43 = vpop.xlane.xlu1 %5862  ;;  %v12404_v38 = vld [vmem:[#allocation33_spill] sm:$0xff] }
 0xe25   :  { %v5864_v36 = vsub.f32 %v10857_v23, %v5863_v43  ;;  %3608 = vrot.lane.b32.xlu0 %v10963_v8, %s12301_s26  ;;  %v12405_v43 = vld [vmem:[#allocation67_spill] sm:$0xff]  ;;  %v3543_v24 = vmul.f32 %v3540_v26, %v12404_v38  ;;  %v4192_v26 = vmul.f32 %v10476_v56, %v12404_v38 }
 0xe27   :  { %v5865_v40 = vmul.f32 1.442695, %v5864_v36  ;;  %v2894_v36 = vmul.f32 %v12405_v43, %v12404_v38  ;;  %v3549_v34 = vadd.f32 %v10729_v50, %v3543_v24 }
 0xe29   :  { %7435 = vpow2.f32 %v5865_v40  ;;  %v2900_v40 = vadd.f32 %v12406_v25, %v2894_v36 }
 0xe2c   :  { %4176 = vadd.xlane.f32.xlu1 %v4175_v14  ;;  %v2855_v27 = vpop.xlane.xlu0 %2854  ;;  %v10996_v14 = vadd.f32 %v10731_v32, %v2900_v40 }
 0xe2d   :  { %3612 = vrot.lane.b32.xlu0 %v10974_v4, %s12302_s1 }
 0xe2f   :  { %v10979_v23 = vpop.eup %7435 }
 0xe30   :  { %v5867_v20 = vsel %vm1730_vm4, %v10979_v23, 0.0 }
 0xe31   :  { %5868 = vadd.xlane.f32.xlu2 %v5867_v20 }
 0xe34   :  { %5448 = vadd.xlane.f32.xlu1 %v5447_v3  ;;  %v3504_v18 = vpop.xlane.xlu0 %3503  ;;  %v5466_v3 = vmul.f32 %v10827_v31, %v10598_v55 }
 0xe36   :  { %v5467_v32 = vsel %vm1730_vm4, %v5466_v3, 0.0 }
 0xe3c   :  { %v4886_v35 = vpop.permute.xlu1 %4885  ;;  %v2863_v15 = vpop.xlane.xlu2 %2862 }
 0xe3d   :  { %v4888_v0 = vadd.f32 %v4886_v35, %v4882_v37  ;;  %v3512_v57 = vpop.xlane.xlu0 %3511 }
 0xe3f   :  { %v10988_v42 = vadd.f32 %v4892_v12, %v4888_v0  ;;  %v12408_v12 = vld [vmem:[#allocation86_spill] sm:$0xff]  ;;  %v4198_v0 = vadd.f32 %v10735_v48, %v4192_v26 }
 0xe40   :  { %v11005_v37 = vadd.f32 %v12408_v12, %v3549_v34 }
 0xe41   :  { %v11014_v36 = vadd.f32 %v10741_v2, %v4198_v0 }
 0xe44   :  { %v2867_v61 = vpop.xlane.xlu2 %2866 }
 0xe45   :  { %v2871_v20 = vpop.xlane.xlu0 %2870 }
 0xe49   :  { %2951 = vrot.lane.b32.xlu2 %v12407_v51, %s12399_s4 }
 0xe4c   :  { %v4157_v35 = vpop.xlane.xlu2 %4156 }
 0xe4d   :  { %2955 = vrot.lane.b32.xlu1 %v10996_v14, %s12399_s4  ;;  %v2875_v50 = vpop.xlane.xlu0 %2874 }
 0xe54   :  { %v4161_v25 = vpop.xlane.xlu2 %4160 }
 0xe55   :  { %3604 = vrot.lane.b32.xlu1 %v11005_v37, %s12399_s4  ;;  %v2879_v40 = vpop.xlane.xlu0 %2878 }
 0xe57   :  { %5468 = vadd.xlane.f32.xlu0 %v5467_v32  ;;  %v5454_v32 = vmul.f32 %v10785_v54, %v10598_v55 }
 0xe5c   :  { %v4165_v51 = vpop.xlane.xlu2 %4164 }
 0xe5d   :  { %4253 = vrot.lane.b32.xlu1 %v11014_v36, %s12399_s4  ;;  %v2883_v12 = vpop.xlane.xlu0 %2882 }
 0xe65   :  { %4257 = vrot.lane.b32.xlu1 %v10745_v9, %s12301_s26 }
 0xe67   :  { %v2859_v24 = vpop.xlane.xlu1 %2858 }
 0xe68   :  { %v2884_v56 = vsel %vm2226_vm8, %v2855_v27, %v2859_v24  ;;  %v4169_v24 = vpop.xlane.xlu2 %4168 }
 0xe69   :  { %v2885_v48 = vsel %vm2228_vm9, %v2884_v56, %v2863_v15 }
 0xe6a   :  { %v2886_v2 = vsel %vm2230_vm10, %v2885_v48, %v2867_v61  ;;  %v5455_v61 = vsel %vm1730_vm4, %v5454_v32, 0.0 }
 0xe6b   :  { %v2887_v34 = vsel %vm1682_vm1, %v2886_v2, %v2871_v20 }
 0xe6c   :  { %v2888_v3 = vsel %vm2233_vm11, %v2887_v34, %v2875_v50  ;;  %v3532_v34 = vpop.xlane.xlu0 %3531 }
 0xe6d   :  { %v2889_v26 = vsel %vm2235_vm12, %v2888_v3, %v2879_v40 }
 0xe6e   :  { %v2890_v27 = vsel %vm2237_vm13, %v2889_v26, %v2883_v12 }
 0xe6f   :  { %v3508_v0 = vpop.xlane.xlu1 %3507 }
 0xe70   :  { %v3533_v15 = vsel %vm2226_vm8, %v3504_v18, %v3508_v0  ;;  %v4173_v40 = vpop.xlane.xlu2 %4172 }
 0xe71   :  { %v3534_v20 = vsel %vm2228_vm9, %v3533_v15, %v3512_v57  ;;  %v2907_v57 = vmul.f32 %v12405_v43, %v12368_v1 }
 0xe72   :  { %5456 = vadd.xlane.f32.xlu2 %v5455_v61 }
 0xe73   :  { %v2913_v0 = vadd.f32 %v10727_v49, %v2907_v57 }
 0xe74   :  { %v4181_v32 = vpop.xlane.xlu0 %4180 }
 0xe77   :  { %v4153_v56 = vpop.xlane.xlu1 %4152 }
 0xe78   :  { %v4182_v50 = vsel %vm2226_vm8, %v4153_v56, %v4157_v35 }
 0xe79   :  { %v4183_v48 = vsel %vm2228_vm9, %v4182_v50, %v4161_v25  ;;  %v11042_v25 = vadd.f32 %v10733_v62, %v2913_v0  ;;  %v6221_v0 = vmul.f32 0.5, %v10547_v46 }
 0xe7a   :  { %v4184_v2 = vsel %vm2230_vm10, %v4183_v48, %v4165_v51 }
 0xe7b   :  { %v4185_v3 = vsel %vm1682_vm1, %v4184_v2, %v4169_v24 }
 0xe7c   :  { %v4186_v12 = vsel %vm2233_vm11, %v4185_v3, %v4173_v40  ;;  %v5453_v15 = vpop.xlane.xlu0 %5452  ;;  %v12409_v3 = vld [vmem:[#allocation38_spill] sm:$0xff] }
 0xe7f   :  { %v3516_v18 = vpop.xlane.xlu1 %3515 }
 0xe80   :  { %v3535_v26 = vsel %vm2230_vm10, %v3534_v20, %v3516_v18  ;;  %v6264_v18 = vsel %vm1726_vm2, %v12409_v3, %v10559_v17 }
 0xe87   :  { %v3520_v35 = vpop.xlane.xlu1 %3519  ;;  %v3601_v20 = vpop.permute.xlu0 %3600 }
 0xe88   :  { %v3536_v51 = vsel %vm1682_vm1, %v3535_v26, %v3520_v35 }
 0xe8a   :  { %2959 = vrot.lane.b32.xlu2 %v11042_v25, %s12301_s26 }
 0xe8f   :  { %v3524_v24 = vpop.xlane.xlu1 %3523  ;;  %v4250_v2 = vpop.permute.xlu0 %4249 }
 0xe90   :  { %v3537_v61 = vsel %vm2233_vm11, %v3536_v51, %v3524_v24  ;;  %v12411_v24 = vld [vmem:[#allocation53_spill] sm:$0xff] }
 0xe97   :  { %v3528_v56 = vpop.xlane.xlu1 %3527 }
 0xe98   :  { %v3538_v43 = vsel %vm2235_vm12, %v3537_v61, %v3528_v56  ;;  %v6248_v61 = vsub.f32 0.0, %v6221_v0  ;;  %v12412_v56 = vld [vmem:[#allocation43_spill] sm:$0xff]  ;;  %v12415_v0 = vld [vmem:[#allocation58_spill] sm:$0xff] }
 0xe99   :  { %v3539_v50 = vsel %vm2237_vm13, %v3538_v43, %v3532_v34  ;;  %v12410_v34 = vld [vmem:[#allocation59_spill] sm:$0xff]  ;;  %v6540_v43 = vsel %vm1726_vm2, %v12412_v56, %v10709_v59 }
 0xe9a   :  { %v11051_v49 = vsel %vm1726_vm2, %v3539_v50, %v3601_v20  ;;  %v6265_v35 = vsel %vm1728_vm3, %v6264_v18, %v12410_v34  ;;  %v5458_v18 = vmul.f32 %v10801_v7, %v10598_v55 }
 0xe9f   :  { %v4177_v62 = vpop.xlane.xlu1 %4176 }
 0xea0   :  { %v4187_v48 = vsel %vm2235_vm12, %v4186_v12, %v4177_v62  ;;  %v6266_v12 = vsel %vm1730_vm4, %v6265_v35, %v12411_v24  ;;  %v12416_v35 = vld [vmem:[#allocation45_spill] sm:$0xff] }
 0xea1   :  { %v4188_v40 = vsel %vm2237_vm13, %v4187_v48, %v4181_v32  ;;  %v6267_v17 = vsel %vm1732_vm6, %v6266_v12, %v6248_v61  ;;  %v12413_v48 = vld [vmem:[#allocation57_spill] sm:$0xff]  ;;  %v6542_v59 = vsel %vm1728_vm3, %v6540_v43, %v12416_v35 }
 0xea2   :  { %v11059_v26 = vsel %vm1726_vm2, %v4188_v40, %v4250_v2  ;;  %v12414_v2 = vld [vmem:[#allocation54_spill] sm:$0xff]  ;;  %v6268_v3 = vsel %vm1734_vm5, %v6267_v17, -1.0  ;;  %v12417_v17 = vld [vmem:[#allocation51_spill] sm:$0xff] }
 0xea3   :  { %v6541_v40 = vsel %vm1726_vm2, %v12414_v2, %v12413_v48  ;;  %v6325_v61 = vsel %vm1801_vm7, %v6268_v3, 0  ;;  %v6544_v56 = vsel %vm1730_vm4, %v6542_v59, %v12417_v17  ;;  %vm2321_vm7 = vcmask 195584  }
 0xea4   :  { %v5869_v57 = vpop.xlane.xlu2 %5868  ;;  %v6543_v34 = vsel %vm1728_vm3, %v6541_v40, %v12415_v0  ;;  %v11092_v2 = vand.u32 4294901760, %v6325_v61  ;;  %v11094_v40 = vand.u32 4294901760, %v6544_v56 }
 0xea5   :  { %7437 = vrcp.f32 %v5869_v57  ;;  %v5879_v12 = vand.u32 2147483647, %v5869_v57  ;;  %vm5875_vm5 = vweird.f32 %v5869_v57 }
 0xea6   :  { %v11112_v35 = vsub.f32 %v6544_v56, %v11094_v40  ;;  %v12418_v56 = vand.u32 4294901760, %v10652_v44 }
 0xea7   :  { %v5449_v51 = vpop.xlane.xlu1 %5448  ;;  %vm5880_vm3 = vcmp.eq.f32.partialorder %v5879_v12, 8.507059e+37 }
 0xea8   :  { %v11067_v32 = vsel %vm2226_vm8, %v5449_v51, %v5453_v15  ;;  %v5881_v51 = vand.u32 2147483648, %v5869_v57  ;;  %v6598_v17 = vand.u32 4294901760, %v11112_v35 }
 0xeaa   :  { %v5882_v43 = vor.u32 1.1754944e-38, %v5881_v51 }
 0xeab   :  { %v7438_v20 = vpop.eup %7437 }
 0xeac   :  { %v5871_v46 = vmul.f32 %v7438_v20, %v5869_v57  ;;  %v2952_v50 = vpop.permute.xlu2 %2951  ;;  %vm5876_vm14 = vweird.f32 %v7438_v20  ;;  %v11103_v57 = vsub.f32 %v6325_v61, %v11092_v2 }
 0xead   :  { %v2970_v62 = vsel %vm1726_vm2, %v2890_v27, %v2952_v50  ;;  %v6545_v27 = vsel %vm1730_vm4, %v6543_v34, %v10705_v11  ;;  %v5459_v50 = vsel %vm1730_vm4, %v5458_v18, 0.0  ;;  %vm5877_vm15 = vmor %vm5875_vm5, %vm5876_vm14 }
 0xeae   :  { %v5872_v15 = vsub.f32 1.0, %v5871_v46  ;;  %v11090_v48 = vand.u32 4294901760, %v6545_v27  ;;  %v6353_v12 = vand.u32 4294901760, %v11103_v57 }
 0xeb0   :  { %v5873_v24 = vmul.f32 %v7438_v20, %v5872_v15  ;;  %v11100_v0 = vsub.f32 %v6545_v27, %v11090_v48 }
 0xeb2   :  { %v5874_v46 = vadd.f32 %v7438_v20, %v5873_v24  ;;  %v6592_v27 = vand.u32 4294901760, %v11100_v0 }
 0xeb3   :  { %5460 = vadd.xlane.f32.xlu2 %v5459_v50  ;;  %v3609_v50 = vpop.permute.xlu0 %3608 }
 0xeb4   :  { %v5878_v11 = vsel %vm5877_vm15, %v7438_v20, %v5874_v46  ;;  %v6593_v46 = vsub.f32 %v11100_v0, %v6592_v27 }
 0xeb5   :  { %v5883_v15 = vsel %vm5880_vm3, %v5882_v43, %v5878_v11 }
 0xeb6   :  { %v11097_v3 = vmul.f32 %v10979_v23, %v5883_v15 }
 0xeb8   :  { %v5916_v18 = vsel %vm1730_vm4, %v11097_v3, 0  ;;  %v6077_v34 = vmul.f32 %v10765_v39, %v11097_v3  ;;  %v6081_v20 = vmul.f32 %v10773_v28, %v11097_v3 }
 0xeb9   :  { %v5936_v23 = vand.u32 4294901760, %v5916_v18 }
 0xeba   :  { %v6078_v59 = vsel %vm1730_vm4, %v6077_v34, 0.0  ;;  %v6082_v51 = vsel %vm1730_vm4, %v6081_v20, 0.0  ;;  %v6354_v34 = vsub.f32 %v11103_v57, %v6353_v12 }
 0xebb   :  { %5972 = vmatmul.f32.vlgmr.msrb.gmra.mxu3 %v5936_v23  ;;  %6079 = vadd.xlane.f32.xlu1 %v6078_v59  ;;  %v5937_v24 = vsub.f32 %v5916_v18, %v5936_v23  ;;  %v6085_v18 = vmul.f32 %v10785_v54, %v11097_v3  ;;  %v6599_v59 = vsub.f32 %v11112_v35, %v6598_v17 }
 0xebc   :  { %6432 = vmatpush.xpose.msrb.mxu3 %v10636_v60  ;;  %6083 = vadd.xlane.f32.xlu0 %v6082_v51  ;;  %v12419_v51 = vand.u32 4294901760, %v10658_v29 }
 0xebd   :  { %5998 = vmatmul.f32.vlgmr.msrb.gmra.mxu0 %v5937_v24  ;;  %v5938_v61 = vand.u32 4294901760, %v5937_v24 }
 0xebe   :  { %6459 = vmatpush.xpose.msrb.mxu0 %v12418_v56 }
 0xebf   :  { %6023 = vmatmul.f32.vlgmr.msrb.gmra.mxu1 %v5938_v61  ;;  %v2956_v43 = vpop.permute.xlu1 %2955  ;;  %v5939_v11 = vsub.f32 %v5937_v24, %v5938_v61  ;;  %v6594_v24 = vand.u32 4294901760, %v6593_v46  ;;  %v6600_v61 = vand.u32 4294901760, %v6599_v59 }
 0xec0   :  { %6434 = vmatpush.xpose.msrb.mxu3 %v10648_v10  ;;  %6484 = vmatpush.xpose.msrb.mxu1 %v10636_v60  ;;  %v2971_v15 = vsel %vm1730_vm4, %v2970_v62, %v2956_v43  ;;  %v6086_v60 = vsel %vm1730_vm4, %v6085_v18, 0.0  ;;  %v6355_v62 = vand.u32 4294901760, %v6354_v34  ;;  %v6089_v43 = vmul.f32 %v10801_v7, %v11097_v3 }
 0xec1   :  { %v5940_v20 = vand.u32 4294901760, %v5939_v11 }
 0xec2   :  { %6463 = vmatpush.xpose.msrb.mxu0 %v12419_v51 }
 0xec3   :  { %5941 = vmatmul.f32.vlgmr.msrb.gmra.mxu2 %v5940_v20  ;;  %6073 = vmatmul.f32.vlgmr.msra.gmra.mxu3 %v5936_v23 }
 0xec4   :  { %6407 = vmatpush.xpose.msrb.mxu2 %v10652_v44  ;;  %6486 = vmatpush.xpose.msrb.mxu1 %v10648_v10  ;;  %v3613_v10 = vpop.permute.xlu0 %3612 }
 0xec5   :  { %6595 = vmatpush.msra.mxu3 %v6594_v24  ;;  %6087 = vadd.xlane.f32.xlu0 %v6086_v60 }
 0xec6   :  { %6356 = vmatmul.f32.vlgmr.msra.gmra.mxu0 %v6355_v62 }
 0xec7   :  { %6601 = vmatpush.msra.mxu3 %v6600_v61  ;;  %6623 = vmatpush.msra.mxu0 %v11100_v0  ;;  %v3605_v56 = vpop.permute.xlu1 %3604 }
 0xec8   :  { %6387 = vmatmul.f32.vlgmr.msra.gmra.mxu1 %v11092_v2  ;;  %6410 = vmatpush.xpose.msrb.mxu2 %v10658_v29  ;;  %v3620_v44 = vsel %vm1730_vm4, %v11051_v49, %v3605_v56  ;;  %v12420_v29 = vld [vmem:[#allocation88_spill] sm:$0xff]  ;;  %v6090_v49 = vsel %vm1730_vm4, %v6089_v43, 0.0 }
 0xec9   :  { %6626 = vmatpush.msra.mxu0 %v11112_v35  ;;  %6648 = vmatpush.msra.mxu1 %v11090_v48  ;;  %v3621_v46 = vsel %vm1732_vm6, %v3620_v44, %v3609_v50 }
 0xeca   :  { %v11148_v11 = vsel %vm2321_vm7, %v3621_v46, %v3613_v10 }
 0xecb   :  { %6650 = vmatpush.msra.mxu1 %v11094_v40  ;;  %6050 = vmatmul.f32.vlgmr.msra.gmra.mxu2 %v5936_v23 }
 0xecc   :  { %6438 = vmatmul.f32.vlgmr.msrb.gmra.mxu3 %v6353_v12  ;;  %6564 = vmatpush.msra.mxu2 %v11090_v48  ;;  %v2933_v12 = vmul.f32 %v10996_v14, %v10996_v14  ;;  %v11180_v61 = vpop.xlane.xlu0 %5468 }
 0xecd   :  { %6700 = vmatpush.msrb.mxu3 %v11090_v48  ;;  %2963 = vrot.lane.b32.xlu2 %v12420_v29, %s12302_s1  ;;  %v2934_v48 = vmul.f32 %v11042_v25, %v11042_v25  ;;  %v5462_v25 = vmul.f32 %v10816_v52, %v10598_v55 }
 0xece   :  { %6091 = vadd.xlane.f32.xlu0 %v6090_v49  ;;  %6465 = vmatmul.f32.vlgmr.msrb.gmra.mxu0 %v11092_v2 }
 0xecf   :  { %6566 = vmatpush.msra.mxu2 %v11094_v40  ;;  %6702 = vmatpush.msrb.mxu3 %v11094_v40  ;;  %v4254_v35 = vpop.permute.xlu1 %4253  ;;  %v2935_v40 = vadd.f32 %v2934_v48, %v2933_v12  ;;  %v5463_v14 = vsel %vm1730_vm4, %v5462_v25, 0.0 }
 0xed0   :  { %6488 = vmatmul.f32.vlgmr.msrb.gmra.mxu1 %v11092_v2  ;;  %v11162_v23 = vsel %vm1730_vm4, %v11059_v26, %v4254_v35  ;;  %v2936_v2 = vmul.f32 %v12420_v29, %v12420_v29  ;;  %v6093_v29 = vmul.f32 %v10816_v52, %v11097_v3 }
 0xed2   :  { %v2937_v50 = vadd.f32 %v2936_v2, %v2935_v40  ;;  %v6094_v35 = vsel %vm1730_vm4, %v6093_v29, 0.0  ;;  %v4232_v2 = vmul.f32 %v10745_v9, %v10745_v9  ;;  %v12428_v29 = vld [vmem:[#allocation87_spill] sm:$0xff] }
 0xed3   :  { %6413 = vmatmul.f32.vlgmr.msrb.gmra.mxu2 %v11103_v57 }
 0xed4   :  { %6675 = vmatpush.msrb.mxu2 %v6592_v27  ;;  %7439 = vrsqrt.f32 %v2937_v50  ;;  %vm2945_vm14 = vcmp.eq.f32.partialorder %v2937_v50, inf  ;;  %vm2947_vm5 = vcmp.eq.f32.partialorder %v2937_v50, 0.0 }
 0xed6   :  { %6679 = vmatpush.msrb.mxu2 %v6598_v17 }
 0xed7   :  { %v11185_v44 = vpop.permute.xlu1 %4257 }
 0xeda   :  { %v7440_v27 = vpop.eup %7439 }
 0xedb   :  { %v2939_v17 = vmul.f32 %v7440_v27, %v2937_v50 }
 0xedd   :  { %v2940_v34 = vmul.f32 %v7440_v27, %v2939_v17 }
 0xedf   :  { %v2941_v20 = vmul.f32 0.5, %v2940_v34 }
 0xee1   :  { %v2942_v59 = vsub.f32 1.5, %v2941_v20 }
 0xee3   :  { %v2943_v51 = vmul.f32 %v7440_v27, %v2942_v59 }
 0xee5   :  { %v5457_v18 = vpop.xlane.xlu2 %5456  ;;  %v2944_v24 = vmul.f32 %v2943_v51, %v2937_v50 }
 0xee6   :  { %v5479_v26 = vsel %vm2228_vm9, %v11067_v32, %v5457_v18  ;;  %v2948_v32 = vand.u32 2147483648, %v2937_v50  ;;  %v12421_v18 = vld [vmem:[#allocation42_spill] sm:$0xff] }
 0xee7   :  { %v2946_v60 = vsel %vm2945_vm14, %v2937_v50, %v2944_v24  ;;  %v4231_v50 = vmul.f32 %v11014_v36, %v11014_v36  ;;  %vm2323_vm14 = vcmask 228352  }
 0xee8   :  { %v2949_v62 = vsel %vm2947_vm5, %v2948_v32, %v2946_v60  ;;  %v12425_v32 = vstv %s12422_s24  ;;  %vm5539_vm5 = vcmp.eq.f32.partialorder %v10943_v53, inf }
 0xeed   :  { %v2960_v57 = vpop.permute.xlu2 %2959 }
 0xeee   :  { %v2972_v0 = vsel %vm1732_vm6, %v2971_v15, %v2960_v57  ;;  %v4233_v57 = vadd.f32 %v4232_v2, %v4231_v50  ;;  %v12431_v2 = vld [vmem:[#allocation28_spill] sm:$0xff] }
 0xef6   :  { %5464 = vadd.xlane.f32.xlu2 %v5463_v14 }
 0xf0e   :  { %2967 = vrot.lane.b32.xlu2 %v2949_v62, %s12261_s6  ;;  %v6309_v62 = vmul.f32 %v10765_v39, %v12425_v32 }
 0xf26   :  { %v5461_v15 = vpop.xlane.xlu2 %5460 }
 0xf27   :  { %v11183_v56 = vsel %vm2230_vm10, %v5479_v26, %v5461_v15  ;;  %v4234_v26 = vmul.f32 %v12421_v18, %v12421_v18  ;;  %v12427_v15 = vstv %s12423_s5 }
 0xf2e   :  { %v2964_v10 = vpop.permute.xlu2 %2963  ;;  %v6080_v49 = vpop.xlane.xlu1 %6079 }
 0xf2f   :  { %v11188_v46 = vsel %vm2321_vm7, %v2972_v0, %v2964_v10  ;;  %v6084_v43 = vpop.xlane.xlu0 %6083  ;;  %v4235_v0 = vadd.f32 %v4234_v26, %v4233_v57  ;;  %v6310_v10 = vmul.f32 %v10773_v28, %v12427_v15  ;;  %v12432_v26 = vld [vmem:[#allocation46_spill] sm:$0xff] }
 0xf30   :  { %v6109_v48 = vsel %vm2226_vm8, %v6080_v49, %v6084_v43 }
 0xf31   :  { %7441 = vrsqrt.f32 %v4235_v0  ;;  %vm4243_vm15 = vcmp.eq.f32.partialorder %v4235_v0, inf  ;;  %vm4245_vm3 = vcmp.eq.f32.partialorder %v4235_v0, 0.0 }
 0xf32   :  { %7443 = vrsqrt.f32 %v10943_v53 }
 0xf37   :  { %6095 = vadd.xlane.f32.xlu2 %v6094_v35  ;;  %v7442_v24 = vpop.eup %7441 }
 0xf38   :  { %v6088_v12 = vpop.xlane.xlu0 %6087  ;;  %v4237_v35 = vmul.f32 %v7442_v24, %v4235_v0 }
 0xf39   :  { %v11195_v40 = vsel %vm2228_vm9, %v6109_v48, %v6088_v12  ;;  %v12429_v48 = vld [vmem:[#allocation44_spill] sm:$0xff] }
 0xf3a   :  { %v5999_v14 = vpop.f32.mrf.mxu0  ;;  %v4238_v28 = vmul.f32 %v7442_v24, %v4237_v35 }
 0xf3c   :  { %v6024_v20 = vpop.f32.mrf.mxu1 }
 0xf3e   :  { %v5973_v27 = vpop.f32.mrf.mxu3 }
 0xf46   :  { %v5942_v25 = vpop.f32.mrf.mxu2  ;;  %v6074_v36 = vpop.f32.mrf.mxu3 }
 0xf47   :  { %v5974_v17 = vadd.f32 %v5973_v27, %v5942_v25  ;;  %v6311_v27 = vadd.f32 %v6310_v10, %v6309_v62  ;;  %v12433_v25 = vstv %s12424_s10  ;;  %v12440_v10 = vstv %s12434_s23 }
 0xf48   :  { %v6312_v39 = vmul.f32 %v10785_v54, %v12433_v25  ;;  %v12438_v54 = vstv %s12430_s7  ;;  %v6318_v35 = vmul.f32 %v10827_v31, %v12440_v10  ;;  %s7661_s7 = smov [#allocation12]  }
 0xf49   :  { %v6000_v34 = vadd.f32 %v5999_v14, %v5974_v17  ;;  %v12435_v14 = vstv %s12426_s0  ;;  %v6316_v32 = vmul.f32 %v10816_v52, %v12438_v54  ;;  %s12470_s0 = sld [smem:[#allocation92_spill]] }
 0xf4a   :  { %v6313_v17 = vadd.f32 %v6312_v39, %v6311_v27  ;;  %v12443_v39 = vstv %s12439_s21 }
 0xf4b   :  { %v6025_v59 = vadd.f32 %v6024_v20, %v6000_v34  ;;  %v6314_v34 = vmul.f32 %v10801_v7, %v12435_v14  ;;  %v4239_v20 = vmul.f32 0.5, %v4238_v28  ;;  %v6322_v28 = vmul.f32 %v10847_v16, %v12443_v39 }
 0xf4d   :  { %v4240_v15 = vsub.f32 1.5, %v4239_v20 }
 0xf4e   :  { %v6051_v9 = vpop.f32.mrf.mxu2 }
 0xf4f   :  { %v6052_v51 = vadd.f32 %v6051_v9, %v6025_v59  ;;  %v12437_v59 = vld [vmem:[#allocation31_spill] sm:$0xff] }
 0xf51   :  { %v11203_v60 = vadd.f32 %v6074_v36, %v6052_v51  ;;  %v6315_v36 = vadd.f32 %v6314_v34, %v6313_v17 }
 0xf53   :  { %v6117_v43 = vsub.f32 %v11203_v60, %v12355_v41  ;;  %v6118_v49 = vsub.f32 %v11203_v60, %v12428_v29  ;;  %v6317_v7 = vadd.f32 %v6316_v32, %v6315_v36 }
 0xf55   :  { %v6133_v12 = vmul.f32 %v6117_v43, %v12429_v48  ;;  %v6120_v50 = vmul.f32 %v6117_v43, %v12431_v2  ;;  %v6139_v57 = vmul.f32 %v6118_v49, %v12432_v26  ;;  %v6126_v9 = vmul.f32 %v6118_v49, %v12437_v59 }
 0xf56   :  { %v6146_v51 = vmul.f32 %v6117_v43, %v12393_v21  ;;  %v6152_v62 = vmul.f32 %v6118_v49, %v12395_v19  ;;  %v6319_v43 = vadd.f32 %v6318_v35, %v6317_v7  ;;  %v6414_v54 = vpop.f32.mrf.mxu2 }
 0xf57   :  { %6135 = vrot.lane.b32.xlu2 %v6133_v12, %s7660_s8  ;;  %6122 = vrot.lane.b32.xlu1 %v6120_v50, %s7660_s8  ;;  %v4241_v12 = vmul.f32 %v7442_v24, %v4240_v15  ;;  %v12441_v50 = vstv %s12436_s9  ;;  %v4246_v24 = vand.u32 2147483648, %v4235_v0  ;;  %s12472_s9 = sld [smem:[#allocation93_spill]] }
 0xf58   :  { %6141 = vrot.lane.b32.xlu0 %v6139_v57, %s12330_s14  ;;  %v12442_v57 = vld [vmem:[#allocation90_spill] sm:$0xff] }
 0xf59   :  { %v6320_v27 = vmul.f32 %v12442_v57, %v12441_v50  ;;  %v4242_v52 = vmul.f32 %v4241_v12, %v4235_v0  ;;  %v6101_v50 = vmul.f32 %v12442_v57, %v11097_v3 }
 0xf5b   :  { %v6321_v25 = vadd.f32 %v6320_v27, %v6319_v43  ;;  %v4244_v14 = vsel %vm4243_vm15, %v4235_v0, %v4242_v52  ;;  %v5470_v43 = vmul.f32 %v12442_v57, %v10598_v55  ;;  %v5474_v27 = vmul.f32 %v10847_v16, %v10598_v55 }
 0xf5c   :  { %v4247_v20 = vsel %vm4245_vm3, %v4246_v24, %v4244_v14  ;;  %v6102_v52 = vsel %vm1730_vm4, %v6101_v50, 0.0  ;;  %vm5541_vm15 = vcmp.eq.f32.partialorder %v10943_v53, 0.0 }
 0xf5d   :  { %v6323_v34 = vadd.f32 %v6322_v28, %v6321_v25  ;;  %v6105_v25 = vmul.f32 %v10847_v16, %v11097_v3  ;;  %v7444_v28 = vpop.eup %7443  ;;  %s7246_s21 = sshll.u32 %s12472_s9, 4  ;;  %s7247_s21 = int_to_ptr.hbm [resolvable:$true] %s7246_s21 }
 0xf5e   :  { %v5533_v57 = vmul.f32 %v7444_v28, %v10943_v53 }
 0xf5f   :  { %6128 = vrot.lane.b32.xlu2 %v6126_v9, %s12330_s14  ;;  %6148 = vrot.lane.b32.xlu1 %v6146_v51, %s7660_s8  ;;  %v6106_v39 = vsel %vm1730_vm4, %v6105_v25, 0.0 }
 0xf60   :  { %6154 = vrot.lane.b32.xlu0 %v6152_v62, %s12330_s14  ;;  %v5534_v14 = vmul.f32 %v7444_v28, %v5533_v57 }
 0xf67   :  { %4261 = vrot.lane.b32.xlu2 %v12421_v18, %s12302_s1  ;;  %v6357_v18 = vpop.f32.mrf.mxu0 }
 0xf68   :  { %v6358_v51 = vadd.f32 %v6357_v18, %v6323_v34 }
 0xf69   :  { %v5465_v49 = vpop.xlane.xlu2 %5464 }
 0xf6a   :  { %v5481_v17 = vsel %vm1682_vm1, %v11183_v56, %v5465_v49  ;;  %v6388_v56 = vpop.f32.mrf.mxu1  ;;  %v5475_v49 = vsel %vm1730_vm4, %v5474_v27, 0.0 }
 0xf6b   :  { %v11251_v31 = vsel %vm2233_vm11, %v5481_v17, %v11180_v61  ;;  %v6389_v32 = vadd.f32 %v6388_v56, %v6358_v51  ;;  %v6439_v61 = vpop.f32.mrf.mxu3  ;;  %v6092_v17 = vpop.xlane.xlu0 %6091  ;;  %v5542_v51 = vand.u32 2147483648, %v10943_v53 }
 0xf6c   :  { %v6111_v55 = vsel %vm2230_vm10, %v11195_v40, %v6092_v17 }
 0xf6d   :  { %v6415_v62 = vadd.f32 %v6414_v54, %v6389_v32  ;;  %v6116_v54 = vsub.f32 %v11203_v60, %v12369_v22 }
 0xf6f   :  { %4265 = vrot.lane.b32.xlu2 %v4247_v20, %s12261_s6  ;;  %v6440_v15 = vadd.f32 %v6439_v61, %v6415_v62  ;;  %v6466_v7 = vpop.f32.mrf.mxu0  ;;  %v5535_v20 = vmul.f32 0.5, %v5534_v14  ;;  %v6119_v32 = vmul.f32 %v6116_v54, %v12374_v63 }
 0xf71   :  { %v2968_v9 = vpop.permute.xlu2 %2967  ;;  %v6467_v0 = vadd.f32 %v6466_v7, %v6440_v15  ;;  %v5536_v16 = vsub.f32 1.5, %v5535_v20 }
 0xf72   :  { %v11256_v36 = vsel %vm2323_vm14, %v11188_v46, %v2968_v9  ;;  %v6489_v10 = vpop.f32.mrf.mxu1  ;;  %v5471_v46 = vsel %vm1730_vm4, %v5470_v43, 0.0 }
 0xf73   :  { %v11258_v35 = vadd.f32 %v6489_v10, %v6467_v0  ;;  %v5537_v18 = vmul.f32 %v7444_v28, %v5536_v16 }
 0xf75   :  { %v6492_v12 = vsel %vm1730_vm4, %v11258_v35, -inf  ;;  %v5538_v9 = vmul.f32 %v5537_v18, %v10943_v53 }
 0xf77   :  { %v5540_v40 = vsel %vm5539_vm5, %v10943_v53, %v5538_v9  ;;  %v6132_v53 = vmul.f32 %v6116_v54, %v12376_v5  ;;  %v3583_v9 = vmul.f32 %v10963_v8, %v10963_v8 }
 0xf78   :  { %v5543_v56 = vsel %vm5541_vm15, %v5542_v51, %v5540_v40  ;;  %v3582_v51 = vmul.f32 %v11005_v37, %v11005_v37 }
 0xf89   :  { %6493 = vmax.xlane.f32.xlu1 %v6492_v12 }
 0xf91   :  { %5472 = vadd.xlane.f32.xlu1 %v5471_v46 }
 0xf98   :  { %6103 = vadd.xlane.f32.xlu2 %v6102_v52 }
 0xf99   :  { %5476 = vadd.xlane.f32.xlu1 %v5475_v49 }
 0xfa1   :  { %6107 = vadd.xlane.f32.xlu1 %v6106_v39 }
 0xfaa   :  { %v6096_v24 = vpop.xlane.xlu2 %6095 }
 0xfab   :  { %v11279_v34 = vsel %vm1682_vm1, %v6111_v55, %v6096_v24 }
 0xfb0   :  { %6176 = vrot.lane.b32.xlu2 %v11203_v60, %s12399_s4 }
 0xfb8   :  { %5557 = vrot.lane.b32.xlu2 %v10911_v6, %s12302_s1  ;;  %v6136_v6 = vpop.permute.xlu2 %6135 }
 0xfb9   :  { %v6138_v0 = vadd.f32 %v6136_v6, %v6132_v53  ;;  %v3584_v6 = vadd.f32 %v3583_v9, %v3582_v51  ;;  %v11338_v9 = vld [vmem:[%s11899_s2 + $0x40] sm:$0xff] }
 0xfba   :  { %5545 = vrot.lane.b32.xlu1 %v10796_v33, %s12399_s4  ;;  %v12444_v33 = vld [vmem:[#allocation66_spill] sm:$0xff] }
 0xfc0   :  { %5561 = vrot.lane.b32.xlu2 %v5543_v56, %s12261_s6  ;;  %v6129_v7 = vpop.permute.xlu2 %6128  ;;  %v3585_v56 = vmul.f32 %v10974_v4, %v10974_v4 }
 0xfc2   :  { %5553 = vrot.lane.b32.xlu1 %v10924_v58, %s12301_s26  ;;  %v6145_v58 = vmul.f32 %v6116_v54, %v12398_v47  ;;  %v3586_v54 = vadd.f32 %v3585_v56, %v3584_v6 }
 0xfc4   :  { %vm3594_vm15 = vcmp.eq.f32.partialorder %v3586_v54, inf }
 0xfc8   :  { %2299 = vrot.lane.b32.xlu2 %v12444_v33, %s12399_s4 }
 0xfc9   :  { %v6123_v62 = vpop.permute.xlu1 %6122 }
 0xfca   :  { %v6125_v61 = vadd.f32 %v6123_v62, %v6119_v32  ;;  %v6142_v15 = vpop.permute.xlu0 %6141 }
 0xfcb   :  { %v6144_v12 = vadd.f32 %v6142_v15, %v6138_v0 }
 0xfcc   :  { %v6131_v10 = vadd.f32 %v6129_v7, %v6125_v61 }
 0xfcd   :  { %v6159_v27 = vmul.f32 %v6144_v12, %v6144_v12 }
 0xfce   :  { %v6158_v46 = vmul.f32 %v6131_v10, %v6131_v10 }
 0xfd0   :  { %v6160_v49 = vadd.f32 %v6159_v27, %v6158_v46 }
 0xfd1   :  { %v6149_v43 = vpop.permute.xlu1 %6148 }
 0xfd2   :  { %v6151_v50 = vadd.f32 %v6149_v43, %v6145_v58  ;;  %v6155_v60 = vpop.permute.xlu0 %6154 }
 0xfd4   :  { %v6157_v52 = vadd.f32 %v6155_v60, %v6151_v50  ;;  %v3597_v50 = vand.u32 2147483648, %v3586_v54 }
 0xfd6   :  { %v6161_v25 = vmul.f32 %v6157_v52, %v6157_v52 }
 0xfd8   :  { %v6162_v39 = vadd.f32 %v6161_v25, %v6160_v49 }
 0xfda   :  { %7445 = vrsqrt.f32 %v6162_v39  ;;  %vm6170_vm3 = vcmp.eq.f32.partialorder %v6162_v39, inf  ;;  %v6173_v16 = vand.u32 2147483648, %v6162_v39  ;;  %vm6172_vm5 = vcmp.eq.f32.partialorder %v6162_v39, 0.0 }
 0xfdb   :  { %7447 = vrsqrt.f32 %v3586_v54 }
 0xfe0   :  { %v7446_v28 = vpop.eup %7445 }
 0xfe1   :  { %v6164_v57 = vmul.f32 %v7446_v28, %v6162_v39  ;;  %v7448_v61 = vpop.eup %7447 }
 0xfe2   :  { %v3588_v53 = vmul.f32 %v7448_v61, %v3586_v54 }
 0xfe3   :  { %v6165_v17 = vmul.f32 %v7446_v28, %v6164_v57 }
 0xfe4   :  { %v3589_v8 = vmul.f32 %v7448_v61, %v3588_v53  ;;  %v11353_v53 = vld [vmem:[%s11899_s2 + $0x78] sm:$0xff] }
 0xfe5   :  { %v6166_v14 = vmul.f32 0.5, %v6165_v17 }
 0xfe6   :  { %v3590_v58 = vmul.f32 0.5, %v3589_v8 }
 0xfe7   :  { %v6167_v55 = vsub.f32 1.5, %v6166_v14 }
 0xfe8   :  { %v3591_v37 = vsub.f32 1.5, %v3590_v58 }
 0xfe9   :  { %v6168_v24 = vmul.f32 %v7446_v28, %v6167_v55 }
 0xfea   :  { %v3592_v43 = vmul.f32 %v7448_v61, %v3591_v37  ;;  %v11361_v37 = vld [vmem:[%s11899_s2 + $0x58] sm:$0xff] }
 0xfeb   :  { %v6169_v20 = vmul.f32 %v6168_v24, %v6162_v39 }
 0xfec   :  { %v3593_v46 = vmul.f32 %v3592_v43, %v3586_v54 }
 0xfed   :  { %v6171_v18 = vsel %vm6170_vm3, %v6162_v39, %v6169_v20  ;;  %vm3596_vm3 = vcmp.eq.f32.partialorder %v3586_v54, 0.0 }
 0xfee   :  { %v6174_v40 = vsel %vm6172_vm5, %v6173_v16, %v6171_v18  ;;  %v3595_v4 = vsel %vm3594_vm15, %v3586_v54, %v3593_v46  ;;  %v11332_v16 = vld [vmem:[%s11899_s2 + $0x48] sm:$0xff]  ;;  %v11366_v46 = vsub.f32 %v12444_v33, %v12401_v30  ;;  %v12446_v30 = vld [vmem:[#allocation34_spill] sm:$0xff] }
 0xfef   :  { %6192 = vrot.lane.b32.xlu2 %v6174_v40, %s12261_s6  ;;  %v3598_v60 = vsel %vm3596_vm3, %v3597_v50, %v3595_v4 }
 0xff0   :  { %v2242_v50 = vmul.f32 %v11366_v46, %v12404_v38 }
 0xffc   :  { %v6494_v32 = vpop.xlane.xlu1 %6493 }
 0xffd   :  { %v6495_v62 = vsub.f32 %v11258_v35, %v6494_v32  ;;  %v11315_v35 = vld [vmem:[%s11899_s2 + $0x68] sm:$0xff] }
 0xffe   :  { %v6097_v27 = vmul.f32 %v11315_v35, %v11097_v3 }
 0xfff   :  { %v6496_v15 = vmul.f32 1.442695, %v6495_v62  ;;  %v11347_v62 = vld [vmem:[%s11899_s2 + $0x50] sm:$0xff] }
0x1000   :  { %v6098_v49 = vsel %vm1730_vm4, %v6097_v27, 0.0  ;;  %v12445_v27 = vld [vmem:[#allocation27_spill] sm:$0xff] }
0x1001   :  { %7449 = vpow2.f32 %v6496_v15 }
0x1007   :  { %v7450_v7 = vpop.eup %7449 }
0x1008   :  { %v6498_v0 = vsel %vm1730_vm4, %v7450_v7, 0.0 }
0x1009   :  { %6499 = vadd.xlane.f32.xlu0 %v6498_v0 }
0x101d   :  { %3616 = vrot.lane.b32.xlu0 %v3598_v60, %s12261_s6  ;;  %v11371_v60 = vpop.permute.xlu2 %4261 }
0x1025   :  { %v11386_v38 = vpop.permute.xlu2 %4265 }
0x1047   :  { %6099 = vadd.xlane.f32.xlu0 %v6098_v49  ;;  %v2248_v49 = vadd.f32 %v12445_v27, %v2242_v50 }
0x1049   :  { %v11381_v33 = vadd.f32 %v12446_v30, %v2248_v49 }
0x105b   :  { %5549 = vrot.lane.b32.xlu0 %v10932_v45, %s12399_s4 }
0x1063   :  { %6180 = vrot.lane.b32.xlu0 %v6131_v10, %s12399_s4 }
0x106b   :  { %6184 = vrot.lane.b32.xlu0 %v6144_v12, %s12301_s26 }
0x1073   :  { %6188 = vrot.lane.b32.xlu0 %v6157_v52, %s12302_s1 }
0x107c   :  { %v6500_v25 = vpop.xlane.xlu0 %6499 }
0x107d   :  { %7451 = vrcp.f32 %v6500_v25  ;;  %v6512_v17 = vand.u32 2147483648, %v6500_v25  ;;  %v6510_v3 = vand.u32 2147483647, %v6500_v25  ;;  %vm6506_vm15 = vweird.f32 %v6500_v25 }
0x107f   :  { %v6513_v24 = vor.u32 1.1754944e-38, %v6512_v17  ;;  %vm6511_vm0 = vcmp.eq.f32.partialorder %v6510_v3, 8.507059e+37  ;;  %v11393_v3 = vld [vmem:[%s11899_s2 + $0x70] sm:$0xff] }
0x1083   :  { %v7452_v39 = vpop.eup %7451 }
0x1084   :  { %v6502_v28 = vmul.f32 %v7452_v39, %v6500_v25  ;;  %vm6507_vm5 = vweird.f32 %v7452_v39  ;;  %v11377_v25 = vld [vmem:[%s11899_s2 + $0x60] sm:$0xff]  ;;  %s12450_s2 = smov 32  }
0x1085   :  { %vm6508_vm3 = vmor %vm6506_vm15, %vm6507_vm5 }
0x1086   :  { %v6503_v57 = vsub.f32 1.0, %v6502_v28 }
0x1088   :  { %v6504_v14 = vmul.f32 %v7452_v39, %v6503_v57 }
0x108a   :  { %v6505_v55 = vadd.f32 %v7452_v39, %v6504_v14  ;;  %v6104_v14 = vpop.xlane.xlu2 %6103 }
0x108c   :  { %v6509_v45 = vsel %vm6508_vm3, %v7452_v39, %v6505_v55 }
0x108d   :  { %v6514_v10 = vsel %vm6511_vm0, %v6513_v24, %v6509_v45 }
0x108e   :  { %v6515_v20 = vmul.f32 %v7450_v7, %v6514_v10 }
0x108f   :  { %v3617_v12 = vpop.permute.xlu0 %3616 }
0x1090   :  { %v11327_v52 = vsel %vm2323_vm14, %v11148_v11, %v3617_v12  ;;  %v6712_v18 = vmul.f32 %v11332_v16, %v6515_v20  ;;  %v6708_v40 = vmul.f32 %v11338_v9, %v6515_v20  ;;  %v6547_v51 = vsel %vm1730_vm4, %v6515_v20, 0  ;;  %v11399_v12 = vpop.xlane.xlu1 %5472 }
0x1091   :  { %v6567_v56 = vand.u32 4294901760, %v6547_v51  ;;  %v6716_v61 = vmul.f32 %v11347_v62, %v6515_v20  ;;  %v6736_v8 = vmul.f32 %v11353_v53, %v6515_v20  ;;  %v6720_v43 = vmul.f32 %v11361_v37, %v6515_v20 }
0x1092   :  { %v6713_v11 = vsel %vm1730_vm4, %v6712_v18, 0.0  ;;  %v6709_v6 = vsel %vm1730_vm4, %v6708_v40, 0.0  ;;  %v6724_v39 = vmul.f32 %v11377_v25, %v6515_v20  ;;  %v6728_v57 = vmul.f32 %v11315_v35, %v6515_v20  ;;  %v6177_v18 = vpop.permute.xlu2 %6176 }
0x1093   :  { %6714 = vadd.xlane.f32.xlu2 %v6713_v11  ;;  %6710 = vadd.xlane.f32.xlu1 %v6709_v6  ;;  %v6568_v54 = vsub.f32 %v6547_v51, %v6567_v56  ;;  %v6717_v0 = vsel %vm1730_vm4, %v6716_v61, 0.0  ;;  %v6737_v58 = vsel %vm1730_vm4, %v6736_v8, 0.0  ;;  %v6721_v4 = vsel %vm1730_vm4, %v6720_v43, 0.0 }
0x1094   :  { %6603 = vmatmul.f32.vlgmr.msra.gmra.mxu3 %v6567_v56  ;;  %v6725_v28 = vsel %vm1730_vm4, %v6724_v39, 0.0  ;;  %v6729_v17 = vsel %vm1730_vm4, %v6728_v57, 0.0  ;;  %v6732_v55 = vmul.f32 %v11393_v3, %v6515_v20 }
0x1095   :  { %6629 = vmatmul.f32.vlgmr.msra.gmra.mxu0 %v6568_v54  ;;  %v6569_v32 = vand.u32 4294901760, %v6568_v54 }
0x1096   :  { %v6733_v45 = vsel %vm1730_vm4, %v6732_v55, 0.0 }
0x1097   :  { %6654 = vmatmul.f32.vlgmr.msra.gmra.mxu1 %v6569_v32  ;;  %v6570_v15 = vsub.f32 %v6568_v54, %v6569_v32 }
0x1098   :  { %v11401_v40 = vpop.xlane.xlu1 %5476 }
0x1099   :  { %v6571_v7 = vand.u32 4294901760, %v6570_v15 }
0x109a   :  { %v11403_v51 = vpop.permute.xlu2 %5557 }
0x109b   :  { %6718 = vadd.xlane.f32.xlu1 %v6717_v0  ;;  %6572 = vmatmul.f32.vlgmr.msra.gmra.mxu2 %v6571_v7 }
0x109c   :  { %6704 = vmatmul.f32.vlgmr.msrb.gmra.mxu3 %v6567_v56 }
0x109d   :  { %6738 = vadd.xlane.f32.xlu0 %v6737_v58 }
0x10a0   :  { %v6108_v6 = vpop.xlane.xlu1 %6107 }
0x10a2   :  { %v11409_v54 = vpop.permute.xlu2 %5561 }
0x10a3   :  { %6722 = vadd.xlane.f32.xlu1 %v6721_v4  ;;  %6681 = vmatmul.f32.vlgmr.msrb.gmra.mxu2 %v6567_v56 }
0x10a8   :  { %v11420_v50 = vpop.permute.xlu1 %5545 }
0x10aa   :  { %v11413_v8 = vpop.permute.xlu2 %2299 }
0x10ab   :  { %2303 = vrot.lane.b32.xlu2 %v11381_v33, %s12399_s4  ;;  %6726 = vadd.xlane.f32.xlu1 %v6725_v28 }
0x10b0   :  { %v11422_v27 = vpop.permute.xlu1 %5553 }
0x10b2   :  { %v6193_v58 = vpop.permute.xlu2 %6192 }
0x10b3   :  { %6730 = vadd.xlane.f32.xlu1 %v6729_v17 }
0x10ba   :  { %v6100_v24 = vpop.xlane.xlu0 %6099 }
0x10bb   :  { %v6113_v10 = vsel %vm2233_vm11, %v11279_v34, %v6100_v24  ;;  %6734 = vadd.xlane.f32.xlu1 %v6733_v45 }
0x10bc   :  { %v6114_v11 = vsel %vm2235_vm12, %v6113_v10, %v6104_v14 }
0x10bd   :  { %v6115_v20 = vsel %vm2237_vm13, %v6114_v11, %v6108_v6 }
0x10be   :  { %v6195_v32 = vsel %vm1726_vm2, %v6115_v20, %v6177_v18 }
0x10cd   :  { %v11405_v56 = vpop.permute.xlu0 %5549 }
0x10d5   :  { %v6181_v34 = vpop.permute.xlu0 %6180 }
0x10d6   :  { %v6196_v61 = vsel %vm1730_vm4, %v6195_v32, %v6181_v34 }
0x10dd   :  { %v6185_v15 = vpop.permute.xlu0 %6184 }
0x10de   :  { %v6197_v7 = vsel %vm1732_vm6, %v6196_v61, %v6185_v15 }
0x10e5   :  { %v6189_v0 = vpop.permute.xlu0 %6188 }
0x10e6   :  { %v6198_v43 = vsel %vm2321_vm7, %v6197_v7, %v6189_v0 }
0x10e7   :  { %v11418_v4 = vsel %vm2323_vm14, %v6198_v43, %v6193_v58 }
0x1106   :  { %v6715_v49 = vpop.xlane.xlu2 %6714  ;;  %v6711_v39 = vpop.xlane.xlu1 %6710 }
0x1107   :  { %v6740_v30 = vsel %vm2226_vm8, %v6711_v39, %v6715_v49 }
0x110e   :  { %v6719_v28 = vpop.xlane.xlu1 %6718 }
0x110f   :  { %v6741_v57 = vsel %vm2228_vm9, %v6740_v30, %v6719_v28 }
0x1112   :  { %v6630_v11 = vpop.f32.mrf.mxu0 }
0x1114   :  { %v6655_v20 = vpop.f32.mrf.mxu1 }
0x1116   :  { %v6723_v17 = vpop.xlane.xlu1 %6722 }
0x1117   :  { %v6742_v14 = vsel %vm2230_vm10, %v6741_v57, %v6723_v17  ;;  %v6604_v55 = vpop.f32.mrf.mxu3 }
0x111e   :  { %v6727_v24 = vpop.xlane.xlu1 %6726  ;;  %v6573_v45 = vpop.f32.mrf.mxu2 }
0x111f   :  { %v6743_v10 = vsel %vm1682_vm1, %v6742_v14, %v6727_v24  ;;  %v6605_v18 = vadd.f32 %v6604_v55, %v6573_v45  ;;  %v6705_v0 = vpop.f32.mrf.mxu3  ;;  %v2255_v24 = vmul.f32 %v11366_v46, %v12368_v1  ;;  %v12448_v45 = vld [vmem:[#allocation49_spill] sm:$0xff]  ;;  %v4270_v1 = vsel %vm1732_vm6, %v11162_v23, %v11185_v44 }
0x1121   :  { %v6631_v6 = vadd.f32 %v6630_v11, %v6605_v18  ;;  %v12449_v18 = vld [vmem:[#allocation22_spill] sm:$0xff] }
0x1123   :  { %v6656_v32 = vadd.f32 %v6655_v20, %v6631_v6 }
0x1126   :  { %v6731_v34 = vpop.xlane.xlu1 %6730  ;;  %v6682_v61 = vpop.f32.mrf.mxu2 }
0x1127   :  { %v6744_v15 = vsel %vm2233_vm11, %v6743_v10, %v6731_v34  ;;  %v6683_v7 = vadd.f32 %v6682_v61, %v6656_v32  ;;  %v2261_v10 = vadd.f32 %v12448_v45, %v2255_v24 }
0x1129   :  { %v6706_v58 = vadd.f32 %v6705_v0, %v6683_v7  ;;  %v2267_v11 = vadd.f32 %v12449_v18, %v2261_v10 }
0x112b   :  { %v6748_v43 = vsub.f32 %v6706_v58, %v12355_v41  ;;  %6807 = vrot.lane.b32.xlu1 %v6706_v58, %s12399_s4  ;;  %v6749_v30 = vsub.f32 %v6706_v58, %v12428_v29  ;;  %v12447_v41 = vld [vmem:[#allocation47_spill] sm:$0xff] }
0x112c   :  { %v4822_v17 = vmul.f32 %v11347_v62, %v12447_v41  ;;  %v4830_v29 = vmul.f32 %v11377_v25, %v12447_v41  ;;  %v4814_v14 = vmul.f32 %v11338_v9, %v12447_v41  ;;  %v4834_v55 = vmul.f32 %v11315_v35, %v12447_v41 }
0x112d   :  { %v6777_v49 = vmul.f32 %v6748_v43, %v12393_v21  ;;  %v6751_v39 = vmul.f32 %v6748_v43, %v12431_v2  ;;  %v6764_v28 = vmul.f32 %v6748_v43, %v12429_v48  ;;  %v6757_v57 = vmul.f32 %v6749_v30, %v12437_v59 }
0x112e   :  { %v4823_v21 = vsel %vm1730_vm4, %v4822_v17, 0.0  ;;  %v4818_v2 = vmul.f32 %v11332_v16, %v12447_v41  ;;  %v4831_v59 = vsel %vm1730_vm4, %v4830_v29, 0.0  ;;  %v4815_v62 = vsel %vm1730_vm4, %v4814_v14, 0.0 }
0x112f   :  { %6779 = vrot.lane.b32.xlu2 %v6777_v49, %s7660_s8  ;;  %6753 = vrot.lane.b32.xlu0 %v6751_v39, %s7660_s8  ;;  %v4835_v16 = vsel %vm1730_vm4, %v4834_v55, 0.0  ;;  %v4838_v25 = vmul.f32 %v11393_v3, %v12447_v41  ;;  %v6770_v6 = vmul.f32 %v6749_v30, %v12432_v26  ;;  %v6783_v35 = vmul.f32 %v6749_v30, %v12395_v19  ;;  %v11506_v39 = vpop.permute.xlu2 %2303  ;;  %v12451_v30 = vld [vmem:[#allocation40_spill] sm:$0xff] }
0x1130   :  { %v4819_v48 = vsel %vm1730_vm4, %v4818_v2, 0.0  ;;  %v4271_v3 = vsel %vm2321_vm7, %v4270_v1, %v11371_v60  ;;  %v5483_v26 = vsel %vm2235_vm12, %v11251_v31, %v11399_v12  ;;  %v2268_v49 = vmul.f32 %v11366_v46, %v12403_v13 }
0x1131   :  { %v4839_v9 = vsel %vm1730_vm4, %v4838_v25, 0.0  ;;  %v4272_v20 = vsel %vm2323_vm14, %v4271_v3, %v11386_v38  ;;  %v5484_v19 = vsel %vm2237_vm13, %v5483_v26, %v11401_v40  ;;  %v6735_v38 = vpop.xlane.xlu1 %6734  ;;  %v6739_v40 = vpop.xlane.xlu0 %6738  ;;  %v2282_v17 = vmul.f32 %v2267_v11, %v2267_v11 }
0x1132   :  { %v5564_v32 = vsel %vm1726_vm2, %v5484_v19, %v11420_v50  ;;  %v6745_v12 = vsel %vm2235_vm12, %v6744_v15, %v6735_v38  ;;  %v4898_v38 = vmul.f32 %v10988_v42, %v10988_v42 }
0x1133   :  { %6766 = vrot.lane.b32.xlu1 %v6764_v28, %s7660_s8  ;;  %v5565_v23 = vsel %vm1730_vm4, %v5564_v32, %v11405_v56  ;;  %v6746_v56 = vsel %vm2237_vm13, %v6745_v12, %v6739_v40  ;;  %v12452_v28 = vld [vmem:[#allocation18_spill] sm:$0xff]  ;;  %v12453_v40 = vld [vmem:[#allocation89_spill] sm:$0xff] }
0x1134   :  { %v5566_v44 = vsel %vm1732_vm6, %v5565_v23, %v11422_v27  ;;  %v4826_v27 = vmul.f32 %v11361_v37, %v12447_v41  ;;  %v2274_v37 = vadd.f32 %v12451_v30, %v2268_v49  ;;  %v12454_v49 = vld [vmem:[#allocation48_spill] sm:$0xff] }
0x1135   :  { %v5567_v60 = vsel %vm2321_vm7, %v5566_v44, %v11403_v51 }
0x1136   :  { %v5568_v31 = vsel %vm2323_vm14, %v5567_v60, %v11409_v54  ;;  %v4827_v51 = vsel %vm1730_vm4, %v4826_v27, 0.0  ;;  %v6747_v54 = vsub.f32 %v6706_v58, %v12369_v22 }
0x1137   :  { %6759 = vrot.lane.b32.xlu0 %v6757_v57, %s12330_s14  ;;  %v11510_v57 = vadd.f32 %v12452_v28, %v2274_v37 }
0x1138   :  { %v6750_v7 = vmul.f32 %v6747_v54, %v12374_v63  ;;  %v2281_v63 = vmul.f32 %v11381_v33, %v11381_v33  ;;  %v6763_v25 = vmul.f32 %v6747_v54, %v12376_v5  ;;  %v6776_v18 = vmul.f32 %v6747_v54, %v12398_v47 }
0x1139   :  { %v2284_v58 = vmul.f32 %v11510_v57, %v11510_v57 }
0x113a   :  { %v2283_v2 = vadd.f32 %v2282_v17, %v2281_v63  ;;  %v12455_v17 = vld [vmem:[#allocation39_spill] sm:$0xff] }
0x113c   :  { %v2285_v29 = vadd.f32 %v2284_v58, %v2283_v2 }
0x113e   :  { %7453 = vrsqrt.f32 %v2285_v29  ;;  %vm2293_vm0 = vcmp.eq.f32.partialorder %v2285_v29, inf  ;;  %v2296_v44 = vand.u32 2147483648, %v2285_v29  ;;  %vm2295_vm5 = vcmp.eq.f32.partialorder %v2285_v29, 0.0 }
0x1158   :  { %4824 = vadd.xlane.f32.xlu2 %v4823_v21 }
0x115d   :  { %4820 = vadd.xlane.f32.xlu1 %v4819_v48 }
0x1160   :  { %4832 = vadd.xlane.f32.xlu2 %v4831_v59 }
0x1161   :  { %4816 = vadd.xlane.f32.xlu0 %v4815_v62  ;;  %v7454_v62 = vpop.eup %7453 }
0x1162   :  { %v2287_v55 = vmul.f32 %v7454_v62, %v2285_v29 }
0x1168   :  { %4836 = vadd.xlane.f32.xlu2 %v4835_v16  ;;  %v2288_v16 = vmul.f32 %v7454_v62, %v2287_v55 }
0x116a   :  { %v2289_v33 = vmul.f32 0.5, %v2288_v16 }
0x116c   :  { %v2290_v10 = vsub.f32 1.5, %v2289_v33 }
0x1170   :  { %4840 = vadd.xlane.f32.xlu2 %v4839_v9 }
0x1175   :  { %2307 = vrot.lane.b32.xlu0 %v2267_v11, %s12301_s26 }
0x1176   :  { %6772 = vrot.lane.b32.xlu1 %v6770_v6, %s12330_s14 }
0x117e   :  { %6785 = vrot.lane.b32.xlu1 %v6783_v35, %s12330_s14  ;;  %v2291_v35 = vmul.f32 %v7454_v62, %v2290_v10 }
0x1180   :  { %v2292_v5 = vmul.f32 %v2291_v35, %v2285_v29 }
0x1182   :  { %v2294_v23 = vsel %vm2293_vm0, %v2285_v29, %v2292_v5 }
0x1183   :  { %v2297_v60 = vsel %vm2295_vm5, %v2296_v44, %v2294_v23 }
0x1188   :  { %4282 = vrot.lane.b32.xlu2 %v4272_v20, %s12215_s13 }
0x1189   :  { %v6780_v22 = vpop.permute.xlu2 %6779 }
0x118a   :  { %v6782_v11 = vadd.f32 %v6780_v22, %v6776_v18 }
0x1190   :  { %4925 = vrot.lane.b32.xlu2 %v10988_v42, %s12302_s1 }
0x1198   :  { %6832 = vrot.lane.b32.xlu2 %v5568_v31, %s12450_s2 }
0x119d   :  { %v6808_v50 = vpop.permute.xlu1 %6807 }
0x119e   :  { %v11496_v34 = vsel %vm1726_vm2, %v6746_v56, %v6808_v50  ;;  %v4899_v50 = vadd.f32 %v4898_v38, %v12453_v40 }
0x11a0   :  { %vm4907_vm0 = vcmp.eq.f32.partialorder %v4899_v50, inf  ;;  %vm4909_vm5 = vcmp.eq.f32.partialorder %v4899_v50, 0.0 }
0x11a1   :  { %v6754_v61 = vpop.permute.xlu0 %6753 }
0x11a2   :  { %v6756_v15 = vadd.f32 %v6754_v61, %v6750_v7 }
0x11a5   :  { %v6767_v21 = vpop.permute.xlu1 %6766 }
0x11a6   :  { %v6769_v24 = vadd.f32 %v6767_v21, %v6763_v25 }
0x11a8   :  { %4828 = vadd.xlane.f32.xlu1 %v4827_v51 }
0x11a9   :  { %v6760_v0 = vpop.permute.xlu0 %6759 }
0x11aa   :  { %v6762_v43 = vadd.f32 %v6760_v0, %v6756_v15 }
0x11ac   :  { %v6789_v3 = vmul.f32 %v6762_v43, %v6762_v43 }
0x11c1   :  { %6811 = vrot.lane.b32.xlu1 %v6762_v43, %s12399_s4 }
0x11cb   :  { %v4825_v46 = vpop.xlane.xlu2 %4824 }
0x11d0   :  { %v4821_v48 = vpop.xlane.xlu1 %4820 }
0x11d3   :  { %v4833_v7 = vpop.xlane.xlu2 %4832 }
0x11d4   :  { %v4817_v13 = vpop.xlane.xlu0 %4816 }
0x11d5   :  { %v4846_v14 = vsel %vm2226_vm8, %v4817_v13, %v4821_v48  ;;  %v12456_v48 = vld [vmem:[#allocation21_spill] sm:$0xff] }
0x11d6   :  { %v4847_v59 = vsel %vm2228_vm9, %v4846_v14, %v4825_v46  ;;  %v4910_v46 = vand.u32 2147483648, %v4899_v50 }
0x11db   :  { %v4837_v30 = vpop.xlane.xlu2 %4836 }
0x11e3   :  { %v4841_v63 = vpop.xlane.xlu2 %4840 }
0x11e8   :  { %v6773_v9 = vpop.permute.xlu1 %6772 }
0x11e9   :  { %v6775_v45 = vadd.f32 %v6773_v9, %v6769_v24 }
0x11eb   :  { %6815 = vrot.lane.b32.xlu1 %v6775_v45, %s12301_s26  ;;  %v6790_v6 = vmul.f32 %v6775_v45, %v6775_v45 }
0x11ed   :  { %v6791_v26 = vadd.f32 %v6790_v6, %v6789_v3 }
0x11f0   :  { %v6786_v1 = vpop.permute.xlu1 %6785 }
0x11f1   :  { %v6788_v20 = vadd.f32 %v6786_v1, %v6782_v11 }
0x11f3   :  { %v6792_v19 = vmul.f32 %v6788_v20, %v6788_v20  ;;  %6819 = vrot.lane.b32.xlu0 %v6788_v20, %s12302_s1 }
0x11f5   :  { %v6793_v32 = vadd.f32 %v6792_v19, %v6791_v26 }
0x11f7   :  { %7455 = vrsqrt.f32 %v6793_v32  ;;  %vm6801_vm15 = vcmp.eq.f32.partialorder %v6793_v32, inf  ;;  %v6804_v54 = vand.u32 2147483648, %v6793_v32  ;;  %vm6803_vm3 = vcmp.eq.f32.partialorder %v6793_v32, 0.0 }
0x11f8   :  { %7457 = vrsqrt.f32 %v4899_v50 }
0x11fb   :  { %2315 = vrot.lane.b32.xlu0 %v2297_v60, %s12261_s6 }
0x11fd   :  { %v7456_v47 = vpop.eup %7455 }
0x11fe   :  { %v6795_v31 = vmul.f32 %v7456_v47, %v6793_v32  ;;  %v7458_v15 = vpop.eup %7457 }
0x11ff   :  { %v4901_v43 = vmul.f32 %v7458_v15, %v4899_v50 }
0x1200   :  { %v6796_v12 = vmul.f32 %v7456_v47, %v6795_v31 }
0x1202   :  { %v6797_v56 = vmul.f32 0.5, %v6796_v12 }
0x1203   :  { %4274 = vrot.lane.b32.xlu0 %v11256_v36, %s12450_s2  ;;  %v4902_v36 = vmul.f32 %v7458_v15, %v4901_v43 }
0x1204   :  { %v6798_v27 = vsub.f32 1.5, %v6797_v56 }
0x1205   :  { %v4903_v37 = vmul.f32 0.5, %v4902_v36 }
0x1206   :  { %v6799_v51 = vmul.f32 %v7456_v47, %v6798_v27 }
0x1207   :  { %v4904_v21 = vsub.f32 1.5, %v4903_v37 }
0x1208   :  { %v6800_v61 = vmul.f32 %v6799_v51, %v6793_v32 }
0x1209   :  { %v4905_v2 = vmul.f32 %v7458_v15, %v4904_v21  ;;  %v11673_v21 = vpop.permute.xlu0 %2307 }
0x120a   :  { %v6802_v0 = vsel %vm6801_vm15, %v6793_v32, %v6800_v61 }
0x120b   :  { %4278 = vrot.lane.b32.xlu0 %v11327_v52, %s12189_s29  ;;  %v6805_v42 = vsel %vm6803_vm3, %v6804_v54, %v6802_v0 }
0x120c   :  { %6823 = vrot.lane.b32.xlu1 %v6805_v42, %s12261_s6 }
0x1213   :  { %4913 = vrot.lane.b32.xlu0 %v12454_v49, %s12399_s4 }
0x1214   :  { %2311 = vrot.lane.b32.xlu1 %v11510_v57, %s12302_s1  ;;  %v4906_v57 = vmul.f32 %v4905_v2, %v4899_v50 }
0x1216   :  { %v4908_v13 = vsel %vm4907_vm0, %v4899_v50, %v4906_v57 }
0x1217   :  { %v4911_v14 = vsel %vm4909_vm5, %v4910_v46, %v4908_v13 }
0x121b   :  { %v4829_v28 = vpop.xlane.xlu1 %4828  ;;  %4917 = vrot.lane.b32.xlu0 %v12455_v17, %s12399_s4 }
0x121c   :  { %v4848_v52 = vsel %vm2230_vm10, %v4847_v59, %v4829_v28  ;;  %v4842_v59 = vmul.f32 %v11353_v53, %v12447_v41 }
0x121d   :  { %v4849_v22 = vsel %vm1682_vm1, %v4848_v52, %v4833_v7 }
0x121e   :  { %v4850_v58 = vsel %vm2233_vm11, %v4849_v22, %v4837_v30  ;;  %v4843_v62 = vsel %vm1730_vm4, %v4842_v59, 0.0 }
0x121f   :  { %v11541_v29 = vsel %vm2235_vm12, %v4850_v58, %v4841_v63 }
0x1223   :  { %4921 = vrot.lane.b32.xlu0 %v12456_v48, %s12301_s26  ;;  %s12457_s26 = sld [smem:[#allocation91_spill]] }
0x1229   :  { %v6861_v55 = vld [vmem:[%s12457_s26 + $0x78] sm:$0xff]  ;;  %v6860_v16 = vld [vmem:[%s12457_s26 + $0x70] sm:$0xff]  ;;  %v6859_v25 = vld [vmem:[%s12457_s26 + $0x68] sm:$0xff] }
0x122a   :  { %v11560_v24 = vand.u32 4294901760, %v6861_v55  ;;  %v11564_v53 = vand.u32 4294901760, %v6859_v25  ;;  %v6858_v41 = vld [vmem:[%s12457_s26 + $0x60] sm:$0xff]  ;;  %v6857_v19 = vld [vmem:[%s12457_s26 + $0x58] sm:$0xff]  ;;  %v6856_v5 = vld [vmem:[%s12457_s26 + $0x50] sm:$0xff] }
0x122b   :  { %4929 = vrot.lane.b32.xlu0 %v4911_v14, %s12261_s6  ;;  %v11569_v33 = vand.u32 4294901760, %v6858_v41  ;;  %v6855_v32 = vld [vmem:[%s12457_s26 + $0x48] sm:$0xff]  ;;  %v11617_v47 = vand.u32 4294901760, %v6857_v19  ;;  %v6854_v38 = vld [vmem:[%s12457_s26 + $0x40] sm:$0xff]  ;;  %v11623_v31 = vand.u32 4294901760, %v6856_v5  ;;  %v6853_v17 = vld [vmem:[%s12457_s26 + $0x38] sm:$0xff] }
0x122c   :  { %v11572_v9 = vsub.f32 %v6861_v55, %v11560_v24  ;;  %v11578_v10 = vsub.f32 %v6859_v25, %v11564_v53  ;;  %7080 = vmatpush.msra.mxu3 %v11560_v24  ;;  %6867 = vmatpush.msrb.mxu0 %v11560_v24  ;;  %v11625_v12 = vand.u32 4294901760, %v6855_v32  ;;  %v11628_v40 = vand.u32 4294901760, %v6854_v38  ;;  %v6852_v63 = vld [vmem:[%s12457_s26 + $0x30] sm:$0xff]  ;;  %v6851_v58 = vld [vmem:[%s12457_s26 + $0x28] sm:$0xff]  ;;  %v6850_v2 = vld [vmem:[%s12457_s26 + $0x20] sm:$0xff] }
0x122d   :  { %v11583_v18 = vsub.f32 %v6858_v41, %v11569_v33  ;;  %v11631_v56 = vsub.f32 %v6857_v19, %v11617_v47  ;;  %v11635_v27 = vsub.f32 %v6856_v5, %v11623_v31  ;;  %v11675_v22 = vand.u32 4294901760, %v6853_v17 }
0x122e   :  { %v6917_v11 = vand.u32 4294901760, %v11572_v9  ;;  %7022 = vmatpush.msra.mxu2 %v11572_v9  ;;  %v6929_v35 = vand.u32 4294901760, %v11578_v10  ;;  %v11638_v51 = vsub.f32 %v6855_v32, %v11625_v12  ;;  %v11642_v61 = vsub.f32 %v6854_v38, %v11628_v40 }
0x122f   :  { %v6935_v1 = vand.u32 4294901760, %v11583_v18  ;;  %v6941_v7 = vand.u32 4294901760, %v11631_v56  ;;  %v6947_v0 = vand.u32 4294901760, %v11635_v27  ;;  %v11687_v48 = vand.u32 4294901760, %v6852_v63 }
0x1230   :  { %v6918_v3 = vsub.f32 %v11572_v9, %v6917_v11  ;;  %v6930_v26 = vsub.f32 %v11578_v10, %v6929_v35  ;;  %v6953_v42 = vand.u32 4294901760, %v11638_v51  ;;  %v6959_v15 = vand.u32 4294901760, %v11642_v61 }
0x1231   :  { %v6936_v60 = vsub.f32 %v11583_v18, %v6935_v1  ;;  %v6942_v43 = vsub.f32 %v11631_v56, %v6941_v7  ;;  %v6948_v49 = vsub.f32 %v11635_v27, %v6947_v0  ;;  %v11689_v57 = vand.u32 4294901760, %v6851_v58 }
0x1232   :  { %v6919_v23 = vand.u32 4294901760, %v6918_v3  ;;  %v6931_v50 = vand.u32 4294901760, %v6930_v26  ;;  %v6954_v36 = vsub.f32 %v11638_v51, %v6953_v42  ;;  %v6960_v37 = vsub.f32 %v11642_v61, %v6959_v15 }
0x1233   :  { %6836 = vrot.lane.b32.xlu0 %v11418_v4, %s12189_s29  ;;  %v11562_v4 = vand.u32 4294901760, %v6860_v16  ;;  %v6937_v54 = vand.u32 4294901760, %v6936_v60  ;;  %v6943_v30 = vand.u32 4294901760, %v6942_v43  ;;  %v6949_v28 = vand.u32 4294901760, %v6948_v49  ;;  %s7244_s29 = sshll.u32 %s7661_s7, 4  ;;  %s7245_s29 = int_to_ptr.vmem [resolvable:$true] %s7244_s29 }
0x1234   :  { %6920 = vmatpush.msrb.mxu1 %v6919_v23  ;;  %v6955_v52 = vand.u32 4294901760, %v6954_v36  ;;  %v11691_v13 = vand.u32 4294901760, %v6850_v2  ;;  %v6961_v46 = vand.u32 4294901760, %v6960_v37  ;;  %v11694_v14 = vsub.f32 %v6853_v17, %v11675_v22 }
0x1235   :  { %v11575_v45 = vsub.f32 %v6860_v16, %v11562_v4  ;;  %7082 = vmatpush.msra.mxu3 %v11562_v4  ;;  %6869 = vmatpush.msrb.mxu0 %v11562_v4  ;;  %v11698_v59 = vsub.f32 %v6852_v63, %v11687_v48  ;;  %v6846_v63 = vld [vmem:[%s12457_s26] sm:$0xff] }
0x1236   :  { %v11704_v55 = vsub.f32 %v6850_v2, %v11691_v13  ;;  %v6965_v16 = vand.u32 4294901760, %v11694_v14 }
0x1237   :  { %v6923_v6 = vand.u32 4294901760, %v11575_v45  ;;  %7025 = vmatpush.msra.mxu2 %v11575_v45  ;;  %7084 = vmatpush.msra.mxu3 %v11564_v53  ;;  %v6971_v25 = vand.u32 4294901760, %v11698_v59 }
0x1238   :  { %6871 = vmatpush.msrb.mxu0 %v11564_v53  ;;  %v6983_v3 = vand.u32 4294901760, %v11704_v55 }
0x1239   :  { %v6924_v20 = vsub.f32 %v11575_v45, %v6923_v6  ;;  %7028 = vmatpush.msra.mxu2 %v11578_v10  ;;  %7086 = vmatpush.msra.mxu3 %v11569_v33  ;;  %v6972_v26 = vsub.f32 %v11698_v59, %v6971_v25  ;;  %v12463_v10 = vld [vmem:[#allocation37_spill] sm:$0xff] }
0x123a   :  { %6873 = vmatpush.msrb.mxu0 %v11569_v33  ;;  %v6984_v23 = vsub.f32 %v11704_v55, %v6983_v3 }
0x123b   :  { %v6925_v44 = vand.u32 4294901760, %v6924_v20  ;;  %7031 = vmatpush.msra.mxu2 %v11583_v18  ;;  %7088 = vmatpush.msra.mxu3 %v11617_v47  ;;  %v6966_v20 = vsub.f32 %v11694_v14, %v6965_v16  ;;  %v6973_v60 = vand.u32 4294901760, %v6972_v26 }
0x123c   :  { %6875 = vmatpush.msrb.mxu0 %v11617_v47  ;;  %v6985_v36 = vand.u32 4294901760, %v6984_v23 }
0x123d   :  { %6926 = vmatpush.msrb.mxu1 %v6925_v44  ;;  %7034 = vmatpush.msra.mxu2 %v11631_v56  ;;  %v6967_v32 = vand.u32 4294901760, %v6966_v20  ;;  %v6849_v44 = vld [vmem:[%s12457_s26 + $0x18] sm:$0xff]  ;;  %v11773_v20 = vand.u32 4294901760, %v6846_v63 }
0x123e   :  { %4844 = vadd.xlane.f32.xlu1 %v4843_v62  ;;  %7090 = vmatpush.msra.mxu3 %v11623_v31  ;;  %v11701_v62 = vsub.f32 %v6851_v58, %v11689_v57  ;;  %v11735_v38 = vand.u32 4294901760, %v6849_v44 }
0x123f   :  { %6877 = vmatpush.msrb.mxu0 %v11623_v31  ;;  %6932 = vmatpush.msrb.mxu1 %v6931_v50  ;;  %v11782_v23 = vsub.f32 %v6846_v63, %v11773_v20 }
0x1240   :  { %7037 = vmatpush.msra.mxu2 %v11635_v27  ;;  %7092 = vmatpush.msra.mxu3 %v11625_v12  ;;  %v6977_v41 = vand.u32 4294901760, %v11701_v62  ;;  %v11744_v43 = vsub.f32 %v6849_v44, %v11735_v38 }
0x1241   :  { %6879 = vmatpush.msrb.mxu0 %v11625_v12  ;;  %6938 = vmatpush.msrb.mxu1 %v6937_v54  ;;  %v6848_v54 = vld [vmem:[%s12457_s26 + $0x10] sm:$0xff] }
0x1242   :  { %7040 = vmatpush.msra.mxu2 %v11638_v51  ;;  %7094 = vmatpush.msra.mxu3 %v11628_v40  ;;  %v6978_v19 = vsub.f32 %v11701_v62, %v6977_v41  ;;  %v11746_v49 = vand.u32 4294901760, %v6848_v54  ;;  %v6989_v37 = vand.u32 4294901760, %v11744_v43 }
0x1243   :  { %6881 = vmatpush.msrb.mxu0 %v11628_v40  ;;  %6944 = vmatpush.msrb.mxu1 %v6943_v30  ;;  %v6847_v30 = vld [vmem:[%s12457_s26 + $0x8] sm:$0xff] }
0x1244   :  { %7043 = vmatpush.msra.mxu2 %v11642_v61  ;;  %7096 = vmatpush.msra.mxu3 %v11675_v22  ;;  %v6979_v50 = vand.u32 4294901760, %v6978_v19  ;;  %v11758_v17 = vand.u32 4294901760, %v6847_v30  ;;  %v6990_v58 = vsub.f32 %v11744_v43, %v6989_v37 }
0x1245   :  { %6950 = vmatpush.msrb.mxu1 %v6949_v28  ;;  %6883 = vmatpush.msrb.mxu0 %v11675_v22  ;;  %v11755_v28 = vsub.f32 %v6848_v54, %v11746_v49  ;;  %v7007_v54 = vand.u32 4294901760, %v11782_v23 }
0x1246   :  { %7046 = vmatpush.msra.mxu2 %v11694_v14  ;;  %7098 = vmatpush.msra.mxu3 %v11687_v48  ;;  %v6991_v26 = vand.u32 4294901760, %v6990_v58 }
0x1247   :  { %6956 = vmatpush.msrb.mxu1 %v6955_v52  ;;  %6885 = vmatpush.msrb.mxu0 %v11687_v48  ;;  %v6812_v52 = vpop.permute.xlu1 %6811  ;;  %v12133_v2 = vand.u32 4294901760, %v11755_v28 }
0x1248   :  { %7049 = vmatpush.msra.mxu2 %v11698_v59  ;;  %7100 = vmatpush.msra.mxu3 %v11689_v57  ;;  %v6827_v45 = vsel %vm1730_vm4, %v11496_v34, %v6812_v52 }
0x1249   :  { %6962 = vmatpush.msrb.mxu1 %v6961_v46  ;;  %6887 = vmatpush.msrb.mxu0 %v11689_v57  ;;  %v11770_v46 = vsub.f32 %v6847_v30, %v11758_v17  ;;  %v6996_v19 = vsub.f32 %v11755_v28, %v12133_v2  ;;  %v12459_v30 = vld [vmem:[#allocation36_spill] sm:$0xff] }
0x124a   :  { %7052 = vmatpush.msra.mxu2 %v11701_v62  ;;  %7102 = vmatpush.msra.mxu3 %v11691_v13 }
0x124b   :  { %6889 = vmatpush.msrb.mxu0 %v11691_v13  ;;  %6968 = vmatpush.msrb.mxu1 %v6967_v32  ;;  %v12132_v32 = vand.u32 4294901760, %v11770_v46  ;;  %v12468_v59 = vand.u32 4294901760, %v11770_v46 }
0x124c   :  { %7055 = vmatpush.msra.mxu2 %v11704_v55  ;;  %7104 = vmatpush.msra.mxu3 %v11735_v38 }
0x124d   :  { %6891 = vmatpush.msrb.mxu0 %v11735_v38  ;;  %6974 = vmatpush.msrb.mxu1 %v6973_v60  ;;  %v6997_v60 = vand.u32 4294901760, %v6996_v19  ;;  %v12460_v19 = vld [vmem:[#allocation32_spill] sm:$0xff] }
0x124e   :  { %7058 = vmatpush.msra.mxu2 %v11744_v43  ;;  %7106 = vmatpush.msra.mxu3 %v11746_v49 }
0x124f   :  { %6980 = vmatpush.msrb.mxu1 %v6979_v50  ;;  %6893 = vmatpush.msrb.mxu0 %v11746_v49  ;;  %v7002_v50 = vsub.f32 %v11770_v46, %v12132_v32 }
0x1250   :  { %7061 = vmatpush.msra.mxu2 %v11755_v28  ;;  %7108 = vmatpush.msra.mxu3 %v11758_v17 }
0x1251   :  { %6986 = vmatpush.msrb.mxu1 %v6985_v36  ;;  %6895 = vmatpush.msrb.mxu0 %v11758_v17  ;;  %v12458_v36 = vld [vmem:[#allocation52_spill] sm:$0xff]  ;;  %v7003_v58 = vand.u32 4294901760, %v7002_v50  ;;  %v12462_v50 = vld [vmem:[#allocation55_spill] sm:$0xff] }
0x1252   :  { %7064 = vmatpush.msra.mxu2 %v11770_v46  ;;  %7110 = vmatpush.msra.mxu3 %v11773_v20  ;;  %v2227_v63 = vsel %vm2226_vm8, %v12459_v30, %v12458_v36  ;;  %vm4288_vm8 = vcmask 785408   ;;  %v7410_v30 = vld [vmem:[%s12470_s0] ss:$0 sm:$0xff] }
0x1253   :  { %6897 = vmatpush.msrb.mxu0 %v11773_v20  ;;  %6992 = vmatpush.msrb.mxu1 %v6991_v26  ;;  %v7008_v26 = vsub.f32 %v11782_v23, %v7007_v54  ;;  %v2229_v32 = vsel %vm2228_vm9, %v2227_v63, %v12460_v19  ;;  %vm12466_vm9 = vcmask 261120  }
0x1254   :  { %7067 = vmatpush.msra.mxu2 %v11782_v23 }
0x1255   :  { %7127 = vmatpush.msra.mxu0 %v6917_v11  ;;  %6998 = vmatpush.msrb.mxu1 %v6997_v60  ;;  %v7009_v9 = vand.u32 4294901760, %v7008_v26  ;;  %v12461_v11 = vld [vmem:[#allocation19_spill] sm:$0xff] }
0x1256   :  { %v2231_v60 = vsel %vm2230_vm10, %v2229_v32, %v12461_v11  ;;  %vm12469_vm10 = vmmov %vm12466_vm9 }
0x1257   :  { %7131 = vmatpush.msra.mxu0 %v6923_v6  ;;  %7004 = vmatpush.msrb.mxu1 %v7003_v58  ;;  %v2232_v36 = vsel %vm1682_vm1, %v2231_v60, %v12462_v50  ;;  %vm4286_vm1 = vcmask 523264  }
0x1259   :  { %7135 = vmatpush.msra.mxu0 %v6929_v35  ;;  %7010 = vmatpush.msrb.mxu1 %v7009_v9  ;;  %v2234_v35 = vsel %vm2233_vm11, %v2232_v36, %v12463_v10 }
0x125b   :  { %7198 = vmatpush.msra.mxu1 %v11560_v24  ;;  %7139 = vmatpush.msra.mxu0 %v6935_v1 }
0x125d   :  { %v6816_v2 = vpop.permute.xlu1 %6815  ;;  %7200 = vmatpush.msra.mxu1 %v11562_v4  ;;  %7143 = vmatpush.msra.mxu0 %v6941_v7  ;;  %v12464_v4 = vld [vmem:[#allocation26_spill] sm:$0xff]  ;;  %v12465_v7 = vld [vmem:[#allocation56_spill] sm:$0xff] }
0x125e   :  { %v6828_v24 = vsel %vm1732_vm6, %v6827_v45, %v6816_v2  ;;  %v2236_v56 = vsel %vm2235_vm12, %v2234_v35, %v12464_v4 }
0x125f   :  { %7202 = vmatpush.msra.mxu1 %v11564_v53  ;;  %7147 = vmatpush.msra.mxu0 %v6947_v0  ;;  %v2238_v53 = vsel %vm2237_vm13, %v2236_v56, %v12465_v7 }
0x1260   :  { %v2318_v27 = vsel %vm1726_vm2, %v2238_v53, %v11413_v8 }
0x1261   :  { %7204 = vmatpush.msra.mxu1 %v11569_v33  ;;  %7151 = vmatpush.msra.mxu0 %v6953_v42  ;;  %v2319_v0 = vsel %vm1730_vm4, %v2318_v27, %v11506_v39 }
0x1262   :  { %v2320_v33 = vsel %vm1732_vm6, %v2319_v0, %v11673_v21  ;;  %v12467_v21 = vand.u32 4294901760, %v11755_v28 }
0x1263   :  { %7206 = vmatpush.msra.mxu1 %v11617_v47  ;;  %7155 = vmatpush.msra.mxu0 %v6959_v15 }
0x1265   :  { %v11726_v5 = vpop.permute.xlu0 %6819  ;;  %7208 = vmatpush.msra.mxu1 %v11623_v31  ;;  %7159 = vmatpush.msra.mxu0 %v6965_v16  ;;  %v4283_v31 = vpop.permute.xlu2 %4282 }
0x1266   :  { %v6829_v18 = vsel %vm2321_vm7, %v6828_v24, %v11726_v5 }
0x1267   :  { %7210 = vmatpush.msra.mxu1 %v11625_v12  ;;  %7163 = vmatpush.msra.mxu0 %v6971_v25 }
0x1269   :  { %7212 = vmatpush.msra.mxu1 %v11628_v40  ;;  %7167 = vmatpush.msra.mxu0 %v6977_v41 }
0x126b   :  { %7214 = vmatpush.msra.mxu1 %v11675_v22  ;;  %7171 = vmatpush.msra.mxu0 %v6983_v3 }
0x126d   :  { %v2316_v44 = vpop.permute.xlu0 %2315  ;;  %7216 = vmatpush.msra.mxu1 %v11687_v48  ;;  %7175 = vmatpush.msra.mxu0 %v6989_v37  ;;  %v4926_v55 = vpop.permute.xlu2 %4925 }
0x126f   :  { %7218 = vmatpush.msra.mxu1 %v11689_v57  ;;  %7179 = vmatpush.msra.mxu0 %v12467_v21 }
0x1271   :  { %7220 = vmatpush.msra.mxu1 %v11691_v13  ;;  %7183 = vmatpush.msra.mxu0 %v12468_v59 }
0x1273   :  { %7222 = vmatpush.msra.mxu1 %v11735_v38  ;;  %7187 = vmatpush.msra.mxu0 %v7007_v54 }
0x1275   :  { %v4275_v6 = vpop.permute.xlu0 %4274  ;;  %7224 = vmatpush.msra.mxu1 %v11746_v49  ;;  %v6833_v49 = vpop.permute.xlu2 %6832 }
0x1277   :  { %7226 = vmatpush.msra.mxu1 %v11758_v17 }
0x1279   :  { %7228 = vmatpush.msra.mxu1 %v11773_v20 }
0x127d   :  { %v4279_v47 = vpop.permute.xlu0 %4278 }
0x127e   :  { %v6824_v1 = vpop.permute.xlu1 %6823 }
0x127f   :  { %v6830_v34 = vsel %vm2323_vm14, %v6829_v18, %v6824_v1 }
0x1280   :  { %6840 = vrot.lane.b32.xlu2 %v6830_v34, %s12215_s13 }
0x1285   :  { %v4914_v14 = vpop.permute.xlu0 %4913 }
0x1286   :  { %v2312_v51 = vpop.permute.xlu1 %2311 }
0x1287   :  { %v2322_v61 = vsel %vm2321_vm7, %v2320_v33, %v2312_v51 }
0x1288   :  { %v2324_v8 = vsel %vm2323_vm14, %v2322_v61, %v2316_v44 }
0x1289   :  { %v4285_v39 = vsel %vm12466_vm9, %v2324_v8, %v4275_v6 }
0x128a   :  { %v4287_v42 = vsel %vm4286_vm1, %v4285_v39, %v4279_v47 }
0x128b   :  { %v4289_v12 = vsel %vm4288_vm8, %v4287_v42, %v4283_v31 }
0x128c   :  { %v6898_v15 = vand.u32 4294901760, %v4289_v12 }
0x128d   :  { %v4918_v57 = vpop.permute.xlu0 %4917 }
0x128e   :  { %v6899_v40 = vsub.f32 %v4289_v12, %v6898_v15  ;;  %7012 = vmatmul.f32.vlgmr.msrb.gmra.mxu1 %v6898_v15 }
0x1290   :  { %7070 = vmatmul.f32.vlgmr.msra.gmra.mxu2 %v6899_v40  ;;  %v6900_v22 = vand.u32 4294901760, %v6899_v40 }
0x1292   :  { %7114 = vmatmul.f32.vlgmr.msra.gmra.mxu3 %v6900_v22  ;;  %v6901_v48 = vsub.f32 %v6899_v40, %v6900_v22 }
0x1294   :  { %v6902_v62 = vand.u32 4294901760, %v6901_v48 }
0x1295   :  { %v4922_v13 = vpop.permute.xlu0 %4921 }
0x1296   :  { %6903 = vmatmul.f32.vlgmr.msrb.gmra.mxu0 %v6902_v62 }
0x129d   :  { %v4930_v16 = vpop.permute.xlu0 %4929 }
0x12a5   :  { %v6837_v28 = vpop.permute.xlu0 %6836 }
0x12b1   :  { %v4845_v25 = vpop.xlane.xlu1 %4844 }
0x12b2   :  { %v4852_v41 = vsel %vm2237_vm13, %v11541_v29, %v4845_v25 }
0x12b3   :  { %v4932_v3 = vsel %vm1726_vm2, %v4852_v41, %v4914_v14  ;;  %vm12471_vm2 = vmmov %vm12466_vm9 }
0x12b4   :  { %v4933_v5 = vsel %vm1730_vm4, %v4932_v3, %v4918_v57  ;;  %vm12473_vm4 = vmmov %vm12471_vm2 }
0x12b5   :  { %v4934_v38 = vsel %vm1732_vm6, %v4933_v5, %v4922_v13 }
0x12b6   :  { %v4935_v43 = vsel %vm2321_vm7, %v4934_v38, %v4926_v55 }
0x12b7   :  { %v4936_v37 = vsel %vm2323_vm14, %v4935_v43, %v4930_v16 }
0x12b8   :  { %v6843_v17 = vsel %vm12469_vm10, %v4936_v37, %v6833_v49 }
0x12b9   :  { %v6844_v52 = vsel %vm4286_vm1, %v6843_v17, %v6837_v28 }
0x12da   :  { %v6841_v2 = vpop.permute.xlu2 %6840 }
0x12db   :  { %v6845_v46 = vsel %vm4288_vm8, %v6844_v52, %v6841_v2 }
0x12dc   :  { %v6906_v29 = vand.u32 4294901760, %v6845_v46 }
0x12de   :  { %v6907_v20 = vsub.f32 %v6845_v46, %v6906_v29  ;;  %7016 = vmatmul.f32.gmra.mxu1 %v6906_v29 }
0x12e0   :  { %7075 = vmatmul.f32.gmra.mxu2 %v6907_v20  ;;  %v6908_v32 = vand.u32 4294901760, %v6907_v20 }
0x12e2   :  { %7120 = vmatmul.f32.gmra.mxu3 %v6908_v32  ;;  %v6909_v23 = vsub.f32 %v6907_v20, %v6908_v32 }
0x12e4   :  { %v6910_v44 = vand.u32 4294901760, %v6909_v23 }
0x12e6   :  { %6911 = vmatmul.f32.gmra.mxu0 %v6910_v44  ;;  %7230 = vmatmul.f32.vlgmr.msra.gmra.mxu1 %v6898_v15 }
0x12ee   :  { %7189 = vmatmul.f32.vlgmr.msra.gmra.mxu0 %v6898_v15  ;;  %7234 = vmatmul.f32.gmra.mxu1 %v6906_v29 }
0x12f6   :  { %7193 = vmatmul.f32.gmra.mxu0 %v6906_v29 }
0x130b   :  { %v7013_v54 = vpop.f32.mrf.mxu1 }
0x1313   :  { %v6904_v63 = vpop.f32.mrf.mxu0  ;;  %v7071_v11 = vpop.f32.mrf.mxu2 }
0x1314   :  { %v6905_v58 = vadd.f32 %v7410_v30, %v6904_v63 }
0x1315   :  { %v7115_v36 = vpop.f32.mrf.mxu3 }
0x1316   :  { %v7014_v19 = vadd.f32 %v7013_v54, %v6905_v58 }
0x1318   :  { %v7072_v60 = vadd.f32 %v7071_v11, %v7014_v19 }
0x131a   :  { %v7116_v45 = vadd.f32 %v7115_v36, %v7072_v60 }
0x135b   :  { %v7017_v26 = vpop.f32.mrf.mxu1 }
0x1363   :  { %v6912_v9 = vpop.f32.mrf.mxu0  ;;  %v7231_v10 = vpop.f32.mrf.mxu1 }
0x1364   :  { %v6913_v50 = vadd.f32 %v7410_v30, %v6912_v9  ;;  %v7076_v18 = vpop.f32.mrf.mxu2 }
0x1365   :  { %v7121_v4 = vpop.f32.mrf.mxu3 }
0x1366   :  { %v7018_v6 = vadd.f32 %v7017_v26, %v6913_v50 }
0x1368   :  { %v7077_v1 = vadd.f32 %v7076_v18, %v7018_v6 }
0x136a   :  { %v7122_v56 = vadd.f32 %v7121_v4, %v7077_v1 }
0x136b   :  { %v7190_v35 = vpop.f32.mrf.mxu0  ;;  %v7235_v27 = vpop.f32.mrf.mxu1 }
0x136c   :  { %v7191_v24 = vadd.f32 %v7190_v35, %v7116_v45 }
0x136e   :  { %v7232_v34 = vadd.f32 %v7231_v10, %v7191_v24 }
0x1370   :  { %7238 = vst.msk [vmem:[#allocation12] sm:$0xff] %vm12471_vm2, %v7232_v34 }
0x1373   :  { %v7194_v7 = vpop.f32.mrf.mxu0 }
0x1374   :  { %v7195_v53 = vadd.f32 %v7194_v7, %v7122_v56 }
0x1376   :  { %v7236_v0 = vadd.f32 %v7235_v27, %v7195_v53 }
0x1378   :  { %7239 = vst.msk [vmem:[#allocation12 + $0x8] sm:$0xff] %vm12473_vm4, %v7236_v0 }
0x1379   :  { %7252 = dma.vmem_to_hbm [thread:$0]  %s7245_s29, 256, %s7247_s21, [#allocation4], %s12474_s25, %s12474_s25, %s12399_s4  }
0x137a   :  { %7619 = dma.done.wait [#allocation4], 256  }
0x137b   :  { %7620 = vsyncadd [#allocation4], 4294967040 }
0x137c   :  { %7257 = vsyncpa [#allocation3], 1 }
0x137d   :  { %7258 = vsyncpa [#allocation7], 1 }
0x137e   :  { %7259 = vsyncpa [#allocation4], 1 }
0x137f   :  { %7260 = vsyncpa [#allocation5], 1 }
0x1380   :  { %7261 = vsyncpa [#allocation11], 1 }

</bundles_post_ra>
